<compile_context>
chip_gen: v5e
topology: v5e:2x2
jax: 0.10.0
libtpu: 0.0.40
codegen_flags: <defaults>
</compile_context>

<pallas_src>
import functools
import math

import jax
import jax.numpy as jnp
from jax.experimental import pallas as pl
from jax.experimental.pallas import tpu as pltpu


# ---- packed-weight offsets (units of H rows) in the bf16 (17H, H) weight slab ------------------
W_EIN, W_EOUT = 0, 1
W_GATE_R = 2          # [ihi_r; iho_r; hh_r]  (3H, H)
W_GATE_I = 5          # [ihi_i; iho_i; hh_i]  (3H, H)
W_GATE_N_IN = 8       # [ihi_n; iho_n]        (2H, H)
W_HH_N = 10
W_Q1, W_K1, W_Q2, W_K2 = 11, 12, 13, 14
W_G = 15              # [Wg_top; Wg_bot]      (2H, H)
NUM_W_BLOCKS = 17

# ---- bias rows in the f32 (NUM_B, 1, H) slab ----------------------------------------------------
B_LN_W, B_LN_B = 0, 1
B_EIN, B_EOUT = 2, 3
B_R, B_I = 4, 5                 # combined (b_gi + b_hh) per fused gate
B_GI_N, B_HH_N = 6, 7
B_Q1, B_K1, B_Q2, B_K2 = 8, 9, 10, 11
B_G = 12
NUM_B = 13


def stargnn_kernel(emb_ref, a_in_ref, a_out_ref, invlen_ref, wp_ref, bp_ref,
                   hid_out_ref, s_out_ref, *, step, bt, seq_len, hidden_size):
    H, Bt, N = hidden_size, bt, seq_len
    R = Bt * N
    inv_sqrt_h = 1.0 / math.sqrt(H)

    def mm(x, off_h, size_h=1):
        # Static sublane slice of the resident bf16 weight slab; bf16 operands feed the MXU,
        # accumulation and all elementwise math stay in f32.
        w = wp_ref[off_h * H:(off_h + size_h) * H, :]
        return jnp.dot(x.astype(jnp.bfloat16), w, preferred_element_type=jnp.float32)

    def bias(idx):
        return bp_ref[idx]                       # (1, H) f32, sublane-broadcast on add

    a_in = a_in_ref[0]                           # (R, R) bf16 block-diagonal adjacency
    a_out = a_out_ref[0]

    # ---- LayerNorm3 (eps=1e-5, elementwise affine) on all Bt*N node rows at once ----
    x = emb_ref[...]                             # (R, H) f32
    mu = jnp.mean(x, axis=-1, keepdims=True)
    var = jnp.mean((x - mu) ** 2, axis=-1, keepdims=True)
    h0 = (x - mu) * jax.lax.rsqrt(var + 1e-5) * bias(B_LN_W) + bias(B_LN_B)

    # ---- star-node init (batched): s_b = sum_N(h0_b) / (sum(mask_b) + 1e-6)
    #      Matches the PyTorch reference exactly: the numerator is NOT masked and the
    #      alpha/beta softmaxes below run over all N positions (padded ones included). ----
    inv_len = invlen_ref[...]                                     # (Bt, 1) f32, exact 1/(len+1e-6)
    s0 = jnp.sum(h0.reshape(Bt, N, H), axis=1) * inv_len          # (Bt, H)

    def one_step(hidden, s):
        # -------- gated graph cell --------
        ein = mm(hidden, W_EIN) + bias(B_EIN)
        eout = mm(hidden, W_EOUT) + bias(B_EOUT)
        # block-diagonal adjacency propagation: one tall matmul per direction for all sessions
        p_in = jnp.dot(a_in, ein.astype(jnp.bfloat16), preferred_element_type=jnp.float32)
        p_out = jnp.dot(a_out, eout.astype(jnp.bfloat16), preferred_element_type=jnp.float32)

        # GRU gates, K-fused: one lane-concat reused for both r/i gates.
        x_po = jnp.concatenate([p_in, p_out], axis=-1)            # (R, 2H)
        x_poh = jnp.concatenate([x_po, hidden], axis=-1)          # (R, 3H)
        r_pre = mm(x_poh, W_GATE_R, 3) + bias(B_R)                # gi_r + gh_r
        i_pre = mm(x_poh, W_GATE_I, 3) + bias(B_I)                # gi_i + gh_i
        gi_n = mm(x_po, W_GATE_N_IN, 2) + bias(B_GI_N)
        gh_n = mm(hidden, W_HH_N) + bias(B_HH_N)
        resetgate = jax.nn.sigmoid(r_pre)
        inputgate = jax.nn.sigmoid(i_pre)
        newgate = jnp.tanh(gi_n + resetgate * gh_n)
        hidden1 = newgate + inputgate * (hidden - newgate)        # (R, H)

        # -------- item <- star attention, batched over sessions --------
        q1 = (mm(hidden1, W_Q1) + bias(B_Q1)).reshape(Bt, N, H)
        k1 = mm(s, W_K1) + bias(B_K1)                             # (Bt, H)
        logit1 = jnp.sum(q1 * k1[:, None, :], axis=-1, keepdims=True) * inv_sqrt_h   # (Bt, N, 1)
        alpha = jax.nn.softmax(logit1, axis=1)
        hidden1_3 = hidden1.reshape(Bt, N, H)
        hnew_3 = (1.0 - alpha) * hidden1_3 + alpha * s[:, None, :]
        hidden_new = hnew_3.reshape(R, H)

        # -------- star <- item update (uses the OLD s, as in the reference) --------
        q2 = (mm(hidden_new, W_Q2) + bias(B_Q2)).reshape(Bt, N, H)
        k2 = mm(s, W_K2) + bias(B_K2)                             # (Bt, H)
        logit2 = jnp.sum(q2 * k2[:, None, :], axis=-1, keepdims=True) * inv_sqrt_h
        beta = jax.nn.softmax(logit2, axis=1)
        s_new = jnp.sum(beta * hnew_3, axis=1)                    # (Bt, H)
        return hidden_new, s_new

    if step == 1:
        hidden, s = one_step(h0, s0)
    else:
        # 2..4: unrolled fori_loop keeps LLO visibility while bounding live ranges; >4: rolled.
        hidden, s = jax.lax.fori_loop(0, step, lambda _, c: one_step(*c), (h0, s0),
                                      unroll=(step <= 4))

    # -------- highway gate, K-fused: one (R,2H)@(2H,H) matmul --------
    g = jax.nn.sigmoid(mm(jnp.concatenate([h0, hidden], axis=-1), W_G, 2) + bias(B_G))
    hidden = g * h0 + (1.0 - g) * hidden

    hid_out_ref[...] = hidden
    s_out_ref[...] = s
    # TODO(synk): with H < 128 the hidden/s stores are 32-lane masked vst; a lane-dense (Bt, N*H)
    # output slab would need an in-kernel sublane->lane relayout, so it is intentionally skipped —
    # stores are a negligible fraction of this kernel's work.


def _choose_bt(batch, seq_len):
    """Sessions folded per grid program.

    Single program (grid=(1,)) on single-TensorCore chips (v5e/v6e) — splitting only halves MXU
    height and adds grid-step overhead there.  Only on dual-TC v7x split into 2 programs, and
    only when each program still gets >= 256 sublane rows (and the block shapes stay 8-aligned).
    """
    dual_tc = False
    try:
        dual_tc = "v7" in jax.devices()[0].device_kind.lower()
    except Exception:
        dual_tc = False
    bt = batch
    if (dual_tc and batch % 2 == 0 and (batch // 2) % 8 == 0
            and (batch // 2) * seq_len >= 256):
        bt = batch // 2
    return bt


def _pack_weights(params):
    """Pack the small StarGNN weights into two resident buffers.

    Exact algebraic refactor of the reference:
      cat(A_in@ein + b_iah, A_out@eout + b_oah) @ w_ih + b_ih
        == (A_in@ein)@w_ih_top + (A_out@eout)@w_ih_bot + (b_ih + b_iah@w_ih_top + b_oah@w_ih_bot)
      Wg(cat(hidden0, hidden)) == [hidden0 | hidden] @ [Wg_top; Wg_bot] + bg
    The r/i gate weights of w_ih and w_hh are stacked along K so each gate is ONE matmul on
    [p_in | p_out | hidden]; gate n keeps w_hh_n separate (multiplied by resetgate).
    """
    H = params["W_ein"].shape[0]
    w_ih, w_hh, Wg = params["w_ih"], params["w_hh"], params["Wg"]
    W_ih_in, W_ih_out = w_ih[:H], w_ih[H:]

    def gate_cols(w):
        return w[:, 0:H], w[:, H:2 * H], w[:, 2 * H:3 * H]

    ihi_r, ihi_i, ihi_n = gate_cols(W_ih_in)
    iho_r, iho_i, iho_n = gate_cols(W_ih_out)
    hh_r, hh_i, hh_n = gate_cols(w_hh)
    b_gi = params["b_ih"] + params["b_iah"] @ W_ih_in + params["b_oah"] @ W_ih_out   # [3H]
    b_gi_r, b_gi_i, b_gi_n = b_gi[0:H], b_gi[H:2 * H], b_gi[2 * H:3 * H]
    b_hh = params["b_hh"]
    b_hh_r, b_hh_i, b_hh_n = b_hh[0:H], b_hh[H:2 * H], b_hh[2 * H:3 * H]

    w_rows = [params["W_ein"], params["W_eout"],
              ihi_r, iho_r, hh_r,           # W_GATE_R stack
              ihi_i, iho_i, hh_i,           # W_GATE_I stack
              ihi_n, iho_n,                 # W_GATE_N_IN stack
              hh_n,
              params["Wq1"], params["Wk1"], params["Wq2"], params["Wk2"],
              Wg[:H], Wg[H:]]               # W_G stack
    w_pack = jnp.concatenate(w_rows, axis=0).astype(jnp.bfloat16)     # (17H, H), MXU operands

    b_list = [params["ln3_w"], params["ln3_b"],
              params["b_ein"], params["b_eout"],
              b_gi_r + b_hh_r, b_gi_i + b_hh_i,
              b_gi_n, b_hh_n,
              params["bq1"], params["bk1"], params["bq2"], params["bk2"],
              params["bg"]]
    b_pack = jnp.stack(b_list).astype(jnp.float32)[:, None, :]        # (NUM_B, 1, H), f32 adds
    return w_pack, b_pack


def init_params(key, n_node, hidden_size):
    # StarSessionGraph.reset_parameters(): every weight ~ Normal(0, 0.1)
    H = hidden_size
    shapes = {
        "embedding": (n_node, H),
        "ln3_w": (H,), "ln3_b": (H,),
        "W_ein": (H, H), "b_ein": (H,),          # linear_edge_in  ([in, out])
        "W_eout": (H, H), "b_eout": (H,),        # linear_edge_out
        "b_iah": (H,), "b_oah": (H,),
        "w_ih": (2 * H, 3 * H), "b_ih": (3 * H,),
        "w_hh": (H, 3 * H), "b_hh": (3 * H,),
        "Wq1": (H, H), "bq1": (H,),
        "Wk1": (H, H), "bk1": (H,),
        "Wq2": (H, H), "bq2": (H,),
        "Wk2": (H, H), "bk2": (H,),
        "Wg": (2 * H, H), "bg": (H,),
    }
    params = {}
    for i, (name, shape) in enumerate(shapes.items()):
        params[name] = 0.1 * jax.random.normal(
            jax.random.fold_in(key, i), shape, dtype=jnp.float32)
    return params


def star_session_graph_forward(params, inputs, A, mask, D, A_hat, *, step=1, gcn_layers=3):
    B, N = inputs.shape
    H = params["embedding"].shape[1]
    assert N % 8 == 0, "session length must be a multiple of 8 (sublane tile)"

    # --- glue that stays in plain XLA: embedding gather, block-diag adjacency, weight packing ---
    emb = params["embedding"][inputs].astype(jnp.float32).reshape(B * N, H)   # sessions folded
    A = A.astype(jnp.float32)
    bt = _choose_bt(B, N)
    G = B // bt

    eye_bt = jnp.eye(bt, dtype=jnp.float32)

    def block_diag(a):                                    # a: (B, N, N) -> (G, bt*N, bt*N) bf16
        a_g = a.reshape(G, bt, N, N)
        out = jnp.einsum("gbij,bc->gbicj", a_g, eye_bt)   # zero off-diagonal session blocks
        return out.reshape(G, bt * N, bt * N).astype(jnp.bfloat16)

    A_in_blk = block_diag(A[:, :, :N])
    A_out_blk = block_diag(A[:, :, N:2 * N])
    inv_len = (1.0 / (jnp.sum(mask.astype(jnp.float32), axis=1) + 1e-6)).reshape(B, 1)
    w_pack, b_pack = _pack_weights(params)

    kernel = functools.partial(stargnn_kernel, step=step, bt=bt, seq_len=N, hidden_size=H)

    hidden_flat, s = pl.pallas_call(
        kernel,
        grid=(G,),
        in_specs=[
            pl.BlockSpec((bt * N, H), lambda g: (g, 0)),              # node rows (bt sessions)
            pl.BlockSpec((1, bt * N, bt * N), lambda g: (g, 0, 0)),   # block-diag A_in  (bf16)
            pl.BlockSpec((1, bt * N, bt * N), lambda g: (g, 0, 0)),   # block-diag A_out (bf16)
            pl.BlockSpec((bt, 1), lambda g: (g, 0)),                  # 1/(len+1e-6)
            pl.BlockSpec(w_pack.shape, lambda g: (0, 0)),             # packed weights: resident
            pl.BlockSpec(b_pack.shape, lambda g: (0, 0, 0)),          # packed biases:  resident
        ],
        out_specs=(
            pl.BlockSpec((bt * N, H), lambda g: (g, 0)),
            pl.BlockSpec((bt, H), lambda g: (g, 0)),
        ),
        out_shape=(
            jax.ShapeDtypeStruct((B * N, H), jnp.float32),
            jax.ShapeDtypeStruct((B, H), jnp.float32),
        ),
        compiler_params=pltpu.CompilerParams(
            dimension_semantics=("parallel",),        # 2 programs only on dual-TC v7x
            vmem_limit_bytes=32 * 1024 * 1024,        # explicit budget, well under 64/128 MiB
        ),
    )(emb, A_in_blk, A_out_blk, inv_len, w_pack, b_pack)

    hidden = hidden_flat.reshape(B, N, H)

    # --- GCN over the star nodes: a chain of [B,B] @ [B,H] matmuls (~KFLOPs) -> plain XLA ---
    x = s
    DA = jnp.dot(D.astype(jnp.float32), A_hat.astype(jnp.float32))
    acc = x
    for _ in range(gcn_layers):
        x = DA @ x
        acc = acc + x
    v_nodes = acc / float(gcn_layers + 1)
    return hidden, v_nodes


def _reference_forward(params, inputs, A, mask, D, A_hat, *, step=1, gcn_layers=3):
    """Pure-JAX f32 reference (mirrors the PyTorch module, weights pre-transposed)."""
    H = params["embedding"].shape[1]
    B, N = inputs.shape
    x = params["embedding"][inputs].astype(jnp.float32)
    mu = jnp.mean(x, -1, keepdims=True)
    var = jnp.mean((x - mu) ** 2, -1, keepdims=True)
    h0 = (x - mu) * jax.lax.rsqrt(var + 1e-5) * params["ln3_w"] + params["ln3_b"]
    A = A.astype(jnp.float32)
    A_in, A_out = A[:, :, :N], A[:, :, N:2 * N]
    s = (jnp.sum(h0, axis=1) / (jnp.sum(mask, axis=1) + 1e-6)[:, None])[:, None, :]
    hidden = h0
    for _ in range(step):
        ein = hidden @ params["W_ein"] + params["b_ein"]
        eout = hidden @ params["W_eout"] + params["b_eout"]
        input_in = jnp.einsum("bij,bjh->bih", A_in, ein) + params["b_iah"]
        input_out = jnp.einsum("bij,bjh->bih", A_out, eout) + params["b_oah"]
        gi = jnp.concatenate([input_in, input_out], -1) @ params["w_ih"] + params["b_ih"]
        gh = hidden @ params["w_hh"] + params["b_hh"]
        i_r, i_i, i_n = gi[..., :H], gi[..., H:2 * H], gi[..., 2 * H:]
        h_r, h_i, h_n = gh[..., :H], gh[..., H:2 * H], gh[..., 2 * H:]
        resetgate = jax.nn.sigmoid(i_r + h_r)
        inputgate = jax.nn.sigmoid(i_i + h_i)
        newgate = jnp.tanh(i_n + resetgate * h_n)
        hidden1 = newgate + inputgate * (hidden - newgate)
        q1 = hidden1 @ params["Wq1"] + params["bq1"]
        k1 = s @ params["Wk1"] + params["bk1"]
        alpha = jax.nn.softmax(jnp.einsum("bnh,bmh->bnm", q1, k1) / math.sqrt(H), axis=1)
        hidden = (1 - alpha) * hidden1 + alpha * s
        q2 = hidden @ params["Wq2"] + params["bq2"]
        k2 = s @ params["Wk2"] + params["bk2"]
        beta = jax.nn.softmax(jnp.einsum("bnh,bmh->bnm", q2, k2) / math.sqrt(H), axis=1)
        s = jnp.sum(beta * hidden, axis=1, keepdims=True)
    g = jax.nn.sigmoid(jnp.concatenate([h0, hidden], -1) @ params["Wg"] + params["bg"])
    hidden = g * h0 + (1 - g) * hidden
    x = s[:, 0, :]
    DA = D.astype(jnp.float32) @ A_hat.astype(jnp.float32)
    acc = x
    for _ in range(gcn_layers):
        x = DA @ x
        acc = acc + x
    return hidden, acc / float(gcn_layers + 1)


if __name__ == "__main__":
    key = jax.random.PRNGKey(0)
    B, N, H, n_node = 16, 8, 32, 64     # batch, session length (multiple of 8), hiddenSize, n_node
    step = 1                            # opt.step
    params = init_params(key, n_node, H)

    kin = jax.random.fold_in(key, 1000)
    k1, k2, k3, k4 = jax.random.split(kin, 4)
    inputs = jax.random.randint(k1, (B, N), 0, n_node)                       # item ids
    A = jax.random.uniform(k2, (B, N, 2 * N), dtype=jnp.float32)             # in|out adjacency
    lengths = (N - (jnp.arange(B) % 4)).astype(jnp.int32)
    mask = (jnp.arange(N)[None, :] < lengths[:, None]).astype(jnp.float32)   # [B, N]
    D = jax.random.uniform(k3, (B, B), dtype=jnp.float32)
    A_hat = jax.random.uniform(k4, (B, B), dtype=jnp.float32)

    fwd = jax.jit(functools.partial(star_session_graph_forward, step=step, gcn_layers=3))
    hidden, v_nodes = fwd(params, inputs, A, mask, D, A_hat)
    jax.block_until_ready((hidden, v_nodes))
    assert hidden.shape == (B, N, H) and v_nodes.shape == (B, H)

    # f32 reference check (bf16 MXU operands -> loose tolerance, normalized by max magnitude)
    h_ref, v_ref = _reference_forward(params, inputs, A, mask, D, A_hat, step=step, gcn_layers=3)
    h_err = float(jnp.max(jnp.abs(hidden - h_ref)) / (jnp.max(jnp.abs(h_ref)) + 1e-6))
    v_err = float(jnp.max(jnp.abs(v_nodes - v_ref)) / (jnp.max(jnp.abs(v_ref)) + 1e-6))
    assert h_err < 0.1 and v_err < 0.1, (h_err, v_err)
    print("KERNEL_OK")
</pallas_src>

<mosaic_0001>
module attributes {stable_mosaic.version = 11 : i64} {
  func.func @stargnn_kernel(%arg0: i32, %arg1: memref<128x32xf32, #tpu.memory_space<vmem>>, %arg2: memref<1x128x128xbf16, #tpu.memory_space<vmem>>, %arg3: memref<1x128x128xbf16, #tpu.memory_space<vmem>>, %arg4: memref<16x1xf32, #tpu.memory_space<vmem>>, %arg5: memref<544x32xbf16, #tpu.memory_space<vmem>>, %arg6: memref<13x1x32xf32, #tpu.memory_space<vmem>>, %arg7: memref<128x32xf32, #tpu.memory_space<vmem>>, %arg8: memref<16x32xf32, #tpu.memory_space<vmem>>) attributes {dimension_semantics = [#tpu.dimension_semantics<parallel>], iteration_bounds = array<i64: 1>, scalar_prefetch = 0 : i64, scratch_operands = 0 : i64, tpu.core_type = #tpu.core_type<tc>, window_params = [{transform_indices = @transform_0, window_bounds = array<i64: 128, 32>}, {transform_indices = @transform_1, window_bounds = array<i64: 1, 128, 128>}, {transform_indices = @transform_2, window_bounds = array<i64: 1, 128, 128>}, {transform_indices = @transform_3, window_bounds = array<i64: 16, 1>}, {pipeline_mode = #tpu.pipeline_mode<synchronous>, transform_indices = @transform_4, window_bounds = array<i64: 544, 32>}, {pipeline_mode = #tpu.pipeline_mode<synchronous>, transform_indices = @transform_5, window_bounds = array<i64: 13, 1, 32>}, {transform_indices = @transform_6, window_bounds = array<i64: 128, 32>}, {transform_indices = @transform_7, window_bounds = array<i64: 16, 32>}]} {
    %c0 = arith.constant 0 : index
    %c0_0 = arith.constant 0 : index
    %c0_1 = arith.constant 0 : index
    %0 = vector.load %arg2[%c0, %c0_0, %c0_1] : memref<1x128x128xbf16, #tpu.memory_space<vmem>>, vector<1x128x128xbf16>
    %1 = vector.shape_cast %0 : vector<1x128x128xbf16> to vector<128x128xbf16>
    %c0_2 = arith.constant 0 : index
    %c0_3 = arith.constant 0 : index
    %c0_4 = arith.constant 0 : index
    %2 = vector.load %arg3[%c0_2, %c0_3, %c0_4] : memref<1x128x128xbf16, #tpu.memory_space<vmem>>, vector<1x128x128xbf16>
    %3 = vector.shape_cast %2 : vector<1x128x128xbf16> to vector<128x128xbf16>
    %c0_5 = arith.constant 0 : index
    %c0_6 = arith.constant 0 : index
    %4 = vector.load %arg1[%c0_5, %c0_6] : memref<128x32xf32, #tpu.memory_space<vmem>>, vector<128x32xf32>
    %cst = arith.constant dense<0.000000e+00> : vector<128xf32>
    %5 = vector.multi_reduction <add>, %4, %cst [1] : vector<128x32xf32> to vector<128xf32>
    %6 = vector.shape_cast %5 : vector<128xf32> to vector<128x1xf32>
    %cst_7 = arith.constant 3.200000e+01 : f32
    %7 = vector.broadcast %cst_7 : f32 to vector<128x1xf32>
    %8 = arith.divf %6, %7 : vector<128x1xf32>
    %9 = vector.broadcast %8 : vector<128x1xf32> to vector<128x32xf32>
    %10 = arith.subf %4, %9 : vector<128x32xf32>
    %11 = arith.mulf %10, %10 : vector<128x32xf32>
    %cst_8 = arith.constant dense<0.000000e+00> : vector<128xf32>
    %12 = vector.multi_reduction <add>, %11, %cst_8 [1] : vector<128x32xf32> to vector<128xf32>
    %13 = vector.shape_cast %12 : vector<128xf32> to vector<128x1xf32>
    %cst_9 = arith.constant 3.200000e+01 : f32
    %14 = vector.broadcast %cst_9 : f32 to vector<128x1xf32>
    %15 = arith.divf %13, %14 : vector<128x1xf32>
    %16 = vector.broadcast %8 : vector<128x1xf32> to vector<128x32xf32>
    %17 = arith.subf %4, %16 : vector<128x32xf32>
    %cst_10 = arith.constant 9.99999974E-6 : f32
    %18 = vector.broadcast %cst_10 : f32 to vector<128x1xf32>
    %19 = arith.addf %15, %18 : vector<128x1xf32>
    %20 = math.rsqrt %19 : vector<128x1xf32>
    %21 = vector.broadcast %20 : vector<128x1xf32> to vector<128x32xf32>
    %22 = arith.mulf %17, %21 : vector<128x32xf32>
    %c0_11 = arith.constant 0 : index
    %c0_12 = arith.constant 0 : index
    %c0_13 = arith.constant 0 : index
    %23 = vector.load %arg6[%c0_11, %c0_12, %c0_13] : memref<13x1x32xf32, #tpu.memory_space<vmem>>, vector<1x1x32xf32>
    %24 = vector.shape_cast %23 : vector<1x1x32xf32> to vector<1x32xf32>
    %25 = vector.broadcast %24 : vector<1x32xf32> to vector<128x32xf32>
    %26 = arith.mulf %22, %25 : vector<128x32xf32>
    %c1 = arith.constant 1 : index
    %c0_14 = arith.constant 0 : index
    %c0_15 = arith.constant 0 : index
    %27 = vector.load %arg6[%c1, %c0_14, %c0_15] : memref<13x1x32xf32, #tpu.memory_space<vmem>>, vector<1x1x32xf32>
    %28 = vector.shape_cast %27 : vector<1x1x32xf32> to vector<1x32xf32>
    %29 = vector.broadcast %28 : vector<1x32xf32> to vector<128x32xf32>
    %30 = arith.addf %26, %29 : vector<128x32xf32>
    %c0_16 = arith.constant 0 : index
    %c0_17 = arith.constant 0 : index
    %31 = vector.load %arg4[%c0_16, %c0_17] : memref<16x1xf32, #tpu.memory_space<vmem>>, vector<16x1xf32>
    %32 = vector.shape_cast %30 : vector<128x32xf32> to vector<16x8x32xf32>
    %cst_18 = arith.constant dense<0.000000e+00> : vector<16x32xf32>
    %33 = vector.multi_reduction <add>, %32, %cst_18 [1] : vector<16x8x32xf32> to vector<16x32xf32>
    %34 = vector.broadcast %31 : vector<16x1xf32> to vector<16x32xf32>
    %35 = arith.mulf %33, %34 : vector<16x32xf32>
    %c0_19 = arith.constant 0 : index
    %c0_20 = arith.constant 0 : index
    %36 = vector.load %arg5[%c0_19, %c0_20] : memref<544x32xbf16, #tpu.memory_space<vmem>>, vector<32x32xbf16>
    %37 = arith.truncf %30 : vector<128x32xf32> to vector<128x32xbf16>
    %cst_21 = arith.constant dense<0.000000e+00> : vector<128x32xf32>
    %38 = tpu.matmul %37, %36, %cst_21 {dimension_numbers = #tpu.dot_dimension_numbers<[1], [0], [0], [1], [0, 0, 1, 1], [], []>} : vector<128x32xbf16>, vector<32x32xbf16>, vector<128x32xf32> -> vector<128x32xf32>
    %c2 = arith.constant 2 : index
    %c0_22 = arith.constant 0 : index
    %c0_23 = arith.constant 0 : index
    %39 = vector.load %arg6[%c2, %c0_22, %c0_23] : memref<13x1x32xf32, #tpu.memory_space<vmem>>, vector<1x1x32xf32>
    %40 = vector.shape_cast %39 : vector<1x1x32xf32> to vector<1x32xf32>
    %41 = vector.broadcast %40 : vector<1x32xf32> to vector<128x32xf32>
    %42 = arith.addf %38, %41 : vector<128x32xf32>
    %c32 = arith.constant 32 : index
    %c0_24 = arith.constant 0 : index
    %43 = vector.load %arg5[%c32, %c0_24] : memref<544x32xbf16, #tpu.memory_space<vmem>>, vector<32x32xbf16>
    %44 = arith.truncf %30 : vector<128x32xf32> to vector<128x32xbf16>
    %cst_25 = arith.constant dense<0.000000e+00> : vector<128x32xf32>
    %45 = tpu.matmul %44, %43, %cst_25 {dimension_numbers = #tpu.dot_dimension_numbers<[1], [0], [0], [1], [0, 0, 1, 1], [], []>} : vector<128x32xbf16>, vector<32x32xbf16>, vector<128x32xf32> -> vector<128x32xf32>
    %c3 = arith.constant 3 : index
    %c0_26 = arith.constant 0 : index
    %c0_27 = arith.constant 0 : index
    %46 = vector.load %arg6[%c3, %c0_26, %c0_27] : memref<13x1x32xf32, #tpu.memory_space<vmem>>, vector<1x1x32xf32>
    %47 = vector.shape_cast %46 : vector<1x1x32xf32> to vector<1x32xf32>
    %48 = vector.broadcast %47 : vector<1x32xf32> to vector<128x32xf32>
    %49 = arith.addf %45, %48 : vector<128x32xf32>
    %50 = arith.truncf %42 : vector<128x32xf32> to vector<128x32xbf16>
    %cst_28 = arith.constant dense<0.000000e+00> : vector<128x32xf32>
    %51 = tpu.matmul %1, %50, %cst_28 {dimension_numbers = #tpu.dot_dimension_numbers<[1], [0], [0], [1], [0, 0, 1, 1], [], []>} : vector<128x128xbf16>, vector<128x32xbf16>, vector<128x32xf32> -> vector<128x32xf32>
    %52 = arith.truncf %49 : vector<128x32xf32> to vector<128x32xbf16>
    %cst_29 = arith.constant dense<0.000000e+00> : vector<128x32xf32>
    %53 = tpu.matmul %3, %52, %cst_29 {dimension_numbers = #tpu.dot_dimension_numbers<[1], [0], [0], [1], [0, 0, 1, 1], [], []>} : vector<128x128xbf16>, vector<128x32xbf16>, vector<128x32xf32> -> vector<128x32xf32>
    %54 = tpu.concatenate %51, %53 in 1 : vector<128x32xf32>, vector<128x32xf32> -> vector<128x64xf32>
    %55 = tpu.concatenate %54, %30 in 1 : vector<128x64xf32>, vector<128x32xf32> -> vector<128x96xf32>
    %c64 = arith.constant 64 : index
    %c0_30 = arith.constant 0 : index
    %56 = vector.load %arg5[%c64, %c0_30] : memref<544x32xbf16, #tpu.memory_space<vmem>>, vector<96x32xbf16>
    %57 = arith.truncf %55 : vector<128x96xf32> to vector<128x96xbf16>
    %cst_31 = arith.constant dense<0.000000e+00> : vector<128x32xf32>
    %58 = tpu.matmul %57, %56, %cst_31 {dimension_numbers = #tpu.dot_dimension_numbers<[1], [0], [0], [1], [0, 0, 1, 1], [], []>} : vector<128x96xbf16>, vector<96x32xbf16>, vector<128x32xf32> -> vector<128x32xf32>
    %c4 = arith.constant 4 : index
    %c0_32 = arith.constant 0 : index
    %c0_33 = arith.constant 0 : index
    %59 = vector.load %arg6[%c4, %c0_32, %c0_33] : memref<13x1x32xf32, #tpu.memory_space<vmem>>, vector<1x1x32xf32>
    %60 = vector.shape_cast %59 : vector<1x1x32xf32> to vector<1x32xf32>
    %61 = vector.broadcast %60 : vector<1x32xf32> to vector<128x32xf32>
    %62 = arith.addf %58, %61 : vector<128x32xf32>
    %c160 = arith.constant 160 : index
    %c0_34 = arith.constant 0 : index
    %63 = vector.load %arg5[%c160, %c0_34] : memref<544x32xbf16, #tpu.memory_space<vmem>>, vector<96x32xbf16>
    %64 = arith.truncf %55 : vector<128x96xf32> to vector<128x96xbf16>
    %cst_35 = arith.constant dense<0.000000e+00> : vector<128x32xf32>
    %65 = tpu.matmul %64, %63, %cst_35 {dimension_numbers = #tpu.dot_dimension_numbers<[1], [0], [0], [1], [0, 0, 1, 1], [], []>} : vector<128x96xbf16>, vector<96x32xbf16>, vector<128x32xf32> -> vector<128x32xf32>
    %c5 = arith.constant 5 : index
    %c0_36 = arith.constant 0 : index
    %c0_37 = arith.constant 0 : index
    %66 = vector.load %arg6[%c5, %c0_36, %c0_37] : memref<13x1x32xf32, #tpu.memory_space<vmem>>, vector<1x1x32xf32>
    %67 = vector.shape_cast %66 : vector<1x1x32xf32> to vector<1x32xf32>
    %68 = vector.broadcast %67 : vector<1x32xf32> to vector<128x32xf32>
    %69 = arith.addf %65, %68 : vector<128x32xf32>
    %c256 = arith.constant 256 : index
    %c0_38 = arith.constant 0 : index
    %70 = vector.load %arg5[%c256, %c0_38] : memref<544x32xbf16, #tpu.memory_space<vmem>>, vector<64x32xbf16>
    %71 = arith.truncf %54 : vector<128x64xf32> to vector<128x64xbf16>
    %cst_39 = arith.constant dense<0.000000e+00> : vector<128x32xf32>
    %72 = tpu.matmul %71, %70, %cst_39 {dimension_numbers = #tpu.dot_dimension_numbers<[1], [0], [0], [1], [0, 0, 1, 1], [], []>} : vector<128x64xbf16>, vector<64x32xbf16>, vector<128x32xf32> -> vector<128x32xf32>
    %c6 = arith.constant 6 : index
    %c0_40 = arith.constant 0 : index
    %c0_41 = arith.constant 0 : index
    %73 = vector.load %arg6[%c6, %c0_40, %c0_41] : memref<13x1x32xf32, #tpu.memory_space<vmem>>, vector<1x1x32xf32>
    %74 = vector.shape_cast %73 : vector<1x1x32xf32> to vector<1x32xf32>
    %75 = vector.broadcast %74 : vector<1x32xf32> to vector<128x32xf32>
    %76 = arith.addf %72, %75 : vector<128x32xf32>
    %c320 = arith.constant 320 : index
    %c0_42 = arith.constant 0 : index
    %77 = vector.load %arg5[%c320, %c0_42] : memref<544x32xbf16, #tpu.memory_space<vmem>>, vector<32x32xbf16>
    %78 = arith.truncf %30 : vector<128x32xf32> to vector<128x32xbf16>
    %cst_43 = arith.constant dense<0.000000e+00> : vector<128x32xf32>
    %79 = tpu.matmul %78, %77, %cst_43 {dimension_numbers = #tpu.dot_dimension_numbers<[1], [0], [0], [1], [0, 0, 1, 1], [], []>} : vector<128x32xbf16>, vector<32x32xbf16>, vector<128x32xf32> -> vector<128x32xf32>
    %c7 = arith.constant 7 : index
    %c0_44 = arith.constant 0 : index
    %c0_45 = arith.constant 0 : index
    %80 = vector.load %arg6[%c7, %c0_44, %c0_45] : memref<13x1x32xf32, #tpu.memory_space<vmem>>, vector<1x1x32xf32>
    %81 = vector.shape_cast %80 : vector<1x1x32xf32> to vector<1x32xf32>
    %82 = vector.broadcast %81 : vector<1x32xf32> to vector<128x32xf32>
    %83 = arith.addf %79, %82 : vector<128x32xf32>
    %84 = arith.negf %62 : vector<128x32xf32>
    %85 = math.exp %84 : vector<128x32xf32>
    %cst_46 = arith.constant 1.000000e+00 : f32
    %86 = vector.broadcast %cst_46 : f32 to vector<128x32xf32>
    %87 = arith.addf %86, %85 : vector<128x32xf32>
    %88 = arith.divf %86, %87 : vector<128x32xf32>
    %89 = arith.negf %69 : vector<128x32xf32>
    %90 = math.exp %89 : vector<128x32xf32>
    %cst_47 = arith.constant 1.000000e+00 : f32
    %91 = vector.broadcast %cst_47 : f32 to vector<128x32xf32>
    %92 = arith.addf %91, %90 : vector<128x32xf32>
    %93 = arith.divf %91, %92 : vector<128x32xf32>
    %94 = arith.mulf %88, %83 : vector<128x32xf32>
    %95 = arith.addf %76, %94 : vector<128x32xf32>
    %96 = math.tanh %95 : vector<128x32xf32>
    %97 = arith.subf %30, %96 : vector<128x32xf32>
    %98 = arith.mulf %93, %97 : vector<128x32xf32>
    %99 = arith.addf %96, %98 : vector<128x32xf32>
    %c352 = arith.constant 352 : index
    %c0_48 = arith.constant 0 : index
    %100 = vector.load %arg5[%c352, %c0_48] : memref<544x32xbf16, #tpu.memory_space<vmem>>, vector<32x32xbf16>
    %101 = arith.truncf %99 : vector<128x32xf32> to vector<128x32xbf16>
    %cst_49 = arith.constant dense<0.000000e+00> : vector<128x32xf32>
    %102 = tpu.matmul %101, %100, %cst_49 {dimension_numbers = #tpu.dot_dimension_numbers<[1], [0], [0], [1], [0, 0, 1, 1], [], []>} : vector<128x32xbf16>, vector<32x32xbf16>, vector<128x32xf32> -> vector<128x32xf32>
    %c8 = arith.constant 8 : index
    %c0_50 = arith.constant 0 : index
    %c0_51 = arith.constant 0 : index
    %103 = vector.load %arg6[%c8, %c0_50, %c0_51] : memref<13x1x32xf32, #tpu.memory_space<vmem>>, vector<1x1x32xf32>
    %104 = vector.shape_cast %103 : vector<1x1x32xf32> to vector<1x32xf32>
    %105 = vector.broadcast %104 : vector<1x32xf32> to vector<128x32xf32>
    %106 = arith.addf %102, %105 : vector<128x32xf32>
    %107 = vector.shape_cast %106 : vector<128x32xf32> to vector<16x8x32xf32>
    %c384 = arith.constant 384 : index
    %c0_52 = arith.constant 0 : index
    %108 = vector.load %arg5[%c384, %c0_52] : memref<544x32xbf16, #tpu.memory_space<vmem>>, vector<32x32xbf16>
    %109 = arith.truncf %35 : vector<16x32xf32> to vector<16x32xbf16>
    %cst_53 = arith.constant dense<0.000000e+00> : vector<16x32xf32>
    %110 = tpu.matmul %109, %108, %cst_53 {dimension_numbers = #tpu.dot_dimension_numbers<[1], [0], [0], [1], [0, 0, 1, 1], [], []>} : vector<16x32xbf16>, vector<32x32xbf16>, vector<16x32xf32> -> vector<16x32xf32>
    %c9 = arith.constant 9 : index
    %c0_54 = arith.constant 0 : index
    %c0_55 = arith.constant 0 : index
    %111 = vector.load %arg6[%c9, %c0_54, %c0_55] : memref<13x1x32xf32, #tpu.memory_space<vmem>>, vector<1x1x32xf32>
    %112 = vector.shape_cast %111 : vector<1x1x32xf32> to vector<1x32xf32>
    %113 = vector.broadcast %112 : vector<1x32xf32> to vector<16x32xf32>
    %114 = arith.addf %110, %113 : vector<16x32xf32>
    %115 = vector.shape_cast %114 : vector<16x32xf32> to vector<16x1x32xf32>
    %116 = vector.broadcast %115 : vector<16x1x32xf32> to vector<16x8x32xf32>
    %117 = arith.mulf %107, %116 : vector<16x8x32xf32>
    %cst_56 = arith.constant dense<0.000000e+00> : vector<16x8xf32>
    %118 = vector.multi_reduction <add>, %117, %cst_56 [2] : vector<16x8x32xf32> to vector<16x8xf32>
    %119 = vector.shape_cast %118 : vector<16x8xf32> to vector<16x8x1xf32>
    %cst_57 = arith.constant 0.176776692 : f32
    %120 = vector.broadcast %cst_57 : f32 to vector<16x8x1xf32>
    %121 = arith.mulf %119, %120 : vector<16x8x1xf32>
    %cst_58 = arith.constant dense<0xFF800000> : vector<16x1xf32>
    %122 = vector.multi_reduction <maximumf>, %121, %cst_58 [1] : vector<16x8x1xf32> to vector<16x1xf32>
    %cst_59 = arith.constant 0xFF800000 : f32
    %123 = vector.broadcast %cst_59 : f32 to vector<16x1xf32>
    %124 = arith.maximumf %123, %122 : vector<16x1xf32>
    %125 = vector.shape_cast %124 : vector<16x1xf32> to vector<16x1x1xf32>
    %126 = vector.broadcast %125 : vector<16x1x1xf32> to vector<16x8x1xf32>
    %127 = arith.subf %121, %126 : vector<16x8x1xf32>
    %128 = math.exp %127 : vector<16x8x1xf32>
    %cst_60 = arith.constant dense<0.000000e+00> : vector<16x1xf32>
    %129 = vector.multi_reduction <add>, %128, %cst_60 [1] : vector<16x8x1xf32> to vector<16x1xf32>
    %130 = vector.shape_cast %129 : vector<16x1xf32> to vector<16x1x1xf32>
    %131 = vector.broadcast %130 : vector<16x1x1xf32> to vector<16x8x1xf32>
    %132 = arith.divf %128, %131 : vector<16x8x1xf32>
    %133 = vector.shape_cast %99 : vector<128x32xf32> to vector<16x8x32xf32>
    %cst_61 = arith.constant 1.000000e+00 : f32
    %134 = vector.broadcast %cst_61 : f32 to vector<16x8x1xf32>
    %135 = arith.subf %134, %132 : vector<16x8x1xf32>
    %136 = vector.broadcast %135 : vector<16x8x1xf32> to vector<16x8x32xf32>
    %137 = arith.mulf %136, %133 : vector<16x8x32xf32>
    %138 = vector.shape_cast %35 : vector<16x32xf32> to vector<16x1x32xf32>
    %139 = vector.broadcast %132 : vector<16x8x1xf32> to vector<16x8x32xf32>
    %140 = vector.broadcast %138 : vector<16x1x32xf32> to vector<16x8x32xf32>
    %141 = arith.mulf %139, %140 : vector<16x8x32xf32>
    %142 = arith.addf %137, %141 : vector<16x8x32xf32>
    %143 = vector.shape_cast %142 : vector<16x8x32xf32> to vector<128x32xf32>
    %c416 = arith.constant 416 : index
    %c0_62 = arith.constant 0 : index
    %144 = vector.load %arg5[%c416, %c0_62] : memref<544x32xbf16, #tpu.memory_space<vmem>>, vector<32x32xbf16>
    %145 = arith.truncf %143 : vector<128x32xf32> to vector<128x32xbf16>
    %cst_63 = arith.constant dense<0.000000e+00> : vector<128x32xf32>
    %146 = tpu.matmul %145, %144, %cst_63 {dimension_numbers = #tpu.dot_dimension_numbers<[1], [0], [0], [1], [0, 0, 1, 1], [], []>} : vector<128x32xbf16>, vector<32x32xbf16>, vector<128x32xf32> -> vector<128x32xf32>
    %c10 = arith.constant 10 : index
    %c0_64 = arith.constant 0 : index
    %c0_65 = arith.constant 0 : index
    %147 = vector.load %arg6[%c10, %c0_64, %c0_65] : memref<13x1x32xf32, #tpu.memory_space<vmem>>, vector<1x1x32xf32>
    %148 = vector.shape_cast %147 : vector<1x1x32xf32> to vector<1x32xf32>
    %149 = vector.broadcast %148 : vector<1x32xf32> to vector<128x32xf32>
    %150 = arith.addf %146, %149 : vector<128x32xf32>
    %151 = vector.shape_cast %150 : vector<128x32xf32> to vector<16x8x32xf32>
    %c448 = arith.constant 448 : index
    %c0_66 = arith.constant 0 : index
    %152 = vector.load %arg5[%c448, %c0_66] : memref<544x32xbf16, #tpu.memory_space<vmem>>, vector<32x32xbf16>
    %153 = arith.truncf %35 : vector<16x32xf32> to vector<16x32xbf16>
    %cst_67 = arith.constant dense<0.000000e+00> : vector<16x32xf32>
    %154 = tpu.matmul %153, %152, %cst_67 {dimension_numbers = #tpu.dot_dimension_numbers<[1], [0], [0], [1], [0, 0, 1, 1], [], []>} : vector<16x32xbf16>, vector<32x32xbf16>, vector<16x32xf32> -> vector<16x32xf32>
    %c11 = arith.constant 11 : index
    %c0_68 = arith.constant 0 : index
    %c0_69 = arith.constant 0 : index
    %155 = vector.load %arg6[%c11, %c0_68, %c0_69] : memref<13x1x32xf32, #tpu.memory_space<vmem>>, vector<1x1x32xf32>
    %156 = vector.shape_cast %155 : vector<1x1x32xf32> to vector<1x32xf32>
    %157 = vector.broadcast %156 : vector<1x32xf32> to vector<16x32xf32>
    %158 = arith.addf %154, %157 : vector<16x32xf32>
    %159 = vector.shape_cast %158 : vector<16x32xf32> to vector<16x1x32xf32>
    %160 = vector.broadcast %159 : vector<16x1x32xf32> to vector<16x8x32xf32>
    %161 = arith.mulf %151, %160 : vector<16x8x32xf32>
    %cst_70 = arith.constant dense<0.000000e+00> : vector<16x8xf32>
    %162 = vector.multi_reduction <add>, %161, %cst_70 [2] : vector<16x8x32xf32> to vector<16x8xf32>
    %163 = vector.shape_cast %162 : vector<16x8xf32> to vector<16x8x1xf32>
    %cst_71 = arith.constant 0.176776692 : f32
    %164 = vector.broadcast %cst_71 : f32 to vector<16x8x1xf32>
    %165 = arith.mulf %163, %164 : vector<16x8x1xf32>
    %cst_72 = arith.constant dense<0xFF800000> : vector<16x1xf32>
    %166 = vector.multi_reduction <maximumf>, %165, %cst_72 [1] : vector<16x8x1xf32> to vector<16x1xf32>
    %cst_73 = arith.constant 0xFF800000 : f32
    %167 = vector.broadcast %cst_73 : f32 to vector<16x1xf32>
    %168 = arith.maximumf %167, %166 : vector<16x1xf32>
    %169 = vector.shape_cast %168 : vector<16x1xf32> to vector<16x1x1xf32>
    %170 = vector.broadcast %169 : vector<16x1x1xf32> to vector<16x8x1xf32>
    %171 = arith.subf %165, %170 : vector<16x8x1xf32>
    %172 = math.exp %171 : vector<16x8x1xf32>
    %cst_74 = arith.constant dense<0.000000e+00> : vector<16x1xf32>
    %173 = vector.multi_reduction <add>, %172, %cst_74 [1] : vector<16x8x1xf32> to vector<16x1xf32>
    %174 = vector.shape_cast %173 : vector<16x1xf32> to vector<16x1x1xf32>
    %175 = vector.broadcast %174 : vector<16x1x1xf32> to vector<16x8x1xf32>
    %176 = arith.divf %172, %175 : vector<16x8x1xf32>
    %177 = vector.broadcast %176 : vector<16x8x1xf32> to vector<16x8x32xf32>
    %178 = arith.mulf %177, %142 : vector<16x8x32xf32>
    %cst_75 = arith.constant dense<0.000000e+00> : vector<16x32xf32>
    %179 = vector.multi_reduction <add>, %178, %cst_75 [1] : vector<16x8x32xf32> to vector<16x32xf32>
    %180 = tpu.concatenate %30, %143 in 1 : vector<128x32xf32>, vector<128x32xf32> -> vector<128x64xf32>
    %c480 = arith.constant 480 : index
    %c0_76 = arith.constant 0 : index
    %181 = vector.load %arg5[%c480, %c0_76] : memref<544x32xbf16, #tpu.memory_space<vmem>>, vector<64x32xbf16>
    %182 = arith.truncf %180 : vector<128x64xf32> to vector<128x64xbf16>
    %cst_77 = arith.constant dense<0.000000e+00> : vector<128x32xf32>
    %183 = tpu.matmul %182, %181, %cst_77 {dimension_numbers = #tpu.dot_dimension_numbers<[1], [0], [0], [1], [0, 0, 1, 1], [], []>} : vector<128x64xbf16>, vector<64x32xbf16>, vector<128x32xf32> -> vector<128x32xf32>
    %c12 = arith.constant 12 : index
    %c0_78 = arith.constant 0 : index
    %c0_79 = arith.constant 0 : index
    %184 = vector.load %arg6[%c12, %c0_78, %c0_79] : memref<13x1x32xf32, #tpu.memory_space<vmem>>, vector<1x1x32xf32>
    %185 = vector.shape_cast %184 : vector<1x1x32xf32> to vector<1x32xf32>
    %186 = vector.broadcast %185 : vector<1x32xf32> to vector<128x32xf32>
    %187 = arith.addf %183, %186 : vector<128x32xf32>
    %188 = arith.negf %187 : vector<128x32xf32>
    %189 = math.exp %188 : vector<128x32xf32>
    %cst_80 = arith.constant 1.000000e+00 : f32
    %190 = vector.broadcast %cst_80 : f32 to vector<128x32xf32>
    %191 = arith.addf %190, %189 : vector<128x32xf32>
    %192 = arith.divf %190, %191 : vector<128x32xf32>
    %193 = arith.mulf %192, %30 : vector<128x32xf32>
    %cst_81 = arith.constant 1.000000e+00 : f32
    %194 = vector.broadcast %cst_81 : f32 to vector<128x32xf32>
    %195 = arith.subf %194, %192 : vector<128x32xf32>
    %196 = arith.mulf %195, %143 : vector<128x32xf32>
    %197 = arith.addf %193, %196 : vector<128x32xf32>
    %c0_82 = arith.constant 0 : index
    %c0_83 = arith.constant 0 : index
    %198 = vector.load %arg7[%c0_82, %c0_83] : memref<128x32xf32, #tpu.memory_space<vmem>>, vector<128x32xf32>
    tpu.vector_store %arg7[%c0_82, %c0_83], %197 {strides = array<i32>} : memref<128x32xf32, #tpu.memory_space<vmem>>, vector<128x32xf32>,
    %c0_84 = arith.constant 0 : index
    %c0_85 = arith.constant 0 : index
    %199 = vector.load %arg8[%c0_84, %c0_85] : memref<16x32xf32, #tpu.memory_space<vmem>>, vector<16x32xf32>
    tpu.vector_store %arg8[%c0_84, %c0_85], %179 {strides = array<i32>} : memref<16x32xf32, #tpu.memory_space<vmem>>, vector<16x32xf32>,
    return
  }
  func.func @transform_0(%arg0: i32) -> (i32, i32) {
    %c0_i32 = arith.constant 0 : i32
    %c0_i32_0 = arith.constant 0 : i32
    return %arg0, %c0_i32 : i32, i32
  }
  func.func @transform_1(%arg0: i32) -> (i32, i32, i32) {
    %c0_i32 = arith.constant 0 : i32
    %c0_i32_0 = arith.constant 0 : i32
    %c0_i32_1 = arith.constant 0 : i32
    return %arg0, %c0_i32, %c0_i32_0 : i32, i32, i32
  }
  func.func @transform_2(%arg0: i32) -> (i32, i32, i32) {
    %c0_i32 = arith.constant 0 : i32
    %c0_i32_0 = arith.constant 0 : i32
    %c0_i32_1 = arith.constant 0 : i32
    return %arg0, %c0_i32, %c0_i32_0 : i32, i32, i32
  }
  func.func @transform_3(%arg0: i32) -> (i32, i32) {
    %c0_i32 = arith.constant 0 : i32
    %c0_i32_0 = arith.constant 0 : i32
    return %arg0, %c0_i32 : i32, i32
  }
  func.func @transform_4(%arg0: i32) -> (i32, i32) {
    %c0_i32 = arith.constant 0 : i32
    %c0_i32_0 = arith.constant 0 : i32
    %c0_i32_1 = arith.constant 0 : i32
    return %c0_i32, %c0_i32_0 : i32, i32
  }
  func.func @transform_5(%arg0: i32) -> (i32, i32, i32) {
    %c0_i32 = arith.constant 0 : i32
    %c0_i32_0 = arith.constant 0 : i32
    %c0_i32_1 = arith.constant 0 : i32
    %c0_i32_2 = arith.constant 0 : i32
    return %c0_i32, %c0_i32_0, %c0_i32_1 : i32, i32, i32
  }
  func.func @transform_6(%arg0: i32) -> (i32, i32) {
    %c0_i32 = arith.constant 0 : i32
    %c0_i32_0 = arith.constant 0 : i32
    return %arg0, %c0_i32 : i32, i32
  }
  func.func @transform_7(%arg0: i32) -> (i32, i32) {
    %c0_i32 = arith.constant 0 : i32
    %c0_i32_0 = arith.constant 0 : i32
    return %arg0, %c0_i32 : i32, i32
  }
}

</mosaic_0001>

<bundles_post_ra>
// kernel: star_session_graph_forward.1
= control target key start
LH: loop header
LB: loop body
LE: loop exit
PB: predicated region body
PF: predicated region fallthrough
CT: control target
= control target key end

     0   :  { %vm75_vm0 = vcmask 261120   ;;  %s9198_s0 = inlined_call_operand.vmem [shape: f32[128,32], index: 0, kind: input, shape index: {}]   ;;  %s9199_s1 = inlined_call_operand.vmem [shape: bf16[1,128,128], index: 1, kind: input, shape index: {}]   ;;  %s9200_s2 = inlined_call_operand.vmem [shape: bf16[1,128,128], index: 2, kind: input, shape index: {}]   ;;  %s9201_s3 = inlined_call_operand.vmem [shape: f32[16,1], index: 3, kind: input, shape index: {}]   ;;  %s9202_s4 = inlined_call_operand.vmem [shape: bf16[544,32], index: 4, kind: input, shape index: {}]   ;;  %s9203_s5 = inlined_call_operand.vmem [shape: f32[13,1,32], index: 5, kind: input, shape index: {}]   ;;  %s9204_s6 = inlined_call_operand.hbm [shape: f32[128,32], index: 6, kind: output, shape index: {0}]   ;;  %s9205_s7 = inlined_call_operand.vmem [shape: f32[16,32], index: 7, kind: output, shape index: {1}]  }
   0x1   :  { %v61_v0 = vld [vmem:[%s9198_s0 + $0x10] sm:$0xff]  ;;  %v59_v1 = vld [vmem:[%s9198_s0] sm:$0xff]  ;;  %v62_v5 = vld [vmem:[%s9198_s0 + $0x18] sm:$0xff] }
   0x2   :  { %v82_v2 = vsel %vm75_vm0, %v61_v0, 0.0  ;;  %v76_v3 = vsel %vm75_vm0, %v59_v1, 0.0  ;;  %v63_v4 = vld [vmem:[%s9198_s0 + $0x20] sm:$0xff]  ;;  %v60_v6 = vld [vmem:[%s9198_s0 + $0x8] sm:$0xff]  ;;  %v85_v9 = vsel %vm75_vm0, %v62_v5, 0.0 }
   0x3   :  { %83 = vadd.xlane.f32.xlu1 %v82_v2  ;;  %77 = vadd.xlane.f32.xlu0 %v76_v3  ;;  %v88_v7 = vsel %vm75_vm0, %v63_v4, 0.0  ;;  %v64_v8 = vld [vmem:[%s9198_s0 + $0x28] sm:$0xff]  ;;  %v79_v10 = vsel %vm75_vm0, %v60_v6, 0.0 }
   0x4   :  { %89 = vadd.xlane.f32.xlu2 %v88_v7 }
   0x5   :  { %13 = vsyncpa [#allocation3], 0  ;;  %v91_v11 = vsel %vm75_vm0, %v64_v8, 0.0  ;;  %v65_v12 = vld [vmem:[%s9198_s0 + $0x30] sm:$0xff]  ;;  %v5694_v14 = vmov 32.0   ;;  %v5784_v34 = vld [vmem:[%s9198_s0 + $0x38] sm:$0xff] }
   0x6   :  { %v94_v13 = vsel %vm75_vm0, %v65_v12, 0.0  ;;  %5277 = vrcp.f32 %v5694_v14  ;;  %v97_v40 = vsel %vm75_vm0, %v5784_v34, 0.0  ;;  %v5808_v47 = vld [vmem:[%s9198_s0 + $0x40] sm:$0xff]  ;;  %v5824_v56 = vld [vmem:[%s9198_s0 + $0x58] sm:$0xff]  ;;  %v5829_v57 = vld [vmem:[%s9198_s0 + $0x48] sm:$0xff]  ;;  %s5695_s21 = smov 64  }
   0x7   :  { %v100_v51 = vsel %vm75_vm0, %v5808_v47, 0.0  ;;  %v109_v59 = vsel %vm75_vm0, %v5824_v56, 0.0  ;;  %v103_v61 = vsel %vm75_vm0, %v5829_v57, 0.0  ;;  %v5843_v63 = vld [vmem:[%s9198_s0 + $0x70] sm:$0xff]  ;;  %s4723_s26 = sshll.u32 %s9204_s6, 4  ;;  %s5699_s6 = smov 128   ;;  %s4724_s26 = int_to_ptr.hbm [resolvable:$true] %s4723_s26 }
   0x8   :  { %v118_v2 = vsel %vm75_vm0, %v5843_v63, 0.0  ;;  %s5700_s27 = smov 8  }
   0xb   :  { %86 = vadd.xlane.f32.xlu1 %v85_v9  ;;  %80 = vadd.xlane.f32.xlu0 %v79_v10 }
   0xc   :  { %92 = vadd.xlane.f32.xlu2 %v91_v11  ;;  %v5278_v15 = vpop.eup %5277  ;;  %v5090_v11 = vld [vmem:[%s9202_s4 + $0x8] sm:$0xff] }
   0xd   :  { %v125_v16 = vmul.f32 32.0, %v5278_v15  ;;  %vm129_vm1 = vweird.f32 %v5278_v15  ;;  %703 = vmatpush.bf16.msra.mxu0 %v5090_v11  ;;  %5123 = vmatpush.bf16.msra.mxu2 %v5090_v11  ;;  %v5932_v11 = vld [vmem:[%s9203_s5] ss:$0 sm:$0xff] }
   0xf   :  { %v126_v17 = vsub.f32 1.0, %v125_v16  ;;  %v5091_v16 = vld [vmem:[%s9202_s4 + $0x10] sm:$0xff] }
  0x11   :  { %v127_v18 = vmul.f32 %v5278_v15, %v126_v17 }
  0x13   :  { %v128_v19 = vadd.f32 %v5278_v15, %v127_v18 }
  0x14   :  { %95 = vadd.xlane.f32.xlu2 %v94_v13 }
  0x15   :  { %v5769_v20 = vsel %vm129_vm1, %v5278_v15, %v128_v19  ;;  %v5089_v15 = vld [vmem:[%s9202_s4] sm:$0xff] }
  0x16   :  { %704 = vmatpush.bf16.msra.mxu0 %v5089_v15  ;;  %5124 = vmatpush.bf16.msra.mxu2 %v5089_v15 }
  0x76   :  { %v84_v21 = vpop.xlane.xlu1 %83  ;;  %v78_v22 = vpop.xlane.xlu0 %77 }
  0x77   :  { %v131_v23 = vmul.f32 %v5769_v20, %v78_v22  ;;  %v90_v24 = vpop.xlane.xlu2 %89  ;;  %v133_v33 = vmul.f32 %v5769_v20, %v84_v21 }
  0x78   :  { %v135_v32 = vmul.f32 %v5769_v20, %v90_v24 }
  0x79   :  { %v5772_v25 = vsub.f32 %v59_v1, %v131_v23  ;;  %v5798_v42 = vsub.f32 %v61_v0, %v133_v33  ;;  %v5848_v0 = vld [vmem:[%s9198_s0 + $0x50] sm:$0xff] }
  0x7a   :  { %v5790_v38 = vsub.f32 %v63_v4, %v135_v32  ;;  %v106_v3 = vsel %vm75_vm0, %v5848_v0, 0.0  ;;  %v5858_v4 = vld [vmem:[%s9198_s0 + $0x68] sm:$0xff] }
  0x7b   :  { %v163_v26 = vmul.f32 %v5772_v25, %v5772_v25  ;;  %v165_v48 = vmul.f32 %v5798_v42, %v5798_v42 }
  0x7c   :  { %v167_v46 = vmul.f32 %v5790_v38, %v5790_v38 }
  0x7d   :  { %v179_v27 = vsel %vm75_vm0, %v163_v26, 0.0  ;;  %v185_v52 = vsel %vm75_vm0, %v165_v48, 0.0 }
  0x7e   :  { %v87_v28 = vpop.xlane.xlu1 %86  ;;  %180 = vadd.xlane.f32.xlu0 %v179_v27  ;;  %v81_v29 = vpop.xlane.xlu0 %80  ;;  %v191_v50 = vsel %vm75_vm0, %v167_v46, 0.0 }
  0x7f   :  { %v134_v30 = vmul.f32 %v5769_v20, %v87_v28  ;;  %v132_v31 = vmul.f32 %v5769_v20, %v81_v29  ;;  %v93_v37 = vpop.xlane.xlu2 %92 }
  0x80   :  { %v136_v45 = vmul.f32 %v5769_v20, %v93_v37 }
  0x81   :  { %v5786_v35 = vsub.f32 %v62_v5, %v134_v30  ;;  %v5788_v36 = vsub.f32 %v60_v6, %v132_v31  ;;  %v5863_v5 = vld [vmem:[%s9198_s0 + $0x78] sm:$0xff]  ;;  %v115_v6 = vsel %vm75_vm0, %v5858_v4, 0.0 }
  0x82   :  { %v5812_v49 = vsub.f32 %v64_v8, %v136_v45  ;;  %v121_v7 = vsel %vm75_vm0, %v5863_v5, 0.0  ;;  %v5872_v8 = vld [vmem:[%s9198_s0 + $0x60] sm:$0xff] }
  0x83   :  { %v166_v39 = vmul.f32 %v5786_v35, %v5786_v35  ;;  %v164_v41 = vmul.f32 %v5788_v36, %v5788_v36  ;;  %v112_v9 = vsel %vm75_vm0, %v5872_v8, 0.0 }
  0x84   :  { %v168_v55 = vmul.f32 %v5812_v49, %v5812_v49 }
  0x85   :  { %v188_v43 = vsel %vm75_vm0, %v166_v39, 0.0  ;;  %v182_v44 = vsel %vm75_vm0, %v164_v41, 0.0 }
  0x86   :  { %189 = vadd.xlane.f32.xlu2 %v188_v43  ;;  %98 = vadd.xlane.f32.xlu0 %v97_v40  ;;  %v194_v60 = vsel %vm75_vm0, %v168_v55, 0.0 }
  0x87   :  { %183 = vadd.xlane.f32.xlu1 %v182_v44  ;;  %v96_v53 = vpop.xlane.xlu2 %95 }
  0x88   :  { %v137_v54 = vmul.f32 %v5769_v20, %v96_v53 }
  0x8a   :  { %v5831_v58 = vsub.f32 %v65_v12, %v137_v54  ;;  %v5092_v12 = vld [vmem:[%s9202_s4 + $0x18] sm:$0xff] }
  0x8b   :  { %773 = vmatpush.bf16.msra.mxu1 %v5092_v12  ;;  %5125 = vmatpush.bf16.msrb.mxu2 %v5092_v12 }
  0x8c   :  { %v169_v62 = vmul.f32 %v5831_v58, %v5831_v58 }
  0x8e   :  { %192 = vadd.xlane.f32.xlu2 %v191_v50  ;;  %101 = vadd.xlane.f32.xlu0 %v100_v51  ;;  %v197_v1 = vsel %vm75_vm0, %v169_v62, 0.0 }
  0x8f   :  { %186 = vadd.xlane.f32.xlu1 %v185_v52  ;;  %774 = vmatpush.bf16.msra.mxu1 %v5091_v16 }
  0x90   :  { %5126 = vmatpush.bf16.msrb.mxu2 %v5091_v16 }
  0x96   :  { %110 = vadd.xlane.f32.xlu2 %v109_v59  ;;  %195 = vadd.xlane.f32.xlu0 %v194_v60 }
  0x97   :  { %104 = vadd.xlane.f32.xlu1 %v103_v61 }
  0x9e   :  { %198 = vadd.xlane.f32.xlu2 %v197_v1  ;;  %119 = vadd.xlane.f32.xlu0 %v118_v2 }
  0x9f   :  { %107 = vadd.xlane.f32.xlu1 %v106_v3 }
  0xa6   :  { %116 = vadd.xlane.f32.xlu2 %v115_v6 }
  0xa7   :  { %122 = vadd.xlane.f32.xlu1 %v121_v7 }
  0xaf   :  { %113 = vadd.xlane.f32.xlu1 %v112_v9 }
  0xf1   :  { %v181_v10 = vpop.xlane.xlu0 %180 }
  0xf2   :  { %v227_v13 = vmul.f32 %v181_v10, %v5769_v20 }
  0xf4   :  { %v243_v14 = vadd.f32 1e-05, %v227_v13 }
  0xf6   :  { %5279 = vrsqrt.f32 %v243_v14  ;;  %vm265_vm3 = vweird.f32 %v243_v14 }
  0xf9   :  { %v190_v17 = vpop.xlane.xlu2 %189  ;;  %v99_v18 = vpop.xlane.xlu0 %98 }
  0xfa   :  { %v230_v19 = vmul.f32 %v190_v17, %v5769_v20  ;;  %v184_v21 = vpop.xlane.xlu1 %183  ;;  %v138_v22 = vmul.f32 %v5769_v20, %v99_v18 }
  0xfb   :  { %v228_v23 = vmul.f32 %v184_v21, %v5769_v20 }
  0xfc   :  { %v5280_v24 = vpop.eup %5279  ;;  %v5892_v26 = vadd.f32 1e-05, %v230_v19  ;;  %v5895_v27 = vsub.f32 %v5784_v34, %v138_v22  ;;  %v5952_v22 = vld [vmem:[%s9203_s5 + $0x1] ss:$0 sm:$0xff] }
  0xfd   :  { %v260_v28 = vmul.f32 %v5280_v24, %v243_v14  ;;  %v244_v29 = vadd.f32 1e-05, %v228_v23  ;;  %vm266_vm2 = vweird.f32 %v5280_v24 }
  0xfe   :  { %5281 = vrsqrt.f32 %v5892_v26  ;;  %v170_v30 = vmul.f32 %v5895_v27, %v5895_v27  ;;  %vm5914_vm4 = vmor %vm265_vm3, %vm266_vm2  ;;  %vm295_vm8 = vweird.f32 %v5892_v26 }
  0xff   :  { %v261_v31 = vmul.f32 %v5280_v24, %v260_v28  ;;  %5283 = vrsqrt.f32 %v244_v29  ;;  %vm275_vm6 = vweird.f32 %v244_v29 }
 0x100   :  { %v200_v32 = vsel %vm75_vm0, %v170_v30, 0.0 }
 0x101   :  { %v262_v33 = vmul.f32 0.5, %v261_v31  ;;  %v193_v37 = vpop.xlane.xlu2 %192  ;;  %201 = vadd.xlane.f32.xlu0 %v200_v32  ;;  %v102_v39 = vpop.xlane.xlu0 %101 }
 0x102   :  { %v187_v40 = vpop.xlane.xlu1 %186  ;;  %v139_v34 = vmul.f32 %v5769_v20, %v102_v39  ;;  %v231_v51 = vmul.f32 %v193_v37, %v5769_v20 }
 0x103   :  { %v263_v41 = vsub.f32 1.5, %v262_v33  ;;  %v229_v43 = vmul.f32 %v187_v40, %v5769_v20 }
 0x104   :  { %v5903_v44 = vpop.eup %5281  ;;  %v5906_v45 = vsub.f32 %v5808_v47, %v139_v34  ;;  %v5923_v61 = vadd.f32 1e-05, %v231_v51 }
 0x105   :  { %v5284_v46 = vpop.eup %5283  ;;  %v264_v48 = vmul.f32 %v5280_v24, %v263_v41  ;;  %v290_v50 = vmul.f32 %v5903_v44, %v5892_v26  ;;  %v5911_v52 = vadd.f32 1e-05, %v229_v43  ;;  %vm296_vm9 = vweird.f32 %v5903_v44 }
 0x106   :  { %v270_v53 = vmul.f32 %v5284_v46, %v244_v29  ;;  %v171_v47 = vmul.f32 %v5906_v45, %v5906_v45  ;;  %vm276_vm5 = vweird.f32 %v5284_v46  ;;  %vm5983_vm11 = vmor %vm295_vm8, %vm296_vm9  ;;  %vm305_vm1 = vweird.f32 %v5923_v61 }
 0x107   :  { %5285 = vrsqrt.f32 %v5911_v52  ;;  %v268_v59 = vsel %vm5914_vm4, %v5280_v24, %v264_v48  ;;  %v291_v60 = vmul.f32 %v5903_v44, %v290_v50  ;;  %vm277_vm7 = vmor %vm275_vm6, %vm276_vm5  ;;  %vm285_vm12 = vweird.f32 %v5911_v52 }
 0x108   :  { %v271_v55 = vmul.f32 %v5284_v46, %v270_v53  ;;  %v203_v7 = vsel %vm75_vm0, %v171_v47, 0.0  ;;  %v419_v12 = vmul.f32 %v268_v59, %v5772_v25  ;;  %5287 = vrsqrt.f32 %v5923_v61 }
 0x109   :  { %v111_v62 = vpop.xlane.xlu2 %110  ;;  %v196_v1 = vpop.xlane.xlu0 %195  ;;  %204 = vadd.xlane.f32.xlu0 %v203_v7  ;;  %v292_v16 = vmul.f32 0.5, %v291_v60 }
 0x10a   :  { %v272_v2 = vmul.f32 0.5, %v271_v55  ;;  %v142_v3 = vmul.f32 %v5769_v20, %v111_v62  ;;  %v105_v6 = vpop.xlane.xlu1 %104  ;;  %v232_v10 = vmul.f32 %v196_v1, %v5769_v20 }
 0x10b   :  { %v140_v9 = vmul.f32 %v5769_v20, %v105_v6  ;;  %v293_v28 = vsub.f32 1.5, %v292_v16 }
 0x10c   :  { %v273_v13 = vsub.f32 1.5, %v272_v2  ;;  %v5936_v14 = vsub.f32 %v5824_v56, %v142_v3  ;;  %v5943_v21 = vadd.f32 1e-05, %v232_v10 }
 0x10d   :  { %v5286_v15 = vpop.eup %5285  ;;  %v5940_v17 = vsub.f32 %v5829_v57, %v140_v9  ;;  %v439_v57 = vmul.f32 %v5932_v11, %v419_v12  ;;  %v294_v48 = vmul.f32 %v5903_v44, %v293_v28 }
 0x10e   :  { %v274_v18 = vmul.f32 %v5284_v46, %v273_v13  ;;  %v280_v19 = vmul.f32 %v5286_v15, %v5911_v52  ;;  %v174_v56 = vmul.f32 %v5936_v14, %v5936_v14  ;;  %5289 = vrsqrt.f32 %v5943_v21  ;;  %v5962_v40 = vpop.eup %5287 }
 0x10f   :  { %v172_v25 = vmul.f32 %v5940_v17, %v5940_v17  ;;  %v5969_v43 = vadd.f32 %v5952_v22, %v439_v57  ;;  %vm286_vm10 = vweird.f32 %v5286_v15  ;;  %v300_v47 = vmul.f32 %v5962_v40, %v5923_v61 }
 0x110   :  { %v278_v23 = vsel %vm277_vm7, %v5284_v46, %v274_v18  ;;  %v281_v24 = vmul.f32 %v5286_v15, %v280_v19  ;;  %v212_v39 = vsel %vm75_vm0, %v174_v56, 0.0  ;;  %vm5990_vm13 = vmor %vm285_vm12, %vm286_vm10  ;;  %v298_v52 = vsel %vm5983_vm11, %v5903_v44, %v294_v48 }
 0x111   :  { %v420_v29 = vmul.f32 %v278_v23, %v5788_v36  ;;  %v5957_v30 = vpop.xlane.xlu2 %198  ;;  %v206_v31 = vsel %vm75_vm0, %v172_v25, 0.0  ;;  %v120_v32 = vpop.xlane.xlu0 %119  ;;  %213 = vadd.xlane.f32.xlu0 %v212_v39  ;;  %9258 = vst [vmem:[#allocation5_spill] sm:$0xff] %v5969_v43  ;;  %v301_v6 = vmul.f32 %v5962_v40, %v300_v47  ;;  %v422_v18 = vmul.f32 %v298_v52, %v5786_v35 }
 0x112   :  { %v282_v33 = vmul.f32 0.5, %v281_v24  ;;  %207 = vadd.xlane.f32.xlu1 %v206_v31  ;;  %v108_v37 = vpop.xlane.xlu1 %107  ;;  %v145_v41 = vmul.f32 %v5769_v20, %v120_v32  ;;  %vm315_vm14 = vweird.f32 %v5943_v21  ;;  %vm306_vm2 = vweird.f32 %v5962_v40 }
 0x113   :  { %v440_v34 = vmul.f32 %v5932_v11, %v420_v29  ;;  %v141_v36 = vmul.f32 %v5769_v20, %v108_v37  ;;  %v302_v19 = vmul.f32 0.5, %v301_v6  ;;  %vm307_vm4 = vmor %vm305_vm1, %vm306_vm2 }
 0x114   :  { %v283_v46 = vsub.f32 1.5, %v282_v33  ;;  %v5979_v53 = vsub.f32 %v5843_v63, %v145_v41  ;;  %v5290_v54 = vpop.eup %5289 }
 0x115   :  { %v5973_v50 = vadd.f32 %v5952_v22, %v440_v34  ;;  %v5976_v51 = vsub.f32 %v5848_v0, %v141_v36  ;;  %v310_v63 = vmul.f32 %v5290_v54, %v5943_v21  ;;  %v303_v28 = vsub.f32 1.5, %v302_v19 }
 0x116   :  { %v284_v59 = vmul.f32 %v5286_v15, %v283_v46  ;;  %v177_v1 = vmul.f32 %v5979_v53, %v5979_v53  ;;  %vm316_vm15 = vweird.f32 %v5290_v54 }
 0x117   :  { %9259 = vst [vmem:[#allocation6_spill] sm:$0xff] %v5973_v50  ;;  %v5997_v0 = vpack.c.bf16 %v5973_v50, %v5969_v43  ;;  %v173_v62 = vmul.f32 %v5976_v51, %v5976_v51  ;;  %v311_v2 = vmul.f32 %v5290_v54, %v310_v63  ;;  %vm317_vm3 = vmor %vm315_vm14, %vm316_vm15  ;;  %v304_v37 = vmul.f32 %v5962_v40, %v303_v28 }
 0x118   :  { %v288_v26 = vsel %vm5990_vm13, %v5286_v15, %v284_v59  ;;  %v221_v12 = vsel %vm75_vm0, %v177_v1, 0.0 }
 0x119   :  { %4749 = vmatmul.msk.bf16.vlgmr.msra.gmra.mxu0 %vm75_vm0, %v5997_v0  ;;  %4766 = vmatmul.msk.bf16.vlgmr.msra.gmra.mxu1 %vm75_vm0, %v5997_v0  ;;  %v117_v3 = vpop.xlane.xlu2 %116  ;;  %v209_v9 = vsel %vm75_vm0, %v173_v62, 0.0  ;;  %v421_v13 = vmul.f32 %v288_v26, %v5798_v42  ;;  %v312_v15 = vmul.f32 0.5, %v311_v2  ;;  %v308_v36 = vsel %vm307_vm4, %v5962_v40, %v304_v37 }
 0x11a   :  { %v144_v7 = vmul.f32 %v5769_v20, %v117_v3  ;;  %v123_v10 = vpop.xlane.xlu1 %122  ;;  %210 = vadd.xlane.f32.xlu2 %v209_v9  ;;  %222 = vadd.xlane.f32.xlu1 %v221_v12  ;;  %v423_v46 = vmul.f32 %v308_v36, %v5790_v38  ;;  %v5147_v38 = vpack.i.bf16 %v5973_v50, %v5969_v43 }
 0x11b   :  { %v146_v44 = vmul.f32 %v5769_v20, %v123_v10  ;;  %v441_v57 = vmul.f32 %v5932_v11, %v421_v13  ;;  %v313_v42 = vsub.f32 1.5, %v312_v15 }
 0x11c   :  { %v6019_v16 = vsub.f32 %v5858_v4, %v144_v7  ;;  %v442_v4 = vmul.f32 %v5932_v11, %v422_v18  ;;  %v443_v55 = vmul.f32 %v5932_v11, %v423_v46 }
 0x11d   :  { %v6023_v25 = vsub.f32 %v5863_v5, %v146_v44  ;;  %v6035_v29 = vadd.f32 %v5952_v22, %v441_v57  ;;  %v314_v32 = vmul.f32 %v5290_v54, %v313_v42 }
 0x11e   :  { %v176_v56 = vmul.f32 %v6019_v16, %v6019_v16  ;;  %v6041_v33 = vadd.f32 %v5952_v22, %v442_v4  ;;  %v6067_v47 = vadd.f32 %v5952_v22, %v443_v55 }
 0x11f   :  { %v178_v23 = vmul.f32 %v6023_v25, %v6023_v25  ;;  %9264 = vst [vmem:[#allocation7_spill] sm:$0xff] %v6035_v29  ;;  %v318_v34 = vsel %vm317_vm3, %v5290_v54, %v314_v32 }
 0x120   :  { %v218_v24 = vsel %vm75_vm0, %v176_v56, 0.0  ;;  %9265 = vst [vmem:[#allocation8_spill] sm:$0xff] %v6041_v33  ;;  %v6049_v39 = vpack.c.bf16 %v6041_v33, %v6035_v29  ;;  %v424_v41 = vmul.f32 %v318_v34, %v5812_v49  ;;  %v233_v49 = vmul.f32 %v5957_v30, %v5769_v20 }
 0x121   :  { %v224_v35 = vsel %vm75_vm0, %v178_v23, 0.0 }
 0x122   :  { %v114_v5 = vpop.xlane.xlu1 %113  ;;  %225 = vadd.xlane.f32.xlu2 %v224_v35  ;;  %219 = vadd.xlane.f32.xlu1 %v218_v24  ;;  %v444_v48 = vmul.f32 %v5932_v11, %v424_v41  ;;  %v249_v40 = vadd.f32 1e-05, %v233_v49 }
 0x123   :  { %v143_v31 = vmul.f32 %v5769_v20, %v114_v5 }
 0x124   :  { %v6064_v54 = vadd.f32 %v5952_v22, %v444_v48  ;;  %5291 = vrsqrt.f32 %v249_v40  ;;  %vm325_vm5 = vweird.f32 %v249_v40 }
 0x125   :  { %v6044_v21 = vsub.f32 %v5872_v8, %v143_v31 }
 0x126   :  { %v6071_v59 = vpack.c.bf16 %v6064_v54, %v6067_v47 }
 0x127   :  { %v175_v61 = vmul.f32 %v6044_v21, %v6044_v21 }
 0x129   :  { %4750 = vmatmul.msk.bf16.gmra.mxu0 %vm75_vm0, %v6049_v39  ;;  %4767 = vmatmul.msk.bf16.gmra.mxu1 %vm75_vm0, %v6049_v39  ;;  %v215_v8 = vsel %vm75_vm0, %v175_v61, 0.0 }
 0x12a   :  { %216 = vadd.xlane.f32.xlu0 %v215_v8  ;;  %v5292_v60 = vpop.eup %5291 }
 0x12b   :  { %v320_v63 = vmul.f32 %v5292_v60, %v249_v40  ;;  %vm326_vm6 = vweird.f32 %v5292_v60 }
 0x12c   :  { %vm327_vm7 = vmor %vm325_vm5, %vm326_vm6 }
 0x12d   :  { %v321_v62 = vmul.f32 %v5292_v60, %v320_v63 }
 0x12f   :  { %v322_v2 = vmul.f32 0.5, %v321_v62 }
 0x131   :  { %v323_v3 = vsub.f32 1.5, %v322_v2 }
 0x133   :  { %v324_v30 = vmul.f32 %v5292_v60, %v323_v3 }
 0x135   :  { %v328_v15 = vsel %vm327_vm7, %v5292_v60, %v324_v30 }
 0x136   :  { %v425_v23 = vmul.f32 %v328_v15, %v5831_v58 }
 0x138   :  { %v445_v37 = vmul.f32 %v5932_v11, %v425_v23 }
 0x139   :  { %4751 = vmatmul.msk.bf16.gmra.mxu0 %vm75_vm0, %v6071_v59  ;;  %4768 = vmatmul.msk.bf16.gmra.mxu1 %vm75_vm0, %v6071_v59 }
 0x13e   :  { %5148 = vrot.lane.b32.xlu0 %v5147_v38, %s5695_s21 }
 0x174   :  { %v202_v26 = vpop.xlane.xlu0 %201 }
 0x175   :  { %v234_v1 = vmul.f32 %v202_v26, %v5769_v20 }
 0x177   :  { %v250_v52 = vadd.f32 1e-05, %v234_v1 }
 0x179   :  { %5293 = vrsqrt.f32 %v250_v52  ;;  %vm335_vm9 = vweird.f32 %v250_v52 }
 0x17c   :  { %v205_v6 = vpop.xlane.xlu0 %204 }
 0x17d   :  { %v235_v9 = vmul.f32 %v205_v6, %v5769_v20 }
 0x17f   :  { %v5294_v7 = vpop.eup %5293  ;;  %v251_v12 = vadd.f32 1e-05, %v235_v9 }
 0x180   :  { %v330_v10 = vmul.f32 %v5294_v7, %v250_v52  ;;  %vm336_vm8 = vweird.f32 %v5294_v7 }
 0x181   :  { %5295 = vrsqrt.f32 %v251_v12  ;;  %vm337_vm10 = vmor %vm335_vm9, %vm336_vm8  ;;  %vm345_vm11 = vweird.f32 %v251_v12 }
 0x182   :  { %v331_v13 = vmul.f32 %v5294_v7, %v330_v10 }
 0x184   :  { %v332_v44 = vmul.f32 0.5, %v331_v13  ;;  %v214_v57 = vpop.xlane.xlu0 %213 }
 0x185   :  { %v208_v18 = vpop.xlane.xlu1 %207  ;;  %v238_v42 = vmul.f32 %v214_v57, %v5769_v20 }
 0x186   :  { %v333_v19 = vsub.f32 1.5, %v332_v44  ;;  %v236_v56 = vmul.f32 %v208_v18, %v5769_v20 }
 0x187   :  { %v5296_v28 = vpop.eup %5295  ;;  %v6087_v35 = vadd.f32 1e-05, %v238_v42 }
 0x188   :  { %v334_v24 = vmul.f32 %v5294_v7, %v333_v19  ;;  %v252_v4 = vadd.f32 1e-05, %v236_v56  ;;  %v340_v31 = vmul.f32 %v5296_v28, %v251_v12  ;;  %vm346_vm12 = vweird.f32 %v5296_v28 }
 0x189   :  { %vm347_vm13 = vmor %vm345_vm11, %vm346_vm12  ;;  %vm375_vm2 = vweird.f32 %v6087_v35 }
 0x18a   :  { %v338_v5 = vsel %vm337_vm10, %v5294_v7, %v334_v24  ;;  %5297 = vrsqrt.f32 %v252_v4  ;;  %v341_v61 = vmul.f32 %v5296_v28, %v340_v31  ;;  %vm355_vm15 = vweird.f32 %v252_v4 }
 0x18b   :  { %v426_v32 = vmul.f32 %v338_v5, %v5895_v27  ;;  %5299 = vrsqrt.f32 %v6087_v35  ;;  %v6099_v27 = vadd.f32 %v5952_v22, %v445_v37 }
 0x18c   :  { %v342_v58 = vmul.f32 0.5, %v341_v61 }
 0x18d   :  { %v446_v34 = vmul.f32 %v5932_v11, %v426_v32  ;;  %v211_v8 = vpop.xlane.xlu2 %210  ;;  %v223_v36 = vpop.xlane.xlu1 %222 }
 0x18e   :  { %v237_v46 = vmul.f32 %v211_v8, %v5769_v20  ;;  %v241_v48 = vmul.f32 %v223_v36, %v5769_v20  ;;  %v343_v38 = vsub.f32 1.5, %v342_v58 }
 0x18f   :  { %v6094_v41 = vadd.f32 %v5952_v22, %v446_v34 }
 0x190   :  { %v5298_v55 = vpop.eup %5297  ;;  %v253_v60 = vadd.f32 1e-05, %v237_v46  ;;  %v6103_v63 = vadd.f32 1e-05, %v241_v48  ;;  %v344_v26 = vmul.f32 %v5296_v28, %v343_v38 }
 0x191   :  { %v6101_v49 = vpop.eup %5299  ;;  %v350_v40 = vmul.f32 %v5298_v55, %v252_v4  ;;  %v6109_v1 = vpack.c.bf16 %v6094_v41, %v6099_v27  ;;  %vm356_vm14 = vweird.f32 %v5298_v55 }
 0x192   :  { %v370_v62 = vmul.f32 %v6101_v49, %v6087_v35  ;;  %5301 = vrsqrt.f32 %v253_v60  ;;  %v348_v3 = vsel %vm347_vm13, %v5296_v28, %v344_v26  ;;  %vm357_vm1 = vmor %vm355_vm15, %vm356_vm14  ;;  %vm376_vm3 = vweird.f32 %v6101_v49 }
 0x193   :  { %v351_v52 = vmul.f32 %v5298_v55, %v350_v40  ;;  %5303 = vrsqrt.f32 %v6103_v63  ;;  %4752 = vmatmul.msk.bf16.gmra.mxu0 %vm75_vm0, %v6109_v1  ;;  %4769 = vmatmul.msk.bf16.gmra.mxu1 %vm75_vm0, %v6109_v1  ;;  %v427_v44 = vmul.f32 %v348_v3, %v5906_v45  ;;  %vm365_vm4 = vweird.f32 %v253_v60  ;;  %vm6141_vm8 = vmor %vm375_vm2, %vm376_vm3 }
 0x194   :  { %v371_v6 = vmul.f32 %v6101_v49, %v370_v62  ;;  %vm405_vm6 = vweird.f32 %v6103_v63 }
 0x195   :  { %v352_v2 = vmul.f32 0.5, %v351_v52  ;;  %v226_v7 = vpop.xlane.xlu2 %225  ;;  %v220_v9 = vpop.xlane.xlu1 %219  ;;  %v447_v5 = vmul.f32 %v5932_v11, %v427_v44 }
 0x196   :  { %v242_v30 = vmul.f32 %v226_v7, %v5769_v20  ;;  %v240_v12 = vmul.f32 %v220_v9, %v5769_v20  ;;  %v372_v57 = vmul.f32 0.5, %v371_v6 }
 0x197   :  { %v353_v10 = vsub.f32 1.5, %v352_v2  ;;  %v6135_v48 = vadd.f32 %v5952_v22, %v447_v5 }
 0x198   :  { %v5302_v13 = vpop.eup %5301  ;;  %v258_v18 = vadd.f32 1e-05, %v242_v30  ;;  %v6120_v19 = vadd.f32 1e-05, %v240_v12  ;;  %v373_v37 = vsub.f32 1.5, %v372_v57 }
 0x199   :  { %v354_v15 = vmul.f32 %v5298_v55, %v353_v10  ;;  %v5304_v56 = vpop.eup %5303  ;;  %v360_v42 = vmul.f32 %v5302_v13, %v253_v60  ;;  %vm366_vm5 = vweird.f32 %v5302_v13  ;;  %9267 = vst [vmem:[#allocation10_spill] sm:$0xff] %v6135_v48 }
 0x19a   :  { %v400_v24 = vmul.f32 %v5304_v56, %v6103_v63  ;;  %5305 = vrsqrt.f32 %v258_v18  ;;  %vm406_vm7 = vweird.f32 %v5304_v56  ;;  %v374_v38 = vmul.f32 %v6101_v49, %v373_v37  ;;  %vm6146_vm9 = vmor %vm365_vm4, %vm366_vm5 }
 0x19b   :  { %v358_v23 = vsel %vm357_vm1, %v5298_v55, %v354_v15  ;;  %v361_v4 = vmul.f32 %v5302_v13, %v360_v42  ;;  %5307 = vrsqrt.f32 %v6120_v19  ;;  %vm6152_vm10 = vmor %vm405_vm6, %vm406_vm7  ;;  %vm415_vm11 = vweird.f32 %v258_v18 }
 0x19c   :  { %v428_v28 = vmul.f32 %v358_v23, %v5940_v17  ;;  %v401_v45 = vmul.f32 %v5304_v56, %v400_v24  ;;  %v378_v63 = vsel %vm6141_vm8, %v6101_v49, %v374_v38  ;;  %vm395_vm14 = vweird.f32 %v6120_v19 }
 0x19d   :  { %v217_v31 = vpop.xlane.xlu0 %216  ;;  %v362_v61 = vmul.f32 0.5, %v361_v4  ;;  %v430_v15 = vmul.f32 %v378_v63, %v5936_v14  ;;  %vm1170_vm5 = vcmask 523264   ;;  %vm1248_vm6 = vcmask 785408  }
 0x19e   :  { %v448_v32 = vmul.f32 %v5932_v11, %v428_v28  ;;  %v239_v34 = vmul.f32 %v217_v31, %v5769_v20  ;;  %v402_v17 = vmul.f32 0.5, %v401_v45  ;;  %vm2476_vm7 = vcmask 1041409  }
 0x19f   :  { %v363_v8 = vsub.f32 1.5, %v362_v61  ;;  %v450_v4 = vmul.f32 %v5932_v11, %v430_v15  ;;  %vm2479_vm8 = vcmask 1042434  }
 0x1a0   :  { %v6132_v58 = vadd.f32 %v5952_v22, %v448_v32  ;;  %v255_v36 = vadd.f32 1e-05, %v239_v34  ;;  %v5306_v46 = vpop.eup %5305  ;;  %v403_v55 = vsub.f32 1.5, %v402_v17 }
 0x1a1   :  { %v364_v40 = vmul.f32 %v5302_v13, %v363_v8  ;;  %v410_v26 = vmul.f32 %v5306_v46, %v258_v18  ;;  %v5308_v62 = vpop.eup %5307  ;;  %vm416_vm12 = vweird.f32 %v5306_v46  ;;  %v6185_v32 = vadd.f32 %v5952_v22, %v450_v4 }
 0x1a2   :  { %9266 = vst [vmem:[#allocation9_spill] sm:$0xff] %v6132_v58  ;;  %5309 = vrsqrt.f32 %v255_v36  ;;  %v404_v52 = vmul.f32 %v5304_v56, %v403_v55  ;;  %v6158_v2 = vpack.c.bf16 %v6132_v58, %v6135_v48  ;;  %v390_v7 = vmul.f32 %v5308_v62, %v6120_v19  ;;  %vm417_vm13 = vmor %vm415_vm11, %vm416_vm12 }
 0x1a3   :  { %v368_v3 = vsel %vm6146_vm9, %v5302_v13, %v364_v40  ;;  %v411_v6 = vmul.f32 %v5306_v46, %v410_v26  ;;  %vm396_vm15 = vweird.f32 %v5308_v62  ;;  %vm385_vm1 = vweird.f32 %v255_v36  ;;  %9275 = vst [vmem:[#allocation12_spill] sm:$0xff] %v6185_v32 }
 0x1a4   :  { %4753 = vmatmul.msk.bf16.gmra.mxu0 %vm75_vm0, %v6158_v2  ;;  %4770 = vmatmul.msk.bf16.gmra.mxu1 %vm75_vm0, %v6158_v2  ;;  %v408_v9 = vsel %vm6152_vm10, %v5304_v56, %v404_v52  ;;  %v391_v30 = vmul.f32 %v5308_v62, %v390_v7  ;;  %v429_v12 = vmul.f32 %v368_v3, %v5976_v51  ;;  %vm397_vm3 = vmor %vm395_vm14, %vm396_vm15  ;;  %vm2482_vm9 = vcmask 1043459  }
 0x1a5   :  { %v412_v10 = vmul.f32 0.5, %v411_v6  ;;  %v433_v57 = vmul.f32 %v408_v9, %v5979_v53  ;;  %vm2485_vm10 = vcmask 1044484   ;;  %vm2488_vm11 = vcmask 1045509  }
 0x1a6   :  { %v392_v24 = vmul.f32 0.5, %v391_v30  ;;  %v449_v49 = vmul.f32 %v5932_v11, %v429_v12  ;;  %vm2491_vm12 = vcmask 1046534  }
 0x1a7   :  { %v413_v44 = vsub.f32 1.5, %v412_v10  ;;  %v453_v51 = vmul.f32 %v5932_v11, %v433_v57 }
 0x1a8   :  { %v5310_v13 = vpop.eup %5309  ;;  %v393_v45 = vsub.f32 1.5, %v392_v24  ;;  %v6181_v14 = vadd.f32 %v5952_v22, %v449_v49  ;;  %v5266_v24 = vld [vmem:[%s9203_s5 + $0x2] ss:$0 sm:$0xff] }
 0x1a9   :  { %v380_v42 = vmul.f32 %v5310_v13, %v255_v36  ;;  %v414_v23 = vmul.f32 %v5306_v46, %v413_v44  ;;  %vm386_vm2 = vweird.f32 %v5310_v13  ;;  %v6188_v37 = vadd.f32 %v5952_v22, %v453_v51 }
 0x1aa   :  { %9274 = vst [vmem:[#allocation11_spill] sm:$0xff] %v6181_v14  ;;  %v394_v19 = vmul.f32 %v5308_v62, %v393_v45  ;;  %vm387_vm4 = vmor %vm385_vm1, %vm386_vm2  ;;  %v6195_v34 = vpack.c.bf16 %v6185_v32, %v6181_v14 }
 0x1ab   :  { %v381_v28 = vmul.f32 %v5310_v13, %v380_v42  ;;  %v418_v56 = vsel %vm417_vm13, %v5306_v46, %v414_v23  ;;  %9276 = vst [vmem:[#allocation13_spill] sm:$0xff] %v6188_v37  ;;  %vm9240_vm13 = vcmask 1047559  }
 0x1ac   :  { %v434_v5 = vmul.f32 %v418_v56, %v6023_v25  ;;  %v398_v36 = vsel %vm397_vm3, %v5308_v62, %v394_v19 }
 0x1ad   :  { %v382_v18 = vmul.f32 0.5, %v381_v28  ;;  %v432_v20 = vmul.f32 %v398_v36, %v6019_v16 }
 0x1ae   :  { %v454_v53 = vmul.f32 %v5932_v11, %v434_v5 }
 0x1af   :  { %v383_v31 = vsub.f32 1.5, %v382_v18  ;;  %v452_v38 = vmul.f32 %v5932_v11, %v432_v20 }
 0x1b0   :  { %v6191_v25 = vadd.f32 %v5952_v22, %v454_v53 }
 0x1b1   :  { %v384_v61 = vmul.f32 %v5310_v13, %v383_v31  ;;  %v6215_v60 = vadd.f32 %v5952_v22, %v452_v38 }
 0x1b2   :  { %9277 = vst [vmem:[#allocation14_spill] sm:$0xff] %v6191_v25  ;;  %v6199_v17 = vpack.c.bf16 %v6191_v25, %v6188_v37 }
 0x1b3   :  { %v388_v8 = vsel %vm387_vm4, %v5310_v13, %v384_v61  ;;  %9279 = vst [vmem:[#allocation16_spill] sm:$0xff] %v6215_v60 }
 0x1b4   :  { %4754 = vmatmul.msk.bf16.gmra.mxu0 %vm75_vm0, %v6195_v34  ;;  %4756 = vmatmul.msk.bf16.vlgmr.msra.gmra.mxu2 %vm75_vm0, %v6199_v17  ;;  %v431_v46 = vmul.f32 %v388_v8, %v6044_v21 }
 0x1b5   :  { %4771 = vmatmul.msk.bf16.gmra.mxu1 %vm75_vm0, %v6195_v34 }
 0x1b6   :  { %v451_v55 = vmul.f32 %v5932_v11, %v431_v46  ;;  %v6227_v11 = vpop.f32.mrf.mxu0 }
 0x1b8   :  { %v6212_v40 = vadd.f32 %v5952_v22, %v451_v55  ;;  %v6229_v22 = vpop.f32.mrf.mxu1 }
 0x1ba   :  { %9278 = vst [vmem:[#allocation15_spill] sm:$0xff] %v6212_v40  ;;  %v6219_v26 = vpack.c.bf16 %v6215_v60, %v6212_v40 }
 0x1be   :  { %v708_v16 = vpop.f32.mrf.mxu0 }
 0x1c0   :  { %v6231_v35 = vpop.f32.mrf.mxu1 }
 0x1c4   :  { %4755 = vmatmul.msk.bf16.gmra.mxu0 %vm75_vm0, %v6219_v26  ;;  %4772 = vmatmul.msk.bf16.vlgmr.msrb.gmra.mxu2 %vm75_vm0, %v6219_v26 }
 0x1c6   :  { %v711_v21 = vpop.f32.mrf.mxu0 }
 0x1c8   :  { %v6233_v6 = vpop.f32.mrf.mxu1 }
 0x1ce   :  { %v713_v62 = vpop.f32.mrf.mxu0 }
 0x1d0   :  { %v6235_v63 = vpop.f32.mrf.mxu1 }
 0x1d4   :  { %4773 = vmatmul.msk.bf16.gmra.mxu2 %vm75_vm0, %v6199_v17 }
 0x1d6   :  { %v716_v52 = vpop.f32.mrf.mxu0 }
 0x1d8   :  { %v6237_v10 = vpop.f32.mrf.mxu1 }
 0x1de   :  { %v718_v3 = vpop.f32.mrf.mxu0 }
 0x1e0   :  { %v6239_v12 = vpop.f32.mrf.mxu1 }
 0x210   :  { %v721_v7 = vpop.f32.mrf.mxu0  ;;  %v6241_v44 = vpop.f32.mrf.mxu1 }
 0x211   :  { %v722_v50 = vadd.f32 %v5266_v24, %v721_v7 }
 0x218   :  { %v723_v9 = vpop.f32.mrf.mxu0  ;;  %v6243_v23 = vpop.f32.mrf.mxu1 }
 0x221   :  { %v726_v30 = vpop.f32.mrf.mxu0  ;;  %v796_v5 = vpop.f32.mrf.mxu1 }
 0x222   :  { %v727_v38 = vadd.f32 %v5266_v24, %v726_v30 }
 0x229   :  { %v728_v13 = vpop.f32.mrf.mxu0  ;;  %v798_v36 = vpop.f32.mrf.mxu1 }
 0x22a   :  { %v729_v20 = vadd.f32 %v5266_v24, %v728_v13  ;;  %v712_v13 = vadd.f32 %v5266_v24, %v711_v21 }
 0x231   :  { %v731_v15 = vpop.f32.mrf.mxu0 }
 0x232   :  { %v732_v8 = vadd.f32 %v5266_v24, %v731_v15  ;;  %v801_v43 = vpop.f32.mrf.mxu1  ;;  %v5267_v15 = vld [vmem:[%s9203_s5 + $0x3] ss:$0 sm:$0xff] }
 0x237   :  { %v741_v57 = vpop.f32.mrf.mxu2 }
 0x238   :  { %v742_v28 = vadd.f32 %v5266_v24, %v741_v57  ;;  %v724_v57 = vadd.f32 %v5266_v24, %v723_v9 }
 0x239   :  { %v733_v42 = vpop.f32.mrf.mxu0 }
 0x23a   :  { %v734_v61 = vadd.f32 %v5266_v24, %v733_v42  ;;  %v714_v42 = vadd.f32 %v5266_v24, %v713_v62 }
 0x23c   :  { %v821_v55 = vpack.c.bf16 %v734_v61, %v732_v8  ;;  %v817_v9 = vpack.c.bf16 %v714_v42, %v712_v13  ;;  %v707_v61 = vadd.f32 %v5266_v24, %v6227_v11  ;;  %v5073_v8 = vld [vmem:[%s9199_s1] sm:$0xff]  ;;  %v5086_v42 = vld [vmem:[%s9200_s2 + $0x28] sm:$0xff] }
 0x23d   :  { %v5109_v13 = vld [vmem:[%s9202_s4 + $0xa0] sm:$0xff] }
 0x23f   :  { %v743_v49 = vpop.f32.mrf.mxu2 }
 0x240   :  { %v744_v56 = vadd.f32 %v5266_v24, %v743_v49  ;;  %v820_v49 = vpack.c.bf16 %v729_v20, %v727_v38  ;;  %v792_v38 = vadd.f32 %v5267_v15, %v6241_v44  ;;  %v779_v44 = vadd.f32 %v5267_v15, %v6231_v35  ;;  %v5084_v35 = vld [vmem:[%s9200_s2 + $0x18] sm:$0xff] }
 0x241   :  { %v736_v4 = vpop.f32.mrf.mxu0 }
 0x242   :  { %v823_v51 = vpack.c.bf16 %v744_v56, %v742_v28  ;;  %v737_v53 = vadd.f32 %v5266_v24, %v736_v4  ;;  %v719_v56 = vadd.f32 %v5266_v24, %v718_v3  ;;  %v717_v4 = vadd.f32 %v5266_v24, %v716_v52  ;;  %v803_v52 = vpop.f32.mrf.mxu1 }
 0x243   :  { %v804_v21 = vadd.f32 %v5267_v15, %v803_v52 }
 0x244   :  { %872 = vmatpush.bf16.msra.mxu2 %v823_v51  ;;  %v819_v51 = vpack.c.bf16 %v724_v57, %v722_v50  ;;  %v789_v57 = vadd.f32 %v5267_v15, %v6239_v12 }
 0x247   :  { %v806_v18 = vpop.f32.mrf.mxu2 }
 0x248   :  { %v807_v62 = vadd.f32 %v5267_v15, %v806_v18 }
 0x249   :  { %v738_v45 = vpop.f32.mrf.mxu0 }
 0x24a   :  { %v739_v31 = vadd.f32 %v5266_v24, %v738_v45  ;;  %v818_v45 = vpack.c.bf16 %v719_v56, %v717_v4  ;;  %v777_v56 = vadd.f32 %v5267_v15, %v6229_v22  ;;  %v5076_v22 = vld [vmem:[%s9199_s1 + $0x18] sm:$0xff]  ;;  %v5077_v4 = vld [vmem:[%s9199_s1 + $0x20] sm:$0xff] }
 0x24c   :  { %v822_v19 = vpack.c.bf16 %v739_v31, %v737_v53  ;;  %v709_v53 = vadd.f32 %v5266_v24, %v708_v16  ;;  %v802_v16 = vadd.f32 %v5267_v15, %v801_v43  ;;  %v797_v24 = vadd.f32 %v5267_v15, %v796_v5 }
 0x24d   :  { %v787_v43 = vadd.f32 %v5267_v15, %v6237_v10  ;;  %v784_v5 = vadd.f32 %v5267_v15, %v6235_v63  ;;  %v921_v10 = vpack.c.bf16 %v779_v44, %v777_v56  ;;  %v5085_v63 = vld [vmem:[%s9200_s2 + $0x20] sm:$0xff] }
 0x24e   :  { %873 = vmatpush.bf16.msra.mxu2 %v822_v19  ;;  %v816_v19 = vpack.c.bf16 %v709_v53, %v707_v61  ;;  %v926_v11 = vpack.c.bf16 %v804_v21, %v802_v16  ;;  %v5079_v53 = vld [vmem:[%s9199_s1 + $0x30] sm:$0xff]  ;;  %v5177_v16 = vpack.i.bf16 %v6094_v41, %v6099_v27 }
 0x24f   :  { %v808_v46 = vpop.f32.mrf.mxu2 }
 0x250   :  { %v809_v3 = vadd.f32 %v5267_v15, %v808_v46  ;;  %v794_v46 = vadd.f32 %v5267_v15, %v6243_v23  ;;  %v782_v23 = vadd.f32 %v5267_v15, %v6233_v6  ;;  %v5075_v6 = vld [vmem:[%s9199_s1 + $0x10] sm:$0xff] }
 0x252   :  { %874 = vmatpush.bf16.msra.mxu2 %v821_v55  ;;  %v927_v20 = vpack.c.bf16 %v809_v3, %v807_v62  ;;  %v799_v55 = vadd.f32 %v5267_v15, %v798_v36  ;;  %v5074_v36 = vld [vmem:[%s9199_s1 + $0x8] sm:$0xff]  ;;  %v922_v12 = vpack.c.bf16 %v784_v5, %v782_v23  ;;  %v476_v23 = vld [vmem:[%s9201_s3] sm:$0xff] }
 0x254   :  { %v925_v18 = vpack.c.bf16 %v799_v55, %v797_v24 }
 0x256   :  { %875 = vmatpush.bf16.msra.mxu2 %v820_v49  ;;  %v924_v49 = vpack.c.bf16 %v794_v46, %v792_v38  ;;  %v5697_v38 = vmov 0  }
 0x257   :  { %v811_v28 = vpop.f32.mrf.mxu2  ;;  %5222 = vset.pattern.permute.xlu0 %v5697_v38  ;;  %5223 = vset.pattern.permute.xlu2 %v5697_v38  ;;  %v5101_v38 = vld [vmem:[%s9202_s4 + $0x60] sm:$0xff] }
 0x258   :  { %v812_v31 = vadd.f32 %v5267_v15, %v811_v28  ;;  %v923_v28 = vpack.c.bf16 %v789_v57, %v787_v43 }
 0x25a   :  { %876 = vmatpush.bf16.msra.mxu2 %v819_v51  ;;  %v5083_v51 = vld [vmem:[%s9200_s2 + $0x10] sm:$0xff] }
 0x25e   :  { %877 = vmatpush.bf16.msra.mxu2 %v818_v45  ;;  %v5078_v45 = vld [vmem:[%s9199_s1 + $0x28] sm:$0xff] }
 0x25f   :  { %v813_v30 = vpop.f32.mrf.mxu2 }
 0x260   :  { %v814_v7 = vadd.f32 %v5267_v15, %v813_v30  ;;  %v5110_v15 = vld [vmem:[%s9202_s4 + $0xa8] sm:$0xff]  ;;  %v5087_v30 = vld [vmem:[%s9200_s2 + $0x30] sm:$0xff] }
 0x262   :  { %878 = vmatpush.bf16.msra.mxu2 %v817_v9  ;;  %v928_v50 = vpack.c.bf16 %v814_v7, %v812_v31  ;;  %v5088_v9 = vld [vmem:[%s9200_s2 + $0x38] sm:$0xff]  ;;  %v5081_v7 = vld [vmem:[%s9200_s2] sm:$0xff] }
 0x263   :  { %v5080_v31 = vld [vmem:[%s9199_s1 + $0x38] sm:$0xff]  ;;  %s5696_s1 = smov 32  }
 0x264   :  { %5127 = vmatpush.bf16.msra.mxu3 %v928_v50 }
 0x266   :  { %879 = vmatpush.bf16.msra.mxu2 %v816_v19 }
 0x268   :  { %5128 = vmatpush.bf16.msra.mxu3 %v927_v20 }
 0x269   :  { %880 = vmatmul.bf16.vlgmr.msra.gmra.mxu2 %v5073_v8 }
 0x26a   :  { %977 = vmatpush.bf16.msrb.mxu2 %v928_v50  ;;  %v5082_v50 = vld [vmem:[%s9200_s2 + $0x8] sm:$0xff] }
 0x26c   :  { %5129 = vmatpush.bf16.msra.mxu3 %v926_v11 }
 0x26e   :  { %978 = vmatpush.bf16.msrb.mxu2 %v927_v20 }
 0x270   :  { %5130 = vmatpush.bf16.msra.mxu3 %v925_v18 }
 0x272   :  { %979 = vmatpush.bf16.msrb.mxu2 %v926_v11 }
 0x274   :  { %5131 = vmatpush.bf16.msra.mxu3 %v924_v49 }
 0x276   :  { %980 = vmatpush.bf16.msrb.mxu2 %v925_v18 }
 0x278   :  { %5132 = vmatpush.bf16.msra.mxu3 %v923_v28 }
 0x279   :  { %885 = vmatmul.bf16.gmra.mxu2 %v5074_v36 }
 0x27a   :  { %981 = vmatpush.bf16.msrb.mxu2 %v924_v49 }
 0x27c   :  { %5133 = vmatpush.bf16.msra.mxu3 %v922_v12 }
 0x27e   :  { %982 = vmatpush.bf16.msrb.mxu2 %v923_v28  ;;  %v5207_v28 = vpack.i.bf16 %v6215_v60, %v6212_v40 }
 0x280   :  { %5134 = vmatpush.bf16.msra.mxu3 %v921_v10 }
 0x282   :  { %983 = vmatpush.bf16.msrb.mxu2 %v922_v12  ;;  %v5098_v12 = vld [vmem:[%s9202_s4 + $0x48] sm:$0xff] }
 0x283   :  { %995 = vmatmul.bf16.vlgmr.msra.gmra.mxu3 %v5083_v51  ;;  %1275 = vmatpush.bf16.msrb.mxu0 %v5098_v12  ;;  %v5097_v51 = vld [vmem:[%s9202_s4 + $0x40] sm:$0xff] }
 0x284   :  { %1569 = vmatpush.bf16.msrb.mxu3 %v5110_v15  ;;  %v5167_v15 = vpack.i.bf16 %v6064_v54, %v6067_v47  ;;  %v5105_v12 = vld [vmem:[%s9202_s4 + $0x80] sm:$0xff] }
 0x286   :  { %984 = vmatpush.bf16.msrb.mxu2 %v921_v10 }
 0x287   :  { %1276 = vmatpush.bf16.msrb.mxu0 %v5097_v51 }
 0x288   :  { %1570 = vmatpush.bf16.msrb.mxu3 %v5109_v13 }
 0x289   :  { %890 = vmatmul.bf16.gmra.mxu2 %v5075_v6 }
 0x293   :  { %1000 = vmatmul.bf16.gmra.mxu3 %v5084_v35 }
 0x299   :  { %895 = vmatmul.bf16.gmra.mxu2 %v5076_v22 }
 0x2a3   :  { %1005 = vmatmul.bf16.gmra.mxu3 %v5085_v63 }
 0x2a9   :  { %900 = vmatmul.bf16.gmra.mxu2 %v5077_v4  ;;  %v5157_v4 = vpack.i.bf16 %v6041_v33, %v6035_v29 }
 0x2b3   :  { %1010 = vmatmul.bf16.gmra.mxu3 %v5086_v42 }
 0x2b9   :  { %905 = vmatmul.bf16.gmra.mxu2 %v5078_v45 }
 0x2c3   :  { %1015 = vmatmul.bf16.gmra.mxu3 %v5087_v30  ;;  %v5096_v30 = vld [vmem:[%s9202_s4 + $0x38] sm:$0xff] }
 0x2c4   :  { %1277 = vmatpush.bf16.msrb.mxu0 %v5096_v30 }
 0x2c9   :  { %910 = vmatmul.bf16.gmra.mxu2 %v5079_v53  ;;  %v5103_v53 = vld [vmem:[%s9202_s4 + $0x70] sm:$0xff] }
 0x2d3   :  { %1020 = vmatmul.bf16.gmra.mxu3 %v5088_v9 }
 0x2d9   :  { %915 = vmatmul.bf16.gmra.mxu2 %v5080_v31 }
 0x2e3   :  { %4938 = vmatmul.msk.bf16.vlgmr.msrb.gmra.mxu3 %vm75_vm0, %v5997_v0 }
 0x2e9   :  { %985 = vmatmul.bf16.vlgmr.msrb.gmra.mxu2 %v5081_v7  ;;  %v5197_v7 = vpack.i.bf16 %v6185_v32, %v6181_v14 }
 0x2ec   :  { %v6313_v61 = vpop.f32.mrf.mxu2 }
 0x2f3   :  { %4939 = vmatmul.msk.bf16.gmra.mxu3 %vm75_vm0, %v6049_v39 }
 0x2f4   :  { %v6317_v3 = vpop.f32.mrf.mxu2 }
 0x2f9   :  { %990 = vmatmul.bf16.gmra.mxu2 %v5082_v50  ;;  %v5187_v50 = vpack.i.bf16 %v6132_v58, %v6135_v48 }
 0x2fc   :  { %v6322_v52 = vpop.f32.mrf.mxu2 }
 0x303   :  { %4940 = vmatmul.msk.bf16.gmra.mxu3 %vm75_vm0, %v6071_v59 }
 0x304   :  { %v6326_v0 = vpop.f32.mrf.mxu2 }
 0x306   :  { %v996_v19 = vpop.f32.mrf.mxu3 }
 0x30c   :  { %v6328_v62 = vpop.f32.mrf.mxu2 }
 0x30e   :  { %v998_v8 = vpop.f32.mrf.mxu3 }
 0x30f   :  { %v5162_v21 = vpack.i.bf16 %v998_v8, %v996_v19  ;;  %v5095_v19 = vld [vmem:[%s9202_s4 + $0x30] sm:$0xff] }
 0x310   :  { %1278 = vmatpush.bf16.msrb.mxu0 %v5095_v19 }
 0x311   :  { %5163 = vrot.lane.b32.xlu0 %v5162_v21, %s5696_s1 }
 0x313   :  { %4941 = vmatmul.msk.bf16.gmra.mxu3 %vm75_vm0, %v6109_v1 }
 0x314   :  { %v6333_v39 = vpop.f32.mrf.mxu2 }
 0x316   :  { %v1001_v20 = vpop.f32.mrf.mxu3 }
 0x319   :  { %5178 = vrot.lane.b32.xlu0 %v5177_v16, %s5695_s21  ;;  %v5102_v16 = vld [vmem:[%s9202_s4 + $0x68] sm:$0xff] }
 0x31c   :  { %v6338_v59 = vpop.f32.mrf.mxu2 }
 0x31e   :  { %v1003_v55 = vpop.f32.mrf.mxu3 }
 0x31f   :  { %v5172_v11 = vpack.i.bf16 %v1003_v55, %v1001_v20  ;;  %v477_v55 = vld [vmem:[%s9201_s3 + $0x8] sm:$0xff] }
 0x323   :  { %4942 = vmatmul.msk.bf16.gmra.mxu3 %vm75_vm0, %v6158_v2 }
 0x324   :  { %v6342_v24 = vpop.f32.mrf.mxu2 }
 0x326   :  { %v1006_v46 = vpop.f32.mrf.mxu3 }
 0x32c   :  { %v6344_v18 = vpop.f32.mrf.mxu2 }
 0x32e   :  { %v1008_v1 = vpop.f32.mrf.mxu3 }
 0x32f   :  { %v5182_v9 = vpack.i.bf16 %v1008_v1, %v1006_v46  ;;  %v5108_v46 = vld [vmem:[%s9202_s4 + $0x98] sm:$0xff]  ;;  %v5094_v1 = vld [vmem:[%s9202_s4 + $0x28] sm:$0xff] }
 0x330   :  { %1497 = vmatpush.bf16.msra.mxu2 %v5108_v46  ;;  %1279 = vmatpush.bf16.msrb.mxu0 %v5094_v1 }
 0x333   :  { %4943 = vmatmul.msk.bf16.gmra.mxu3 %vm75_vm0, %v6195_v34 }
 0x334   :  { %v6348_v57 = vpop.f32.mrf.mxu2 }
 0x336   :  { %v1011_v49 = vpop.f32.mrf.mxu3 }
 0x33c   :  { %v6350_v43 = vpop.f32.mrf.mxu2 }
 0x33e   :  { %v1013_v36 = vpop.f32.mrf.mxu3 }
 0x33f   :  { %v5192_v5 = vpack.i.bf16 %v1013_v36, %v1011_v49  ;;  %v5107_v49 = vld [vmem:[%s9202_s4 + $0x90] sm:$0xff]  ;;  %v5100_v36 = vld [vmem:[%s9202_s4 + $0x58] sm:$0xff] }
 0x340   :  { %1498 = vmatpush.bf16.msra.mxu2 %v5107_v49 }
 0x341   :  { %5193 = vrot.lane.b32.xlu0 %v5192_v5, %s5696_s1  ;;  %v5106_v5 = vld [vmem:[%s9202_s4 + $0x88] sm:$0xff] }
 0x343   :  { %4944 = vmatmul.msk.bf16.gmra.mxu3 %vm75_vm0, %v6219_v26 }
 0x344   :  { %v6355_v2 = vpop.f32.mrf.mxu2  ;;  %1499 = vmatpush.bf16.msra.mxu2 %v5106_v5 }
 0x346   :  { %v1016_v22 = vpop.f32.mrf.mxu3 }
 0x348   :  { %1500 = vmatpush.bf16.msra.mxu2 %v5105_v12 }
 0x349   :  { %5208 = vrot.lane.b32.xlu0 %v5207_v28, %s5695_s21  ;;  %v5093_v28 = vld [vmem:[%s9202_s4 + $0x20] sm:$0xff] }
 0x34a   :  { %1280 = vmatpush.bf16.msrb.mxu0 %v5093_v28 }
 0x34c   :  { %v6360_v34 = vpop.f32.mrf.mxu2 }
 0x34e   :  { %v1018_v13 = vpop.f32.mrf.mxu3 }
 0x34f   :  { %v5202_v21 = vpack.i.bf16 %v1018_v13, %v1016_v22 }
 0x351   :  { %592 = vperm.xlu0 %5222, %v476_v23   ;;  %v5099_v23 = vld [vmem:[%s9202_s4 + $0x50] sm:$0xff] }
 0x353   :  { %4945 = vmatmul.msk.bf16.gmra.mxu3 %vm75_vm0, %v6199_v17  ;;  %v5104_v17 = vld [vmem:[%s9202_s4 + $0x78] sm:$0xff] }
 0x354   :  { %v6367_v44 = vpop.f32.mrf.mxu2  ;;  %1377 = vmatpush.bf16.msrb.mxu1 %v5104_v17 }
 0x356   :  { %v1021_v31 = vpop.f32.mrf.mxu3 }
 0x358   :  { %1378 = vmatpush.bf16.msrb.mxu1 %v5103_v53 }
 0x35c   :  { %v6369_v26 = vpop.f32.mrf.mxu2  ;;  %1379 = vmatpush.bf16.msrb.mxu1 %v5102_v16  ;;  %v5112_v16 = vld [vmem:[%s9202_s4 + $0xb8] sm:$0xff] }
 0x35d   :  { %2375 = vmatpush.bf16.msra.mxu0 %v5112_v16 }
 0x35e   :  { %v1023_v8 = vpop.f32.mrf.mxu3 }
 0x35f   :  { %v5212_v20 = vpack.i.bf16 %v1023_v8, %v1021_v31 }
 0x360   :  { %1380 = vmatpush.bf16.msrb.mxu1 %v5101_v38 }
 0x364   :  { %v6374_v56 = vpop.f32.mrf.mxu2  ;;  %1381 = vmatpush.bf16.msrb.mxu1 %v5100_v36 }
 0x368   :  { %1382 = vmatpush.bf16.msrb.mxu1 %v5099_v23 }
 0x36c   :  { %v986_v10 = vpop.f32.mrf.mxu2 }
 0x374   :  { %v988_v6 = vpop.f32.mrf.mxu2 }
 0x375   :  { %v5142_v35 = vpack.i.bf16 %v988_v6, %v986_v10  ;;  %v5149_v10 = vpop.permute.xlu0 %5148 }
 0x376   :  { %v5151_v17 = vunpack.i.h.bf16 %v5149_v10  ;;  %v5150_v22 = vunpack.i.l.bf16 %v5149_v10 }
 0x377   :  { %5143 = vrot.lane.b32.xlu2 %v5142_v35, %s5696_s1 }
 0x37c   :  { %v991_v63 = vpop.f32.mrf.mxu2 }
 0x37f   :  { %5158 = vrot.lane.b32.xlu2 %v5157_v4, %s5695_s21 }
 0x384   :  { %v993_v42 = vpop.f32.mrf.mxu2 }
 0x385   :  { %v5152_v45 = vpack.i.bf16 %v993_v42, %v991_v63 }
 0x387   :  { %5168 = vrot.lane.b32.xlu2 %v5167_v15, %s5695_s21  ;;  %5153 = vrot.lane.b32.xlu1 %v5152_v45, %s5696_s1 }
 0x38f   :  { %5183 = vrot.lane.b32.xlu2 %v5182_v9, %s5696_s1  ;;  %5173 = vrot.lane.b32.xlu1 %v5172_v11, %s5696_s1  ;;  %v5217_v11 = vpack.i.bf16 %v6191_v25, %v6188_v37 }
 0x397   :  { %5198 = vrot.lane.b32.xlu2 %v5197_v7, %s5695_s21  ;;  %5188 = vrot.lane.b32.xlu1 %v5187_v50, %s5695_s21 }
 0x39f   :  { %5213 = vrot.lane.b32.xlu2 %v5212_v20, %s5696_s1  ;;  %5203 = vrot.lane.b32.xlu1 %v5202_v21, %s5696_s1 }
 0x3a7   :  { %596 = vperm.xlu2 %5223, %v477_v55   ;;  %5218 = vrot.lane.b32.xlu1 %v5217_v11, %s5695_s21 }
 0x3d1   :  { %v5144_v51 = vpop.permute.xlu2 %5143 }
 0x3d2   :  { %v5146_v6 = vunpack.i.h.bf16 %v5144_v51  ;;  %v5145_v35 = vunpack.i.l.bf16 %v5144_v51 }
 0x3d4   :  { %v1091_v63 = vsel %vm75_vm0, %v6317_v3, %v5146_v6  ;;  %v1090_v4 = vsel %vm75_vm0, %v6313_v61, %v5145_v35 }
 0x3d5   :  { %v1432_v42 = vpack.c.bf16 %v1091_v63, %v1090_v4  ;;  %v1171_v45 = vsel %vm1170_vm5, %v1090_v4, %v5150_v22  ;;  %v1172_v15 = vsel %vm1170_vm5, %v1091_v63, %v5151_v17  ;;  %v9280_v63 = vld [vmem:[#allocation5_spill] sm:$0xff] }
 0x3d6   :  { %v1199_v13 = vpack.c.bf16 %v1172_v15, %v1171_v45  ;;  %v478_v4 = vsel %vm75_vm0, %v9280_v63, 0.0 }
 0x3d7   :  { %4921 = vmatmul.msk.bf16.vlgmr.msra.gmra.mxu2 %vm1170_vm5, %v1432_v42  ;;  %v479_v15 = vrot.slane %v478_v4, 4 }
 0x3d8   :  { %4863 = vmatmul.msk.bf16.vlgmr.msrb.gmra.mxu0 %vm1248_vm6, %v1199_v13  ;;  %4896 = vmatmul.msk.bf16.vlgmr.msrb.gmra.mxu1 %vm1248_vm6, %v1199_v13 }
 0x3d9   :  { %v5159_v30 = vpop.permute.xlu2 %5158 }
 0x3da   :  { %v5161_v31 = vunpack.i.h.bf16 %v5159_v30  ;;  %v5160_v7 = vunpack.i.l.bf16 %v5159_v30  ;;  %v9281_v30 = vld [vmem:[#allocation6_spill] sm:$0xff] }
 0x3e1   :  { %v5169_v55 = vpop.permute.xlu2 %5168 }
 0x3e2   :  { %v5171_v1 = vunpack.i.h.bf16 %v5169_v55  ;;  %v5170_v38 = vunpack.i.l.bf16 %v5169_v55 }
 0x3f9   :  { %v5154_v53 = vpop.permute.xlu1 %5153 }
 0x3fa   :  { %v5156_v9 = vunpack.i.h.bf16 %v5154_v53  ;;  %v5155_v3 = vunpack.i.l.bf16 %v5154_v53  ;;  %v485_v53 = vsel %vm75_vm0, %v9281_v30, 0.0 }
 0x3fc   :  { %v1093_v61 = vsel %vm75_vm0, %v6326_v0, %v5156_v9  ;;  %v1092_v50 = vsel %vm75_vm0, %v6322_v52, %v5155_v3  ;;  %v5114_v52 = vld [vmem:[%s9202_s4 + $0xc8] sm:$0xff]  ;;  %v5164_v0 = vpop.permute.xlu0 %5163  ;;  %v486_v3 = vrot.slane %v485_v53, 4 }
 0x3fd   :  { %v1433_v19 = vpack.c.bf16 %v1093_v61, %v1092_v50  ;;  %v1173_v8 = vsel %vm1170_vm5, %v1092_v50, %v5160_v7  ;;  %v1174_v21 = vsel %vm1170_vm5, %v1093_v61, %v5161_v31  ;;  %2532 = vmatpush.bf16.msra.mxu1 %v5114_v52  ;;  %v5166_v11 = vunpack.i.h.bf16 %v5164_v0  ;;  %v5184_v61 = vpop.permute.xlu2 %5183 }
 0x3fe   :  { %v1200_v20 = vpack.c.bf16 %v1174_v21, %v1173_v8  ;;  %v5165_v46 = vunpack.i.l.bf16 %v5164_v0  ;;  %v499_v31 = vsel %vm75_vm0, %v6041_v33, 0.0  ;;  %v492_v7 = vsel %vm75_vm0, %v6035_v29, 0.0 }
 0x3ff   :  { %4922 = vmatmul.msk.bf16.gmra.mxu2 %vm1170_vm5, %v1433_v19  ;;  %v1095_v36 = vsel %vm75_vm0, %v6333_v39, %v5166_v11  ;;  %v487_v8 = vadd.f32 %v486_v3, %v485_v53  ;;  %v500_v21 = vrot.slane %v499_v31, 4  ;;  %v5186_v16 = vunpack.i.h.bf16 %v5184_v61 }
 0x400   :  { %4864 = vmatmul.msk.bf16.gmra.mxu0 %vm1248_vm6, %v1200_v20  ;;  %4897 = vmatmul.msk.bf16.gmra.mxu1 %vm1248_vm6, %v1200_v20  ;;  %v1094_v49 = vsel %vm75_vm0, %v6328_v62, %v5165_v46  ;;  %v1176_v28 = vsel %vm1170_vm5, %v1095_v36, %v5171_v1  ;;  %v493_v20 = vrot.slane %v492_v7, 4  ;;  %v5185_v52 = vunpack.i.l.bf16 %v5184_v61 }
 0x401   :  { %v1175_v5 = vsel %vm1170_vm5, %v1094_v49, %v5170_v38  ;;  %v1434_v23 = vpack.c.bf16 %v1095_v36, %v1094_v49  ;;  %v5174_v10 = vpop.permute.xlu1 %5173  ;;  %v506_v46 = vsel %vm75_vm0, %v6067_v47, 0.0  ;;  %v513_v1 = vsel %vm75_vm0, %v6064_v54, 0.0 }
 0x402   :  { %v1201_v12 = vpack.c.bf16 %v1176_v28, %v1175_v5  ;;  %v5176_v51 = vunpack.i.h.bf16 %v5174_v10  ;;  %v5175_v6 = vunpack.i.l.bf16 %v5174_v10  ;;  %v488_v38 = vrot.slane %v487_v8, 2 }
 0x403   :  { %v501_v49 = vadd.f32 %v500_v21, %v499_v31  ;;  %v520_v36 = vsel %vm75_vm0, %v6099_v27, 0.0  ;;  %v494_v28 = vadd.f32 %v493_v20, %v492_v7  ;;  %v507_v10 = vrot.slane %v506_v46, 4 }
 0x404   :  { %v5179_v35 = vpop.permute.xlu0 %5178  ;;  %v1097_v62 = vsel %vm75_vm0, %v6342_v24, %v5176_v51  ;;  %v1096_v39 = vsel %vm75_vm0, %v6338_v59, %v5175_v6  ;;  %v6489_v24 = vpop.f32.mrf.mxu3  ;;  %v480_v59 = vadd.f32 %v479_v15, %v478_v4  ;;  %v514_v51 = vrot.slane %v513_v1, 4 }
 0x405   :  { %v5181_v17 = vunpack.i.h.bf16 %v5179_v35  ;;  %v5180_v22 = vunpack.i.l.bf16 %v5179_v35  ;;  %v1435_v13 = vpack.c.bf16 %v1097_v62, %v1096_v39  ;;  %v502_v4 = vrot.slane %v501_v49, 2 }
 0x406   :  { %v481_v50 = vrot.slane %v480_v59, 2  ;;  %v541_v15 = vsel %vm75_vm0, %v6132_v58, 0.0  ;;  %v515_v3 = vadd.f32 %v514_v51, %v513_v1  ;;  %v555_v61 = vsel %vm75_vm0, %v6185_v32, 0.0 }
 0x407   :  { %v1177_v42 = vsel %vm1170_vm5, %v1096_v39, %v5180_v22  ;;  %v1178_v45 = vsel %vm1170_vm5, %v1097_v62, %v5181_v17  ;;  %v521_v17 = vrot.slane %v520_v36, 4  ;;  %v6513_v22 = vadd.f32 %v488_v38, %v487_v8 }
 0x408   :  { %v1202_v9 = vpack.c.bf16 %v1178_v45, %v1177_v42  ;;  %v482_v11 = vadd.f32 %v481_v50, %v480_v59  ;;  %v527_v42 = vsel %vm75_vm0, %v6094_v41, 0.0  ;;  %v5199_v45 = vpop.permute.xlu2 %5198  ;;  %v508_v59 = vadd.f32 %v507_v10, %v506_v46 }
 0x409   :  { %v5189_v19 = vpop.permute.xlu1 %5188  ;;  %v522_v31 = vadd.f32 %v521_v17, %v520_v36  ;;  %v528_v7 = vrot.slane %v527_v42, 4  ;;  %v576_v50 = vsel %vm75_vm0, %v6188_v37, 0.0  ;;  %v542_v8 = vrot.slane %v541_v15, 4 }
 0x40a   :  { %v5191_v0 = vunpack.i.h.bf16 %v5189_v19  ;;  %v5190_v55 = vunpack.i.l.bf16 %v5189_v19  ;;  %v483_v39 = vrot.slane %v482_v11, 1  ;;  %v556_v46 = vrot.slane %v555_v61, 4 }
 0x40b   :  { %v577_v1 = vrot.slane %v576_v50, 4  ;;  %v583_v38 = vsel %vm75_vm0, %v6191_v25, 0.0  ;;  %v523_v10 = vrot.slane %v522_v31, 2  ;;  %v529_v51 = vadd.f32 %v528_v7, %v527_v42 }
 0x40c   :  { %v6503_v5 = vpop.f32.mrf.mxu3  ;;  %v6511_v62 = vpop.permute.xlu0 %5193  ;;  %v6530_v20 = vadd.f32 %v483_v39, %v482_v11  ;;  %v557_v37 = vadd.f32 %v556_v46, %v555_v61 }
 0x40d   :  { %v5195_v17 = vunpack.i.l.bf16 %v6511_v62  ;;  %v578_v42 = vadd.f32 %v577_v1, %v576_v50  ;;  %v530_v7 = vrot.slane %v529_v51, 2 }
 0x40f   :  { %4923 = vmatmul.msk.bf16.gmra.mxu2 %vm1170_vm5, %v1434_v23  ;;  %v1099_v23 = vsel %vm75_vm0, %v6348_v57, %v5186_v16  ;;  %v490_v16 = vrot.slane %v6513_v22, 1  ;;  %v531_v1 = vadd.f32 %v530_v7, %v529_v51 }
 0x410   :  { %4865 = vmatmul.msk.bf16.gmra.mxu0 %vm1248_vm6, %v1201_v12  ;;  %4898 = vmatmul.msk.bf16.gmra.mxu1 %vm1248_vm6, %v1201_v12  ;;  %v1098_v12 = vsel %vm75_vm0, %v6344_v18, %v5185_v52  ;;  %v1180_v35 = vsel %vm1170_vm5, %v1099_v23, %v5191_v0  ;;  %v534_v18 = vsel %vm75_vm0, %v6135_v48, 0.0  ;;  %v503_v52 = vadd.f32 %v502_v4, %v501_v49  ;;  %v6545_v25 = vpop.permute.xlu2 %5213 }
 0x411   :  { %v1179_v6 = vsel %vm1170_vm5, %v1098_v12, %v5190_v55  ;;  %v1436_v57 = vpack.c.bf16 %v1099_v23, %v1098_v12  ;;  %v535_v19 = vrot.slane %v534_v18, 4  ;;  %v569_v0 = vsel %vm75_vm0, %v6215_v60, 0.0 }
 0x412   :  { %v1203_v53 = vpack.c.bf16 %v1180_v35, %v1179_v6  ;;  %v509_v23 = vrot.slane %v508_v59, 2  ;;  %v516_v12 = vrot.slane %v515_v3, 2  ;;  %v543_v6 = vadd.f32 %v542_v8, %v541_v15 }
 0x413   :  { %v536_v11 = vadd.f32 %v535_v19, %v534_v18  ;;  %v570_v39 = vrot.slane %v569_v0, 4  ;;  %v5196_v49 = vunpack.i.h.bf16 %v6511_v62  ;;  %v562_v4 = vsel %vm75_vm0, %v6212_v40, 0.0 }
 0x414   :  { %v6537_v36 = vpop.f32.mrf.mxu3  ;;  %v510_v18 = vadd.f32 %v509_v23, %v508_v59  ;;  %v517_v15 = vadd.f32 %v516_v12, %v515_v3  ;;  %v544_v8 = vrot.slane %v543_v6, 2  ;;  %v563_v62 = vrot.slane %v562_v4, 4 }
 0x415   :  { %v537_v19 = vrot.slane %v536_v11, 2  ;;  %v1100_v60 = vsel %vm75_vm0, %v6350_v43, %v5195_v17  ;;  %v1101_v40 = vsel %vm75_vm0, %v6355_v2, %v5196_v49  ;;  %v571_v32 = vadd.f32 %v570_v39, %v569_v0 }
 0x416   :  { %v558_v59 = vrot.slane %v557_v37, 2  ;;  %v579_v3 = vrot.slane %v578_v42, 2  ;;  %v504_v50 = vrot.slane %v503_v52, 1  ;;  %v511_v46 = vrot.slane %v510_v18, 1 }
 0x417   :  { %v1437_v23 = vpack.c.bf16 %v1101_v40, %v1100_v60  ;;  %v538_v12 = vadd.f32 %v537_v19, %v536_v11  ;;  %v564_v58 = vadd.f32 %v563_v62, %v562_v4  ;;  %v572_v0 = vrot.slane %v571_v32, 2 }
 0x418   :  { %v518_v39 = vrot.slane %v517_v15, 1  ;;  %v505_v51 = vadd.f32 %v504_v50, %v503_v52 }
 0x419   :  { %v539_v11 = vrot.slane %v538_v12, 1  ;;  %v573_v7 = vadd.f32 %v572_v0, %v571_v32 }
 0x41b   :  { %v574_v32 = vrot.slane %v573_v7, 1 }
 0x41c   :  { %v6553_v43 = vpop.f32.mrf.mxu3 }
 0x41f   :  { %4924 = vmatmul.msk.bf16.gmra.mxu2 %vm1170_vm5, %v1435_v13  ;;  %v548_v13 = vsel %vm75_vm0, %v6181_v14, 0.0 }
 0x420   :  { %4866 = vmatmul.msk.bf16.gmra.mxu0 %vm1248_vm6, %v1202_v9  ;;  %4899 = vmatmul.msk.bf16.gmra.mxu1 %vm1248_vm6, %v1202_v9  ;;  %v495_v9 = vrot.slane %v494_v28, 2  ;;  %v549_v21 = vrot.slane %v548_v13, 4 }
 0x422   :  { %v496_v55 = vadd.f32 %v495_v9, %v494_v28  ;;  %v550_v35 = vadd.f32 %v549_v21, %v548_v13  ;;  %v6541_v28 = vpop.permute.xlu0 %5208  ;;  %v5200_v9 = vunpack.i.l.bf16 %v5199_v45  ;;  %v524_v13 = vadd.f32 %v523_v10, %v522_v31 }
 0x423   :  { %v545_v10 = vadd.f32 %v544_v8, %v543_v6  ;;  %v565_v6 = vrot.slane %v564_v58, 2 }
 0x424   :  { %v551_v21 = vrot.slane %v550_v35, 2  ;;  %v1181_v61 = vsel %vm1170_vm5, %v1100_v60, %v5200_v9  ;;  %v497_v31 = vrot.slane %v496_v55, 1  ;;  %v525_v49 = vrot.slane %v524_v13, 1  ;;  %v6572_v0 = vpop.f32.mrf.mxu3 }
 0x425   :  { %v491_v9 = vadd.f32 %v490_v16, %v6513_v22  ;;  %v532_v60 = vrot.slane %v531_v1, 1  ;;  %v546_v4 = vrot.slane %v545_v10, 1  ;;  %v519_v22 = vadd.f32 %v518_v39, %v517_v15 }
 0x426   :  { %v552_v2 = vadd.f32 %v551_v21, %v550_v35  ;;  %v498_v48 = vadd.f32 %v497_v31, %v496_v55  ;;  %v6561_v35 = vpop.permute.xlu2 %596  ;;  %v6563_v16 = vadd.f32 %v525_v49, %v524_v13  ;;  %v566_v31 = vadd.f32 %v565_v6, %v564_v58 }
 0x427   :  { %v605_v21 = vrot.slane %v6561_v35, 1  ;;  %v547_v50 = vadd.f32 %v546_v4, %v545_v10  ;;  %v5211_v10 = vunpack.i.h.bf16 %v6541_v28 }
 0x428   :  { %v567_v49 = vrot.slane %v566_v31, 1 }
 0x42f   :  { %4925 = vmatmul.msk.bf16.gmra.mxu2 %vm1170_vm5, %v1436_v57  ;;  %v584_v57 = vrot.slane %v583_v38, 4 }
 0x430   :  { %4867 = vmatmul.msk.bf16.gmra.mxu0 %vm1248_vm6, %v1203_v53  ;;  %4900 = vmatmul.msk.bf16.gmra.mxu1 %vm1248_vm6, %v1203_v53  ;;  %v5201_v53 = vunpack.i.h.bf16 %v5199_v45 }
 0x431   :  { %v585_v45 = vadd.f32 %v584_v57, %v583_v38  ;;  %v559_v57 = vadd.f32 %v558_v59, %v557_v37  ;;  %v5204_v37 = vpop.permute.xlu1 %5203 }
 0x432   :  { %v1182_v14 = vsel %vm1170_vm5, %v1101_v40, %v5201_v53  ;;  %v580_v53 = vadd.f32 %v579_v3, %v578_v42  ;;  %v6557_v40 = vpop.permute.xlu0 %592  ;;  %v553_v42 = vrot.slane %v552_v2, 1  ;;  %v5205_v62 = vunpack.i.l.bf16 %v5204_v37 }
 0x433   :  { %v1204_v17 = vpack.c.bf16 %v1182_v14, %v1181_v61  ;;  %v586_v38 = vrot.slane %v585_v45, 2  ;;  %v512_v14 = vadd.f32 %v511_v46, %v510_v18  ;;  %v560_v52 = vrot.slane %v559_v57, 1 }
 0x434   :  { %v581_v55 = vrot.slane %v580_v53, 1  ;;  %v598_v8 = vrot.slane %v6557_v40, 1  ;;  %v5206_v18 = vunpack.i.h.bf16 %v5204_v37  ;;  %v533_v61 = vadd.f32 %v532_v60, %v531_v1 }
 0x435   :  { %v587_v19 = vadd.f32 %v586_v38, %v585_v45  ;;  %v599_v59 = vrot.slane %v6557_v40, 2  ;;  %v540_v3 = vadd.f32 %v539_v11, %v538_v12  ;;  %v554_v46 = vadd.f32 %v553_v42, %v552_v2 }
 0x436   :  { %v600_v15 = vrot.slane %v6557_v40, 3  ;;  %v561_v13 = vadd.f32 %v560_v52, %v559_v57  ;;  %v6574_v38 = vmul.f32 %v598_v8, %v491_v9  ;;  %v6576_v1 = vmul.f32 %v605_v21, %v547_v50 }
 0x437   :  { %v588_v45 = vrot.slane %v587_v19, 1  ;;  %v1103_v58 = vsel %vm75_vm0, %v6367_v44, %v5206_v18  ;;  %v1102_v12 = vsel %vm75_vm0, %v6360_v34, %v5205_v62  ;;  %v5210_v2 = vunpack.i.l.bf16 %v6541_v28 }
 0x438   :  { %9282 = vst [vmem:[#allocation17_spill] sm:$0xff] %v6576_v1  ;;  %v6584_v39 = vmul.f32 %v599_v59, %v498_v48  ;;  %v601_v57 = vrot.slane %v6557_v40, 4  ;;  %v575_v9 = vadd.f32 %v574_v32, %v573_v7  ;;  %v6592_v44 = vmul.f32 %v6557_v40, %v6530_v20 }
 0x439   :  { %v6588_v60 = vadd.f32 %v588_v45, %v587_v19  ;;  %v1183_v34 = vsel %vm1170_vm5, %v1102_v12, %v5210_v2  ;;  %v1184_v28 = vsel %vm1170_vm5, %v1103_v58, %v5211_v10  ;;  %v6598_v48 = vmul.f32 %v600_v15, %v505_v51 }
 0x43a   :  { %v2423_v6 = vpack.c.bf16 %v6574_v38, %v6574_v38  ;;  %v607_v37 = vrot.slane %v6561_v35, 3  ;;  %v2431_v4 = vpack.c.bf16 %v6576_v1, %v6576_v1  ;;  %v603_v42 = vrot.slane %v6557_v40, 6 }
 0x43b   :  { %v2424_v20 = vpack.c.bf16 %v6584_v39, %v6584_v39  ;;  %v568_v7 = vadd.f32 %v567_v49, %v566_v31  ;;  %v1438_v19 = vpack.c.bf16 %v1103_v58, %v1102_v12  ;;  %v604_v52 = vrot.slane %v6557_v40, 7  ;;  %v6648_v58 = vld [vmem:[%s9203_s5 + $0x5] ss:$0 sm:$0xff] }
 0x43c   :  { %v6612_v51 = vmul.f32 %v6561_v35, %v540_v3  ;;  %v1205_v8 = vpack.c.bf16 %v1184_v28, %v1183_v34  ;;  %v2422_v18 = vpack.c.bf16 %v6592_v44, %v6592_v44  ;;  %v608_v62 = vrot.slane %v6561_v35, 4  ;;  %v5219_v34 = vpop.permute.xlu1 %5218 }
 0x43d   :  { %v6624_v31 = vmul.f32 %v607_v37, %v561_v13  ;;  %v2468_v3 = vunpack.c.l.b16 %v2431_v4  ;;  %v609_v50 = vrot.slane %v6561_v35, 5  ;;  %v6632_v32 = vmul.f32 %v603_v42, %v6563_v16 }
 0x43e   :  { %9285 = vst [vmem:[#allocation20_spill] sm:$0xff] %v6612_v51  ;;  %v6634_v45 = vmul.f32 %v604_v52, %v533_v61  ;;  %v2430_v13 = vpack.c.bf16 %v6612_v51, %v6612_v51  ;;  %v2459_v61 = vunpack.c.l.b16 %v2422_v18  ;;  %v6652_v12 = vmul.f32 %v608_v62, %v568_v7 }
 0x43f   :  { %4926 = vmatmul.msk.bf16.gmra.mxu2 %vm1170_vm5, %v1437_v23  ;;  %v6569_v23 = vadd.f32 %v581_v55, %v580_v53  ;;  %v602_v53 = vrot.slane %v6557_v40, 5  ;;  %v6609_v55 = vmul.f32 %v601_v57, %v512_v14  ;;  %v2425_v40 = vpack.c.bf16 %v6598_v48, %v6598_v48  ;;  %9287 = vst [vmem:[#allocation22_spill] sm:$0xff] %v6624_v31 }
 0x440   :  { %4868 = vmatmul.msk.bf16.gmra.mxu0 %vm1248_vm6, %v1204_v17  ;;  %4901 = vmatmul.msk.bf16.gmra.mxu1 %vm1248_vm6, %v1204_v17  ;;  %v606_v17 = vrot.slane %v6561_v35, 2  ;;  %v2460_v14 = vunpack.c.l.b16 %v2423_v6  ;;  %9288 = vst [vmem:[#allocation23_spill] sm:$0xff] %v6632_v32  ;;  %v2433_v57 = vpack.c.bf16 %v6624_v31, %v6624_v31  ;;  %v5216_v6 = vunpack.i.h.bf16 %v6545_v25 }
 0x441   :  { %9284 = vst [vmem:[#allocation19_spill] sm:$0xff] %v6609_v55  ;;  %v6614_v21 = vmul.f32 %v602_v53, %v519_v22  ;;  %v2461_v22 = vunpack.c.l.b16 %v2424_v20  ;;  %v2426_v15 = vpack.c.bf16 %v6609_v55, %v6609_v55  ;;  %v6654_v2 = vunpack.c.l.b16 %v2425_v40 }
 0x442   :  { %v6594_v11 = vmul.f32 %v606_v17, %v554_v46  ;;  %v6629_v46 = vpop.f32.mrf.mxu3  ;;  %9289 = vst [vmem:[#allocation24_spill] sm:$0xff] %v6634_v45  ;;  %v6643_v17 = vld [vmem:[%s9203_s5 + $0x4] ss:$0 sm:$0xff]  ;;  %v2475_v49 = vrot.slane %v2460_v14, 7  ;;  %v2496_v53 = vrot.slane %v2468_v3, 7  ;;  %v610_v37 = vrot.slane %v6561_v35, 6 }
 0x443   :  { %9286 = vst [vmem:[#allocation21_spill] sm:$0xff] %v6614_v21  ;;  %v2427_v16 = vpack.c.bf16 %v6614_v21, %v6614_v21  ;;  %v2478_v28 = vrot.slane %v2461_v22, 6  ;;  %v6660_v4 = vmul.f32 %v609_v50, %v575_v9  ;;  %v5215_v7 = vunpack.i.l.bf16 %v6545_v25  ;;  %v5118_v9 = vld [vmem:[%s9202_s4 + $0xe8] sm:$0xff] }
 0x444   :  { %9283 = vst [vmem:[#allocation18_spill] sm:$0xff] %v6594_v11  ;;  %v2432_v59 = vpack.c.bf16 %v6594_v11, %v6594_v11  ;;  %v2434_v18 = vpack.c.bf16 %v6652_v12, %v6652_v12  ;;  %v5220_v40 = vunpack.i.l.bf16 %v5219_v34  ;;  %v611_v14 = vrot.slane %v6561_v35, 7  ;;  %3357 = vmatpush.bf16.msrb.mxu2 %v5118_v9 }
 0x445   :  { %9290 = vst [vmem:[#allocation25_spill] sm:$0xff] %v6652_v12  ;;  %v2470_v3 = vunpack.c.l.b16 %v2433_v57  ;;  %v2477_v50 = vsel %vm2476_vm7, %v2475_v49, %v2459_v61  ;;  %v1104_v35 = vsel %vm75_vm0, %v6369_v26, %v5215_v7  ;;  %v5117_v49 = vld [vmem:[%s9202_s4 + $0xe0] sm:$0xff]  ;;  %v2464_v9 = vunpack.c.l.b16 %v2427_v16 }
 0x446   :  { %v2469_v10 = vunpack.c.l.b16 %v2432_v59  ;;  %9291 = vst [vmem:[#allocation26_spill] sm:$0xff] %v6660_v4  ;;  %v5221_v59 = vunpack.i.h.bf16 %v5219_v34  ;;  %v2463_v34 = vunpack.c.l.b16 %v2426_v15  ;;  %v2471_v57 = vunpack.c.l.b16 %v2434_v18  ;;  %v5113_v7 = vld [vmem:[%s9202_s4 + $0xc0] sm:$0xff] }
 0x447   :  { %v2480_v15 = vsel %vm2479_vm8, %v2478_v28, %v2477_v50  ;;  %v6693_v26 = vmul.f32 %v611_v14, %v6588_v60  ;;  %2533 = vmatpush.bf16.msra.mxu1 %v5113_v7 }
 0x448   :  { %v2498_v62 = vrot.slane %v2469_v10, 6  ;;  %v2435_v10 = vpack.c.bf16 %v6660_v4, %v6660_v4  ;;  %3358 = vmatpush.bf16.msrb.mxu2 %v5117_v49  ;;  %v2502_v14 = vrot.slane %v2471_v57, 4  ;;  %v2429_v57 = vpack.c.bf16 %v6634_v45, %v6634_v45 }
 0x449   :  { %9293 = vst [vmem:[#allocation28_spill] sm:$0xff] %v6693_v26  ;;  %v2487_v49 = vrot.slane %v2464_v9, 3 }
 0x44f   :  { %4927 = vmatmul.msk.bf16.gmra.mxu2 %vm1170_vm5, %v1438_v19  ;;  %v2467_v19 = vunpack.c.l.b16 %v2430_v13  ;;  %v6674_v13 = vmul.f32 %v610_v37, %v6569_v23  ;;  %v1185_v23 = vsel %vm1170_vm5, %v1104_v35, %v5220_v40  ;;  %v6688_v37 = vpop.f32.mrf.mxu3  ;;  %v2428_v40 = vpack.c.bf16 %v6632_v32, %v6632_v32 }
 0x450   :  { %4869 = vmatmul.msk.bf16.gmra.mxu0 %vm1248_vm6, %v1205_v8  ;;  %4902 = vmatmul.msk.bf16.gmra.mxu1 %vm1248_vm6, %v1205_v8 }
 0x451   :  { %v2497_v25 = vsel %vm2476_vm7, %v2496_v53, %v2467_v19  ;;  %9292 = vst [vmem:[#allocation27_spill] sm:$0xff] %v6674_v13 }
 0x452   :  { %v2499_v53 = vsel %vm2479_vm8, %v2498_v62, %v2497_v25  ;;  %v2484_v25 = vrot.slane %v2463_v34, 4 }
 0x455   :  { %v1282_v42 = vpop.f32.mrf.mxu0  ;;  %v1384_v20 = vpop.f32.mrf.mxu1 }
 0x456   :  { %v1283_v52 = vadd.f32 %v6643_v17, %v1282_v42  ;;  %v1385_v8 = vadd.f32 %v6648_v58, %v1384_v20  ;;  %v1105_v20 = vsel %vm75_vm0, %v6374_v56, %v5216_v6  ;;  %v2481_v56 = vrot.slane %v6654_v2, 5 }
 0x457   :  { %v1186_v61 = vsel %vm1170_vm5, %v1105_v20, %v5221_v59  ;;  %v2500_v6 = vrot.slane %v2470_v3, 5  ;;  %v1439_v19 = vpack.c.bf16 %v1105_v20, %v1104_v35  ;;  %v6716_v7 = vpop.f32.mrf.mxu3 }
 0x458   :  { %v4946_v22 = vmul.f32 -1.442695, %v1283_v52  ;;  %v4962_v42 = vmul.f32 -1.442695, %v1385_v8  ;;  %v2436_v52 = vpack.c.bf16 %v6674_v13, %v6674_v13  ;;  %v2472_v8 = vunpack.c.l.b16 %v2435_v10 }
 0x459   :  { %v1206_v28 = vpack.c.bf16 %v1186_v61, %v1185_v23  ;;  %v2501_v59 = vsel %vm2482_vm9, %v2500_v6, %v2499_v53  ;;  %v2483_v10 = vsel %vm2482_vm9, %v2481_v56, %v2480_v15  ;;  %v2465_v61 = vunpack.c.l.b16 %v2428_v40 }
 0x45a   :  { %5311 = vpow2.f32 %v4946_v22  ;;  %v2437_v22 = vpack.c.bf16 %v6693_v26, %v6693_v26  ;;  %v2503_v16 = vsel %vm2485_vm10, %v2502_v14, %v2501_v59  ;;  %v2504_v53 = vrot.slane %v2472_v8, 3 }
 0x45b   :  { %5313 = vpow2.f32 %v4962_v42  ;;  %v2473_v42 = vunpack.c.l.b16 %v2436_v52  ;;  %v2486_v23 = vsel %vm2485_vm10, %v2484_v25, %v2483_v10  ;;  %v2466_v52 = vunpack.c.l.b16 %v2429_v57  ;;  %v6734_v57 = vld [vmem:[%s9203_s5 + $0x7] ss:$0 sm:$0xff] }
 0x45c   :  { %v2474_v6 = vunpack.c.l.b16 %v2437_v22  ;;  %v2505_v15 = vsel %vm2488_vm11, %v2504_v53, %v2503_v16  ;;  %v2489_v8 = vsel %vm2488_vm11, %v2487_v49, %v2486_v23 }
 0x45d   :  { %v1284_v18 = vpop.f32.mrf.mxu0  ;;  %v1386_v62 = vpop.f32.mrf.mxu1  ;;  %v2506_v56 = vrot.slane %v2473_v42, 2  ;;  %v2493_v14 = vrot.slane %v2466_v52, 1 }
 0x45e   :  { %v1285_v2 = vadd.f32 %v6643_v17, %v1284_v18  ;;  %v1387_v60 = vadd.f32 %v6648_v58, %v1386_v62  ;;  %v2490_v18 = vrot.slane %v2465_v61, 2  ;;  %v1502_v61 = vpop.f32.mrf.mxu2 }
 0x45f   :  { %4928 = vmatmul.msk.bf16.gmra.mxu2 %vm1170_vm5, %v1439_v19  ;;  %v2507_v62 = vsel %vm2491_vm12, %v2506_v56, %v2505_v15  ;;  %v6740_v49 = vpop.f32.mrf.mxu3 }
 0x460   :  { %v5312_v3 = vpop.eup %5311  ;;  %v4947_v50 = vmul.f32 -1.442695, %v1285_v2  ;;  %4870 = vmatmul.msk.bf16.gmra.mxu0 %vm1248_vm6, %v1206_v28  ;;  %4903 = vmatmul.msk.bf16.gmra.mxu1 %vm1248_vm6, %v1206_v28  ;;  %v4963_v35 = vmul.f32 -1.442695, %v1387_v60  ;;  %v2508_v2 = vrot.slane %v2474_v6, 1  ;;  %v2492_v40 = vsel %vm2491_vm12, %v2490_v18, %v2489_v8 }
 0x461   :  { %v1660_v20 = vadd.f32 1.0, %v5312_v3  ;;  %v5314_v34 = vpop.eup %5313  ;;  %v2495_v10 = vsel %vm9240_vm13, %v2493_v14, %v2492_v40  ;;  %v6745_v6 = vld [vmem:[%s9203_s5 + $0x6] ss:$0 sm:$0xff]  ;;  %v1573_v8 = vadd.f32 %v6734_v57, %v6489_v24 }
 0x462   :  { %5315 = vpow2.f32 %v4947_v50  ;;  %v6718_v19 = vadd.f32 1.0, %v5314_v34  ;;  %v2509_v3 = vsel %vm9240_vm13, %v2508_v2, %v2507_v62 }
 0x463   :  { %5317 = vrcp.f32 %v1660_v20  ;;  %v1687_v42 = vand.u32 2147483648, %v1660_v20  ;;  %v2510_v16 = vpack.c.b16 %v2509_v3, %v2495_v10  ;;  %v1685_v34 = vand.u32 2147483647, %v1660_v20 }
 0x464   :  { %5319 = vpow2.f32 %v4963_v35  ;;  %v5111_v35 = vld [vmem:[%s9202_s4 + $0xb0] sm:$0xff]  ;;  %vm1681_vm15 = vweird.f32 %v1660_v20 }
 0x465   :  { %5321 = vrcp.f32 %v6718_v19  ;;  %2376 = vmatpush.bf16.msra.mxu0 %v5111_v35  ;;  %v1688_v52 = vor.u32 1.1754944e-38, %v1687_v42  ;;  %vm1686_vm2 = vcmp.eq.f32.partialorder %v1685_v34, 8.507059e+37  ;;  %v1575_v34 = vadd.f32 %v6734_v57, %v6503_v5 }
 0x468   :  { %v5316_v28 = vpop.eup %5315 }
 0x469   :  { %v5318_v60 = vpop.eup %5317  ;;  %v1661_v59 = vadd.f32 1.0, %v5316_v28 }
 0x46a   :  { %v1677_v9 = vmul.f32 %v5318_v60, %v1660_v20  ;;  %v5320_v25 = vpop.eup %5319  ;;  %vm1682_vm14 = vweird.f32 %v5318_v60 }
 0x46b   :  { %5323 = vrcp.f32 %v1661_v59  ;;  %v6725_v50 = vadd.f32 1.0, %v5320_v25  ;;  %v6738_v23 = vpop.eup %5321  ;;  %vm1683_vm1 = vmor %vm1681_vm15, %vm1682_vm14  ;;  %v1702_v25 = vand.u32 2147483648, %v1661_v59  ;;  %v1700_v24 = vand.u32 2147483647, %v1661_v59 }
 0x46c   :  { %v1678_v22 = vsub.f32 1.0, %v1677_v9  ;;  %v1981_v28 = vmul.f32 %v6738_v23, %v6718_v19  ;;  %v1503_v9 = vadd.f32 %v6745_v6, %v1502_v61  ;;  %vm1696_vm4 = vweird.f32 %v1661_v59  ;;  %v6759_v61 = vpop.f32.mrf.mxu3 }
 0x46d   :  { %5325 = vrcp.f32 %v6725_v50  ;;  %vm1701_vm14 = vcmp.eq.f32.partialorder %v1700_v24, 8.507059e+37  ;;  %vm1986_vm15 = vweird.f32 %v6738_v23 }
 0x46e   :  { %v1679_v53 = vmul.f32 %v5318_v60, %v1678_v22 }
 0x46f   :  { %5031 = vmatmul.msk.bf16.vlgmr.msrb.gmra.mxu2 %vm75_vm0, %v2510_v16 }
 0x470   :  { %v1680_v15 = vadd.f32 %v5318_v60, %v1679_v53  ;;  %5004 = vmatmul.msk.bf16.vlgmr.msra.gmra.mxu1 %vm75_vm0, %v2510_v16  ;;  %v1504_v16 = vpop.f32.mrf.mxu2  ;;  %v1703_v53 = vor.u32 1.1754944e-38, %v1702_v25  ;;  %v1989_v25 = vand.u32 2147483647, %v6718_v19 }
 0x471   :  { %v5324_v56 = vpop.eup %5323 }
 0x472   :  { %v1684_v18 = vsel %vm1683_vm1, %v5318_v60, %v1680_v15  ;;  %v1692_v62 = vmul.f32 %v5324_v56, %v1661_v59  ;;  %vm1697_vm3 = vweird.f32 %v5324_v56  ;;  %v1982_v60 = vsub.f32 1.0, %v1981_v28 }
 0x473   :  { %v1689_v2 = vsel %vm1686_vm2, %v1688_v52, %v1684_v18  ;;  %v6752_v40 = vpop.eup %5325  ;;  %vm1698_vm6 = vmor %vm1696_vm4, %vm1697_vm3  ;;  %v1505_v18 = vadd.f32 %v6745_v6, %v1504_v16  ;;  %vm1985_vm1 = vweird.f32 %v6718_v19  ;;  %vm2000_vm4 = vweird.f32 %v6725_v50 }
 0x474   :  { %v2220_v20 = vmul.f32 %v1689_v2, %v1573_v8  ;;  %v1693_v14 = vsub.f32 1.0, %v1692_v62  ;;  %v1996_v3 = vmul.f32 %v6752_v40, %v6725_v50  ;;  %v1983_v52 = vmul.f32 %v6738_v23, %v1982_v60  ;;  %vm6773_vm3 = vmor %vm1985_vm1, %vm1986_vm15 }
 0x475   :  { %vm2001_vm2 = vweird.f32 %v6752_v40  ;;  %v2006_v60 = vand.u32 2147483648, %v6725_v50  ;;  %v2004_v16 = vand.u32 2147483647, %v6725_v50 }
 0x476   :  { %v2236_v22 = vadd.f32 %v2220_v20, %v1503_v9  ;;  %v1694_v10 = vmul.f32 %v5324_v56, %v1693_v14  ;;  %v1997_v35 = vsub.f32 1.0, %v1996_v3  ;;  %v1984_v5 = vadd.f32 %v6738_v23, %v1983_v52 }
 0x477   :  { %vm2005_vm15 = vcmp.eq.f32.partialorder %v2004_v16, 8.507059e+37 }
 0x478   :  { %v1695_v42 = vadd.f32 %v5324_v56, %v1694_v10  ;;  %5327 = vtanh.f32 %v2236_v22  ;;  %v1998_v59 = vmul.f32 %v6752_v40, %v1997_v35  ;;  %v1988_v35 = vsel %vm6773_vm3, %v6738_v23, %v1984_v5 }
 0x47a   :  { %v1699_v15 = vsel %vm1698_vm6, %v5324_v56, %v1695_v42  ;;  %v1991_v56 = vand.u32 2147483648, %v6718_v19  ;;  %v1999_v22 = vadd.f32 %v6752_v40, %v1998_v59  ;;  %vm2002_vm6 = vmor %vm2000_vm4, %vm2001_vm2 }
 0x47b   :  { %v1704_v8 = vsel %vm1701_vm14, %v1703_v53, %v1699_v15  ;;  %v6786_v53 = vpop.f32.mrf.mxu3  ;;  %vm1990_vm14 = vcmp.eq.f32.partialorder %v1989_v25, 8.507059e+37 }
 0x47c   :  { %v2221_v62 = vmul.f32 %v1704_v8, %v1575_v34  ;;  %v1992_v34 = vor.u32 1.1754944e-38, %v1991_v56  ;;  %v2003_v15 = vsel %vm2002_vm6, %v6752_v40, %v1999_v22 }
 0x47d   :  { %v1287_v28 = vpop.f32.mrf.mxu0  ;;  %v1389_v2 = vpop.f32.mrf.mxu1 }
 0x47e   :  { %v2237_v9 = vadd.f32 %v2221_v62, %v1505_v18  ;;  %v1288_v20 = vadd.f32 %v6643_v17, %v1287_v28  ;;  %v5328_v14 = vpop.eup %5327  ;;  %v1390_v10 = vadd.f32 %v6648_v58, %v1389_v2  ;;  %v1993_v59 = vsel %vm1990_vm14, %v1992_v34, %v1988_v35 }
 0x47f   :  { %v2268_v19 = vsub.f32 %v9280_v63, %v5328_v14  ;;  %v2007_v28 = vor.u32 1.1754944e-38, %v2006_v60 }
 0x480   :  { %5329 = vtanh.f32 %v2237_v9  ;;  %v4948_v3 = vmul.f32 -1.442695, %v1288_v20  ;;  %v4964_v52 = vmul.f32 -1.442695, %v1390_v10 }
 0x481   :  { %v2284_v2 = vmul.f32 %v2268_v19, %v1993_v59  ;;  %v2008_v20 = vsel %vm2005_vm15, %v2007_v28, %v2003_v15 }
 0x482   :  { %5331 = vpow2.f32 %v4948_v3  ;;  %v6778_v42 = vpop.f32.mrf.mxu2 }
 0x483   :  { %5333 = vpow2.f32 %v4964_v52  ;;  %v6796_v22 = vadd.f32 %v5328_v14, %v2284_v2  ;;  %v1599_v16 = vpop.f32.mrf.mxu3 }
 0x485   :  { %v1289_v8 = vpop.f32.mrf.mxu0  ;;  %v1391_v18 = vpop.f32.mrf.mxu1 }
 0x486   :  { %v5330_v62 = vpop.eup %5329  ;;  %v1290_v23 = vadd.f32 %v6643_v17, %v1289_v8  ;;  %v1392_v40 = vadd.f32 %v6648_v58, %v1391_v18 }
 0x487   :  { %v2269_v9 = vsub.f32 %v9281_v30, %v5330_v62 }
 0x488   :  { %v5332_v50 = vpop.eup %5331  ;;  %v4949_v5 = vmul.f32 -1.442695, %v1290_v23  ;;  %v4965_v60 = vmul.f32 -1.442695, %v1392_v40  ;;  %v6820_v40 = vadd.f32 %v6734_v57, %v6537_v36 }
 0x489   :  { %v2285_v56 = vmul.f32 %v2269_v9, %v2008_v20  ;;  %v6791_v3 = vadd.f32 1.0, %v5332_v50  ;;  %v5334_v15 = vpop.eup %5333 }
 0x48a   :  { %5335 = vpow2.f32 %v4949_v5  ;;  %v6794_v25 = vpop.f32.mrf.mxu2  ;;  %v6812_v59 = vadd.f32 1.0, %v5334_v15 }
 0x48b   :  { %v6798_v10 = vadd.f32 %v5330_v62, %v2285_v56  ;;  %5337 = vrcp.f32 %v6791_v3  ;;  %vm1711_vm1 = vweird.f32 %v6791_v3 }
 0x48c   :  { %5339 = vpow2.f32 %v4965_v60  ;;  %v6828_v60 = vadd.f32 %v6734_v57, %v6572_v0  ;;  %v6846_v0 = vadd.f32 %v6734_v57, %v6716_v7  ;;  %v6863_v7 = vadd.f32 %v6734_v57, %v6786_v53 }
 0x48d   :  { %v2320_v24 = vpack.c.bf16 %v6798_v10, %v6796_v22  ;;  %v1292_v35 = vpop.f32.mrf.mxu0  ;;  %v1394_v19 = vpop.f32.mrf.mxu1  ;;  %v1715_v53 = vand.u32 2147483647, %v6791_v3  ;;  %v2021_v12 = vand.u32 2147483648, %v6812_v59 }
 0x48e   :  { %v1293_v34 = vadd.f32 %v6643_v17, %v1292_v35  ;;  %v1395_v20 = vadd.f32 %v6648_v58, %v1394_v19  ;;  %v1602_v35 = vpop.f32.mrf.mxu3  ;;  %v6835_v19 = vadd.f32 %v6734_v57, %v6629_v46  ;;  %v6854_v46 = vadd.f32 %v6734_v57, %v6740_v49 }
 0x48f   :  { %4987 = vmatmul.msk.bf16.vlgmr.msra.gmra.mxu0 %vm75_vm0, %v2320_v24  ;;  %v6824_v24 = vadd.f32 %v6734_v57, %v6553_v43  ;;  %v6842_v43 = vadd.f32 %v6734_v57, %v6688_v37  ;;  %v6884_v13 = vadd.f32 %v6734_v57, %v1602_v35  ;;  %vm1716_vm15 = vcmp.eq.f32.partialorder %v1715_v53, 8.507059e+37 }
 0x490   :  { %v5336_v52 = vpop.eup %5335  ;;  %v4950_v8 = vmul.f32 -1.442695, %v1293_v34  ;;  %v4966_v37 = vmul.f32 -1.442695, %v1395_v20 }
 0x491   :  { %v6805_v14 = vpop.eup %5337  ;;  %v6807_v18 = vadd.f32 1.0, %v5336_v52 }
 0x492   :  { %v1707_v62 = vmul.f32 %v6805_v14, %v6791_v3  ;;  %5341 = vpow2.f32 %v4950_v8  ;;  %v6814_v28 = vpop.f32.mrf.mxu2  ;;  %v5340_v50 = vpop.eup %5339  ;;  %vm1712_vm2 = vweird.f32 %v6805_v14 }
 0x493   :  { %5343 = vrcp.f32 %v6807_v18  ;;  %v6848_v8 = vadd.f32 1.0, %v5340_v50  ;;  %vm6890_vm4 = vmor %vm1711_vm1, %vm1712_vm2  ;;  %vm1726_vm6 = vweird.f32 %v6807_v18 }
 0x494   :  { %v1708_v23 = vsub.f32 1.0, %v1707_v62  ;;  %5345 = vrcp.f32 %v6812_v59 }
 0x495   :  { %v1294_v2 = vpop.f32.mrf.mxu0  ;;  %v1396_v9 = vpop.f32.mrf.mxu1 }
 0x496   :  { %v1295_v5 = vadd.f32 %v6643_v17, %v1294_v2  ;;  %v1709_v36 = vmul.f32 %v6805_v14, %v1708_v23  ;;  %v6858_v23 = vadd.f32 %v6734_v57, %v6759_v61  ;;  %v6866_v2 = vadd.f32 %v6734_v57, %v1599_v16 }
 0x497   :  { %v1717_v61 = vand.u32 2147483648, %v6791_v3  ;;  %v1397_v26 = vadd.f32 %v6648_v58, %v1396_v9 }
 0x498   :  { %v5342_v56 = vpop.eup %5341  ;;  %v4951_v52 = vmul.f32 -1.442695, %v1295_v5  ;;  %v1710_v49 = vadd.f32 %v6805_v14, %v1709_v36  ;;  %v1732_v36 = vand.u32 2147483648, %v6807_v18 }
 0x499   :  { %v6831_v34 = vpop.eup %5343  ;;  %v6838_v15 = vadd.f32 1.0, %v5342_v56  ;;  %v1718_v31 = vor.u32 1.1754944e-38, %v1717_v61 }
 0x49a   :  { %v1722_v62 = vmul.f32 %v6831_v34, %v6807_v18  ;;  %v6872_v20 = vpop.eup %5345  ;;  %vm1727_vm3 = vweird.f32 %v6831_v34  ;;  %v1714_v3 = vsel %vm6890_vm4, %v6805_v14, %v1710_v49  ;;  %v1733_v14 = vor.u32 1.1754944e-38, %v1732_v36 }
 0x49b   :  { %5347 = vrcp.f32 %v6838_v15  ;;  %v2011_v35 = vmul.f32 %v6872_v20, %v6812_v59  ;;  %vm6907_vm14 = vmor %vm1726_vm6, %vm1727_vm3  ;;  %v4967_v49 = vmul.f32 -1.442695, %v1397_v26  ;;  %v1719_v1 = vsel %vm1716_vm15, %v1718_v31, %v1714_v3 }
 0x49c   :  { %v1723_v50 = vsub.f32 1.0, %v1722_v62  ;;  %5349 = vpow2.f32 %v4951_v52  ;;  %v1730_v62 = vand.u32 2147483647, %v6807_v18  ;;  %v6881_v52 = vpop.f32.mrf.mxu2  ;;  %v1604_v18 = vpop.f32.mrf.mxu3  ;;  %v1510_v26 = vadd.f32 %v6745_v6, %v6794_v25 }
 0x49d   :  { %v1297_v5 = vpop.f32.mrf.mxu0  ;;  %v1399_v56 = vpop.f32.mrf.mxu1  ;;  %5351 = vrcp.f32 %v6848_v8  ;;  %vm2016_vm2 = vweird.f32 %v6872_v20  ;;  %vm2015_vm4 = vweird.f32 %v6812_v59  ;;  %vm1741_vm6 = vweird.f32 %v6838_v15 }
 0x49e   :  { %v1724_v16 = vmul.f32 %v6831_v34, %v1723_v50  ;;  %5353 = vpow2.f32 %v4966_v37  ;;  %v1298_v37 = vadd.f32 %v6643_v17, %v1297_v5  ;;  %v1400_v30 = vadd.f32 %v6648_v58, %v1399_v56 }
 0x49f   :  { %vm1731_vm1 = vcmp.eq.f32.partialorder %v1730_v62, 8.507059e+37  ;;  %v1508_v56 = vadd.f32 %v6745_v6, %v6778_v42  ;;  %v2019_v42 = vand.u32 2147483647, %v6812_v59 }
 0x4a0   :  { %v1725_v4 = vadd.f32 %v6831_v34, %v1724_v16  ;;  %v4952_v63 = vmul.f32 -1.442695, %v1298_v37 }
 0x4a1   :  { %v6897_v9 = vpop.eup %5347 }
 0x4a2   :  { %v1729_v5 = vsel %vm6907_vm14, %v6831_v34, %v1725_v4  ;;  %v1737_v11 = vmul.f32 %v6897_v9, %v6838_v15  ;;  %v5350_v50 = vpop.eup %5349  ;;  %5355 = vpow2.f32 %v4952_v63  ;;  %v6922_v4 = vadd.f32 %v6734_v57, %v1604_v18 }
 0x4a3   :  { %v6917_v61 = vpop.eup %5351  ;;  %v6919_v45 = vadd.f32 1.0, %v5350_v50  ;;  %v2012_v34 = vsub.f32 1.0, %v2011_v35  ;;  %v1734_v37 = vsel %vm1731_vm1, %v1733_v14, %v1729_v5  ;;  %v6930_v63 = vor.u32 1.1754944e-38, %v2021_v12 }
 0x4a4   :  { %v1738_v51 = vsub.f32 1.0, %v1737_v11  ;;  %v5354_v16 = vpop.eup %5353  ;;  %v4968_v11 = vmul.f32 -1.442695, %v1400_v30  ;;  %v2222_v57 = vmul.f32 %v1719_v1, %v6820_v40  ;;  %v2026_v36 = vmul.f32 %v6917_v61, %v6848_v8  ;;  %v1517_v12 = vpop.f32.mrf.mxu2 }
 0x4a5   :  { %v1299_v53 = vpop.f32.mrf.mxu0  ;;  %v1401_v62 = vpop.f32.mrf.mxu1  ;;  %5357 = vrcp.f32 %v6919_v45  ;;  %v2036_v35 = vand.u32 2147483648, %v6848_v8  ;;  %v2223_v3 = vmul.f32 %v1734_v37, %v6824_v24  ;;  %v6938_v18 = vadd.f32 1.0, %v5354_v16 }
 0x4a6   :  { %v1739_v31 = vmul.f32 %v6897_v9, %v1738_v51  ;;  %5359 = vpow2.f32 %v4967_v49  ;;  %v2013_v51 = vmul.f32 %v6872_v20, %v2012_v34  ;;  %v6944_v30 = vadd.f32 %v6745_v6, %v6814_v28 }
 0x4a7   :  { %vm1742_vm3 = vweird.f32 %v6897_v9  ;;  %v1745_v40 = vand.u32 2147483647, %v6838_v15  ;;  %v1747_v24 = vand.u32 2147483648, %v6838_v15  ;;  %5361 = vpow2.f32 %v4968_v11 }
 0x4a8   :  { %v1740_v1 = vadd.f32 %v6897_v9, %v1739_v31  ;;  %v5356_v25 = vpop.eup %5355  ;;  %v1300_v5 = vadd.f32 %v6643_v17, %v1299_v53  ;;  %v2238_v50 = vadd.f32 %v2222_v57, %v1508_v56  ;;  %v2027_v14 = vsub.f32 1.0, %v2026_v36  ;;  %vm6960_vm14 = vmor %vm1741_vm6, %vm1742_vm3 }
 0x4a9   :  { %v6953_v28 = vadd.f32 1.0, %v5356_v25  ;;  %v2239_v16 = vadd.f32 %v2223_v3, %v1510_v26  ;;  %v2051_v34 = vand.u32 2147483648, %v6938_v18  ;;  %v6965_v31 = vor.u32 1.1754944e-38, %v2036_v35 }
 0x4aa   :  { %v1744_v15 = vsel %vm6960_vm14, %v6897_v9, %v1740_v1  ;;  %v4953_v26 = vmul.f32 -1.442695, %v1300_v5  ;;  %vm1746_vm15 = vcmp.eq.f32.partialorder %v1745_v40, 8.507059e+37  ;;  %v1748_v3 = vor.u32 1.1754944e-38, %v1747_v24 }
 0x4ab   :  { %v6955_v49 = vpop.eup %5357  ;;  %5363 = vrcp.f32 %v6953_v28  ;;  %v2014_v35 = vadd.f32 %v6872_v20, %v2013_v51  ;;  %v2028_v25 = vmul.f32 %v6917_v61, %v2027_v14  ;;  %v6978_v9 = vadd.f32 %v6745_v6, %v6881_v52 }
 0x4ac   :  { %v1752_v56 = vmul.f32 %v6955_v49, %v6919_v45  ;;  %v5360_v36 = vpop.eup %5359  ;;  %5365 = vrcp.f32 %v6938_v18  ;;  %vm2030_vm1 = vweird.f32 %v6848_v8  ;;  %v1749_v5 = vsel %vm1746_vm15, %v1748_v3, %v1744_v15  ;;  %vm7010_vm15 = vmor %vm2015_vm4, %vm2016_vm2 }
 0x4ad   :  { %v1302_v11 = vpop.f32.mrf.mxu0  ;;  %v1404_v57 = vpop.f32.mrf.mxu1  ;;  %5367 = vtanh.f32 %v2238_v50  ;;  %v1402_v53 = vadd.f32 %v6648_v58, %v1401_v62  ;;  %vm6983_vm3 = vcmp.eq.f32.partialorder %v2019_v42, 8.507059e+37  ;;  %v6987_v51 = vor.u32 1.1754944e-38, %v2051_v34 }
 0x4ae   :  { %v1753_v1 = vsub.f32 1.0, %v1752_v56  ;;  %v5362_v37 = vpop.eup %5361  ;;  %5369 = vtanh.f32 %v2239_v16  ;;  %v1303_v40 = vadd.f32 %v6643_v17, %v1302_v11  ;;  %v6989_v50 = vadd.f32 1.0, %v5360_v36  ;;  %v7002_v11 = vpop.f32.mrf.mxu2 }
 0x4af   :  { %5371 = vpow2.f32 %v4953_v26  ;;  %vm1756_vm6 = vweird.f32 %v6919_v45  ;;  %vm1757_vm14 = vweird.f32 %v6955_v49  ;;  %v1760_v14 = vand.u32 2147483647, %v6919_v45 }
 0x4b0   :  { %v1754_v52 = vmul.f32 %v6955_v49, %v1753_v1  ;;  %v4954_v62 = vmul.f32 -1.442695, %v1303_v40  ;;  %v2224_v42 = vmul.f32 %v1749_v5, %v6828_v60  ;;  %v1762_v34 = vand.u32 2147483648, %v6919_v45  ;;  %vm7024_vm13 = vmor %vm1756_vm6, %vm1757_vm14 }
 0x4b1   :  { %v6995_v16 = vpop.eup %5363  ;;  %v7000_v56 = vadd.f32 1.0, %v5362_v37  ;;  %v4969_v3 = vmul.f32 -1.442695, %v1402_v53  ;;  %v1405_v1 = vadd.f32 %v6648_v58, %v1404_v57  ;;  %v7029_v5 = vadd.f32 %v6745_v6, %v1517_v12 }
 0x4b2   :  { %v1755_v15 = vadd.f32 %v6955_v49, %v1754_v52  ;;  %v7004_v26 = vpop.eup %5365  ;;  %v1767_v60 = vmul.f32 %v6995_v16, %v6953_v28  ;;  %5373 = vpow2.f32 %v4954_v62  ;;  %v2018_v53 = vsel %vm7010_vm15, %v6872_v20, %v2014_v35 }
 0x4b3   :  { %v7017_v37 = vpop.eup %5367  ;;  %5375 = vrcp.f32 %v6989_v50  ;;  %vm2031_vm2 = vweird.f32 %v6917_v61  ;;  %v2029_v32 = vadd.f32 %v6917_v61, %v2028_v25  ;;  %v2041_v21 = vmul.f32 %v7004_v26, %v6938_v18 }
 0x4b4   :  { %v7035_v57 = vpop.eup %5369  ;;  %v1759_v45 = vsel %vm7024_vm13, %v6955_v49, %v1755_v15  ;;  %v1768_v52 = vsub.f32 1.0, %v1767_v60  ;;  %v2240_v36 = vadd.f32 %v2224_v42, %v6944_v30  ;;  %v1763_v20 = vor.u32 1.1754944e-38, %v1762_v34  ;;  %vm7056_vm13 = vmor %vm2030_vm1, %vm2031_vm2 }
 0x4b5   :  { %v1304_v40 = vpop.f32.mrf.mxu0  ;;  %v5372_v12 = vpop.eup %5371  ;;  %5377 = vrcp.f32 %v7000_v56  ;;  %vm1761_vm4 = vcmp.eq.f32.partialorder %v1760_v14, 8.507059e+37  ;;  %v4970_v49 = vmul.f32 -1.442695, %v1405_v1  ;;  %v2023_v25 = vsel %vm6983_vm3, %v6930_v63, %v2018_v53 }
 0x4b6   :  { %v1305_v62 = vadd.f32 %v6643_v17, %v1304_v40  ;;  %v1406_v35 = vpop.f32.mrf.mxu1  ;;  %v7046_v55 = vadd.f32 1.0, %v5372_v12  ;;  %5379 = vpow2.f32 %v4969_v3  ;;  %v1764_v15 = vsel %vm1761_vm4, %v1763_v20, %v1759_v45 }
 0x4b7   :  { %v1769_v60 = vmul.f32 %v6995_v16, %v1768_v52  ;;  %v2270_v42 = vsub.f32 %v6035_v29, %v7017_v37  ;;  %v2271_v34 = vsub.f32 %v6041_v33, %v7035_v57  ;;  %v2033_v63 = vsel %vm7056_vm13, %v6917_v61, %v2029_v32 }
 0x4b8   :  { %v4955_v59 = vmul.f32 -1.442695, %v1305_v62  ;;  %v5374_v14 = vpop.eup %5373  ;;  %5381 = vrcp.f32 %v7046_v55  ;;  %v2042_v3 = vsub.f32 1.0, %v2041_v21  ;;  %v2081_v1 = vand.u32 2147483648, %v7000_v56  ;;  %v1522_v21 = vpop.f32.mrf.mxu2 }
 0x4b9   :  { %v7068_v24 = vpop.eup %5375  ;;  %5383 = vtanh.f32 %v2240_v36  ;;  %v1777_v40 = vand.u32 2147483648, %v6953_v28  ;;  %v2225_v53 = vmul.f32 %v1764_v15, %v6835_v19  ;;  %v7073_v45 = vadd.f32 1.0, %v5374_v14 }
 0x4ba   :  { %5385 = vpow2.f32 %v4970_v49  ;;  %v9310_v52 = vand.u32 2147483647, %v6848_v8  ;;  %v1770_v32 = vadd.f32 %v6995_v16, %v1769_v60  ;;  %vm1772_vm3 = vweird.f32 %v6995_v16 }
 0x4bb   :  { %v7077_v62 = vpop.eup %5377  ;;  %5387 = vpow2.f32 %v4955_v59  ;;  %v2056_v19 = vmul.f32 %v7068_v24, %v6989_v50  ;;  %v2286_v36 = vmul.f32 %v2270_v42, %v2023_v25  ;;  %vm1771_vm6 = vweird.f32 %v6953_v28 }
 0x4bc   :  { %vm2035_vm1 = vcmp.eq.f32.partialorder %v9310_v52, 8.507059e+37  ;;  %v5380_v12 = vpop.eup %5379  ;;  %5389 = vrcp.f32 %v7073_v45  ;;  %v1775_v15 = vand.u32 2147483647, %v6953_v28  ;;  %v1407_v60 = vadd.f32 %v6648_v58, %v1406_v35  ;;  %vm7099_vm14 = vmor %vm1771_vm6, %vm1772_vm3 }
 0x4bd   :  { %v2038_v61 = vsel %vm2035_vm1, %v6965_v31, %v2033_v63  ;;  %v1307_v8 = vpop.f32.mrf.mxu0  ;;  %v7092_v31 = vmul.f32 %v7004_v26, %v2042_v3  ;;  %v2241_v30 = vadd.f32 %v2225_v53, %v6978_v9  ;;  %v7095_v14 = vor.u32 1.1754944e-38, %v2081_v1 }
 0x4be   :  { %v2287_v20 = vmul.f32 %v2271_v34, %v2038_v61  ;;  %v7089_v59 = vpop.eup %5381  ;;  %v7105_v28 = vadd.f32 %v6745_v6, %v7002_v11  ;;  %v2071_v42 = vmul.f32 %v7077_v62, %v7000_v56  ;;  %v1774_v9 = vsel %vm7099_vm14, %v6995_v16, %v1770_v32  ;;  %v1409_v3 = vpop.f32.mrf.mxu1 }
 0x4bf   :  { %v7107_v35 = vpop.eup %5383  ;;  %v7114_v34 = vadd.f32 1.0, %v5380_v12  ;;  %v1782_v63 = vmul.f32 %v7089_v59, %v7046_v55  ;;  %v2057_v53 = vsub.f32 1.0, %v2056_v19  ;;  %v1778_v52 = vor.u32 1.1754944e-38, %v1777_v40 }
 0x4c0   :  { %v5386_v1 = vpop.eup %5385  ;;  %v7119_v11 = vadd.f32 %v7017_v37, %v2286_v36  ;;  %v7122_v61 = vadd.f32 %v7035_v57, %v2287_v20  ;;  %vm1776_vm15 = vcmp.eq.f32.partialorder %v1775_v15, 8.507059e+37  ;;  %v7125_v16 = vadd.f32 %v6745_v6, %v1522_v21 }
 0x4c1   :  { %v5388_v49 = vpop.eup %5387  ;;  %v1783_v29 = vsub.f32 1.0, %v1782_v63  ;;  %v4971_v32 = vmul.f32 -1.442695, %v1407_v60  ;;  %5391 = vtanh.f32 %v2241_v30  ;;  %v1779_v25 = vsel %vm1776_vm15, %v1778_v52, %v1774_v9  ;;  %v1524_v60 = vpop.f32.mrf.mxu2 }
 0x4c2   :  { %9313 = vst [vmem:[#allocation29_spill] sm:$0xff] %v7119_v11  ;;  %v7127_v12 = vpop.eup %5389  ;;  %v7129_v33 = vadd.f32 1.0, %v5388_v49  ;;  %v2321_v37 = vpack.c.bf16 %v7122_v61, %v7119_v11  ;;  %v2072_v40 = vsub.f32 1.0, %v2071_v42  ;;  %5393 = vrcp.f32 %v7114_v34 }
 0x4c3   :  { %9314 = vst [vmem:[#allocation30_spill] sm:$0xff] %v7122_v61  ;;  %v1784_v57 = vmul.f32 %v7089_v59, %v1783_v29  ;;  %v1797_v19 = vmul.f32 %v7127_v12, %v7073_v45  ;;  %v7138_v21 = vmul.f32 %v7068_v24, %v2057_v53  ;;  %v1790_v36 = vand.u32 2147483647, %v7046_v55 }
 0x4c4   :  { %5395 = vrcp.f32 %v7129_v33  ;;  %4988 = vmatmul.msk.bf16.gmra.mxu0 %vm75_vm0, %v2321_v37  ;;  %v1308_v20 = vadd.f32 %v6643_v17, %v1307_v8  ;;  %v2226_v15 = vmul.f32 %v1779_v25, %v6842_v43  ;;  %v7147_v29 = vadd.f32 1.0, %v5386_v1 }
 0x4c5   :  { %5397 = vpow2.f32 %v4971_v32  ;;  %v1785_v30 = vadd.f32 %v7089_v59, %v1784_v57  ;;  %vm1787_vm2 = vweird.f32 %v7089_v59  ;;  %v1792_v42 = vand.u32 2147483648, %v7046_v55  ;;  %v1309_v63 = vpop.f32.mrf.mxu0 }
 0x4c6   :  { %v1798_v9 = vsub.f32 1.0, %v1797_v19  ;;  %vm2046_vm4 = vweird.f32 %v7004_v26  ;;  %v7154_v8 = vmul.f32 %v7077_v62, %v2072_v40  ;;  %vm1786_vm13 = vweird.f32 %v7046_v55  ;;  %v1411_v19 = vpop.f32.mrf.mxu1 }
 0x4c7   :  { %v1805_v43 = vand.u32 2147483647, %v7073_v45  ;;  %v1410_v1 = vadd.f32 %v6648_v58, %v1409_v3  ;;  %v7159_v53 = vpop.eup %5391  ;;  %vm7162_vm1 = vcmp.eq.f32.partialorder %v1790_v36, 8.507059e+37  ;;  %v4956_v37 = vmul.f32 -1.442695, %v1308_v20  ;;  %vm7173_vm6 = vmor %vm1786_vm13, %vm1787_vm2 }
 0x4c8   :  { %v1799_v25 = vmul.f32 %v7127_v12, %v1798_v9  ;;  %v7167_v57 = vpop.eup %5393  ;;  %vm2045_vm3 = vweird.f32 %v6938_v18  ;;  %v2242_v55 = vadd.f32 %v2226_v15, %v7029_v5  ;;  %5399 = vrcp.f32 %v7147_v29 }
 0x4c9   :  { %v1807_v3 = vand.u32 2147483648, %v7073_v45  ;;  %v1310_v40 = vadd.f32 %v6643_v17, %v1309_v63  ;;  %v1789_v20 = vsel %vm7173_vm6, %v7089_v59, %v1785_v30  ;;  %v1793_v5 = vor.u32 1.1754944e-38, %v1792_v42  ;;  %v7199_v30 = vld [vmem:[%s9203_s5 + $0x5] ss:$0 sm:$0xff] }
 0x4ca   :  { %v7180_v36 = vpop.eup %5395  ;;  %vm1801_vm14 = vweird.f32 %v7073_v45  ;;  %5401 = vpow2.f32 %v4956_v37  ;;  %vm2060_vm15 = vweird.f32 %v6989_v50  ;;  %v2111_v9 = vand.u32 2147483648, %v7147_v29 }
 0x4cb   :  { %v5398_v15 = vpop.eup %5397  ;;  %vm7188_vm2 = vcmp.eq.f32.partialorder %v1805_v43, 8.507059e+37  ;;  %v1812_v17 = vmul.f32 %v7180_v36, %v7129_v33  ;;  %v4972_v63 = vmul.f32 -1.442695, %v1410_v1  ;;  %v1800_v58 = vadd.f32 %v7127_v12, %v1799_v25 }
 0x4cc   :  { %vm1802_vm13 = vweird.f32 %v7127_v12  ;;  %v4957_v59 = vmul.f32 -1.442695, %v1310_v40  ;;  %v1412_v42 = vadd.f32 %v7199_v30, %v1411_v19  ;;  %5403 = vtanh.f32 %v2242_v55 }
 0x4cd   :  { %v1794_v43 = vsel %vm7162_vm1, %v1793_v5, %v1789_v20  ;;  %v1808_v37 = vor.u32 1.1754944e-38, %v1807_v3  ;;  %v1813_v49 = vsub.f32 1.0, %v1812_v17  ;;  %v2273_v1 = vsub.f32 %v6064_v54, %v7159_v53  ;;  %vm7216_vm6 = vmor %vm1801_vm14, %vm1802_vm13  ;;  %v1527_v3 = vpop.f32.mrf.mxu2 }
 0x4ce   :  { %v2086_v25 = vmul.f32 %v7167_v57, %v7114_v34  ;;  %v7208_v40 = vadd.f32 1.0, %v5398_v15  ;;  %5405 = vpow2.f32 %v4957_v59  ;;  %v7210_v61 = vpop.eup %5399  ;;  %v7212_v11 = vor.u32 1.1754944e-38, %v2111_v9  ;;  %vm7240_vm14 = vmor %vm2045_vm3, %vm2046_vm4 }
 0x4cf   :  { %v1814_v55 = vmul.f32 %v7180_v36, %v1813_v49  ;;  %5407 = vpow2.f32 %v4972_v63  ;;  %v2044_v19 = vadd.f32 %v7004_v26, %v7092_v31  ;;  %v2227_v5 = vmul.f32 %v1794_v43, %v6846_v0 }
 0x4d0   :  { %v5402_v20 = vpop.eup %5401  ;;  %v1804_v15 = vsel %vm7216_vm6, %v7127_v12, %v1800_v58  ;;  %v7228_v45 = vadd.f32 %v6745_v6, %v1524_v60  ;;  %v4973_v9 = vmul.f32 -1.442695, %v1412_v42  ;;  %v2049_v49 = vand.u32 2147483647, %v6938_v18 }
 0x4d1   :  { %v7230_v17 = vadd.f32 1.0, %v5402_v20  ;;  %v2059_v63 = vadd.f32 %v7068_v24, %v7138_v21  ;;  %vm2061_vm1 = vweird.f32 %v7068_v24  ;;  %v2087_v31 = vsub.f32 1.0, %v2086_v25 }
 0x4d2   :  { %5409 = vrcp.f32 %v7208_v40  ;;  %vm1817_vm13 = vweird.f32 %v7180_v36  ;;  %v7247_v12 = vadd.f32 %v6745_v6, %v1527_v3  ;;  %v7249_v60 = vpop.eup %5403  ;;  %v1815_v21 = vadd.f32 %v7180_v36, %v1814_v55  ;;  %vm7265_vm3 = vmor %vm2060_vm15, %vm2061_vm1 }
 0x4d3   :  { %5411 = vrcp.f32 %v7230_v17  ;;  %v2048_v18 = vsel %vm7240_vm14, %v7004_v26, %v2044_v19  ;;  %v2064_v58 = vand.u32 2147483647, %v6989_v50  ;;  %v1809_v42 = vsel %vm7188_vm2, %v1808_v37, %v1804_v15 }
 0x4d4   :  { %v5406_v59 = vpop.eup %5405  ;;  %vm1816_vm4 = vweird.f32 %v7129_v33  ;;  %v1822_v6 = vand.u32 2147483648, %v7129_v33  ;;  %5413 = vpow2.f32 %v4973_v9  ;;  %v2243_v25 = vadd.f32 %v2227_v5, %v7105_v28 }
 0x4d5   :  { %v5408_v26 = vpop.eup %5407  ;;  %v1820_v32 = vand.u32 2147483647, %v7129_v33  ;;  %vm2050_vm6 = vcmp.eq.f32.partialorder %v2049_v49, 8.507059e+37  ;;  %v2063_v52 = vsel %vm7265_vm3, %v7068_v24, %v2059_v63  ;;  %v2101_v37 = vmul.f32 %v7210_v61, %v7147_v29  ;;  %vm7278_vm2 = vmor %vm1816_vm4, %vm1817_vm13 }
 0x4d6   :  { %v7282_v3 = vadd.f32 1.0, %v5406_v59  ;;  %v2053_v28 = vsel %vm2050_vm6, %v6987_v51, %v2048_v18  ;;  %v9329_v33 = vand.u32 2147483648, %v6989_v50  ;;  %v2228_v20 = vmul.f32 %v1809_v42, %v6854_v46 }
 0x4d7   :  { %v1819_v24 = vsel %vm7278_vm2, %v7180_v36, %v1815_v21  ;;  %vm2065_vm15 = vcmp.eq.f32.partialorder %v2064_v58, 8.507059e+37  ;;  %v9330_v5 = vsub.f32 %v6067_v47, %v7107_v35  ;;  %v1823_v49 = vor.u32 1.1754944e-38, %v1822_v6  ;;  %v1312_v36 = vpop.f32.mrf.mxu0 }
 0x4d8   :  { %v2067_v19 = vor.u32 1.1754944e-38, %v9329_v33  ;;  %v7294_v9 = vpop.eup %5409  ;;  %v7296_v63 = vadd.f32 1.0, %v5408_v26  ;;  %5415 = vrcp.f32 %v7282_v3  ;;  %v2088_v46 = vmul.f32 %v7167_v57, %v2087_v31  ;;  %v1414_v26 = vpop.f32.mrf.mxu1 }
 0x4d9   :  { %v2288_v15 = vmul.f32 %v9330_v5, %v2053_v28  ;;  %v5412_v50 = vpop.eup %5411  ;;  %5417 = vtanh.f32 %v2243_v25  ;;  %vm1821_vm1 = vcmp.eq.f32.partialorder %v1820_v32, 8.507059e+37  ;;  %vm2076_vm14 = vweird.f32 %v7077_v62 }
 0x4da   :  { %v2068_v51 = vsel %vm2065_vm15, %v2067_v19, %v2063_v52  ;;  %v5414_v21 = vpop.eup %5413  ;;  %v2274_v18 = vsub.f32 %v6099_v27, %v7249_v60  ;;  %v2126_v58 = vand.u32 2147483648, %v7208_v40  ;;  %v1824_v59 = vsel %vm1821_vm1, %v1823_v49, %v1819_v24 }
 0x4db   :  { %v2289_v0 = vmul.f32 %v2273_v1, %v2068_v51  ;;  %v1827_v42 = vmul.f32 %v5412_v50, %v7230_v17  ;;  %v2102_v6 = vsub.f32 1.0, %v2101_v37  ;;  %v2244_v43 = vadd.f32 %v2228_v20, %v7125_v16  ;;  %v7321_v16 = vld [vmem:[%s9203_s5 + $0x4] ss:$0 sm:$0xff] }
 0x4dc   :  { %v7307_v31 = vadd.f32 %v7107_v35, %v2288_v15  ;;  %vm2075_vm13 = vweird.f32 %v7000_v56  ;;  %v7315_v25 = vmul.f32 %v7294_v9, %v7208_v40  ;;  %5419 = vrcp.f32 %v7296_v63 }
 0x4dd   :  { %v7310_v1 = vadd.f32 %v7159_v53, %v2289_v0  ;;  %v1828_v32 = vsub.f32 1.0, %v1827_v42  ;;  %v1313_v35 = vadd.f32 %v7321_v16, %v1312_v36  ;;  %v2229_v53 = vmul.f32 %v1824_v59, %v6858_v23 }
 0x4de   :  { %v1837_v52 = vand.u32 2147483648, %v7230_v17  ;;  %v7326_v37 = vadd.f32 1.0, %v5414_v21  ;;  %v7330_v28 = vpop.eup %5415  ;;  %vm2090_vm4 = vweird.f32 %v7114_v34  ;;  %vm1832_vm3 = vweird.f32 %v5412_v50 }
 0x4df   :  { %v2322_v55 = vpack.c.bf16 %v7310_v1, %v7307_v31  ;;  %v1829_v33 = vmul.f32 %v5412_v50, %v1828_v32  ;;  %v1835_v19 = vand.u32 2147483647, %v7230_v17  ;;  %v4958_v20 = vmul.f32 -1.442695, %v1313_v35  ;;  %v7334_v24 = vpop.eup %5417 }
 0x4e0   :  { %v7337_v23 = vmul.f32 %v7210_v61, %v2102_v6  ;;  %5421 = vtanh.f32 %v2244_v43  ;;  %v1842_v5 = vmul.f32 %v7330_v28, %v7282_v3  ;;  %v1415_v15 = vadd.f32 %v7199_v30, %v1414_v26 }
 0x4e1   :  { %4989 = vmatmul.msk.bf16.gmra.mxu0 %vm75_vm0, %v2322_v55  ;;  %v2117_v49 = vsub.f32 1.0, %v7315_v25  ;;  %v1830_v51 = vadd.f32 %v5412_v50, %v1829_v33  ;;  %vm1831_vm6 = vweird.f32 %v7230_v17  ;;  %5423 = vpow2.f32 %v4958_v20  ;;  %v1416_v33 = vpop.f32.mrf.mxu1 }
 0x4e2   :  { %v2245_v0 = vadd.f32 %v2229_v53, %v7228_v45  ;;  %vm1833_vm2 = vmor %vm1831_vm6, %vm1832_vm3  ;;  %v1838_v36 = vor.u32 1.1754944e-38, %v1837_v52  ;;  %5425 = vrcp.f32 %v7326_v37  ;;  %v1843_v21 = vsub.f32 1.0, %v1842_v5  ;;  %v7347_v59 = vpop.eup %5419 }
 0x4e3   :  { %v2275_v42 = vsub.f32 %v6094_v41, %v7334_v24  ;;  %v1834_v6 = vsel %vm1833_vm2, %v5412_v50, %v1830_v51  ;;  %vm1836_vm15 = vcmp.eq.f32.partialorder %v1835_v19, 8.507059e+37  ;;  %v2074_v43 = vadd.f32 %v7077_v62, %v7154_v8  ;;  %vm7365_vm3 = vmor %vm2075_vm13, %vm2076_vm14 }
 0x4e4   :  { %v2141_v17 = vand.u32 2147483648, %v7296_v63  ;;  %v1839_v26 = vsel %vm1836_vm15, %v1838_v36, %v1834_v6  ;;  %v1844_v45 = vmul.f32 %v7330_v28, %v1843_v21  ;;  %v4974_v32 = vmul.f32 -1.442695, %v1415_v15 }
 0x4e5   :  { %v2156_v35 = vand.u32 2147483648, %v7326_v37  ;;  %v2079_v53 = vand.u32 2147483647, %v7000_v56  ;;  %v2089_v52 = vadd.f32 %v7167_v57, %v2088_v46  ;;  %vm2091_vm1 = vweird.f32 %v7167_v57  ;;  %v1314_v46 = vpop.f32.mrf.mxu0 }
 0x4e6   :  { %v7359_v55 = vpop.eup %5421  ;;  %5427 = vtanh.f32 %v2245_v0  ;;  %v7371_v50 = vmul.f32 %v7347_v59, %v7296_v63  ;;  %vm1846_vm6 = vweird.f32 %v7282_v3  ;;  %vm1847_vm2 = vweird.f32 %v7330_v28  ;;  %vm7391_vm14 = vmor %vm2090_vm4, %vm2091_vm1 }
 0x4e7   :  { %v5424_v19 = vpop.eup %5423  ;;  %v2230_v20 = vmul.f32 %v1839_v26, %v6863_v7  ;;  %v1315_v56 = vadd.f32 %v7321_v16, %v1314_v46  ;;  %v2078_v5 = vsel %vm7365_vm3, %v7077_v62, %v2074_v43  ;;  %v2094_v15 = vand.u32 2147483647, %v7114_v34  ;;  %vm7415_vm1 = vmor %vm1846_vm6, %vm1847_vm2 }
 0x4e8   :  { %v7381_v51 = vpop.eup %5425  ;;  %v1845_v0 = vadd.f32 %v7330_v28, %v1844_v45  ;;  %v7384_v36 = vadd.f32 1.0, %v5424_v19  ;;  %5429 = vpow2.f32 %v4974_v32  ;;  %v1417_v21 = vadd.f32 %v7199_v30, %v1416_v33  ;;  %v1529_v33 = vpop.f32.mrf.mxu2 }
 0x4e9   :  { %vm2106_vm13 = vweird.f32 %v7210_v61  ;;  %v1852_v62 = vand.u32 2147483648, %v7282_v3  ;;  %v4959_v6 = vmul.f32 -1.442695, %v1315_v56  ;;  %vm2080_vm15 = vcmp.eq.f32.partialorder %v2079_v53, 8.507059e+37 }
 0x4ea   :  { %v2093_v43 = vsel %vm7391_vm14, %v7167_v57, %v2089_v52  ;;  %v1850_v26 = vand.u32 2147483647, %v7282_v3  ;;  %5431 = vrcp.f32 %v7384_v36  ;;  %v2083_v45 = vsel %vm2080_vm15, %v7095_v14, %v2078_v5 }
 0x4eb   :  { %v9335_v32 = vand.u32 2147483648, %v7114_v34  ;;  %vm2105_vm4 = vweird.f32 %v7147_v29  ;;  %v2246_v46 = vadd.f32 %v2230_v20, %v7247_v12  ;;  %v7409_v53 = vmul.f32 %v7381_v51, %v7326_v37 }
 0x4ec   :  { %vm2095_vm3 = vcmp.eq.f32.partialorder %v2094_v15, 8.507059e+37  ;;  %v2290_v14 = vmul.f32 %v2274_v18, %v2083_v45  ;;  %v7422_v34 = vpop.eup %5427  ;;  %vm2120_vm14 = vweird.f32 %v7208_v40  ;;  %v1849_v12 = vsel %vm7415_vm1, %v7330_v28, %v1845_v0  ;;  %v9338_v15 = vld [vmem:[#allocation10_spill] sm:$0xff]  ;;  %v7440_v28 = vld [vmem:[%s9203_s5 + $0x6] ss:$0 sm:$0xff]  ;;  %vm7476_vm1 = vmor %vm2105_vm4, %vm2106_vm13 }
 0x4ed   :  { %v2097_v8 = vor.u32 1.1754944e-38, %v9335_v32  ;;  %5433 = vpow2.f32 %v4959_v6  ;;  %v4975_v52 = vmul.f32 -1.442695, %v1417_v21  ;;  %v2118_v19 = vmul.f32 %v7294_v9, %v2117_v49  ;;  %v1419_v32 = vpop.f32.mrf.mxu1 }
 0x4ee   :  { %v7431_v20 = vor.u32 1.1754944e-38, %v2141_v17  ;;  %v1853_v56 = vor.u32 1.1754944e-38, %v1852_v62  ;;  %v5430_v18 = vpop.eup %5429  ;;  %v2276_v7 = vsub.f32 %v9338_v15, %v7359_v55  ;;  %v7435_v45 = vor.u32 1.1754944e-38, %v2156_v35  ;;  %v9339_v35 = vld [vmem:[#allocation9_spill] sm:$0xff] }
 0x4ef   :  { %v2098_v3 = vsel %vm2095_vm3, %v2097_v8, %v2093_v43  ;;  %v1530_v0 = vadd.f32 %v7440_v28, %v1529_v33  ;;  %vm1851_vm6 = vcmp.eq.f32.partialorder %v1850_v26, 8.507059e+37  ;;  %5435 = vpow2.f32 %v4975_v52 }
 0x4f0   :  { %v2291_v5 = vmul.f32 %v2275_v42, %v2098_v3  ;;  %v1854_v25 = vsel %vm1851_vm6, %v1853_v56, %v1849_v12  ;;  %v7444_v49 = vadd.f32 %v7249_v60, %v2290_v14  ;;  %v7449_v17 = vpop.eup %5431  ;;  %v2277_v21 = vsub.f32 %v9339_v35, %v7422_v34 }
 0x4f1   :  { %v2132_v62 = vsub.f32 1.0, %v7371_v50  ;;  %5437 = vtanh.f32 %v2246_v46  ;;  %v2147_v6 = vsub.f32 1.0, %v7409_v53  ;;  %v1857_v43 = vmul.f32 %v7449_v17, %v7384_v36 }
 0x4f2   :  { %v7447_v42 = vadd.f32 %v7334_v24, %v2291_v5  ;;  %v7457_v26 = vadd.f32 1.0, %v5430_v18  ;;  %v1317_v24 = vpop.f32.mrf.mxu0  ;;  %v2104_v8 = vadd.f32 %v7210_v61, %v7337_v23  ;;  %v2231_v57 = vmul.f32 %v1854_v25, %v6866_v2 }
 0x4f3   :  { %v5434_v33 = vpop.eup %5433  ;;  %v1318_v50 = vadd.f32 %v7321_v16, %v1317_v24  ;;  %v2119_v46 = vadd.f32 %v7294_v9, %v2118_v19  ;;  %vm2121_vm2 = vweird.f32 %v7294_v9  ;;  %v1858_v53 = vsub.f32 1.0, %v1857_v43 }
 0x4f4   :  { %v2323_v60 = vpack.c.bf16 %v7447_v42, %v7444_v49  ;;  %vm1861_vm15 = vweird.f32 %v7384_v36  ;;  %v7468_v14 = vadd.f32 1.0, %v5434_v33  ;;  %v2109_v12 = vand.u32 2147483647, %v7147_v29  ;;  %vm7493_vm13 = vmor %vm2120_vm14, %vm2121_vm2  ;;  %v1532_v33 = vpop.f32.mrf.mxu2 }
 0x4f5   :  { %v1867_v23 = vand.u32 2147483648, %v7384_v36  ;;  %v4960_v52 = vmul.f32 -1.442695, %v1318_v50  ;;  %v1420_v3 = vadd.f32 %v7199_v30, %v1419_v32  ;;  %v2124_v19 = vand.u32 2147483647, %v7208_v40  ;;  %v5436_v56 = vpop.eup %5435 }
 0x4f6   :  { %4990 = vmatmul.msk.bf16.gmra.mxu0 %vm75_vm0, %v2323_v60  ;;  %v1859_v5 = vmul.f32 %v7449_v17, %v1858_v53  ;;  %vm1862_vm3 = vweird.f32 %v7449_v17  ;;  %5439 = vrcp.f32 %v7468_v14  ;;  %v2108_v29 = vsel %vm7476_vm1, %v7210_v61, %v2104_v8 }
 0x4f7   :  { %v7497_v25 = vpop.eup %5437  ;;  %v2247_v43 = vadd.f32 %v2231_v57, %v1530_v0  ;;  %v1865_v60 = vand.u32 2147483647, %v7384_v36  ;;  %v7500_v24 = vadd.f32 1.0, %v5436_v56  ;;  %v2123_v32 = vsel %vm7493_vm13, %v7294_v9, %v2119_v46  ;;  %vm7513_vm14 = vmor %vm1861_vm15, %vm1862_vm3 }
 0x4f8   :  { %v1860_v61 = vadd.f32 %v7449_v17, %v1859_v5  ;;  %5441 = vpow2.f32 %v4960_v52  ;;  %vm2110_vm4 = vcmp.eq.f32.partialorder %v2109_v12, 8.507059e+37  ;;  %v2127_v8 = vor.u32 1.1754944e-38, %v2126_v58  ;;  %v1421_v52 = vpop.f32.mrf.mxu1 }
 0x4f9   :  { %5443 = vrcp.f32 %v7457_v26  ;;  %v4976_v57 = vmul.f32 -1.442695, %v1420_v3  ;;  %v2113_v9 = vsel %vm2110_vm4, %v7212_v11, %v2108_v29  ;;  %vm2125_vm6 = vcmp.eq.f32.partialorder %v2124_v19, 8.507059e+37 }
 0x4fa   :  { %vm2150_vm2 = vweird.f32 %v7326_v37  ;;  %v1864_v40 = vsel %vm7513_vm14, %v7449_v17, %v1860_v61  ;;  %v1868_v58 = vor.u32 1.1754944e-38, %v1867_v23  ;;  %v2128_v50 = vsel %vm2125_vm6, %v2127_v8, %v2123_v32 }
 0x4fb   :  { %v2292_v46 = vmul.f32 %v2276_v7, %v2113_v9  ;;  %vm2136_vm1 = vweird.f32 %v7347_v59  ;;  %vm1866_vm13 = vcmp.eq.f32.partialorder %v1865_v60, 8.507059e+37  ;;  %5445 = vrcp.f32 %v7500_v24  ;;  %v1319_v7 = vpop.f32.mrf.mxu0 }
 0x4fc   :  { %v2293_v36 = vmul.f32 %v2277_v21, %v2128_v50  ;;  %v5440_v53 = vpop.eup %5439  ;;  %v2133_v12 = vmul.f32 %v7347_v59, %v2132_v62  ;;  %vm2135_vm15 = vweird.f32 %v7296_v63  ;;  %5447 = vtanh.f32 %v2247_v43 }
 0x4fd   :  { %v1533_v11 = vadd.f32 %v7440_v28, %v1532_v33  ;;  %v1869_v2 = vsel %vm1866_vm13, %v1868_v58, %v1864_v40  ;;  %v2148_v17 = vmul.f32 %v7381_v51, %v2147_v6  ;;  %v1872_v23 = vmul.f32 %v5440_v53, %v7468_v14  ;;  %v9346_v33 = vld [vmem:[#allocation11_spill] sm:$0xff]  ;;  %v7609_v40 = vld [vmem:[%s9203_s5 + $0x7] ss:$0 sm:$0xff] }
 0x4fe   :  { %5449 = vpow2.f32 %v4976_v57  ;;  %v7530_v3 = vadd.f32 %v7422_v34, %v2293_v36  ;;  %v5442_v21 = vpop.eup %5441  ;;  %vm2151_vm3 = vweird.f32 %v7381_v51  ;;  %v2171_v62 = vand.u32 2147483648, %v7457_v26 }
 0x4ff   :  { %v1320_v19 = vadd.f32 %v7321_v16, %v1319_v7  ;;  %v7536_v56 = vadd.f32 %v7359_v55, %v2292_v46  ;;  %v7538_v5 = vpop.eup %5443  ;;  %v2232_v6 = vmul.f32 %v1869_v2, %v6884_v13  ;;  %v1873_v29 = vsub.f32 1.0, %v1872_v23  ;;  %vm7565_vm14 = vmor %vm2150_vm2, %vm2151_vm3  ;;  %v1534_v2 = vpop.f32.mrf.mxu2 }
 0x500   :  { %v1880_v18 = vand.u32 2147483647, %v7468_v14  ;;  %v7542_v43 = vadd.f32 1.0, %v5442_v21  ;;  %v1882_v34 = vand.u32 2147483648, %v7468_v14  ;;  %v1422_v32 = vadd.f32 %v7199_v30, %v1421_v52  ;;  %vm7580_vm2 = vmor %vm2135_vm15, %vm2136_vm1 }
 0x501   :  { %v4961_v60 = vmul.f32 -1.442695, %v1320_v19  ;;  %v2324_v16 = vpack.c.bf16 %v7530_v3, %v7536_v56  ;;  %v7548_v61 = vpop.eup %5445  ;;  %v1874_v55 = vmul.f32 %v5440_v53, %v1873_v29  ;;  %vm1877_vm4 = vweird.f32 %v5440_v53 }
 0x502   :  { %5451 = vrcp.f32 %v7542_v43  ;;  %v2149_v13 = vadd.f32 %v7381_v51, %v2148_v17  ;;  %v7552_v8 = vpop.eup %5447  ;;  %v2278_v0 = vsub.f32 %v9346_v33, %v7497_v25  ;;  %v7558_v57 = vmul.f32 %v7538_v5, %v7457_v26 }
 0x503   :  { %5453 = vpow2.f32 %v4961_v60  ;;  %v2134_v30 = vadd.f32 %v7347_v59, %v2133_v12  ;;  %v2248_v58 = vadd.f32 %v2232_v6, %v1533_v11  ;;  %v1875_v50 = vadd.f32 %v5440_v53, %v1874_v55 }
 0x504   :  { %v5450_v9 = vpop.eup %5449  ;;  %vm1876_vm6 = vweird.f32 %v7468_v14  ;;  %v2154_v46 = vand.u32 2147483647, %v7326_v37  ;;  %v2176_v36 = vmul.f32 %v7548_v61, %v7500_v24  ;;  %v1883_v12 = vor.u32 1.1754944e-38, %v1882_v34  ;;  %v9351_v37 = vld [vmem:[#allocation12_spill] sm:$0xff]  ;;  %v1607_v34 = vpop.f32.mrf.mxu3 }
 0x505   :  { %vm1878_vm13 = vmor %vm1876_vm6, %vm1877_vm4  ;;  %v4977_v17 = vmul.f32 -1.442695, %v1422_v32  ;;  %v2139_v23 = vand.u32 2147483647, %v7296_v63  ;;  %v2279_v11 = vsub.f32 %v9351_v37, %v7552_v8  ;;  %vm1881_vm3 = vcmp.eq.f32.partialorder %v1880_v18, 8.507059e+37 }
 0x506   :  { %4991 = vmatmul.msk.bf16.gmra.mxu0 %vm75_vm0, %v2324_v16  ;;  %v1879_v7 = vsel %vm1878_vm13, %v5440_v53, %v1875_v50  ;;  %v2153_v52 = vsel %vm7565_vm14, %v7381_v51, %v2149_v13  ;;  %v7589_v19 = vadd.f32 1.0, %v5450_v9  ;;  %v2138_v63 = vsel %vm7580_vm2, %v7347_v59, %v2134_v30 }
 0x507   :  { %v1884_v21 = vsel %vm1881_vm3, %v1883_v12, %v1879_v7  ;;  %5455 = vpow2.f32 %v4977_v17  ;;  %v1535_v29 = vadd.f32 %v7440_v28, %v1534_v2  ;;  %vm2155_vm1 = vcmp.eq.f32.partialorder %v2154_v46, 8.507059e+37  ;;  %v7625_v46 = vld [vmem:[%s9203_s5 + $0x9] ss:$0 sm:$0xff]  ;;  %v1537_v7 = vpop.f32.mrf.mxu2 }
 0x508   :  { %v7594_v6 = vpop.eup %5451  ;;  %5457 = vtanh.f32 %v2248_v58  ;;  %v2233_v53 = vmul.f32 %v1884_v21, %v6922_v4  ;;  %v2177_v60 = vsub.f32 1.0, %v2176_v36  ;;  %vm2140_vm15 = vcmp.eq.f32.partialorder %v2139_v23, 8.507059e+37  ;;  %v2535_v23 = vpop.f32.mrf.mxu1 }
 0x509   :  { %v5454_v18 = vpop.eup %5453  ;;  %v1887_v51 = vmul.f32 %v7594_v6, %v7542_v43  ;;  %v2158_v32 = vsel %vm2155_vm1, %v7435_v45, %v2153_v52  ;;  %v2143_v59 = vsel %vm2140_vm15, %v7431_v20, %v2138_v63  ;;  %v2162_v30 = vsub.f32 1.0, %v7558_v57 }
 0x50a   :  { %v2249_v16 = vadd.f32 %v2233_v53, %v1535_v29  ;;  %v7601_v55 = vadd.f32 1.0, %v5454_v18  ;;  %v2295_v13 = vmul.f32 %v2279_v11, %v2158_v32  ;;  %5459 = vrcp.f32 %v7589_v19 }
 0x50b   :  { %v1888_v4 = vsub.f32 1.0, %v1887_v51  ;;  %v2294_v9 = vmul.f32 %v2278_v0, %v2143_v59  ;;  %v1608_v58 = vadd.f32 %v7609_v40, %v1607_v34  ;;  %v7614_v45 = vor.u32 1.1754944e-38, %v2171_v62  ;;  %v9354_v59 = vld [vmem:[#allocation15_spill] sm:$0xff] }
 0x50c   :  { %5461 = vtanh.f32 %v2249_v16  ;;  %v1897_v20 = vand.u32 2147483648, %v7542_v43  ;;  %vm2165_vm4 = vweird.f32 %v7457_v26  ;;  %v2178_v57 = vmul.f32 %v7548_v61, %v2177_v60  ;;  %v2378_v62 = vpop.f32.mrf.mxu0 }
 0x50d   :  { %v5456_v50 = vpop.eup %5455  ;;  %v1889_v0 = vmul.f32 %v7594_v6, %v1888_v4  ;;  %vm1892_vm14 = vweird.f32 %v7594_v6  ;;  %5463 = vrcp.f32 %v7601_v55  ;;  %v2186_v2 = vand.u32 2147483648, %v7500_v24 }
 0x50e   :  { %v7627_v36 = vpop.eup %5457  ;;  %v1895_v12 = vand.u32 2147483647, %v7542_v43  ;;  %v7631_v17 = vadd.f32 1.0, %v5456_v50  ;;  %v7634_v14 = vadd.f32 %v7552_v8, %v2295_v13  ;;  %v2163_v11 = vmul.f32 %v7538_v5, %v2162_v30 }
 0x50f   :  { %v1890_v52 = vadd.f32 %v7594_v6, %v1889_v0  ;;  %vm1891_vm6 = vweird.f32 %v7542_v43  ;;  %v7640_v21 = vadd.f32 %v7497_v25, %v2294_v9  ;;  %vm2166_vm13 = vweird.f32 %v7538_v5  ;;  %v7654_v43 = vld [vmem:[%s9203_s5 + $0x8] ss:$0 sm:$0xff] }
 0x510   :  { %vm2181_vm2 = vweird.f32 %v7548_v61  ;;  %vm7646_vm3 = vmor %vm1891_vm6, %vm1892_vm14  ;;  %v1898_v8 = vor.u32 1.1754944e-38, %v1897_v20  ;;  %5465 = vrcp.f32 %v7631_v17  ;;  %v7656_v25 = vpop.eup %5459  ;;  %v7662_v53 = vadd.f32 %v7625_v46, %v2535_v23 }
 0x511   :  { %v1894_v29 = vsel %vm7646_vm3, %v7594_v6, %v1890_v52  ;;  %v2325_v18 = vpack.c.bf16 %v7634_v14, %v7640_v21  ;;  %v2179_v34 = vadd.f32 %v7548_v61, %v2178_v57  ;;  %vm2180_vm1 = vweird.f32 %v7500_v24 }
 0x512   :  { %v5462_v60 = vpop.eup %5461  ;;  %v2187_v51 = vor.u32 1.1754944e-38, %v2186_v2  ;;  %v1538_v32 = vadd.f32 %v7440_v28, %v1537_v7  ;;  %vm1896_vm15 = vcmp.eq.f32.partialorder %v1895_v12, 8.507059e+37  ;;  %v2280_v13 = vsub.f32 %v9354_v59, %v7627_v36  ;;  %vm7675_vm14 = vmor %vm2180_vm1, %vm2181_vm2  ;;  %v9357_v2 = vld [vmem:[#allocation16_spill] sm:$0xff] }
 0x513   :  { %v5464_v16 = vpop.eup %5463  ;;  %v1899_v6 = vsel %vm1896_vm15, %v1898_v8, %v1894_v29  ;;  %v2164_v30 = vadd.f32 %v7538_v5, %v2163_v11  ;;  %v2184_v4 = vand.u32 2147483647, %v7500_v24  ;;  %v2191_v20 = vmul.f32 %v7656_v25, %v7589_v19  ;;  %vm7697_vm2 = vmor %vm2165_vm4, %vm2166_vm13 }
 0x514   :  { %v1902_v50 = vmul.f32 %v5464_v16, %v7601_v55  ;;  %v2169_v57 = vand.u32 2147483647, %v7457_v26  ;;  %v2379_v0 = vadd.f32 %v7654_v43, %v2378_v62  ;;  %v2281_v12 = vsub.f32 %v9357_v2, %v5462_v60  ;;  %v2380_v29 = vpop.f32.mrf.mxu0 }
 0x515   :  { %vm1906_vm6 = vweird.f32 %v7601_v55  ;;  %v2183_v24 = vsel %vm7675_vm14, %v7548_v61, %v2179_v34  ;;  %v2556_v23 = vperm.slane %v7662_v53, 0  ;;  %v2234_v7 = vmul.f32 %v1899_v6, %v1608_v58  ;;  %v1609_v58 = vpop.f32.mrf.mxu3 }
 0x516   :  { %4992 = vmatmul.msk.bf16.gmra.mxu0 %vm75_vm0, %v2325_v18  ;;  %v7691_v11 = vpop.eup %5465  ;;  %v1903_v52 = vsub.f32 1.0, %v1902_v50  ;;  %v1910_v63 = vand.u32 2147483647, %v7601_v55  ;;  %v1912_v8 = vand.u32 2147483648, %v7601_v55  ;;  %v2168_v18 = vsel %vm7697_vm2, %v7538_v5, %v2164_v30  ;;  %v1539_v30 = vpop.f32.mrf.mxu2 }
 0x517   :  { %v2206_v61 = vmul.f32 %v7691_v11, %v7631_v17  ;;  %vm2185_vm3 = vcmp.eq.f32.partialorder %v2184_v4, 8.507059e+37  ;;  %v2588_v26 = vmul.f32 %v2556_v23, %v2379_v0  ;;  %vm1907_vm4 = vweird.f32 %v5464_v16 }
 0x518   :  { %v1904_v34 = vmul.f32 %v5464_v16, %v1903_v52  ;;  %vm2170_vm13 = vcmp.eq.f32.partialorder %v2169_v57, 8.507059e+37  ;;  %v2188_v9 = vsel %vm2185_vm3, %v2187_v51, %v2183_v24  ;;  %v2381_v59 = vadd.f32 %v7654_v43, %v2380_v29  ;;  %vm1908_vm1 = vmor %vm1906_vm6, %vm1907_vm4 }
 0x519   :  { %v2297_v6 = vmul.f32 %v2281_v12, %v2188_v9  ;;  %v2604_v50 = vsel %vm75_vm0, %v2588_v26, 0.0  ;;  %v2542_v2 = vrot.slane %v7662_v53, 1  ;;  %v2192_v33 = vsub.f32 1.0, %v2191_v20  ;;  %v9363_v9 = vld [vmem:[#allocation14_spill] sm:$0xff] }
 0x51a   :  { %v2250_v37 = vadd.f32 %v2234_v7, %v1538_v32  ;;  %v1905_v15 = vadd.f32 %v5464_v16, %v1904_v34  ;;  %v2173_v62 = vsel %vm2170_vm13, %v7614_v45, %v2168_v18  ;;  %2605 = vadd.xlane.f32.xlu1 %v2604_v50  ;;  %v2207_v5 = vsub.f32 1.0, %v2206_v61 }
 0x51b   :  { %v1913_v51 = vor.u32 1.1754944e-38, %v1912_v8  ;;  %v2296_v4 = vmul.f32 %v2280_v13, %v2173_v62  ;;  %v2557_v57 = vperm.slane %v2542_v2, 0  ;;  %v1610_v0 = vadd.f32 %v7609_v40, %v1609_v58 }
 0x51c   :  { %v1909_v12 = vsel %vm1908_vm1, %v5464_v16, %v1905_v15  ;;  %vm1911_vm15 = vcmp.eq.f32.partialorder %v1910_v63, 8.507059e+37  ;;  %v7716_v20 = vadd.f32 %v5462_v60, %v2297_v6  ;;  %5467 = vtanh.f32 %v2250_v37  ;;  %v9362_v63 = vld [vmem:[#allocation13_spill] sm:$0xff] }
 0x51d   :  { %v1914_v24 = vsel %vm1911_vm15, %v1913_v51, %v1909_v12  ;;  %v2589_v32 = vmul.f32 %v2557_v57, %v2381_v59  ;;  %v1540_v45 = vadd.f32 %v7440_v28, %v1539_v30  ;;  %v2193_v7 = vmul.f32 %v7656_v25, %v2192_v33 }
 0x51e   :  { %v2235_v23 = vmul.f32 %v1914_v24, %v1610_v0  ;;  %v2208_v55 = vmul.f32 %v7691_v11, %v2207_v5  ;;  %v7722_v52 = vadd.f32 %v7627_v36, %v2296_v4  ;;  %vm2196_vm14 = vweird.f32 %v7656_v25 }
 0x51f   :  { %v2607_v13 = vsel %vm75_vm0, %v2589_v32, 0.0  ;;  %vm2211_vm6 = vweird.f32 %v7691_v11  ;;  %v2194_v28 = vadd.f32 %v7656_v25, %v2193_v7  ;;  %vm2195_vm2 = vweird.f32 %v7589_v19 }
 0x520   :  { %v2251_v40 = vadd.f32 %v2235_v23, %v1540_v45  ;;  %2608 = vadd.xlane.f32.xlu2 %v2607_v13  ;;  %v2326_v15 = vpack.c.bf16 %v7716_v20, %v7722_v52  ;;  %v2209_v33 = vadd.f32 %v7691_v11, %v2208_v55  ;;  %v2201_v36 = vand.u32 2147483648, %v7589_v19  ;;  %vm7734_vm3 = vmor %vm2195_vm2, %vm2196_vm14 }
 0x521   :  { %v2216_v60 = vand.u32 2147483648, %v7631_v17  ;;  %vm2210_vm4 = vweird.f32 %v7631_v17  ;;  %v2199_v59 = vand.u32 2147483647, %v7589_v19  ;;  %v2214_v2 = vand.u32 2147483647, %v7631_v17 }
 0x522   :  { %5469 = vtanh.f32 %v2251_v40  ;;  %v5468_v37 = vpop.eup %5467  ;;  %vm2212_vm13 = vmor %vm2210_vm4, %vm2211_vm6  ;;  %v2198_v29 = vsel %vm7734_vm3, %v7656_v25, %v2194_v28  ;;  %v2202_v26 = vor.u32 1.1754944e-38, %v2201_v36  ;;  %v2544_v12 = vrot.slane %v7662_v53, 3 }
 0x523   :  { %v2282_v8 = vsub.f32 %v9362_v63, %v5468_v37  ;;  %v2213_v61 = vsel %vm2212_vm13, %v7691_v11, %v2209_v33  ;;  %v2217_v34 = vor.u32 1.1754944e-38, %v2216_v60  ;;  %vm2200_vm1 = vcmp.eq.f32.partialorder %v2199_v59, 8.507059e+37 }
 0x524   :  { %vm2215_vm15 = vcmp.eq.f32.partialorder %v2214_v2, 8.507059e+37  ;;  %v2203_v6 = vsel %vm2200_vm1, %v2202_v26, %v2198_v29  ;;  %v2543_v11 = vrot.slane %v7662_v53, 2  ;;  %v2559_v45 = vperm.slane %v2544_v12, 0 }
 0x525   :  { %v2218_v19 = vsel %vm2215_vm15, %v2217_v34, %v2213_v61  ;;  %v2298_v50 = vmul.f32 %v2282_v8, %v2203_v6  ;;  %v2545_v55 = vrot.slane %v7662_v53, 4  ;;  %v2547_v8 = vrot.slane %v7662_v53, 6 }
 0x526   :  { %4993 = vmatmul.msk.bf16.gmra.mxu0 %vm75_vm0, %v2326_v15  ;;  %v2558_v4 = vperm.slane %v2543_v11, 0 }
 0x527   :  { %v7750_v5 = vadd.f32 %v5468_v37, %v2298_v50  ;;  %v2560_v15 = vperm.slane %v2545_v55, 0  ;;  %v2546_v37 = vrot.slane %v7662_v53, 5 }
 0x528   :  { %v5470_v18 = vpop.eup %5469 }
 0x529   :  { %v2283_v58 = vsub.f32 %v9363_v9, %v5470_v18  ;;  %v2561_v16 = vperm.slane %v2546_v37, 0 }
 0x52b   :  { %v2299_v17 = vmul.f32 %v2283_v58, %v2218_v19  ;;  %v2548_v58 = vrot.slane %v7662_v53, 7 }
 0x52d   :  { %v7748_v62 = vadd.f32 %v5470_v18, %v2299_v17  ;;  %v2562_v18 = vperm.slane %v2547_v8, 0  ;;  %v2563_v50 = vperm.slane %v2548_v58, 0  ;;  %v2537_v17 = vpop.f32.mrf.mxu1 }
 0x52e   :  { %v7773_v11 = vadd.f32 %v7625_v46, %v2537_v17 }
 0x52f   :  { %v2327_v25 = vpack.c.bf16 %v7748_v62, %v7750_v5 }
 0x530   :  { %v2549_v12 = vrot.slane %v7773_v11, 1 }
 0x536   :  { %4994 = vmatmul.msk.bf16.gmra.mxu0 %vm75_vm0, %v2327_v25 }
 0x541   :  { %v2383_v30 = vpop.f32.mrf.mxu0 }
 0x542   :  { %v2384_v51 = vadd.f32 %v7654_v43, %v2383_v30 }
 0x544   :  { %v2590_v57 = vmul.f32 %v2558_v4, %v2384_v51 }
 0x546   :  { %v2610_v0 = vsel %vm75_vm0, %v2590_v57, 0.0  ;;  %v2564_v57 = vperm.slane %v7773_v11, 0 }
 0x547   :  { %2611 = vadd.xlane.f32.xlu0 %v2610_v0 }
 0x549   :  { %v2385_v24 = vpop.f32.mrf.mxu0 }
 0x54a   :  { %v2386_v32 = vadd.f32 %v7654_v43, %v2385_v24 }
 0x54c   :  { %v2591_v23 = vmul.f32 %v2559_v45, %v2386_v32  ;;  %v2565_v45 = vperm.slane %v2549_v12, 0 }
 0x54e   :  { %v2613_v7 = vsel %vm75_vm0, %v2591_v23, 0.0 }
 0x54f   :  { %2614 = vadd.xlane.f32.xlu1 %v2613_v7 }
 0x55e   :  { %v2388_v13 = vpop.f32.mrf.mxu0 }
 0x55f   :  { %v2389_v40 = vadd.f32 %v7654_v43, %v2388_v13  ;;  %v2550_v13 = vrot.slane %v7773_v11, 2 }
 0x561   :  { %v2592_v28 = vmul.f32 %v2560_v15, %v2389_v40  ;;  %v2566_v37 = vperm.slane %v2550_v13, 0 }
 0x563   :  { %v2616_v33 = vsel %vm75_vm0, %v2592_v28, 0.0 }
 0x564   :  { %2617 = vadd.xlane.f32.xlu2 %v2616_v33 }
 0x566   :  { %v2390_v36 = vpop.f32.mrf.mxu0 }
 0x567   :  { %v2391_v60 = vadd.f32 %v7654_v43, %v2390_v36 }
 0x569   :  { %v2593_v59 = vmul.f32 %v2561_v16, %v2391_v60 }
 0x56b   :  { %v2619_v2 = vsel %vm75_vm0, %v2593_v59, 0.0 }
 0x56c   :  { %2620 = vadd.xlane.f32.xlu1 %v2619_v2 }
 0x573   :  { %v2393_v29 = vpop.f32.mrf.mxu0 }
 0x574   :  { %v2394_v61 = vadd.f32 %v7654_v43, %v2393_v29 }
 0x576   :  { %v2594_v26 = vmul.f32 %v2562_v18, %v2394_v61  ;;  %v2551_v61 = vrot.slane %v7773_v11, 3 }
 0x578   :  { %v2622_v34 = vsel %vm75_vm0, %v2594_v26, 0.0 }
 0x579   :  { %2623 = vadd.xlane.f32.xlu0 %v2622_v34 }
 0x57b   :  { %v2395_v6 = vpop.f32.mrf.mxu0 }
 0x57c   :  { %v2396_v19 = vadd.f32 %v7654_v43, %v2395_v6 }
 0x57e   :  { %v2595_v25 = vmul.f32 %v2563_v50, %v2396_v19  ;;  %v2567_v50 = vperm.slane %v2551_v61, 0 }
 0x580   :  { %v2625_v30 = vsel %vm75_vm0, %v2595_v25, 0.0 }
 0x581   :  { %2626 = vadd.xlane.f32.xlu2 %v2625_v30 }
 0x583   :  { %v2398_v51 = vpop.f32.mrf.mxu0 }
 0x584   :  { %v2399_v4 = vadd.f32 %v7654_v43, %v2398_v51 }
 0x586   :  { %v2596_v0 = vmul.f32 %v2564_v57, %v2399_v4 }
 0x588   :  { %v2628_v53 = vsel %vm75_vm0, %v2596_v0, 0.0  ;;  %v2552_v0 = vrot.slane %v7773_v11, 4 }
 0x589   :  { %2629 = vadd.xlane.f32.xlu1 %v2628_v53 }
 0x58b   :  { %v2400_v24 = vpop.f32.mrf.mxu0 }
 0x58c   :  { %v2401_v32 = vadd.f32 %v7654_v43, %v2400_v24 }
 0x58d   :  { %v2606_v23 = vpop.xlane.xlu1 %2605 }
 0x58e   :  { %v2597_v46 = vmul.f32 %v2565_v45, %v2401_v32  ;;  %v2652_v7 = vmul.f32 0.17677669, %v2606_v23  ;;  %v2568_v45 = vperm.slane %v2552_v0, 0 }
 0x590   :  { %v2631_v55 = vsel %vm75_vm0, %v2597_v46, 0.0  ;;  %v2668_v40 = vrot.slane %v2652_v7, 4 }
 0x591   :  { %2632 = vadd.xlane.f32.xlu0 %v2631_v55  ;;  %v2553_v55 = vrot.slane %v7773_v11, 5 }
 0x592   :  { %v2669_v28 = vmax.f32 %v2652_v7, %v2668_v40 }
 0x593   :  { %v2403_v15 = vpop.f32.mrf.mxu0  ;;  %v2609_v36 = vpop.xlane.xlu2 %2608 }
 0x594   :  { %v2404_v33 = vadd.f32 %v7654_v43, %v2403_v15  ;;  %v2670_v60 = vrot.slane %v2669_v28, 2  ;;  %v2653_v16 = vmul.f32 0.17677669, %v2609_v36 }
 0x596   :  { %v2598_v59 = vmul.f32 %v2566_v37, %v2404_v33  ;;  %v2671_v2 = vmax.f32 %v2669_v28, %v2670_v60  ;;  %v2674_v8 = vrot.slane %v2653_v16, 4  ;;  %v2569_v33 = vperm.slane %v2553_v55, 0 }
 0x598   :  { %v2634_v29 = vsel %vm75_vm0, %v2598_v59, 0.0  ;;  %v2672_v18 = vrot.slane %v2671_v2, 1  ;;  %v2675_v26 = vmax.f32 %v2653_v16, %v2674_v8 }
 0x599   :  { %2635 = vadd.xlane.f32.xlu2 %v2634_v29 }
 0x59a   :  { %v2673_v58 = vmax.f32 %v2671_v2, %v2672_v18  ;;  %v2676_v6 = vrot.slane %v2675_v26, 2 }
 0x59b   :  { %v2405_v34 = vpop.f32.mrf.mxu0 }
 0x59c   :  { %v2406_v19 = vadd.f32 %v7654_v43, %v2405_v34  ;;  %v2764_v17 = vsub.f32 %v2652_v7, %v2673_v58  ;;  %v2677_v25 = vmax.f32 %v2675_v26, %v2676_v6 }
 0x59e   :  { %v2599_v30 = vmul.f32 %v2567_v50, %v2406_v19  ;;  %v2780_v51 = vmul.f32 1.442695, %v2764_v17  ;;  %v2678_v4 = vrot.slane %v2677_v25, 1  ;;  %v2555_v19 = vrot.slane %v7773_v11, 7 }
 0x5a0   :  { %v2637_v57 = vsel %vm75_vm0, %v2599_v30, 0.0  ;;  %v2679_v53 = vmax.f32 %v2677_v25, %v2678_v4  ;;  %5471 = vpow2.f32 %v2780_v51  ;;  %v2571_v51 = vperm.slane %v2555_v19, 0 }
 0x5a1   :  { %2638 = vadd.xlane.f32.xlu1 %v2637_v57 }
 0x5a2   :  { %v2765_v24 = vsub.f32 %v2653_v16, %v2679_v53  ;;  %v2554_v16 = vrot.slane %v7773_v11, 6 }
 0x5a3   :  { %v2408_v12 = vpop.f32.mrf.mxu0 }
 0x5a4   :  { %v2409_v32 = vadd.f32 %v7654_v43, %v2408_v12  ;;  %v2782_v23 = vmul.f32 1.442695, %v2765_v24  ;;  %v2570_v18 = vperm.slane %v2554_v16, 0 }
 0x5a6   :  { %v2600_v46 = vmul.f32 %v2568_v45, %v2409_v32  ;;  %v7792_v13 = vpop.eup %5471  ;;  %5473 = vpow2.f32 %v2782_v23 }
 0x5a7   :  { %v2812_v15 = vrot.slane %v7792_v13, 4 }
 0x5a8   :  { %v2640_v7 = vsel %vm75_vm0, %v2600_v46, 0.0 }
 0x5a9   :  { %2641 = vadd.xlane.f32.xlu0 %v2640_v7  ;;  %v2813_v36 = vadd.f32 %v7792_v13, %v2812_v15 }
 0x5ab   :  { %v2410_v40 = vpop.f32.mrf.mxu0  ;;  %v2814_v8 = vrot.slane %v2813_v36, 2 }
 0x5ac   :  { %v2411_v28 = vadd.f32 %v7654_v43, %v2410_v40  ;;  %v7799_v59 = vpop.eup %5473 }
 0x5ad   :  { %v2818_v29 = vrot.slane %v7799_v59, 4  ;;  %v2815_v34 = vadd.f32 %v2814_v8, %v2813_v36 }
 0x5ae   :  { %v2601_v37 = vmul.f32 %v2569_v33, %v2411_v28 }
 0x5af   :  { %v2819_v58 = vadd.f32 %v7799_v59, %v2818_v29  ;;  %v2816_v17 = vrot.slane %v2815_v34, 1 }
 0x5b0   :  { %v2643_v60 = vsel %vm75_vm0, %v2601_v37, 0.0 }
 0x5b1   :  { %2644 = vadd.xlane.f32.xlu2 %v2643_v60  ;;  %v2820_v25 = vrot.slane %v2819_v58, 2  ;;  %v2817_v53 = vadd.f32 %v2816_v17, %v2815_v34 }
 0x5b3   :  { %v2413_v2 = vpop.f32.mrf.mxu0  ;;  %v2821_v12 = vadd.f32 %v2820_v25, %v2819_v58  ;;  %5475 = vrcp.f32 %v2817_v53  ;;  %vm2913_vm6 = vweird.f32 %v2817_v53 }
 0x5b4   :  { %v2414_v61 = vadd.f32 %v7654_v43, %v2413_v2 }
 0x5b5   :  { %v2822_v46 = vrot.slane %v2821_v12, 1 }
 0x5b6   :  { %v2602_v26 = vmul.f32 %v2570_v18, %v2414_v61  ;;  %v2917_v61 = vand.u32 2147483647, %v2817_v53  ;;  %v2919_v18 = vand.u32 2147483648, %v2817_v53 }
 0x5b7   :  { %v2823_v40 = vadd.f32 %v2822_v46, %v2821_v12 }
 0x5b8   :  { %v2646_v6 = vsel %vm75_vm0, %v2602_v26, 0.0  ;;  %vm2918_vm3 = vcmp.eq.f32.partialorder %v2917_v61, 8.507059e+37 }
 0x5b9   :  { %2647 = vadd.xlane.f32.xlu1 %v2646_v6  ;;  %v5476_v28 = vpop.eup %5475  ;;  %5477 = vrcp.f32 %v2823_v40  ;;  %vm2928_vm13 = vweird.f32 %v2823_v40 }
 0x5ba   :  { %v2612_v57 = vpop.xlane.xlu0 %2611  ;;  %v2909_v16 = vmul.f32 %v5476_v28, %v2817_v53  ;;  %vm2914_vm14 = vweird.f32 %v5476_v28 }
 0x5bb   :  { %v2415_v50 = vpop.f32.mrf.mxu0  ;;  %v2654_v0 = vmul.f32 0.17677669, %v2612_v57  ;;  %vm2915_vm2 = vmor %vm2913_vm6, %vm2914_vm14 }
 0x5bc   :  { %v2416_v30 = vadd.f32 %v7654_v43, %v2415_v50  ;;  %v2910_v29 = vsub.f32 1.0, %v2909_v16  ;;  %v2920_v50 = vor.u32 1.1754944e-38, %v2919_v18 }
 0x5bd   :  { %v2680_v32 = vrot.slane %v2654_v0, 4 }
 0x5be   :  { %v2603_v4 = vmul.f32 %v2571_v51, %v2416_v30  ;;  %v2911_v34 = vmul.f32 %v5476_v28, %v2910_v29 }
 0x5bf   :  { %v2681_v45 = vmax.f32 %v2654_v0, %v2680_v32  ;;  %v5478_v58 = vpop.eup %5477  ;;  %v2934_v32 = vand.u32 2147483648, %v2823_v40 }
 0x5c0   :  { %v2649_v24 = vsel %vm75_vm0, %v2603_v4, 0.0  ;;  %v2912_v19 = vadd.f32 %v5476_v28, %v2911_v34  ;;  %v2924_v30 = vmul.f32 %v5478_v58, %v2823_v40  ;;  %vm2929_vm4 = vweird.f32 %v5478_v58 }
 0x5c1   :  { %2650 = vadd.xlane.f32.xlu0 %v2649_v24  ;;  %v2682_v11 = vrot.slane %v2681_v45, 2  ;;  %v2932_v24 = vand.u32 2147483647, %v2823_v40  ;;  %vm2930_vm1 = vmor %vm2928_vm13, %vm2929_vm4  ;;  %v5116_v40 = vld [vmem:[%s9202_s4 + $0xd8] sm:$0xff]  ;;  %v3181_v34 = vperm.slane %v6574_v38, 0 }
 0x5c2   :  { %v2615_v23 = vpop.xlane.xlu1 %2614  ;;  %v2916_v25 = vsel %vm2915_vm2, %v5476_v28, %v2912_v19  ;;  %3287 = vmatpush.bf16.msrb.mxu1 %v5116_v40 }
 0x5c3   :  { %v2683_v7 = vmax.f32 %v2681_v45, %v2682_v11  ;;  %v2655_v55 = vmul.f32 0.17677669, %v2615_v23  ;;  %v2921_v51 = vsel %vm2918_vm3, %v2920_v50, %v2916_v25  ;;  %vm2933_vm15 = vcmp.eq.f32.partialorder %v2932_v24, 8.507059e+37 }
 0x5c4   :  { %v2922_v46 = vmul.f32 %v7792_v13, %v2921_v51 }
 0x5c5   :  { %v2684_v15 = vrot.slane %v2683_v7, 1  ;;  %v2686_v43 = vrot.slane %v2655_v55, 4 }
 0x5c7   :  { %v2685_v33 = vmax.f32 %v2683_v7, %v2684_v15  ;;  %v2687_v37 = vmax.f32 %v2655_v55, %v2686_v43  ;;  %v2935_v43 = vor.u32 1.1754944e-38, %v2934_v32 }
 0x5c9   :  { %v2766_v36 = vsub.f32 %v2654_v0, %v2685_v33  ;;  %v2688_v60 = vrot.slane %v2687_v37, 2  ;;  %v2925_v0 = vsub.f32 1.0, %v2924_v30  ;;  %v3148_v33 = vsub.f32 1.0, %v2922_v46 }
 0x5cb   :  { %v2784_v2 = vmul.f32 1.442695, %v2766_v36  ;;  %v2689_v8 = vmax.f32 %v2687_v37, %v2688_v60  ;;  %v2926_v53 = vmul.f32 %v5478_v58, %v2925_v0  ;;  %v3164_v18 = vmul.f32 %v3148_v33, %v6796_v22  ;;  %v5115_v22 = vld [vmem:[%s9202_s4 + $0xd0] sm:$0xff] }
 0x5cc   :  { %3288 = vmatpush.bf16.msrb.mxu1 %v5115_v22 }
 0x5cd   :  { %5479 = vpow2.f32 %v2784_v2  ;;  %v2690_v26 = vrot.slane %v2689_v8, 1  ;;  %v2927_v7 = vadd.f32 %v5478_v58, %v2926_v53 }
 0x5cf   :  { %v2691_v6 = vmax.f32 %v2689_v8, %v2690_v26  ;;  %v2931_v28 = vsel %vm2930_vm1, %v5478_v58, %v2927_v7  ;;  %v3180_v26 = vperm.slane %v6592_v44, 0 }
 0x5d0   :  { %v2936_v36 = vsel %vm2933_vm15, %v2935_v43, %v2931_v28 }
 0x5d1   :  { %v2767_v17 = vsub.f32 %v2655_v55, %v2691_v6  ;;  %v2937_v13 = vmul.f32 %v7799_v59, %v2936_v36  ;;  %v3196_v50 = vmul.f32 %v3180_v26, %v2922_v46 }
 0x5d3   :  { %v7808_v4 = vpop.eup %5479  ;;  %v2786_v57 = vmul.f32 1.442695, %v2767_v17  ;;  %v3149_v61 = vsub.f32 1.0, %v2937_v13  ;;  %v3197_v17 = vmul.f32 %v3181_v34, %v2937_v13  ;;  %v7828_v44 = vadd.f32 %v3196_v50, %v3164_v18 }
 0x5d4   :  { %v2824_v12 = vrot.slane %v7808_v4, 4 }
 0x5d5   :  { %5481 = vpow2.f32 %v2786_v57  ;;  %v3165_v19 = vmul.f32 %v3149_v61, %v6798_v10 }
 0x5d6   :  { %v2825_v11 = vadd.f32 %v7808_v4, %v2824_v12 }
 0x5d7   :  { %v2618_v45 = vpop.xlane.xlu2 %2617  ;;  %v7830_v38 = vadd.f32 %v3197_v17, %v3165_v19 }
 0x5d8   :  { %v2656_v23 = vmul.f32 0.17677669, %v2618_v45  ;;  %v2826_v55 = vrot.slane %v2825_v11, 2 }
 0x5d9   :  { %v5224_v10 = vpack.i.bf16 %v7830_v38, %v7828_v44  ;;  %v3232_v24 = vpack.c.bf16 %v7830_v38, %v7828_v44 }
 0x5da   :  { %v2692_v15 = vrot.slane %v2656_v23, 4  ;;  %v2827_v16 = vadd.f32 %v2826_v55, %v2825_v11 }
 0x5db   :  { %v7813_v60 = vpop.eup %5481  ;;  %5225 = vrot.lane.b32.xlu2 %v5224_v10, %s5696_s1  ;;  %5014 = vmatmul.msk.bf16.vlgmr.msrb.gmra.mxu1 %vm75_vm0, %v3232_v24 }
 0x5dc   :  { %v2693_v37 = vmax.f32 %v2656_v23, %v2692_v15  ;;  %v2830_v2 = vrot.slane %v7813_v60, 4  ;;  %v2828_v25 = vrot.slane %v2827_v16, 1 }
 0x5de   :  { %v2694_v8 = vrot.slane %v2693_v37, 2  ;;  %v2831_v58 = vadd.f32 %v7813_v60, %v2830_v2  ;;  %v7836_v32 = vadd.f32 %v2828_v25, %v2827_v16  ;;  %v9364_v25 = vld [vmem:[#allocation19_spill] sm:$0xff] }
 0x5df   :  { %v2621_v29 = vpop.xlane.xlu1 %2620 }
 0x5e0   :  { %v2695_v6 = vmax.f32 %v2693_v37, %v2694_v8  ;;  %v2657_v59 = vmul.f32 0.17677669, %v2621_v29  ;;  %v2832_v57 = vrot.slane %v2831_v58, 2  ;;  %5483 = vrcp.f32 %v7836_v32 }
 0x5e1   :  { %v2947_v22 = vand.u32 2147483647, %v7836_v32  ;;  %vm2943_vm6 = vweird.f32 %v7836_v32 }
 0x5e2   :  { %v2696_v30 = vrot.slane %v2695_v6, 1  ;;  %v2698_v51 = vrot.slane %v2657_v59, 4  ;;  %v2833_v53 = vadd.f32 %v2832_v57, %v2831_v58  ;;  %v2949_v57 = vand.u32 2147483648, %v7836_v32 }
 0x5e3   :  { %vm7866_vm2 = vcmp.eq.f32.partialorder %v2947_v22, 8.507059e+37 }
 0x5e4   :  { %v2697_v0 = vmax.f32 %v2695_v6, %v2696_v30  ;;  %v2699_v12 = vmax.f32 %v2657_v59, %v2698_v51  ;;  %v2834_v43 = vrot.slane %v2833_v53, 1  ;;  %v3182_v6 = vperm.slane %v6584_v39, 0 }
 0x5e5   :  { %v3184_v30 = vperm.slane %v9364_v25, 0 }
 0x5e6   :  { %v2768_v45 = vsub.f32 %v2656_v23, %v2697_v0  ;;  %v2700_v46 = vrot.slane %v2699_v12, 2  ;;  %v7841_v13 = vadd.f32 %v2834_v43, %v2833_v53  ;;  %v5484_v16 = vpop.eup %5483  ;;  %v9365_v0 = vld [vmem:[#allocation21_spill] sm:$0xff]  ;;  %v9368_v43 = vld [vmem:[#allocation20_spill] sm:$0xff] }
 0x5e7   :  { %v2939_v34 = vmul.f32 %v5484_v16, %v7836_v32  ;;  %vm2944_vm14 = vweird.f32 %v5484_v16 }
 0x5e8   :  { %v2788_v11 = vmul.f32 1.442695, %v2768_v45  ;;  %v2701_v7 = vmax.f32 %v2699_v12, %v2700_v46  ;;  %v3185_v12 = vperm.slane %v9365_v0, 0  ;;  %v9366_v46 = vld [vmem:[#allocation23_spill] sm:$0xff]  ;;  %vm2945_vm3 = vmor %vm2943_vm6, %vm2944_vm14  ;;  %v2962_v32 = vand.u32 2147483647, %v7841_v13 }
 0x5e9   :  { %v2940_v17 = vsub.f32 1.0, %v2939_v34  ;;  %v3186_v53 = vperm.slane %v9366_v46, 0  ;;  %v2950_v34 = vor.u32 1.1754944e-38, %v2949_v57  ;;  %vm2958_vm4 = vweird.f32 %v7841_v13 }
 0x5ea   :  { %v2702_v55 = vrot.slane %v2701_v7, 1  ;;  %5485 = vpow2.f32 %v2788_v11  ;;  %vm7888_vm1 = vcmp.eq.f32.partialorder %v2962_v32, 8.507059e+37 }
 0x5eb   :  { %v2941_v45 = vmul.f32 %v5484_v16, %v2940_v17 }
 0x5ec   :  { %v2624_v15 = vpop.xlane.xlu0 %2623  ;;  %v2703_v33 = vmax.f32 %v2701_v7, %v2702_v55  ;;  %v9367_v55 = vld [vmem:[#allocation24_spill] sm:$0xff] }
 0x5ed   :  { %v2658_v28 = vmul.f32 0.17677669, %v2624_v15 }
 0x5ee   :  { %v2769_v36 = vsub.f32 %v2657_v59, %v2703_v33  ;;  %v3183_v59 = vperm.slane %v6598_v48, 0 }
 0x5ef   :  { %v2704_v37 = vrot.slane %v2658_v28, 4 }
 0x5f0   :  { %v2790_v2 = vmul.f32 1.442695, %v2769_v36  ;;  %v7843_v8 = vpop.eup %5485 }
 0x5f1   :  { %v2705_v23 = vmax.f32 %v2658_v28, %v2704_v37  ;;  %v2836_v29 = vrot.slane %v7843_v8, 4 }
 0x5f2   :  { %5487 = vpow2.f32 %v2790_v2 }
 0x5f3   :  { %v2706_v40 = vrot.slane %v2705_v23, 2  ;;  %5489 = vrcp.f32 %v7841_v13  ;;  %v2837_v58 = vadd.f32 %v7843_v8, %v2836_v29 }
 0x5f4   :  { %v2627_v61 = vpop.xlane.xlu2 %2626 }
 0x5f5   :  { %v2707_v18 = vmax.f32 %v2705_v23, %v2706_v40  ;;  %v7847_v26 = vmul.f32 0.17677669, %v2627_v61  ;;  %v2838_v51 = vrot.slane %v2837_v58, 2  ;;  %v2942_v40 = vadd.f32 %v5484_v16, %v2941_v45 }
 0x5f7   :  { %v2708_v19 = vrot.slane %v2707_v18, 1  ;;  %v2710_v50 = vrot.slane %v7847_v26, 4  ;;  %v2839_v7 = vadd.f32 %v2838_v51, %v2837_v58  ;;  %v2946_v51 = vsel %vm2945_vm3, %v5484_v16, %v2942_v40 }
 0x5f8   :  { %v7860_v11 = vpop.eup %5487 }
 0x5f9   :  { %v2709_v10 = vmax.f32 %v2707_v18, %v2708_v19  ;;  %v2711_v24 = vmax.f32 %v7847_v26, %v2710_v50  ;;  %v5490_v37 = vpop.eup %5489  ;;  %v2842_v36 = vrot.slane %v7860_v11, 4  ;;  %v2840_v29 = vrot.slane %v2839_v7, 1 }
 0x5fa   :  { %vm2959_vm13 = vweird.f32 %v5490_v37 }
 0x5fb   :  { %v2770_v23 = vsub.f32 %v2658_v28, %v2709_v10  ;;  %v2712_v2 = vrot.slane %v2711_v24, 2  ;;  %v2843_v58 = vadd.f32 %v7860_v11, %v2842_v36  ;;  %v7874_v28 = vadd.f32 %v2840_v29, %v2839_v7  ;;  %vm2960_vm15 = vmor %vm2958_vm4, %vm2959_vm13 }
 0x5fc   :  { %v2630_v61 = vpop.xlane.xlu1 %2629  ;;  %v2954_v10 = vmul.f32 %v5490_v37, %v7841_v13 }
 0x5fd   :  { %v2792_v19 = vmul.f32 1.442695, %v2770_v23  ;;  %v2713_v50 = vmax.f32 %v2711_v24, %v2712_v2  ;;  %v7871_v17 = vmul.f32 0.17677669, %v2630_v61  ;;  %v2844_v22 = vrot.slane %v2843_v58, 2  ;;  %v9371_v61 = vld [vmem:[#allocation17_spill] sm:$0xff] }
 0x5fe   :  { %v2951_v24 = vsel %vm7866_vm2, %v2950_v34, %v2946_v51  ;;  %v2955_v36 = vsub.f32 1.0, %v2954_v10  ;;  %v2964_v23 = vand.u32 2147483648, %v7841_v13  ;;  %vm2973_vm14 = vweird.f32 %v7874_v28 }
 0x5ff   :  { %5491 = vpow2.f32 %v2792_v19  ;;  %v2714_v45 = vrot.slane %v2713_v50, 1  ;;  %v2716_v57 = vrot.slane %v7871_v17, 4  ;;  %v2845_v7 = vadd.f32 %v2844_v22, %v2843_v58 }
 0x600   :  { %5493 = vrcp.f32 %v7874_v28  ;;  %v2952_v40 = vmul.f32 %v7808_v4, %v2951_v24  ;;  %v2956_v29 = vmul.f32 %v5490_v37, %v2955_v36  ;;  %v2977_v4 = vand.u32 2147483647, %v7874_v28 }
 0x601   :  { %v2715_v2 = vmax.f32 %v2713_v50, %v2714_v45  ;;  %v2717_v16 = vmax.f32 %v7871_v17, %v2716_v57  ;;  %v2846_v33 = vrot.slane %v2845_v7, 1  ;;  %v2965_v50 = vor.u32 1.1754944e-38, %v2964_v23  ;;  %v9374_v23 = vld [vmem:[#allocation29_spill] sm:$0xff] }
 0x602   :  { %v3150_v34 = vsub.f32 1.0, %v2952_v40  ;;  %v2957_v10 = vadd.f32 %v5490_v37, %v2956_v29  ;;  %v2979_v19 = vand.u32 2147483648, %v7874_v28  ;;  %vm7921_vm6 = vcmp.eq.f32.partialorder %v2977_v4, 8.507059e+37 }
 0x603   :  { %v2771_v15 = vsub.f32 %v7847_v26, %v2715_v2  ;;  %v2718_v18 = vrot.slane %v2717_v16, 2  ;;  %v7895_v45 = vadd.f32 %v2846_v33, %v2845_v7 }
 0x604   :  { %v2633_v51 = vpop.xlane.xlu0 %2632  ;;  %v2961_v2 = vsel %vm2960_vm15, %v5490_v37, %v2957_v10  ;;  %v3166_v29 = vmul.f32 %v3150_v34, %v9374_v23  ;;  %v3198_v37 = vmul.f32 %v3182_v6, %v2952_v40 }
 0x605   :  { %v7893_v22 = vpop.eup %5491  ;;  %v2794_v57 = vmul.f32 1.442695, %v2771_v15  ;;  %v2719_v24 = vmax.f32 %v2717_v16, %v2718_v18  ;;  %v7897_v36 = vmul.f32 0.17677669, %v2633_v51  ;;  %5495 = vrcp.f32 %v7895_v45 }
 0x606   :  { %v7902_v26 = vpop.eup %5493  ;;  %v2848_v32 = vrot.slane %v7893_v22, 4  ;;  %v2966_v7 = vsel %vm7888_vm1, %v2965_v50, %v2961_v2  ;;  %v7919_v58 = vadd.f32 %v3198_v37, %v3166_v29  ;;  %v2992_v29 = vand.u32 2147483647, %v7895_v45 }
 0x607   :  { %v2720_v33 = vrot.slane %v2719_v24, 1  ;;  %v2722_v15 = vrot.slane %v7897_v36, 4  ;;  %5497 = vpow2.f32 %v2794_v57  ;;  %v2967_v16 = vmul.f32 %v7813_v60, %v2966_v7 }
 0x608   :  { %v2849_v13 = vadd.f32 %v7893_v22, %v2848_v32  ;;  %v2969_v51 = vmul.f32 %v7902_v26, %v7874_v28  ;;  %v2980_v60 = vor.u32 1.1754944e-38, %v2979_v19  ;;  %vm2974_vm2 = vweird.f32 %v7902_v26  ;;  %v9377_v32 = vld [vmem:[#allocation30_spill] sm:$0xff] }
 0x609   :  { %v2721_v18 = vmax.f32 %v2719_v24, %v2720_v33  ;;  %v2723_v34 = vmax.f32 %v7897_v36, %v2722_v15  ;;  %v3151_v23 = vsub.f32 1.0, %v2967_v16  ;;  %v3199_v33 = vmul.f32 %v3183_v59, %v2967_v16  ;;  %vm2975_vm3 = vmor %vm2973_vm14, %vm2974_vm2 }
 0x60a   :  { %v2850_v10 = vrot.slane %v2849_v13, 2  ;;  %v2970_v40 = vsub.f32 1.0, %v2969_v51  ;;  %vm2988_vm4 = vweird.f32 %v7895_v45  ;;  %vm7964_vm1 = vcmp.eq.f32.partialorder %v2992_v29, 8.507059e+37 }
 0x60b   :  { %v2772_v39 = vsub.f32 %v7871_v17, %v2721_v18  ;;  %v2724_v6 = vrot.slane %v2723_v34, 2  ;;  %v3167_v2 = vmul.f32 %v3151_v23, %v9377_v32  ;;  %v5496_v4 = vpop.eup %5495 }
 0x60c   :  { %v2851_v57 = vadd.f32 %v2850_v10, %v2849_v13  ;;  %v2636_v24 = vpop.xlane.xlu2 %2635  ;;  %v2971_v17 = vmul.f32 %v7902_v26, %v2970_v40  ;;  %v2984_v13 = vmul.f32 %v5496_v4, %v7895_v45  ;;  %v2994_v10 = vand.u32 2147483648, %v7895_v45 }
 0x60d   :  { %v2796_v15 = vmul.f32 1.442695, %v2772_v39  ;;  %v2725_v7 = vmax.f32 %v2723_v34, %v2724_v6  ;;  %v7931_v37 = vmul.f32 0.17677669, %v2636_v24  ;;  %v7934_v19 = vpop.eup %5497  ;;  %v7936_v51 = vadd.f32 %v3199_v33, %v3167_v2 }
 0x60e   :  { %v2852_v18 = vrot.slane %v2851_v57, 1  ;;  %v2854_v48 = vrot.slane %v7934_v19, 4  ;;  %v2972_v6 = vadd.f32 %v7902_v26, %v2971_v17  ;;  %vm2989_vm13 = vweird.f32 %v5496_v4 }
 0x60f   :  { %5499 = vpow2.f32 %v2796_v15  ;;  %v2726_v59 = vrot.slane %v2725_v7, 1  ;;  %v2728_v16 = vrot.slane %v7931_v37, 4  ;;  %v5229_v23 = vpack.i.bf16 %v7936_v51, %v7919_v58  ;;  %vm2990_vm15 = vmor %vm2988_vm4, %vm2989_vm13 }
 0x610   :  { %v7942_v34 = vadd.f32 %v2852_v18, %v2851_v57  ;;  %v3233_v39 = vpack.c.bf16 %v7936_v51, %v7919_v58  ;;  %v2855_v40 = vadd.f32 %v7934_v19, %v2854_v48  ;;  %v2985_v57 = vsub.f32 1.0, %v2984_v13 }
 0x611   :  { %v2727_v24 = vmax.f32 %v2725_v7, %v2726_v59  ;;  %v2729_v32 = vmax.f32 %v7931_v37, %v2728_v16  ;;  %5230 = vrot.lane.b32.xlu1 %v5229_v23, %s5696_s1  ;;  %v2976_v2 = vsel %vm2975_vm3, %v7902_v26, %v2972_v6  ;;  %v2995_v59 = vor.u32 1.1754944e-38, %v2994_v10 }
 0x612   :  { %5501 = vrcp.f32 %v7942_v34  ;;  %5015 = vmatmul.msk.bf16.gmra.mxu1 %vm75_vm0, %v3233_v39  ;;  %v2856_v33 = vrot.slane %v2855_v40, 2  ;;  %v2981_v28 = vsel %vm7921_vm6, %v2980_v60, %v2976_v2  ;;  %v2986_v13 = vmul.f32 %v5496_v4, %v2985_v57 }
 0x613   :  { %v2773_v15 = vsub.f32 %v7897_v36, %v2727_v24  ;;  %v2730_v7 = vrot.slane %v2729_v32, 2  ;;  %v2982_v18 = vmul.f32 %v7843_v8, %v2981_v28  ;;  %v3007_v24 = vand.u32 2147483647, %v7942_v34 }
 0x614   :  { %v2639_v17 = vpop.xlane.xlu1 %2638  ;;  %v2857_v16 = vadd.f32 %v2856_v33, %v2855_v40  ;;  %v2987_v50 = vadd.f32 %v5496_v4, %v2986_v13  ;;  %v5122_v13 = vld [vmem:[%s9202_s4 + $0x108] sm:$0xff]  ;;  %vm3003_vm14 = vweird.f32 %v7942_v34 }
 0x615   :  { %v7968_v26 = vpop.eup %5499  ;;  %v2798_v23 = vmul.f32 1.442695, %v2773_v15  ;;  %v2731_v39 = vmax.f32 %v2729_v32, %v2730_v7  ;;  %v7970_v6 = vmul.f32 0.17677669, %v2639_v17  ;;  %v3152_v60 = vsub.f32 1.0, %v2982_v18  ;;  %4254 = vmatpush.bf16.msra.mxu3 %v5122_v13 }
 0x616   :  { %v2860_v36 = vrot.slane %v7968_v26, 4  ;;  %v2858_v8 = vrot.slane %v2857_v16, 1  ;;  %v2991_v32 = vsel %vm2990_vm15, %v5496_v4, %v2987_v50  ;;  %v3200_v33 = vmul.f32 %v3184_v30, %v2982_v18 }
 0x617   :  { %5503 = vpow2.f32 %v2798_v23  ;;  %v2732_v29 = vrot.slane %v2731_v39, 1  ;;  %v2734_v57 = vrot.slane %v7970_v6, 4  ;;  %v3168_v2 = vmul.f32 %v3152_v60, %v7307_v31 }
 0x618   :  { %v7978_v10 = vpop.eup %5501  ;;  %v2861_v40 = vadd.f32 %v7968_v26, %v2860_v36  ;;  %v7984_v15 = vadd.f32 %v2858_v8, %v2857_v16  ;;  %v2996_v17 = vsel %vm7964_vm1, %v2995_v59, %v2991_v32  ;;  %vm8000_vm6 = vcmp.eq.f32.partialorder %v3007_v24, 8.507059e+37 }
 0x619   :  { %v2733_v7 = vmax.f32 %v2731_v39, %v2732_v29  ;;  %v2735_v28 = vmax.f32 %v7970_v6, %v2734_v57  ;;  %v2997_v4 = vmul.f32 %v7860_v11, %v2996_v17  ;;  %v2999_v31 = vmul.f32 %v7978_v10, %v7942_v34 }
 0x61a   :  { %v2862_v45 = vrot.slane %v2861_v40, 2  ;;  %5505 = vrcp.f32 %v7984_v15  ;;  %v7998_v18 = vadd.f32 %v3200_v33, %v3168_v2  ;;  %v3009_v8 = vand.u32 2147483648, %v7942_v34 }
 0x61b   :  { %v2774_v25 = vsub.f32 %v7931_v37, %v2733_v7  ;;  %v2736_v30 = vrot.slane %v2735_v28, 2  ;;  %v3153_v11 = vsub.f32 1.0, %v2997_v4  ;;  %v3201_v23 = vmul.f32 %v3185_v12, %v2997_v4 }
 0x61c   :  { %v2863_v59 = vadd.f32 %v2862_v45, %v2861_v40  ;;  %v2642_v16 = vpop.xlane.xlu0 %2641  ;;  %v3000_v39 = vsub.f32 1.0, %v2999_v31  ;;  %vm3004_vm2 = vweird.f32 %v7978_v10  ;;  %v3010_v45 = vor.u32 1.1754944e-38, %v3009_v8 }
 0x61d   :  { %v8006_v36 = vpop.eup %5503  ;;  %v2800_v50 = vmul.f32 1.442695, %v2774_v25  ;;  %v2737_v60 = vmax.f32 %v2735_v28, %v2736_v30  ;;  %v8008_v37 = vmul.f32 0.17677669, %v2642_v16  ;;  %v3169_v57 = vmul.f32 %v3153_v11, %v7310_v1  ;;  %vm3005_vm3 = vmor %vm3003_vm14, %vm3004_vm2 }
 0x61e   :  { %v2864_v24 = vrot.slane %v2863_v59, 1  ;;  %v2866_v29 = vrot.slane %v8006_v36, 4  ;;  %v3001_v40 = vmul.f32 %v7978_v10, %v3000_v39  ;;  %v3022_v13 = vand.u32 2147483647, %v7984_v15 }
 0x61f   :  { %5507 = vpow2.f32 %v2800_v50  ;;  %v2738_v32 = vrot.slane %v2737_v60, 1  ;;  %v2740_v0 = vrot.slane %v8008_v37, 4  ;;  %v8019_v33 = vadd.f32 %v3201_v23, %v3169_v57 }
 0x620   :  { %v8016_v12 = vadd.f32 %v2864_v24, %v2863_v59  ;;  %v2867_v2 = vadd.f32 %v8006_v36, %v2866_v29  ;;  %v3002_v7 = vadd.f32 %v7978_v10, %v3001_v40  ;;  %v8022_v28 = vpop.eup %5505  ;;  %vm3018_vm4 = vweird.f32 %v7984_v15 }
 0x621   :  { %v2739_v17 = vmax.f32 %v2737_v60, %v2738_v32  ;;  %v2741_v1 = vmax.f32 %v8008_v37, %v2740_v0  ;;  %v5234_v31 = vpack.i.bf16 %v8019_v33, %v7998_v18  ;;  %v3234_v25 = vpack.c.bf16 %v8019_v33, %v7998_v18 }
 0x622   :  { %5509 = vrcp.f32 %v8016_v12  ;;  %v2868_v4 = vrot.slane %v2867_v2, 2  ;;  %v3006_v16 = vsel %vm3005_vm3, %v7978_v10, %v3002_v7  ;;  %v3014_v11 = vmul.f32 %v8022_v28, %v7984_v15 }
 0x623   :  { %v2775_v30 = vsub.f32 %v7970_v6, %v2739_v17  ;;  %v2742_v59 = vrot.slane %v2741_v1, 2  ;;  %5235 = vrot.lane.b32.xlu0 %v5234_v31, %s5696_s1  ;;  %5016 = vmatmul.msk.bf16.gmra.mxu1 %vm75_vm0, %v3234_v25  ;;  %v3011_v34 = vsel %vm8000_vm6, %v3010_v45, %v3006_v16  ;;  %vm3019_vm13 = vweird.f32 %v8022_v28 }
 0x624   :  { %v2869_v23 = vadd.f32 %v2868_v4, %v2867_v2  ;;  %v2645_v39 = vpop.xlane.xlu2 %2644  ;;  %vm8043_vm1 = vcmp.eq.f32.partialorder %v3022_v13, 8.507059e+37  ;;  %v3012_v24 = vmul.f32 %v7893_v22, %v3011_v34  ;;  %v3015_v40 = vsub.f32 1.0, %v3014_v11  ;;  %vm3020_vm15 = vmor %vm3018_vm4, %vm3019_vm13 }
 0x625   :  { %v8047_v6 = vpop.eup %5507  ;;  %v2802_v10 = vmul.f32 1.442695, %v2775_v30  ;;  %v2743_v60 = vmax.f32 %v2741_v1, %v2742_v59  ;;  %v8049_v8 = vmul.f32 0.17677669, %v2645_v39  ;;  %v3024_v48 = vand.u32 2147483648, %v7984_v15 }
 0x626   :  { %v2870_v29 = vrot.slane %v2869_v23, 1  ;;  %v2872_v57 = vrot.slane %v8047_v6, 4  ;;  %v3154_v2 = vsub.f32 1.0, %v3012_v24  ;;  %v3016_v45 = vmul.f32 %v8022_v28, %v3015_v40 }
 0x627   :  { %5511 = vpow2.f32 %v2802_v10  ;;  %v2744_v32 = vrot.slane %v2743_v60, 1  ;;  %v2746_v0 = vrot.slane %v8049_v8, 4  ;;  %v3025_v22 = vor.u32 1.1754944e-38, %v3024_v48 }
 0x628   :  { %v8055_v7 = vpop.eup %5509  ;;  %v8057_v17 = vadd.f32 %v2870_v29, %v2869_v23  ;;  %v2873_v1 = vadd.f32 %v8047_v6, %v2872_v57  ;;  %v3170_v31 = vmul.f32 %v3154_v2, %v7444_v49  ;;  %v3202_v25 = vmul.f32 %v3186_v53, %v3012_v24 }
 0x629   :  { %v2745_v13 = vmax.f32 %v2743_v60, %v2744_v32  ;;  %v2747_v4 = vmax.f32 %v8049_v8, %v2746_v0  ;;  %v3017_v59 = vadd.f32 %v8022_v28, %v3016_v45  ;;  %v3029_v16 = vmul.f32 %v8055_v7, %v8016_v12 }
 0x62a   :  { %5513 = vrcp.f32 %v8057_v17  ;;  %v2874_v30 = vrot.slane %v2873_v1, 2  ;;  %v8074_v49 = vadd.f32 %v3202_v25, %v3170_v31  ;;  %vm3033_vm14 = vweird.f32 %v8016_v12 }
 0x62b   :  { %v2776_v11 = vsub.f32 %v8008_v37, %v2745_v13  ;;  %v2748_v23 = vrot.slane %v2747_v4, 2  ;;  %v3021_v39 = vsel %vm3020_vm15, %v8022_v28, %v3017_v59  ;;  %v3030_v34 = vsub.f32 1.0, %v3029_v16 }
 0x62c   :  { %v2875_v46 = vadd.f32 %v2874_v30, %v2873_v1  ;;  %v2648_v53 = vpop.xlane.xlu1 %2647  ;;  %vm3034_vm6 = vweird.f32 %v8055_v7  ;;  %v3026_v15 = vsel %vm8043_vm1, %v3025_v22, %v3021_v39  ;;  %v3037_v0 = vand.u32 2147483647, %v8016_v12 }
 0x62d   :  { %v8079_v10 = vpop.eup %5511  ;;  %v2804_v37 = vmul.f32 1.442695, %v2776_v11  ;;  %v2749_v60 = vmax.f32 %v2747_v4, %v2748_v23  ;;  %v8081_v24 = vmul.f32 0.17677669, %v2648_v53  ;;  %v3027_v40 = vmul.f32 %v7934_v19, %v3026_v15  ;;  %vm8109_vm3 = vmor %vm3033_vm14, %vm3034_vm6 }
 0x62e   :  { %v2876_v29 = vrot.slane %v2875_v46, 1  ;;  %v2878_v57 = vrot.slane %v8079_v10, 4  ;;  %v3031_v48 = vmul.f32 %v8055_v7, %v3030_v34  ;;  %v9384_v22 = vperm.slane %v9367_v55, 0 }
 0x62f   :  { %5515 = vpow2.f32 %v2804_v37  ;;  %v2750_v28 = vrot.slane %v2749_v60, 1  ;;  %v2752_v32 = vrot.slane %v8081_v24, 4  ;;  %v3155_v45 = vsub.f32 1.0, %v3027_v40 }
 0x630   :  { %v8090_v2 = vpop.eup %5513  ;;  %v8092_v1 = vadd.f32 %v2876_v29, %v2875_v46  ;;  %v2879_v50 = vadd.f32 %v8079_v10, %v2878_v57  ;;  %v3203_v13 = vmul.f32 %v9384_v22, %v3027_v40  ;;  %v3032_v31 = vadd.f32 %v8055_v7, %v3031_v48 }
 0x631   :  { %v2751_v4 = vmax.f32 %v2749_v60, %v2750_v28  ;;  %v2753_v19 = vmax.f32 %v8081_v24, %v2752_v32  ;;  %vm8099_vm2 = vcmp.eq.f32.partialorder %v3037_v0, 8.507059e+37  ;;  %v3171_v59 = vmul.f32 %v3155_v45, %v7447_v42 }
 0x632   :  { %5517 = vrcp.f32 %v8092_v1  ;;  %v2880_v30 = vrot.slane %v2879_v50, 2  ;;  %v3039_v16 = vand.u32 2147483648, %v8016_v12  ;;  %v3036_v46 = vsel %vm8109_vm3, %v8055_v7, %v3032_v31 }
 0x633   :  { %v2777_v11 = vsub.f32 %v8049_v8, %v2751_v4  ;;  %v2754_v23 = vrot.slane %v2753_v19, 2  ;;  %v3044_v42 = vmul.f32 %v8090_v2, %v8057_v17  ;;  %v8120_v34 = vadd.f32 %v3203_v13, %v3171_v59  ;;  %v5121_v59 = vld [vmem:[%s9202_s4 + $0x100] sm:$0xff] }
 0x634   :  { %v2881_v53 = vadd.f32 %v2880_v30, %v2879_v50  ;;  %v2651_v39 = vpop.xlane.xlu0 %2650  ;;  %v3040_v37 = vor.u32 1.1754944e-38, %v3039_v16  ;;  %vm3048_vm4 = vweird.f32 %v8057_v17  ;;  %vm3049_vm13 = vweird.f32 %v8090_v2  ;;  %4255 = vmatpush.bf16.msra.mxu3 %v5121_v59 }
 0x635   :  { %v8123_v60 = vpop.eup %5515  ;;  %v2806_v12 = vmul.f32 1.442695, %v2777_v11  ;;  %v2755_v15 = vmax.f32 %v2753_v19, %v2754_v23  ;;  %v8125_v8 = vmul.f32 0.17677669, %v2651_v39  ;;  %v3045_v29 = vsub.f32 1.0, %v3044_v42  ;;  %vm3050_vm15 = vmor %vm3048_vm4, %vm3049_vm13 }
 0x636   :  { %v2882_v57 = vrot.slane %v2881_v53, 1  ;;  %v2884_v7 = vrot.slane %v8123_v60, 4  ;;  %v5239_v40 = vpack.i.bf16 %v8120_v34, %v8074_v49  ;;  %v3235_v48 = vpack.c.bf16 %v8120_v34, %v8074_v49 }
 0x637   :  { %5519 = vpow2.f32 %v2806_v12  ;;  %v2756_v28 = vrot.slane %v2755_v15, 1  ;;  %v2758_v32 = vrot.slane %v8125_v8, 4  ;;  %v3041_v0 = vsel %vm8099_vm2, %v3040_v37, %v3036_v46 }
 0x638   :  { %v8135_v50 = vpop.eup %5517  ;;  %v8137_v45 = vadd.f32 %v2882_v57, %v2881_v53  ;;  %v2885_v22 = vadd.f32 %v8123_v60, %v2884_v7  ;;  %5240 = vrot.lane.b32.xlu2 %v5239_v40, %s5696_s1  ;;  %5017 = vmatmul.msk.bf16.gmra.mxu1 %vm75_vm0, %v3235_v48  ;;  %v3042_v13 = vmul.f32 %v7968_v26, %v3041_v0  ;;  %v3052_v25 = vand.u32 2147483647, %v8057_v17 }
 0x639   :  { %v2757_v4 = vmax.f32 %v2755_v15, %v2756_v28  ;;  %v2759_v19 = vmax.f32 %v8125_v8, %v2758_v32  ;;  %v3046_v31 = vmul.f32 %v8090_v2, %v3045_v29  ;;  %v3054_v55 = vand.u32 2147483648, %v8057_v17 }
 0x63a   :  { %5521 = vrcp.f32 %v8137_v45  ;;  %v2886_v30 = vrot.slane %v2885_v22, 2  ;;  %v3156_v16 = vsub.f32 1.0, %v3042_v13  ;;  %vm3053_vm1 = vcmp.eq.f32.partialorder %v3052_v25, 8.507059e+37 }
 0x63b   :  { %v2778_v26 = vsub.f32 %v8081_v24, %v2757_v4  ;;  %v2760_v11 = vrot.slane %v2759_v19, 2  ;;  %v3047_v23 = vadd.f32 %v8090_v2, %v3046_v31  ;;  %v3055_v42 = vor.u32 1.1754944e-38, %v3054_v55  ;;  %v5120_v24 = vld [vmem:[%s9202_s4 + $0xf8] sm:$0xff] }
 0x63c   :  { %v2887_v46 = vadd.f32 %v2886_v30, %v2885_v22  ;;  %v3172_v53 = vmul.f32 %v3156_v16, %v7536_v56  ;;  %v9389_v39 = vperm.slane %v9368_v43, 0  ;;  %v3059_v17 = vmul.f32 %v8135_v50, %v8092_v1  ;;  %4256 = vmatpush.bf16.msra.mxu3 %v5120_v24 }
 0x63d   :  { %v8164_v12 = vpop.eup %5519  ;;  %v2808_v15 = vmul.f32 1.442695, %v2778_v26  ;;  %v2761_v29 = vmax.f32 %v2759_v19, %v2760_v11  ;;  %v3051_v57 = vsel %vm3050_vm15, %v8090_v2, %v3047_v23  ;;  %vm3063_vm14 = vweird.f32 %v8092_v1  ;;  %v5226_v11 = vpop.permute.xlu2 %5225 }
 0x63e   :  { %v3204_v37 = vmul.f32 %v9389_v39, %v3042_v13  ;;  %v2888_v7 = vrot.slane %v2887_v46, 1  ;;  %v2890_v40 = vrot.slane %v8164_v12, 4  ;;  %v3056_v56 = vsel %vm3053_vm1, %v3055_v42, %v3051_v57  ;;  %v5119_v13 = vld [vmem:[%s9202_s4 + $0xf0] sm:$0xff] }
 0x63f   :  { %5523 = vpow2.f32 %v2808_v15  ;;  %v2762_v43 = vrot.slane %v2761_v29, 1  ;;  %v3057_v28 = vmul.f32 %v8006_v36, %v3056_v56  ;;  %v3060_v32 = vsub.f32 1.0, %v3059_v17  ;;  %v9395_v17 = vld [vmem:[#allocation6_spill] sm:$0xff] }
 0x640   :  { %v8170_v48 = vadd.f32 %v3204_v37, %v3172_v53  ;;  %v8173_v0 = vpop.eup %5521  ;;  %v8175_v22 = vadd.f32 %v2888_v7, %v2887_v46  ;;  %v2891_v2 = vadd.f32 %v8164_v12, %v2890_v40  ;;  %vm3064_vm6 = vweird.f32 %v8135_v50  ;;  %4257 = vmatpush.bf16.msra.mxu3 %v5119_v13  ;;  %v9396_v40 = vld [vmem:[#allocation5_spill] sm:$0xff] }
 0x641   :  { %v2763_v4 = vmax.f32 %v2761_v29, %v2762_v43  ;;  %v3157_v19 = vsub.f32 1.0, %v3057_v28  ;;  %v9390_v36 = vperm.slane %v9371_v61, 0  ;;  %v3061_v25 = vmul.f32 %v8135_v50, %v3060_v32  ;;  %vm8198_vm2 = vmor %vm3063_vm14, %vm3064_vm6 }
 0x642   :  { %5525 = vrcp.f32 %v8175_v22  ;;  %v2892_v30 = vrot.slane %v2891_v2, 2  ;;  %v3067_v59 = vand.u32 2147483647, %v8092_v1  ;;  %v3069_v55 = vand.u32 2147483648, %v8092_v1 }
 0x643   :  { %v3205_v31 = vmul.f32 %v9390_v36, %v3057_v28  ;;  %v2779_v16 = vsub.f32 %v8125_v8, %v2763_v4  ;;  %v3173_v26 = vmul.f32 %v3157_v19, %v7530_v3  ;;  %v3062_v23 = vadd.f32 %v8135_v50, %v3061_v25 }
 0x644   :  { %v3074_v61 = vmul.f32 %v8173_v0, %v8137_v45  ;;  %v2893_v46 = vadd.f32 %v2892_v30, %v2891_v2  ;;  %v5228_v42 = vunpack.i.h.bf16 %v5226_v11  ;;  %v5227_v53 = vunpack.i.l.bf16 %v5226_v11 }
 0x645   :  { %vm8202_vm3 = vcmp.eq.f32.partialorder %v3067_v59, 8.507059e+37  ;;  %v8206_v8 = vpop.eup %5523  ;;  %v2810_v37 = vmul.f32 1.442695, %v2779_v16  ;;  %v8208_v24 = vadd.f32 %v3205_v31, %v3173_v26  ;;  %v3066_v15 = vsel %vm8198_vm2, %v8135_v50, %v3062_v23  ;;  %v9398_v23 = vld [vmem:[#allocation22_spill] sm:$0xff] }
 0x646   :  { %v3070_v29 = vor.u32 1.1754944e-38, %v3069_v55  ;;  %v2894_v57 = vrot.slane %v2893_v46, 1  ;;  %v2896_v1 = vrot.slane %v8206_v8, 4  ;;  %v4166_v7 = vsel %vm75_vm0, %v9395_v17, %v5228_v42  ;;  %v9397_v55 = vld [vmem:[#allocation18_spill] sm:$0xff] }
 0x647   :  { %v4165_v56 = vsel %vm75_vm0, %v9396_v40, %v5227_v53  ;;  %5527 = vpow2.f32 %v2810_v37  ;;  %v5244_v43 = vpack.i.bf16 %v8208_v24, %v8170_v48  ;;  %v3236_v28 = vpack.c.bf16 %v8208_v24, %v8170_v48 }
 0x648   :  { %v4189_v32 = vpack.c.bf16 %v4166_v7, %v4165_v56  ;;  %v5526_v2 = vpop.eup %5525  ;;  %v8222_v50 = vadd.f32 %v2894_v57, %v2893_v46  ;;  %v2897_v13 = vadd.f32 %v8206_v8, %v2896_v1  ;;  %v3071_v4 = vsel %vm8202_vm3, %v3070_v29, %v3066_v15 }
 0x649   :  { %v3075_v19 = vsub.f32 1.0, %v3074_v61  ;;  %5245 = vrot.lane.b32.xlu0 %v5244_v43, %s5696_s1  ;;  %5018 = vmatmul.msk.bf16.gmra.mxu1 %vm75_vm0, %v3236_v28  ;;  %v3072_v36 = vmul.f32 %v8047_v6, %v3071_v4  ;;  %vm3079_vm4 = vweird.f32 %v8173_v0  ;;  %v3082_v31 = vand.u32 2147483647, %v8137_v45 }
 0x64a   :  { %5529 = vrcp.f32 %v8222_v50  ;;  %v2898_v25 = vrot.slane %v2897_v13, 2  ;;  %5049 = vmatmul.msk.bf16.vlgmr.msra.gmra.mxu3 %vm1170_vm5, %v4189_v32  ;;  %v3084_v59 = vand.u32 2147483648, %v8137_v45  ;;  %v3190_v16 = vperm.slane %v9397_v55, 0 }
 0x64b   :  { %v3076_v30 = vmul.f32 %v8173_v0, %v3075_v19  ;;  %v3089_v26 = vmul.f32 %v5526_v2, %v8175_v22  ;;  %vm3078_vm13 = vweird.f32 %v8137_v45  ;;  %v3191_v61 = vperm.slane %v9398_v23, 0 }
 0x64c   :  { %v2899_v11 = vadd.f32 %v2898_v25, %v2897_v13  ;;  %vm3080_vm1 = vmor %vm3078_vm13, %vm3079_vm4  ;;  %vm3083_vm15 = vcmp.eq.f32.partialorder %v3082_v31, 8.507059e+37  ;;  %v3085_v42 = vor.u32 1.1754944e-38, %v3084_v59  ;;  %v3158_v53 = vsub.f32 1.0, %v3072_v36 }
 0x64d   :  { %v3077_v6 = vadd.f32 %v8173_v0, %v3076_v30  ;;  %v8241_v46 = vpop.eup %5527  ;;  %v3090_v39 = vsub.f32 1.0, %v3089_v26  ;;  %v3099_v29 = vand.u32 2147483648, %v8175_v22  ;;  %vm3094_vm14 = vweird.f32 %v5526_v2 }
 0x64e   :  { %v2900_v3 = vrot.slane %v2899_v11, 1  ;;  %v2902_v37 = vrot.slane %v8241_v46, 4  ;;  %v3097_v45 = vand.u32 2147483647, %v8175_v22  ;;  %v3206_v32 = vmul.f32 %v3190_v16, %v3072_v36 }
 0x64f   :  { %v3081_v15 = vsel %vm3080_vm1, %v8173_v0, %v3077_v6  ;;  %v3091_v1 = vmul.f32 %v5526_v2, %v3090_v39  ;;  %v3174_v13 = vmul.f32 %v3158_v53, %v7640_v21  ;;  %vm3093_vm6 = vweird.f32 %v8175_v22 }
 0x650   :  { %v3086_v57 = vsel %vm3083_vm15, %v3085_v42, %v3081_v15  ;;  %v5530_v7 = vpop.eup %5529  ;;  %v2901_v56 = vadd.f32 %v2900_v3, %v2899_v11  ;;  %v2903_v43 = vadd.f32 %v8241_v46, %v2902_v37  ;;  %vm3095_vm2 = vmor %vm3093_vm6, %vm3094_vm14  ;;  %v3100_v25 = vor.u32 1.1754944e-38, %v3099_v29 }
 0x651   :  { %v3087_v28 = vmul.f32 %v8079_v10, %v3086_v57  ;;  %v3092_v4 = vadd.f32 %v5526_v2, %v3091_v1  ;;  %v3104_v0 = vmul.f32 %v5530_v7, %v8222_v50  ;;  %vm3098_vm3 = vcmp.eq.f32.partialorder %v3097_v45, 8.507059e+37  ;;  %v9399_v1 = vld [vmem:[#allocation25_spill] sm:$0xff] }
 0x652   :  { %5531 = vrcp.f32 %v2901_v56  ;;  %v2904_v19 = vrot.slane %v2903_v43, 2  ;;  %v3114_v21 = vand.u32 2147483648, %v8222_v50  ;;  %vm3109_vm4 = vweird.f32 %v5530_v7 }
 0x653   :  { %v3159_v31 = vsub.f32 1.0, %v3087_v28  ;;  %v3207_v30 = vmul.f32 %v3191_v61, %v3087_v28  ;;  %v3096_v59 = vsel %vm3095_vm2, %v5526_v2, %v3092_v4  ;;  %v3105_v55 = vsub.f32 1.0, %v3104_v0 }
 0x654   :  { %v2905_v26 = vadd.f32 %v2904_v19, %v2903_v43  ;;  %v3101_v36 = vsel %vm3098_vm3, %v3100_v25, %v3096_v59  ;;  %v3112_v11 = vand.u32 2147483647, %v8222_v50  ;;  %v8256_v23 = vadd.f32 %v3206_v32, %v3174_v13  ;;  %v9400_v43 = vld [vmem:[#allocation26_spill] sm:$0xff] }
 0x655   :  { %v3175_v10 = vmul.f32 %v3159_v31, %v7634_v14  ;;  %v3102_v16 = vmul.f32 %v8123_v60, %v3101_v36  ;;  %v3106_v22 = vmul.f32 %v5530_v7, %v3105_v55  ;;  %vm3108_vm13 = vweird.f32 %v8222_v50 }
 0x656   :  { %v2906_v6 = vrot.slane %v2905_v26, 1  ;;  %vm3110_vm1 = vmor %vm3108_vm13, %vm3109_vm4  ;;  %v3115_v39 = vor.u32 1.1754944e-38, %v3114_v21  ;;  %vm3113_vm15 = vcmp.eq.f32.partialorder %v3112_v11, 8.507059e+37  ;;  %v3192_v45 = vperm.slane %v9399_v1, 0 }
 0x657   :  { %v8258_v42 = vadd.f32 %v3207_v30, %v3175_v10  ;;  %v3107_v2 = vadd.f32 %v5530_v7, %v3106_v22  ;;  %v3160_v37 = vsub.f32 1.0, %v3102_v16  ;;  %v3193_v28 = vperm.slane %v9400_v43, 0 }
 0x658   :  { %v5532_v61 = vpop.eup %5531  ;;  %v2907_v53 = vadd.f32 %v2906_v6, %v2905_v26  ;;  %v3127_v32 = vand.u32 2147483647, %v2901_v56  ;;  %v3129_v13 = vand.u32 2147483648, %v2901_v56  ;;  %vm3123_vm6 = vweird.f32 %v2901_v56 }
 0x659   :  { %v5249_v14 = vpack.i.bf16 %v8258_v42, %v8256_v23  ;;  %v3237_v60 = vpack.c.bf16 %v8258_v42, %v8256_v23  ;;  %v3111_v3 = vsel %vm3110_vm1, %v5530_v7, %v3107_v2  ;;  %v3119_v15 = vmul.f32 %v5532_v61, %v2901_v56 }
 0x65a   :  { %5533 = vrcp.f32 %v2907_v53  ;;  %v3116_v50 = vsel %vm3113_vm15, %v3115_v39, %v3111_v3  ;;  %v3176_v7 = vmul.f32 %v3160_v37, %v7722_v52  ;;  %vm3124_vm14 = vweird.f32 %v5532_v61 }
 0x65b   :  { %5250 = vrot.lane.b32.xlu1 %v5249_v14, %s5696_s1  ;;  %5019 = vmatmul.msk.bf16.gmra.mxu1 %vm75_vm0, %v3237_v60  ;;  %v3117_v29 = vmul.f32 %v8164_v12, %v3116_v50  ;;  %v3120_v57 = vsub.f32 1.0, %v3119_v15  ;;  %v3208_v31 = vmul.f32 %v3192_v45, %v3102_v16  ;;  %vm3125_vm2 = vmor %vm3123_vm6, %vm3124_vm14  ;;  %vm3128_vm3 = vcmp.eq.f32.partialorder %v3127_v32, 8.507059e+37  ;;  %v9401_v15 = vld [vmem:[#allocation27_spill] sm:$0xff] }
 0x65c   :  { %v3130_v12 = vor.u32 1.1754944e-38, %v3129_v13  ;;  %v3144_v22 = vand.u32 2147483648, %v2907_v53  ;;  %v3142_v11 = vand.u32 2147483647, %v2907_v53  ;;  %vm3138_vm13 = vweird.f32 %v2907_v53  ;;  %v8305_v13 = vld [vmem:[%s9203_s5 + $0xa] ss:$0 sm:$0xff] }
 0x65d   :  { %v3161_v4 = vsub.f32 1.0, %v3117_v29  ;;  %v3121_v0 = vmul.f32 %v5532_v61, %v3120_v57  ;;  %v3209_v25 = vmul.f32 %v3193_v28, %v3117_v29  ;;  %v8272_v55 = vadd.f32 %v3208_v31, %v3176_v7  ;;  %v9402_v29 = vld [vmem:[#allocation28_spill] sm:$0xff] }
 0x65e   :  { %vm3143_vm15 = vcmp.eq.f32.partialorder %v3142_v11, 8.507059e+37  ;;  %v3194_v50 = vperm.slane %v9401_v15, 0  ;;  %v3195_v57 = vperm.slane %v9402_v29, 0 }
 0x65f   :  { %v3177_v19 = vmul.f32 %v3161_v4, %v7716_v20  ;;  %v3122_v30 = vadd.f32 %v5532_v61, %v3121_v0  ;;  %v3290_v4 = vpop.f32.mrf.mxu1 }
 0x660   :  { %v5534_v59 = vpop.eup %5533  ;;  %v3291_v0 = vadd.f32 %v8305_v13, %v3290_v4 }
 0x661   :  { %v8274_v26 = vadd.f32 %v3209_v25, %v3177_v19  ;;  %v3126_v10 = vsel %vm3125_vm2, %v5532_v61, %v3122_v30  ;;  %v3134_v36 = vmul.f32 %v5534_v59, %v2907_v53  ;;  %vm3139_vm4 = vweird.f32 %v5534_v59 }
 0x662   :  { %v3131_v21 = vsel %vm3128_vm3, %v3130_v12, %v3126_v10  ;;  %vm3140_vm1 = vmor %vm3138_vm13, %vm3139_vm4  ;;  %v3145_v61 = vor.u32 1.1754944e-38, %v3144_v22  ;;  %v9405_v22 = vld [vmem:[#allocation7_spill] sm:$0xff] }
 0x663   :  { %v5254_v52 = vpack.i.bf16 %v8274_v26, %v8272_v55  ;;  %v3135_v56 = vsub.f32 1.0, %v3134_v36  ;;  %v3132_v20 = vmul.f32 %v8206_v8, %v3131_v21  ;;  %v3238_v6 = vpack.c.bf16 %v8274_v26, %v8272_v55 }
 0x665   :  { %5255 = vrot.lane.b32.xlu2 %v5254_v52, %s5696_s1  ;;  %v3136_v16 = vmul.f32 %v5534_v59, %v3135_v56  ;;  %v3162_v60 = vsub.f32 1.0, %v3132_v20  ;;  %v3210_v53 = vmul.f32 %v3194_v50, %v3132_v20  ;;  %v9404_v52 = vld [vmem:[#allocation8_spill] sm:$0xff] }
 0x667   :  { %v3137_v2 = vadd.f32 %v5534_v59, %v3136_v16  ;;  %v3178_v8 = vmul.f32 %v3162_v60, %v7750_v5  ;;  %v3360_v5 = vpop.f32.mrf.mxu2  ;;  %v3292_v25 = vpop.f32.mrf.mxu1 }
 0x668   :  { %v3293_v10 = vadd.f32 %v8305_v13, %v3292_v25 }
 0x669   :  { %v3141_v14 = vsel %vm3140_vm1, %v5534_v59, %v3137_v2  ;;  %v8288_v43 = vadd.f32 %v3210_v53, %v3178_v8 }
 0x66a   :  { %v3146_v39 = vsel %vm3143_vm15, %v3145_v61, %v3141_v14 }
 0x66b   :  { %5020 = vmatmul.msk.bf16.gmra.mxu1 %vm75_vm0, %v3238_v6  ;;  %v3147_v3 = vmul.f32 %v8241_v46, %v3146_v39  ;;  %v8297_v46 = vld [vmem:[%s9203_s5 + $0xb] ss:$0 sm:$0xff] }
 0x66c   :  { %v8308_v7 = vadd.f32 %v8297_v46, %v3360_v5 }
 0x66d   :  { %v3163_v37 = vsub.f32 1.0, %v3147_v3  ;;  %v3211_v45 = vmul.f32 %v3195_v57, %v3147_v3 }
 0x66e   :  { %v3381_v19 = vperm.slane %v8308_v7, 0  ;;  %v3367_v59 = vrot.slane %v8308_v7, 1  ;;  %v3368_v2 = vrot.slane %v8308_v7, 2  ;;  %v3369_v8 = vrot.slane %v8308_v7, 3 }
 0x66f   :  { %v3179_v1 = vmul.f32 %v3163_v37, %v7748_v62 }
 0x670   :  { %v3413_v31 = vmul.f32 %v3381_v19, %v3291_v0  ;;  %v3382_v16 = vperm.slane %v3367_v59, 0  ;;  %v3383_v39 = vperm.slane %v3368_v2, 0  ;;  %v3384_v53 = vperm.slane %v3369_v8, 0 }
 0x671   :  { %v8290_v28 = vadd.f32 %v3211_v45, %v3179_v1  ;;  %v3370_v0 = vrot.slane %v8308_v7, 4 }
 0x672   :  { %v3429_v30 = vsel %vm75_vm0, %v3413_v31, 0.0  ;;  %v3414_v6 = vmul.f32 %v3382_v16, %v3293_v10 }
 0x673   :  { %9403 = vst [vmem:[#allocation9_spill] sm:$0xff] %v8290_v28  ;;  %v5259_v32 = vpack.i.bf16 %v8290_v28, %v8288_v43  ;;  %v3239_v62 = vpack.c.bf16 %v8290_v28, %v8288_v43 }
 0x674   :  { %v3432_v61 = vsel %vm75_vm0, %v3414_v6, 0.0 }
 0x675   :  { %5260 = vrot.lane.b32.xlu0 %v5259_v32, %s5696_s1 }
 0x67b   :  { %5021 = vmatmul.msk.bf16.gmra.mxu1 %vm75_vm0, %v3239_v62 }
 0x683   :  { %v5231_v12 = vpop.permute.xlu1 %5230 }
 0x684   :  { %v5233_v36 = vunpack.i.h.bf16 %v5231_v12  ;;  %v5232_v21 = vunpack.i.l.bf16 %v5231_v12 }
 0x685   :  { %3430 = vadd.xlane.f32.xlu1 %v3429_v30  ;;  %v3385_v30 = vperm.slane %v3370_v0, 0 }
 0x686   :  { %v4168_v56 = vsel %vm75_vm0, %v9404_v52, %v5233_v36  ;;  %v4167_v20 = vsel %vm75_vm0, %v9405_v22, %v5232_v21  ;;  %v3371_v21 = vrot.slane %v8308_v7, 5 }
 0x687   :  { %v4190_v11 = vpack.c.bf16 %v4168_v56, %v4167_v20 }
 0x688   :  { %v3386_v2 = vperm.slane %v3371_v21, 0 }
 0x689   :  { %5050 = vmatmul.msk.bf16.gmra.mxu3 %vm1170_vm5, %v4190_v11 }
 0x68e   :  { %3433 = vadd.xlane.f32.xlu2 %v3432_v61 }
 0x68f   :  { %v3295_v14 = vpop.f32.mrf.mxu1 }
 0x690   :  { %v3296_v60 = vadd.f32 %v8305_v13, %v3295_v14 }
 0x692   :  { %v3415_v3 = vmul.f32 %v3383_v39, %v3296_v60  ;;  %v5241_v19 = vpop.permute.xlu2 %5240  ;;  %v3372_v60 = vrot.slane %v8308_v7, 6 }
 0x693   :  { %v5243_v59 = vunpack.i.h.bf16 %v5241_v19  ;;  %v5242_v12 = vunpack.i.l.bf16 %v5241_v19 }
 0x694   :  { %v3435_v37 = vsel %vm75_vm0, %v3415_v3, 0.0 }
 0x695   :  { %v5236_v15 = vpop.permute.xlu0 %5235  ;;  %v4172_v56 = vsel %vm75_vm0, %v6094_v41, %v5243_v59  ;;  %v4171_v20 = vsel %vm75_vm0, %v6099_v27, %v5242_v12 }
 0x696   :  { %3436 = vadd.xlane.f32.xlu2 %v3435_v37  ;;  %v5238_v50 = vunpack.i.h.bf16 %v5236_v15  ;;  %v5237_v29 = vunpack.i.l.bf16 %v5236_v15  ;;  %v4192_v11 = vpack.c.bf16 %v4172_v56, %v4171_v20  ;;  %v3387_v37 = vperm.slane %v3372_v60, 0 }
 0x697   :  { %v3297_v57 = vpop.f32.mrf.mxu1 }
 0x698   :  { %v3298_v1 = vadd.f32 %v8305_v13, %v3297_v57  ;;  %v4170_v45 = vsel %vm75_vm0, %v6064_v54, %v5238_v50  ;;  %v4169_v32 = vsel %vm75_vm0, %v6067_v47, %v5237_v29 }
 0x699   :  { %v4191_v5 = vpack.c.bf16 %v4170_v45, %v4169_v32  ;;  %v9406_v45 = vld [vmem:[#allocation10_spill] sm:$0xff] }
 0x69a   :  { %v3416_v62 = vmul.f32 %v3384_v53, %v3298_v1 }
 0x69b   :  { %5051 = vmatmul.msk.bf16.gmra.mxu3 %vm1170_vm5, %v4191_v5 }
 0x69c   :  { %v3438_v4 = vsel %vm75_vm0, %v3416_v62, 0.0  ;;  %v3362_v62 = vpop.f32.mrf.mxu2 }
 0x69d   :  { %3439 = vadd.xlane.f32.xlu1 %v3438_v4  ;;  %v8355_v4 = vadd.f32 %v8297_v46, %v3362_v62 }
 0x69f   :  { %v3374_v12 = vrot.slane %v8355_v4, 1 }
 0x6a0   :  { %v3300_v31 = vpop.f32.mrf.mxu1 }
 0x6a1   :  { %v3301_v25 = vadd.f32 %v8305_v13, %v3300_v31  ;;  %v3389_v31 = vperm.slane %v8355_v4, 0 }
 0x6a3   :  { %v3417_v10 = vmul.f32 %v3385_v30, %v3301_v25  ;;  %v8362_v30 = vld [vmem:[%s9203_s5 + $0xc] ss:$0 sm:$0xff] }
 0x6a5   :  { %v3441_v36 = vsel %vm75_vm0, %v3417_v10, 0.0 }
 0x6a6   :  { %3442 = vadd.xlane.f32.xlu0 %v3441_v36 }
 0x6a8   :  { %v3302_v16 = vpop.f32.mrf.mxu1 }
 0x6a9   :  { %v3303_v6 = vadd.f32 %v8305_v13, %v3302_v16  ;;  %v9407_v16 = vld [vmem:[#allocation12_spill] sm:$0xff] }
 0x6ab   :  { %5052 = vmatmul.msk.bf16.gmra.mxu3 %vm1170_vm5, %v4192_v11  ;;  %v3418_v61 = vmul.f32 %v3386_v2, %v3303_v6  ;;  %v9408_v6 = vld [vmem:[#allocation11_spill] sm:$0xff] }
 0x6ad   :  { %v3444_v14 = vsel %vm75_vm0, %v3418_v61, 0.0 }
 0x6ae   :  { %3445 = vadd.xlane.f32.xlu2 %v3444_v14  ;;  %v3390_v14 = vperm.slane %v3374_v12, 0  ;;  %v3376_v12 = vrot.slane %v8355_v4, 3 }
 0x6b5   :  { %v3305_v39 = vpop.f32.mrf.mxu1 }
 0x6b6   :  { %v3306_v3 = vadd.f32 %v8305_v13, %v3305_v39 }
 0x6b8   :  { %v3419_v8 = vmul.f32 %v3387_v37, %v3306_v3 }
 0x6ba   :  { %v3447_v15 = vsel %vm75_vm0, %v3419_v8, 0.0  ;;  %v3375_v8 = vrot.slane %v8355_v4, 2 }
 0x6bb   :  { %v5246_v50 = vpop.permute.xlu0 %5245  ;;  %3448 = vadd.xlane.f32.xlu1 %v3447_v15 }
 0x6bc   :  { %v5248_v29 = vunpack.i.h.bf16 %v5246_v50  ;;  %v5247_v57 = vunpack.i.l.bf16 %v5246_v50  ;;  %v3391_v62 = vperm.slane %v3375_v8, 0 }
 0x6bd   :  { %v8347_v1 = vpop.f32.mrf.mxu1 }
 0x6be   :  { %v4174_v53 = vsel %vm75_vm0, %v9339_v35, %v5248_v29  ;;  %v4173_v32 = vsel %vm75_vm0, %v9406_v45, %v5247_v57 }
 0x6bf   :  { %v4193_v5 = vpack.c.bf16 %v4174_v53, %v4173_v32  ;;  %v5256_v50 = vpop.permute.xlu2 %5255 }
 0x6c1   :  { %5053 = vmatmul.msk.bf16.gmra.mxu3 %vm1170_vm5, %v4193_v5 }
 0x6c6   :  { %v3310_v0 = vpop.f32.mrf.mxu1 }
 0x6c7   :  { %v3311_v19 = vadd.f32 %v8305_v13, %v3310_v0  ;;  %v5258_v0 = vunpack.i.h.bf16 %v5256_v50 }
 0x6c9   :  { %v3421_v25 = vmul.f32 %v3389_v31, %v3311_v19  ;;  %v5257_v19 = vunpack.i.l.bf16 %v5256_v50  ;;  %v3377_v50 = vrot.slane %v8355_v4, 4 }
 0x6cb   :  { %v3453_v59 = vsel %vm75_vm0, %v3421_v25, 0.0 }
 0x6cc   :  { %3454 = vadd.xlane.f32.xlu0 %v3453_v59 }
 0x6cd   :  { %v5251_v10 = vpop.permute.xlu1 %5250  ;;  %v4259_v21 = vpop.f32.mrf.mxu3 }
 0x6ce   :  { %v5253_v36 = vunpack.i.h.bf16 %v5251_v10  ;;  %v5252_v46 = vunpack.i.l.bf16 %v5251_v10  ;;  %v3312_v56 = vpop.f32.mrf.mxu1  ;;  %v4260_v20 = vadd.f32 %v8362_v30, %v4259_v21  ;;  %v9409_v10 = vld [vmem:[#allocation16_spill] sm:$0xff] }
 0x6cf   :  { %v3313_v61 = vadd.f32 %v8305_v13, %v3312_v56 }
 0x6d0   :  { %v4176_v11 = vsel %vm75_vm0, %v9407_v16, %v5253_v36  ;;  %v4175_v2 = vsel %vm75_vm0, %v9408_v6, %v5252_v46  ;;  %v5057_v39 = vmul.f32 -1.442695, %v4260_v20  ;;  %v4178_v36 = vsel %vm75_vm0, %v9409_v10, %v5258_v0  ;;  %v9410_v46 = vld [vmem:[#allocation15_spill] sm:$0xff] }
 0x6d1   :  { %v4194_v60 = vpack.c.bf16 %v4176_v11, %v4175_v2  ;;  %v3422_v3 = vmul.f32 %v3390_v14, %v3313_v61  ;;  %v4177_v21 = vsel %vm75_vm0, %v9410_v46, %v5257_v19  ;;  %v3392_v61 = vperm.slane %v3376_v12, 0 }
 0x6d2   :  { %5535 = vpow2.f32 %v5057_v39  ;;  %v4195_v11 = vpack.c.bf16 %v4178_v36, %v4177_v21  ;;  %v3393_v12 = vperm.slane %v3377_v50, 0 }
 0x6d3   :  { %5054 = vmatmul.msk.bf16.gmra.mxu3 %vm1170_vm5, %v4194_v60  ;;  %v3456_v37 = vsel %vm75_vm0, %v3422_v3, 0.0 }
 0x6d4   :  { %3457 = vadd.xlane.f32.xlu1 %v3456_v37 }
 0x6d5   :  { %v4261_v15 = vpop.f32.mrf.mxu3 }
 0x6d6   :  { %v4262_v29 = vadd.f32 %v8362_v30, %v4261_v15 }
 0x6d8   :  { %v3315_v57 = vpop.f32.mrf.mxu1  ;;  %v5536_v53 = vpop.eup %5535  ;;  %v5058_v5 = vmul.f32 -1.442695, %v4262_v29 }
 0x6d9   :  { %v3316_v32 = vadd.f32 %v8305_v13, %v3315_v57  ;;  %v4347_v31 = vadd.f32 1.0, %v5536_v53 }
 0x6da   :  { %5537 = vpow2.f32 %v5058_v5 }
 0x6db   :  { %v3423_v25 = vmul.f32 %v3391_v62, %v3316_v32  ;;  %5539 = vrcp.f32 %v4347_v31  ;;  %v4374_v15 = vand.u32 2147483648, %v4347_v31  ;;  %v4372_v57 = vand.u32 2147483647, %v4347_v31 }
 0x6dc   :  { %vm4368_vm6 = vweird.f32 %v4347_v31 }
 0x6dd   :  { %v3459_v59 = vsel %vm75_vm0, %v3423_v25, 0.0  ;;  %vm4373_vm3 = vcmp.eq.f32.partialorder %v4372_v57, 8.507059e+37 }
 0x6de   :  { %3460 = vadd.xlane.f32.xlu0 %v3459_v59  ;;  %v4375_v59 = vor.u32 1.1754944e-38, %v4374_v15 }
 0x6e0   :  { %v3317_v56 = vpop.f32.mrf.mxu1  ;;  %v5538_v20 = vpop.eup %5537 }
 0x6e1   :  { %v3318_v2 = vadd.f32 %v8305_v13, %v3317_v56  ;;  %v5540_v14 = vpop.eup %5539  ;;  %v4348_v60 = vadd.f32 1.0, %v5538_v20  ;;  %v3378_v56 = vrot.slane %v8355_v4, 5 }
 0x6e2   :  { %v4364_v39 = vmul.f32 %v5540_v14, %v4347_v31  ;;  %vm4369_vm14 = vweird.f32 %v5540_v14 }
 0x6e3   :  { %5055 = vmatmul.msk.bf16.gmra.mxu3 %vm1170_vm5, %v4195_v11  ;;  %v3424_v3 = vmul.f32 %v3392_v61, %v3318_v2  ;;  %5541 = vrcp.f32 %v4348_v60  ;;  %vm4370_vm2 = vmor %vm4368_vm6, %vm4369_vm14  ;;  %vm4383_vm13 = vweird.f32 %v4348_v60 }
 0x6e4   :  { %v4365_v37 = vsub.f32 1.0, %v4364_v39 }
 0x6e5   :  { %v3462_v8 = vsel %vm75_vm0, %v3424_v3, 0.0  ;;  %v4387_v3 = vand.u32 2147483647, %v4348_v60 }
 0x6e6   :  { %3463 = vadd.xlane.f32.xlu2 %v3462_v8  ;;  %v4366_v29 = vmul.f32 %v5540_v14, %v4365_v37  ;;  %v4389_v37 = vand.u32 2147483648, %v4348_v60 }
 0x6e7   :  { %v5261_v32 = vpop.permute.xlu0 %5260  ;;  %vm4388_vm15 = vcmp.eq.f32.partialorder %v4387_v3, 8.507059e+37 }
 0x6e8   :  { %v3320_v53 = vpop.f32.mrf.mxu1  ;;  %v4367_v5 = vadd.f32 %v5540_v14, %v4366_v29  ;;  %v5263_v0 = vunpack.i.h.bf16 %v5261_v32  ;;  %v5262_v19 = vunpack.i.l.bf16 %v5261_v32 }
 0x6e9   :  { %v3321_v62 = vadd.f32 %v8305_v13, %v3320_v53  ;;  %v5542_v25 = vpop.eup %5541  ;;  %v3394_v53 = vperm.slane %v3378_v56, 0 }
 0x6ea   :  { %v4371_v36 = vsel %vm4370_vm2, %v5540_v14, %v4367_v5  ;;  %v4379_v21 = vmul.f32 %v5542_v25, %v4348_v60  ;;  %v4180_v31 = vsel %vm75_vm0, %v9363_v9, %v5263_v0  ;;  %v4179_v11 = vsel %vm75_vm0, %v9362_v63, %v5262_v19 }
 0x6eb   :  { %v4376_v20 = vsel %vm4373_vm3, %v4375_v59, %v4371_v36  ;;  %v3425_v2 = vmul.f32 %v3393_v12, %v3321_v62  ;;  %vm4384_vm4 = vweird.f32 %v5542_v25  ;;  %v4196_v29 = vpack.c.bf16 %v4180_v31, %v4179_v11 }
 0x6ec   :  { %v4619_v61 = vsub.f32 1.0, %v4376_v20  ;;  %v4380_v39 = vsub.f32 1.0, %v4379_v21  ;;  %v4603_v14 = vmul.f32 %v4376_v20, %v9396_v40  ;;  %vm4385_vm1 = vmor %vm4383_vm13, %vm4384_vm4  ;;  %v4390_v0 = vor.u32 1.1754944e-38, %v4389_v37 }
 0x6ed   :  { %v3465_v8 = vsel %vm75_vm0, %v3425_v2, 0.0  ;;  %v3373_v59 = vrot.slane %v8308_v7, 7  ;;  %v3379_v36 = vrot.slane %v8355_v4, 6  ;;  %v3308_v60 = vadd.f32 %v8305_v13, %v8347_v1 }
 0x6ee   :  { %v4635_v15 = vmul.f32 %v4619_v61, %v7828_v44  ;;  %v4381_v50 = vmul.f32 %v5542_v25, %v4380_v39  ;;  %3466 = vadd.xlane.f32.xlu1 %v3465_v8 }
 0x6ef   :  { %v3388_v31 = vperm.slane %v3373_v59, 0  ;;  %v3395_v61 = vperm.slane %v3379_v36, 0 }
 0x6f0   :  { %v3322_v57 = vpop.f32.mrf.mxu1  ;;  %v4651_v32 = vadd.f32 %v4635_v15, %v4603_v14  ;;  %v4382_v5 = vadd.f32 %v5542_v25, %v4381_v50  ;;  %v3380_v50 = vrot.slane %v8355_v4, 7 }
 0x6f1   :  { %v3323_v62 = vadd.f32 %v8305_v13, %v3322_v57  ;;  %v3420_v37 = vmul.f32 %v3388_v31, %v3308_v60 }
 0x6f2   :  { %4667 = vst.msk [vmem:[#allocation2] sm:$0xff] %vm75_vm0, %v4651_v32  ;;  %v4386_v19 = vsel %vm4385_vm1, %v5542_v25, %v4382_v5  ;;  %v3396_v5 = vperm.slane %v3380_v50, 0 }
 0x6f3   :  { %5056 = vmatmul.msk.bf16.gmra.mxu3 %vm1170_vm5, %v4196_v29  ;;  %v3426_v40 = vmul.f32 %v3394_v53, %v3323_v62  ;;  %v4391_v12 = vsel %vm4388_vm15, %v4390_v0, %v4386_v19  ;;  %v3450_v15 = vsel %vm75_vm0, %v3420_v37, 0.0 }
 0x6f4   :  { %v4620_v21 = vsub.f32 1.0, %v4391_v12  ;;  %v4604_v20 = vmul.f32 %v4391_v12, %v9395_v17 }
 0x6f5   :  { %v3468_v56 = vsel %vm75_vm0, %v3426_v40, 0.0 }
 0x6f6   :  { %3469 = vadd.xlane.f32.xlu0 %v3468_v56  ;;  %v4636_v25 = vmul.f32 %v4620_v21, %v7830_v38 }
 0x6f8   :  { %v3325_v11 = vpop.f32.mrf.mxu1  ;;  %v3431_v2 = vpop.xlane.xlu1 %3430  ;;  %v4652_v39 = vadd.f32 %v4636_v25, %v4604_v20 }
 0x6f9   :  { %v3326_v7 = vadd.f32 %v8305_v13, %v3325_v11  ;;  %v3477_v3 = vmul.f32 0.17677669, %v3431_v2 }
 0x6fa   :  { %4668 = vst.msk [vmem:[#allocation2 + $0x8] sm:$0xff] %vm75_vm0, %v4652_v39 }
 0x6fb   :  { %v3493_v1 = vrot.slane %v3477_v3, 4  ;;  %v3427_v8 = vmul.f32 %v3395_v61, %v3326_v7 }
 0x6fd   :  { %v3494_v14 = vmax.f32 %v3477_v3, %v3493_v1  ;;  %v3471_v17 = vsel %vm75_vm0, %v3427_v8, 0.0 }
 0x6fe   :  { %3451 = vadd.xlane.f32.xlu0 %v3450_v15  ;;  %3472 = vadd.xlane.f32.xlu2 %v3471_v17 }
 0x6ff   :  { %v3495_v29 = vrot.slane %v3494_v14, 2 }
 0x700   :  { %v3327_v57 = vpop.f32.mrf.mxu1 }
 0x701   :  { %v3496_v53 = vmax.f32 %v3494_v14, %v3495_v29  ;;  %v3328_v32 = vadd.f32 %v8305_v13, %v3327_v57  ;;  %v3434_v62 = vpop.xlane.xlu2 %3433 }
 0x702   :  { %v3478_v40 = vmul.f32 0.17677669, %v3434_v62 }
 0x703   :  { %v3497_v0 = vrot.slane %v3496_v53, 1  ;;  %v3428_v19 = vmul.f32 %v3396_v5, %v3328_v32 }
 0x704   :  { %v3499_v36 = vrot.slane %v3478_v40, 4 }
 0x705   :  { %v3498_v59 = vmax.f32 %v3496_v53, %v3497_v0  ;;  %v3474_v12 = vsel %vm75_vm0, %v3428_v19, 0.0 }
 0x706   :  { %3475 = vadd.xlane.f32.xlu1 %v3474_v12  ;;  %v3500_v21 = vmax.f32 %v3478_v40, %v3499_v36 }
 0x707   :  { %v3589_v60 = vsub.f32 %v3477_v3, %v3498_v59 }
 0x708   :  { %v3501_v56 = vrot.slane %v3500_v21, 2 }
 0x709   :  { %v3605_v4 = vmul.f32 1.442695, %v3589_v60  ;;  %v3437_v20 = vpop.xlane.xlu2 %3436 }
 0x70a   :  { %v3502_v25 = vmax.f32 %v3500_v21, %v3501_v56  ;;  %v3479_v31 = vmul.f32 0.17677669, %v3437_v20 }
 0x70b   :  { %5543 = vpow2.f32 %v3605_v4 }
 0x70c   :  { %v3503_v11 = vrot.slane %v3502_v25, 1  ;;  %v3505_v13 = vrot.slane %v3479_v31, 4  ;;  %v4264_v2 = vpop.f32.mrf.mxu3 }
 0x70d   :  { %v4265_v7 = vadd.f32 %v8362_v30, %v4264_v2 }
 0x70e   :  { %v3504_v61 = vmax.f32 %v3502_v25, %v3503_v11  ;;  %v3506_v39 = vmax.f32 %v3479_v31, %v3505_v13 }
 0x70f   :  { %v5059_v1 = vmul.f32 -1.442695, %v4265_v7 }
 0x710   :  { %v3507_v37 = vrot.slane %v3506_v39, 2  ;;  %v3440_v8 = vpop.xlane.xlu1 %3439  ;;  %v3590_v14 = vsub.f32 %v3478_v40, %v3504_v61 }
 0x711   :  { %v8415_v15 = vmul.f32 0.17677669, %v3440_v8  ;;  %v8417_v3 = vpop.eup %5543  ;;  %5545 = vpow2.f32 %v5059_v1 }
 0x712   :  { %v3508_v17 = vmax.f32 %v3506_v39, %v3507_v37  ;;  %v3637_v57 = vrot.slane %v8417_v3, 4  ;;  %v3607_v53 = vmul.f32 1.442695, %v3590_v14 }
 0x713   :  { %v3511_v50 = vrot.slane %v8415_v15, 4 }
 0x714   :  { %v3509_v29 = vrot.slane %v3508_v17, 1  ;;  %v4266_v32 = vpop.f32.mrf.mxu3  ;;  %v3638_v59 = vadd.f32 %v8417_v3, %v3637_v57  ;;  %5547 = vpow2.f32 %v3607_v53 }
 0x715   :  { %v3512_v5 = vmax.f32 %v8415_v15, %v3511_v50  ;;  %v4267_v62 = vadd.f32 %v8362_v30, %v4266_v32 }
 0x716   :  { %v3510_v19 = vmax.f32 %v3508_v17, %v3509_v29  ;;  %v3639_v4 = vrot.slane %v3638_v59, 2 }
 0x717   :  { %v5546_v0 = vpop.eup %5545  ;;  %v5060_v40 = vmul.f32 -1.442695, %v4267_v62  ;;  %v3513_v36 = vrot.slane %v3512_v5, 2 }
 0x718   :  { %v4349_v12 = vadd.f32 1.0, %v5546_v0  ;;  %v3591_v60 = vsub.f32 %v3479_v31, %v3510_v19  ;;  %v3640_v61 = vadd.f32 %v3639_v4, %v3638_v59 }
 0x719   :  { %5549 = vpow2.f32 %v5060_v40  ;;  %v3443_v21 = vpop.xlane.xlu0 %3442  ;;  %v3514_v56 = vmax.f32 %v3512_v5, %v3513_v36 }
 0x71a   :  { %5551 = vrcp.f32 %v4349_v12  ;;  %v8424_v20 = vpop.eup %5547  ;;  %v8426_v25 = vmul.f32 0.17677669, %v3443_v21  ;;  %v3609_v13 = vmul.f32 1.442695, %v3591_v60  ;;  %v3641_v14 = vrot.slane %v3640_v61, 1 }
 0x71b   :  { %v3515_v37 = vrot.slane %v3514_v56, 1  ;;  %v3643_v8 = vrot.slane %v8424_v20, 4  ;;  %v4404_v50 = vand.u32 2147483648, %v4349_v12  ;;  %v4402_v32 = vand.u32 2147483647, %v4349_v12 }
 0x71c   :  { %v3517_v1 = vrot.slane %v8426_v25, 4  ;;  %v8432_v62 = vadd.f32 %v3641_v14, %v3640_v61  ;;  %vm4398_vm14 = vweird.f32 %v4349_v12 }
 0x71d   :  { %v3516_v29 = vmax.f32 %v3514_v56, %v3515_v37  ;;  %v3644_v53 = vadd.f32 %v8424_v20, %v3643_v8  ;;  %v4405_v36 = vor.u32 1.1754944e-38, %v4404_v50  ;;  %vm4403_vm2 = vcmp.eq.f32.partialorder %v4402_v32, 8.507059e+37 }
 0x71e   :  { %v3518_v57 = vmax.f32 %v8426_v25, %v3517_v1  ;;  %v4269_v40 = vpop.f32.mrf.mxu3 }
 0x71f   :  { %v5550_v11 = vpop.eup %5549  ;;  %v3592_v60 = vsub.f32 %v8415_v15, %v3516_v29  ;;  %v3645_v4 = vrot.slane %v3644_v53, 2  ;;  %v4270_v61 = vadd.f32 %v8362_v30, %v4269_v40 }
 0x720   :  { %v5552_v2 = vpop.eup %5551  ;;  %v4350_v39 = vadd.f32 1.0, %v5550_v11  ;;  %v3519_v19 = vrot.slane %v3518_v57, 2 }
 0x721   :  { %v4394_v7 = vmul.f32 %v5552_v2, %v4349_v12  ;;  %vm4399_vm5 = vweird.f32 %v5552_v2  ;;  %v3446_v1 = vpop.xlane.xlu2 %3445  ;;  %v3611_v8 = vmul.f32 1.442695, %v3592_v60  ;;  %v3646_v15 = vadd.f32 %v3645_v4, %v3644_v53 }
 0x722   :  { %5553 = vrcp.f32 %v4350_v39  ;;  %vm4400_vm6 = vmor %vm4398_vm14, %vm4399_vm5  ;;  %v3520_v11 = vmax.f32 %v3518_v57, %v3519_v19  ;;  %v4419_v14 = vand.u32 2147483648, %v4350_v39  ;;  %v4417_v50 = vand.u32 2147483647, %v4350_v39 }
 0x723   :  { %5555 = vpow2.f32 %v3609_v13  ;;  %v4395_v31 = vsub.f32 1.0, %v4394_v7  ;;  %v5061_v57 = vmul.f32 -1.442695, %v4270_v61  ;;  %v8442_v32 = vmul.f32 0.17677669, %v3446_v1 }
 0x724   :  { %5557 = vrcp.f32 %v8432_v62  ;;  %vm4413_vm4 = vweird.f32 %v4350_v39  ;;  %vm4418_vm1 = vcmp.eq.f32.partialorder %v4417_v50, 8.507059e+37  ;;  %v3647_v4 = vrot.slane %v3646_v15, 1 }
 0x725   :  { %v4396_v17 = vmul.f32 %v5552_v2, %v4395_v31  ;;  %5559 = vpow2.f32 %v3611_v8  ;;  %vm3738_vm5 = vweird.f32 %v8432_v62 }
 0x726   :  { %5561 = vpow2.f32 %v5061_v57  ;;  %v4271_v8 = vpop.f32.mrf.mxu3 }
 0x727   :  { %v4397_v0 = vadd.f32 %v5552_v2, %v4396_v17  ;;  %v3521_v17 = vrot.slane %v3520_v11, 1 }
 0x728   :  { %v5554_v5 = vpop.eup %5553 }
 0x729   :  { %v8434_v59 = vpop.eup %5555  ;;  %v4409_v21 = vmul.f32 %v5554_v5, %v4350_v39  ;;  %v4401_v56 = vsel %vm4400_vm6, %v5552_v2, %v4397_v0  ;;  %vm4414_vm3 = vweird.f32 %v5554_v5  ;;  %v3522_v60 = vmax.f32 %v3520_v11, %v3521_v17 }
 0x72a   :  { %v4406_v13 = vsel %vm4403_vm2, %v4405_v36, %v4401_v56  ;;  %v3649_v12 = vrot.slane %v8434_v59, 4  ;;  %vm4415_vm13 = vmor %vm4413_vm4, %vm4414_vm3  ;;  %v4420_v36 = vor.u32 1.1754944e-38, %v4419_v14  ;;  %v3523_v56 = vrot.slane %v8442_v32, 4 }
 0x72b   :  { %v4410_v7 = vsub.f32 1.0, %v4409_v21  ;;  %v4621_v37 = vsub.f32 1.0, %v4406_v13  ;;  %v4605_v2 = vmul.f32 %v4406_v13, %v9405_v22  ;;  %v8445_v21 = vpop.eup %5557  ;;  %v3593_v61 = vsub.f32 %v8426_v25, %v3522_v60 }
 0x72c   :  { %v3650_v0 = vadd.f32 %v8434_v59, %v3649_v12  ;;  %v3734_v13 = vmul.f32 %v8445_v21, %v8432_v62  ;;  %v3524_v11 = vmax.f32 %v8442_v32, %v3523_v56  ;;  %v8453_v12 = vpop.eup %5559  ;;  %v3744_v60 = vand.u32 2147483648, %v8432_v62 }
 0x72d   :  { %v4411_v31 = vmul.f32 %v5554_v5, %v4410_v7  ;;  %v4637_v29 = vmul.f32 %v4621_v37, %v7919_v58  ;;  %vm3739_vm15 = vweird.f32 %v8445_v21 }
 0x72e   :  { %v3651_v39 = vrot.slane %v3650_v0, 2  ;;  %v3735_v14 = vsub.f32 1.0, %v3734_v13  ;;  %v3525_v25 = vrot.slane %v3524_v11, 2  ;;  %vm8477_vm14 = vmor %vm3738_vm5, %vm3739_vm15 }
 0x72f   :  { %v4412_v19 = vadd.f32 %v5554_v5, %v4411_v31  ;;  %v4653_v40 = vadd.f32 %v4637_v29, %v4605_v2  ;;  %v5562_v31 = vpop.eup %5561  ;;  %v3613_v2 = vmul.f32 1.442695, %v3593_v61  ;;  %v3655_v29 = vrot.slane %v8453_v12, 4 }
 0x730   :  { %v3652_v17 = vadd.f32 %v3651_v39, %v3650_v0  ;;  %v4351_v57 = vadd.f32 1.0, %v5562_v31  ;;  %v3526_v0 = vmax.f32 %v3524_v11, %v3525_v25  ;;  %v3742_v31 = vand.u32 2147483647, %v8432_v62 }
 0x731   :  { %v4416_v53 = vsel %vm4415_vm13, %v5554_v5, %v4412_v19  ;;  %4669 = vst.msk [vmem:[#allocation2 + $0x10] sm:$0xff] %vm75_vm0, %v4653_v40  ;;  %v8455_v5 = vadd.f32 %v3647_v4, %v3646_v15  ;;  %v4272_v15 = vadd.f32 %v8362_v30, %v4271_v8  ;;  %v3656_v40 = vadd.f32 %v8453_v12, %v3655_v29  ;;  %v3449_v4 = vpop.xlane.xlu1 %3448 }
 0x732   :  { %v4421_v22 = vsel %vm4418_vm1, %v4420_v36, %v4416_v53  ;;  %v3653_v19 = vrot.slane %v3652_v17, 1  ;;  %v3527_v53 = vrot.slane %v3526_v0, 1  ;;  %v3745_v29 = vor.u32 1.1754944e-38, %v3744_v60 }
 0x733   :  { %v4622_v7 = vsub.f32 1.0, %v4421_v22  ;;  %v4606_v37 = vmul.f32 %v4421_v22, %v9404_v52  ;;  %5563 = vrcp.f32 %v8455_v5  ;;  %v3736_v52 = vmul.f32 %v8445_v21, %v3735_v14 }
 0x734   :  { %5565 = vrcp.f32 %v4351_v57  ;;  %v5062_v36 = vmul.f32 -1.442695, %v4272_v15  ;;  %v8470_v13 = vadd.f32 %v3653_v19, %v3652_v17  ;;  %v3528_v61 = vmax.f32 %v3526_v0, %v3527_v53 }
 0x735   :  { %v4638_v1 = vmul.f32 %v4622_v7, %v7936_v51  ;;  %5567 = vpow2.f32 %v3613_v2  ;;  %v3737_v56 = vadd.f32 %v8445_v21, %v3736_v52  ;;  %v3657_v7 = vrot.slane %v3656_v40, 2 }
 0x736   :  { %5569 = vpow2.f32 %v5062_v36  ;;  %v3594_v17 = vsub.f32 %v8442_v32, %v3528_v61  ;;  %v4432_v19 = vand.u32 2147483647, %v4351_v57  ;;  %v4434_v0 = vand.u32 2147483648, %v4351_v57 }
 0x737   :  { %v4654_v50 = vadd.f32 %v4638_v1, %v4606_v37  ;;  %v8475_v1 = vmul.f32 0.17677669, %v3449_v4  ;;  %v3741_v2 = vsel %vm8477_vm14, %v8445_v21, %v3737_v56  ;;  %5571 = vrcp.f32 %v8470_v13 }
 0x738   :  { %v3658_v15 = vadd.f32 %v3657_v7, %v3656_v40  ;;  %vm3743_vm2 = vcmp.eq.f32.partialorder %v3742_v31, 8.507059e+37  ;;  %v3615_v61 = vmul.f32 1.442695, %v3594_v17  ;;  %vm4428_vm3 = vweird.f32 %v4351_v57 }
 0x739   :  { %4670 = vst.msk [vmem:[#allocation2 + $0x18] sm:$0xff] %vm75_vm0, %v4654_v50  ;;  %v8466_v22 = vpop.eup %5563  ;;  %v4274_v50 = vpop.f32.mrf.mxu3  ;;  %v3529_v53 = vrot.slane %v8475_v1, 4  ;;  %v3746_v21 = vsel %vm3743_vm2, %v3745_v29, %v3741_v2  ;;  %vm4433_vm13 = vcmp.eq.f32.partialorder %v4432_v19, 8.507059e+37  ;;  %v3759_v2 = vand.u32 2147483648, %v8455_v5 }
 0x73a   :  { %v5566_v39 = vpop.eup %5565  ;;  %v3749_v14 = vmul.f32 %v8466_v22, %v8455_v5  ;;  %v4275_v32 = vadd.f32 %v8362_v30, %v4274_v50  ;;  %v3659_v40 = vrot.slane %v3658_v15, 1  ;;  %vm3754_vm1 = vweird.f32 %v8466_v22 }
 0x73b   :  { %v8472_v37 = vpop.eup %5567  ;;  %v4424_v11 = vmul.f32 %v5566_v39, %v4351_v57  ;;  %vm4429_vm6 = vweird.f32 %v5566_v39  ;;  %v3530_v31 = vmax.f32 %v8475_v1, %v3529_v53  ;;  %v3757_v57 = vand.u32 2147483647, %v8455_v5 }
 0x73c   :  { %v3661_v52 = vrot.slane %v8472_v37, 4  ;;  %v5570_v62 = vpop.eup %5569  ;;  %v3750_v4 = vsub.f32 1.0, %v3749_v14  ;;  %vm4430_vm4 = vmor %vm4428_vm3, %vm4429_vm6  ;;  %v5063_v14 = vmul.f32 -1.442695, %v4275_v32  ;;  %vm3753_vm15 = vweird.f32 %v8455_v5 }
 0x73d   :  { %v4425_v25 = vsub.f32 1.0, %v4424_v11  ;;  %v8492_v56 = vadd.f32 1.0, %v5570_v62  ;;  %v4435_v11 = vor.u32 1.1754944e-38, %v4434_v0  ;;  %v8495_v8 = vpop.eup %5571  ;;  %v3531_v53 = vrot.slane %v3530_v31, 2  ;;  %vm8520_vm14 = vmor %vm3753_vm15, %vm3754_vm1 }
 0x73e   :  { %v3662_v7 = vadd.f32 %v8472_v37, %v3661_v52  ;;  %v3751_v17 = vmul.f32 %v8466_v22, %v3750_v4  ;;  %v3747_v52 = vmul.f32 %v8417_v3, %v3746_v21  ;;  %v3764_v19 = vmul.f32 %v8495_v8, %v8470_v13 }
 0x73f   :  { %v4426_v36 = vmul.f32 %v5566_v39, %v4425_v25  ;;  %5573 = vrcp.f32 %v8492_v56  ;;  %vm8515_vm5 = vcmp.eq.f32.partialorder %v3757_v57, 8.507059e+37  ;;  %v3772_v57 = vand.u32 2147483647, %v8470_v13 }
 0x740   :  { %5575 = vpow2.f32 %v3615_v61  ;;  %v3663_v0 = vrot.slane %v3662_v7, 2  ;;  %v3752_v32 = vadd.f32 %v8466_v22, %v3751_v17  ;;  %v3455_v17 = vpop.xlane.xlu0 %3454  ;;  %vm4443_vm2 = vweird.f32 %v8492_v56 }
 0x741   :  { %v4427_v60 = vadd.f32 %v5566_v39, %v4426_v36  ;;  %5577 = vpow2.f32 %v5063_v14  ;;  %v4276_v4 = vpop.f32.mrf.mxu3  ;;  %v3765_v14 = vsub.f32 1.0, %v3764_v19  ;;  %v4449_v19 = vand.u32 2147483648, %v8492_v56 }
 0x742   :  { %v3664_v5 = vadd.f32 %v3663_v0, %v3662_v7  ;;  %vm3768_vm3 = vweird.f32 %v8470_v13  ;;  %vm3769_vm15 = vweird.f32 %v8495_v8 }
 0x743   :  { %v4431_v25 = vsel %vm4430_vm4, %v5566_v39, %v4427_v60  ;;  %v8505_v39 = vadd.f32 %v3659_v40, %v3658_v15  ;;  %v3973_v15 = vmul.f32 %v3747_v52, %v7828_v44  ;;  %v4277_v44 = vadd.f32 %v8362_v30, %v4276_v4 }
 0x744   :  { %v4436_v50 = vsel %vm4433_vm13, %v4435_v11, %v4431_v25  ;;  %v3532_v11 = vmax.f32 %v3530_v31, %v3531_v53  ;;  %v8535_v53 = vmul.f32 0.17677669, %v3455_v17  ;;  %v3766_v4 = vmul.f32 %v8495_v8, %v3765_v14 }
 0x745   :  { %v4623_v29 = vsub.f32 1.0, %v4436_v50  ;;  %v4607_v62 = vmul.f32 %v4436_v50, %v6067_v47  ;;  %v5574_v61 = vpop.eup %5573  ;;  %v3760_v47 = vor.u32 1.1754944e-38, %v3759_v2  ;;  %5579 = vrcp.f32 %v8505_v39 }
 0x746   :  { %v8512_v21 = vpop.eup %5575  ;;  %v4439_v40 = vmul.f32 %v5574_v61, %v8492_v56  ;;  %v3756_v50 = vsel %vm8520_vm14, %v8466_v22, %v3752_v32  ;;  %v3533_v2 = vrot.slane %v3532_v11, 1  ;;  %vm4444_vm6 = vweird.f32 %v5574_v61 }
 0x747   :  { %v4639_v36 = vmul.f32 %v4623_v29, %v7998_v18  ;;  %v5578_v29 = vpop.eup %5577  ;;  %v3667_v52 = vrot.slane %v8512_v21, 4  ;;  %v5064_v7 = vmul.f32 -1.442695, %v4277_v44  ;;  %v3665_v22 = vrot.slane %v3664_v5, 1  ;;  %vm4445_vm4 = vmor %vm4443_vm2, %vm4444_vm6 }
 0x748   :  { %v4440_v31 = vsub.f32 1.0, %v4439_v40  ;;  %v4447_v32 = vand.u32 2147483647, %v8492_v56  ;;  %v3774_v44 = vand.u32 2147483648, %v8470_v13  ;;  %v3541_v56 = vrot.slane %v8535_v53, 4 }
 0x749   :  { %v4655_v3 = vadd.f32 %v4639_v36, %v4607_v62  ;;  %v3534_v62 = vmax.f32 %v3532_v11, %v3533_v2  ;;  %v8533_v36 = vadd.f32 1.0, %v5578_v29  ;;  %5581 = vpow2.f32 %v5064_v7 }
 0x74a   :  { %v4441_v0 = vmul.f32 %v5574_v61, %v4440_v31  ;;  %v3989_v11 = vsel %vm75_vm0, %v3973_v15, 0.0  ;;  %v3668_v14 = vadd.f32 %v8512_v21, %v3667_v52  ;;  %v4450_v31 = vor.u32 1.1754944e-38, %v4449_v19 }
 0x74b   :  { %4671 = vst.msk [vmem:[#allocation2 + $0x20] sm:$0xff] %vm75_vm0, %v4655_v3  ;;  %v3595_v40 = vsub.f32 %v8475_v1, %v3534_v62  ;;  %5583 = vrcp.f32 %v8533_v36  ;;  %v8542_v25 = vpop.eup %5579  ;;  %v3761_v1 = vsel %vm8515_vm5, %v3760_v47, %v3756_v50  ;;  %vm8552_vm13 = vcmp.eq.f32.partialorder %v3772_v57, 8.507059e+37  ;;  %v4279_v47 = vpop.f32.mrf.mxu3  ;;  %vm8569_vm5 = vmor %vm3768_vm3, %vm3769_vm15 }
 0x74c   :  { %v4442_v3 = vadd.f32 %v5574_v61, %v4441_v0  ;;  %v8556_v15 = vadd.f32 %v3665_v22, %v3664_v5  ;;  %vm4448_vm1 = vcmp.eq.f32.partialorder %v4447_v32, 8.507059e+37  ;;  %v3767_v7 = vadd.f32 %v8495_v8, %v3766_v4 }
 0x74d   :  { %v3617_v2 = vmul.f32 1.442695, %v3595_v40  ;;  %v3990_v0 = vrot.slane %v3989_v11, 4  ;;  %v3669_v62 = vrot.slane %v3668_v14, 2  ;;  %v3762_v57 = vmul.f32 %v8424_v20, %v3761_v1 }
 0x74e   :  { %v4446_v17 = vsel %vm4445_vm4, %v5574_v61, %v4442_v3  ;;  %v3779_v61 = vmul.f32 %v8542_v25, %v8505_v39  ;;  %v3789_v5 = vand.u32 2147483648, %v8505_v39  ;;  %v3542_v4 = vmax.f32 %v8535_v53, %v3541_v56 }
 0x74f   :  { %v4451_v52 = vsel %vm4448_vm1, %v4450_v31, %v4446_v17  ;;  %v5582_v19 = vpop.eup %5581  ;;  %5585 = vpow2.f32 %v3617_v2  ;;  %v3771_v17 = vsel %vm8569_vm5, %v8495_v8, %v3767_v7  ;;  %v4280_v13 = vadd.f32 %v8362_v30, %v4279_v47 }
 0x750   :  { %v4624_v60 = vsub.f32 1.0, %v4451_v52  ;;  %v8564_v22 = vadd.f32 1.0, %v5582_v19  ;;  %5587 = vrcp.f32 %v8556_v15  ;;  %v4608_v3 = vmul.f32 %v4451_v52, %v6064_v54 }
 0x751   :  { %v5584_v50 = vpop.eup %5583  ;;  %v3780_v31 = vsub.f32 1.0, %v3779_v61  ;;  %v3670_v2 = vadd.f32 %v3669_v62, %v3668_v14  ;;  %v4464_v19 = vand.u32 2147483648, %v8533_v36  ;;  %v8583_v28 = vadd.f32 %v3990_v0, %v3989_v11  ;;  %v3458_v61 = vpop.xlane.xlu1 %3457 }
 0x752   :  { %v4640_v40 = vmul.f32 %v4624_v60, %v8019_v33  ;;  %v4454_v20 = vmul.f32 %v5584_v50, %v8533_v36  ;;  %5589 = vrcp.f32 %v8564_v22  ;;  %v3775_v54 = vor.u32 1.1754944e-38, %v3774_v44 }
 0x753   :  { %v3787_v52 = vand.u32 2147483647, %v8505_v39  ;;  %v3543_v60 = vrot.slane %v3542_v4, 2  ;;  %v3974_v8 = vmul.f32 %v3762_v57, %v7830_v38  ;;  %vm3783_vm14 = vweird.f32 %v8505_v39 }
 0x754   :  { %v4656_v56 = vadd.f32 %v4640_v40, %v4608_v3  ;;  %v4455_v1 = vsub.f32 1.0, %v4454_v20  ;;  %vm4459_vm6 = vweird.f32 %v5584_v50  ;;  %v4462_v14 = vand.u32 2147483647, %v8533_v36 }
 0x755   :  { %v8586_v9 = vpop.eup %5585  ;;  %v3776_v11 = vsel %vm8552_vm13, %v3775_v54, %v3771_v17  ;;  %v3781_v44 = vmul.f32 %v8542_v25, %v3780_v31  ;;  %v3790_v0 = vor.u32 1.1754944e-38, %v3789_v5  ;;  %v5065_v62 = vmul.f32 -1.442695, %v4280_v13 }
 0x756   :  { %4672 = vst.msk [vmem:[#allocation2 + $0x28] sm:$0xff] %vm75_vm0, %v4656_v56  ;;  %v4456_v7 = vmul.f32 %v5584_v50, %v4455_v1  ;;  %v8595_v47 = vpop.eup %5587  ;;  %v3671_v32 = vrot.slane %v3670_v2, 1  ;;  %vm4458_vm2 = vweird.f32 %v8533_v36  ;;  %v4465_v57 = vor.u32 1.1754944e-38, %v4464_v19  ;;  %v4281_v1 = vpop.f32.mrf.mxu3 }
 0x757   :  { %v3673_v40 = vrot.slane %v8586_v9, 4  ;;  %vm4460_vm3 = vmor %vm4458_vm2, %vm4459_vm6  ;;  %v3544_v20 = vmax.f32 %v3542_v4, %v3543_v60  ;;  %5591 = vpow2.f32 %v5065_v62  ;;  %v8599_v56 = vmul.f32 0.17677669, %v3458_v61 }
 0x758   :  { %v4457_v38 = vadd.f32 %v5584_v50, %v4456_v7  ;;  %v5590_v3 = vpop.eup %5589  ;;  %v3777_v29 = vmul.f32 %v8434_v59, %v3776_v11  ;;  %vm4463_vm4 = vcmp.eq.f32.partialorder %v4462_v14, 8.507059e+37  ;;  %v3782_v31 = vadd.f32 %v8542_v25, %v3781_v44 }
 0x759   :  { %v4469_v5 = vmul.f32 %v5590_v3, %v8564_v22  ;;  %vm3784_vm13 = vweird.f32 %v8542_v25  ;;  %vm8605_vm1 = vcmp.eq.f32.partialorder %v3787_v52, 8.507059e+37  ;;  %v3794_v4 = vmul.f32 %v8595_v47, %v8556_v15 }
 0x75a   :  { %v4461_v17 = vsel %vm4460_vm3, %v5584_v50, %v4457_v38  ;;  %v8611_v19 = vadd.f32 %v3671_v32, %v3670_v2  ;;  %v4477_v54 = vand.u32 2147483647, %v8564_v22  ;;  %v3674_v60 = vadd.f32 %v8586_v9, %v3673_v40  ;;  %vm8626_vm15 = vmor %vm3783_vm14, %vm3784_vm13 }
 0x75b   :  { %v4466_v13 = vsel %vm4463_vm4, %v4465_v57, %v4461_v17  ;;  %v4470_v50 = vsub.f32 1.0, %v4469_v5  ;;  %v4479_v7 = vand.u32 2147483648, %v8564_v22  ;;  %v3545_v14 = vrot.slane %v3544_v20, 1 }
 0x75c   :  { %v4625_v59 = vsub.f32 1.0, %v4466_v13  ;;  %v3547_v52 = vrot.slane %v8599_v56, 4  ;;  %v4609_v61 = vmul.f32 %v4466_v13, %v6099_v27  ;;  %v4282_v62 = vadd.f32 %v8362_v30, %v4281_v1 }
 0x75d   :  { %v4471_v44 = vmul.f32 %v5590_v3, %v4470_v50  ;;  %v5592_v2 = vpop.eup %5591  ;;  %v3996_v32 = vsel %vm75_vm0, %v3974_v8, 0.0  ;;  %v3975_v38 = vmul.f32 %v3777_v29, %v7919_v58  ;;  %vm4474_vm5 = vweird.f32 %v5590_v3  ;;  %v3461_v58 = vpop.xlane.xlu0 %3460 }
 0x75e   :  { %v4641_v11 = vmul.f32 %v4625_v59, %v8074_v49  ;;  %v3548_v27 = vmax.f32 %v8599_v56, %v3547_v52  ;;  %v3786_v30 = vsel %vm8626_vm15, %v8542_v25, %v3782_v31  ;;  %v8634_v8 = vadd.f32 1.0, %v5592_v2 }
 0x75f   :  { %v4472_v17 = vadd.f32 %v5590_v3, %v4471_v44  ;;  %v3795_v29 = vsub.f32 1.0, %v3794_v4  ;;  %v3675_v5 = vrot.slane %v3674_v60, 2  ;;  %vm4473_vm6 = vweird.f32 %v8564_v22 }
 0x760   :  { %v4657_v40 = vadd.f32 %v4641_v11, %v4609_v61  ;;  %v3546_v39 = vmax.f32 %v3544_v20, %v3545_v14  ;;  %5593 = vrcp.f32 %v8611_v19  ;;  %vm4475_vm14 = vmor %vm4473_vm6, %vm4474_vm5  ;;  %vm4478_vm2 = vcmp.eq.f32.partialorder %v4477_v54, 8.507059e+37 }
 0x761   :  { %v4480_v13 = vor.u32 1.1754944e-38, %v4479_v7  ;;  %v5066_v1 = vmul.f32 -1.442695, %v4282_v62  ;;  %v4476_v59 = vsel %vm4475_vm14, %v5590_v3, %v4472_v17  ;;  %5595 = vrcp.f32 %v8634_v8  ;;  %v4284_v7 = vpop.f32.mrf.mxu3 }
 0x762   :  { %4673 = vst.msk [vmem:[#allocation2 + $0x30] sm:$0xff] %vm75_vm0, %v4657_v40  ;;  %v3549_v25 = vrot.slane %v3548_v27, 2  ;;  %v8640_v31 = vmul.f32 0.17677669, %v3461_v58  ;;  %v3992_v4 = vrot.slane %v8583_v28, 2  ;;  %v3791_v22 = vsel %vm8605_vm1, %v3790_v0, %v3786_v30 }
 0x763   :  { %v4481_v20 = vsel %vm4478_vm2, %v4480_v13, %v4476_v59  ;;  %v3796_v50 = vmul.f32 %v8595_v47, %v3795_v29  ;;  %v3676_v14 = vadd.f32 %v3675_v5, %v3674_v60  ;;  %v3597_v54 = vsub.f32 %v8535_v53, %v3546_v39  ;;  %v8661_v53 = vld [vmem:[%s9203_s5 + $0xc] ss:$0 sm:$0xff]  ;;  %s5698_s5 = smov [#allocation2]  }
 0x764   :  { %v4626_v52 = vsub.f32 1.0, %v4481_v20  ;;  %v3997_v61 = vrot.slane %v3996_v32, 4  ;;  %v4003_v3 = vsel %vm75_vm0, %v3975_v38, 0.0  ;;  %5597 = vpow2.f32 %v5066_v1  ;;  %s9138_s23 = sshll.u32 %s5698_s5, 4  ;;  %s4722_s23 = int_to_ptr.vmem [resolvable:$true] %s9138_s23 }
 0x765   :  { %v4610_v11 = vmul.f32 %v4481_v20, %v6094_v41  ;;  %v3550_v62 = vmax.f32 %v3548_v27, %v3549_v25  ;;  %v3553_v36 = vrot.slane %v8640_v31, 4  ;;  %v8654_v2 = vadd.f32 %v3992_v4, %v8583_v28 }
 0x766   :  { %v4642_v44 = vmul.f32 %v4626_v52, %v8120_v34  ;;  %v8651_v0 = vpop.eup %5593  ;;  %v3792_v60 = vmul.f32 %v8453_v12, %v3791_v22  ;;  %vm3799_vm3 = vweird.f32 %v8595_v47  ;;  %v4285_v41 = vadd.f32 %v8661_v53, %v4284_v7 }
 0x767   :  { %v5596_v38 = vpop.eup %5595  ;;  %v3797_v57 = vadd.f32 %v8595_v47, %v3796_v50  ;;  %v3677_v27 = vrot.slane %v3676_v14, 1  ;;  %v3621_v40 = vmul.f32 1.442695, %v3597_v54  ;;  %v3998_v17 = vadd.f32 %v3997_v61, %v3996_v32 }
 0x768   :  { %v4658_v30 = vadd.f32 %v4642_v44, %v4610_v11  ;;  %v4004_v28 = vrot.slane %v4003_v3, 4  ;;  %vm3798_vm4 = vweird.f32 %v8556_v15  ;;  %v4484_v12 = vmul.f32 %v5596_v38, %v8634_v8 }
 0x769   :  { %v3802_v58 = vand.u32 2147483647, %v8556_v15  ;;  %v3551_v29 = vrot.slane %v3550_v62, 1  ;;  %v3554_v5 = vmax.f32 %v8640_v31, %v3553_v36  ;;  %v5067_v39 = vmul.f32 -1.442695, %v4285_v41  ;;  %vm8673_vm13 = vmor %vm3798_vm4, %vm3799_vm3  ;;  %v3464_v36 = vpop.xlane.xlu2 %3463 }
 0x76a   :  { %4674 = vst.msk [vmem:[#allocation2 + $0x38] sm:$0xff] %vm75_vm0, %v4658_v30  ;;  %v5598_v13 = vpop.eup %5597  ;;  %v3976_v1 = vmul.f32 %v3792_v60, %v7936_v51  ;;  %v3804_v59 = vand.u32 2147483648, %v8556_v15  ;;  %v3809_v25 = vmul.f32 %v8651_v0, %v8611_v19  ;;  %v4485_v4 = vsub.f32 1.0, %v4484_v12 }
 0x76b   :  { %v3801_v22 = vsel %vm8673_vm13, %v8595_v47, %v3797_v57  ;;  %v8683_v20 = vadd.f32 %v3677_v27, %v3676_v14  ;;  %5599 = vpow2.f32 %v3621_v40  ;;  %v8685_v51 = vadd.f32 1.0, %v5598_v13 }
 0x76c   :  { %v4486_v50 = vmul.f32 %v5596_v38, %v4485_v4  ;;  %v4492_v52 = vand.u32 2147483647, %v8634_v8  ;;  %v4494_v54 = vand.u32 2147483648, %v8634_v8  ;;  %5601 = vpow2.f32 %v5067_v39 }
 0x76d   :  { %vm4489_vm1 = vweird.f32 %v5596_v38  ;;  %v3552_v15 = vmax.f32 %v3550_v62, %v3551_v29  ;;  %5603 = vrcp.f32 %v8685_v51  ;;  %v3555_v7 = vrot.slane %v3554_v5, 2 }
 0x76e   :  { %v3999_v61 = vrot.slane %v3998_v17, 2  ;;  %v3805_v11 = vor.u32 1.1754944e-38, %v3804_v59  ;;  %v3810_v44 = vsub.f32 1.0, %v3809_v25  ;;  %v4487_v47 = vadd.f32 %v5596_v38, %v4486_v50  ;;  %v4286_v59 = vpop.f32.mrf.mxu3 }
 0x76f   :  { %v8690_v14 = vadd.f32 %v4004_v28, %v4003_v3  ;;  %vm3803_vm15 = vcmp.eq.f32.partialorder %v3802_v58, 8.507059e+37  ;;  %5605 = vrcp.f32 %v8683_v20  ;;  %vm4488_vm5 = vweird.f32 %v8634_v8 }
 0x770   :  { %v3994_v60 = vrot.slane %v8654_v2, 1  ;;  %v8696_v41 = vsel %vm75_vm0, %v3976_v1, 0.0  ;;  %v3806_v62 = vsel %vm3803_vm15, %v3805_v11, %v3801_v22  ;;  %vm4490_vm6 = vmor %vm4488_vm5, %vm4489_vm1  ;;  %v4495_v57 = vor.u32 1.1754944e-38, %v4494_v54 }
 0x771   :  { %v8699_v27 = vpop.eup %5599  ;;  %v4491_v30 = vsel %vm4490_vm6, %v5596_v38, %v4487_v47  ;;  %vm4493_vm14 = vcmp.eq.f32.partialorder %v4492_v52, 8.507059e+37  ;;  %v3598_v3 = vsub.f32 %v8599_v56, %v3552_v15  ;;  %v3556_v40 = vmax.f32 %v3554_v5, %v3555_v7 }
 0x772   :  { %v5602_v28 = vpop.eup %5601  ;;  %v8702_v12 = vadd.f32 %v3999_v61, %v3998_v17  ;;  %v3811_v8 = vmul.f32 %v8651_v0, %v3810_v44  ;;  %v4496_v58 = vsel %vm4493_vm14, %v4495_v57, %v4491_v30  ;;  %v8705_v29 = vmul.f32 0.17677669, %v3464_v36 }
 0x773   :  { %v5604_v39 = vpop.eup %5603  ;;  %v4006_v13 = vrot.slane %v8690_v14, 2  ;;  %v4011_v1 = vrot.slane %v8696_v41, 4  ;;  %v3807_v32 = vmul.f32 %v8472_v37, %v3806_v62  ;;  %v4627_v38 = vsub.f32 1.0, %v4496_v58 }
 0x774   :  { %vm3814_vm2 = vweird.f32 %v8651_v0  ;;  %v3819_v56 = vand.u32 2147483648, %v8611_v19  ;;  %v4499_v17 = vmul.f32 %v5604_v39, %v8685_v51  ;;  %v8713_v5 = vadd.f32 1.0, %v5602_v28 }
 0x775   :  { %v8715_v25 = vpop.eup %5605  ;;  %v4611_v4 = vmul.f32 %v4496_v58, %v9406_v45  ;;  %v4643_v22 = vmul.f32 %v4627_v38, %v8170_v48  ;;  %v3623_v50 = vmul.f32 1.442695, %v3598_v3  ;;  %v3557_v52 = vrot.slane %v3556_v40, 1 }
 0x776   :  { %v3812_v37 = vadd.f32 %v8651_v0, %v3811_v8  ;;  %v3685_v54 = vrot.slane %v8699_v27, 4  ;;  %v4500_v15 = vsub.f32 1.0, %v4499_v17  ;;  %v3559_v7 = vrot.slane %v8705_v29, 4 }
 0x777   :  { %v4659_v61 = vadd.f32 %v4643_v22, %v4611_v4  ;;  %v4509_v11 = vand.u32 2147483648, %v8685_v51  ;;  %5607 = vrcp.f32 %v8713_v5  ;;  %v4287_v44 = vadd.f32 %v8661_v53, %v4286_v59 }
 0x778   :  { %v3824_v45 = vmul.f32 %v8715_v25, %v8683_v20  ;;  %v4501_v47 = vmul.f32 %v5604_v39, %v4500_v15  ;;  %vm4504_vm3 = vweird.f32 %v5604_v39  ;;  %v4507_v36 = vand.u32 2147483647, %v8685_v51 }
 0x779   :  { %vm3813_vm4 = vweird.f32 %v8611_v19  ;;  %v3817_v62 = vand.u32 2147483647, %v8611_v19  ;;  %4675 = vst.msk [vmem:[#allocation2 + $0x40] sm:$0xff] %vm75_vm0, %v4659_v61  ;;  %5609 = vpow2.f32 %v3623_v50  ;;  %v3558_v57 = vmax.f32 %v3556_v40, %v3557_v52  ;;  %v3467_v61 = vpop.xlane.xlu1 %3466 }
 0x77a   :  { %v3977_v30 = vmul.f32 %v3807_v32, %v7998_v18  ;;  %vm8734_vm13 = vmor %vm3813_vm4, %vm3814_vm2  ;;  %v4502_v28 = vadd.f32 %v5604_v39, %v4501_v47  ;;  %vm4503_vm1 = vweird.f32 %v8685_v51  ;;  %v3560_v8 = vmax.f32 %v8705_v29, %v3559_v7 }
 0x77b   :  { %v3816_v19 = vsel %vm8734_vm13, %v8651_v0, %v3812_v37  ;;  %v3820_v58 = vor.u32 1.1754944e-38, %v3819_v56  ;;  %vm4505_vm15 = vmor %vm4503_vm1, %vm4504_vm3  ;;  %v4510_v40 = vor.u32 1.1754944e-38, %v4509_v11  ;;  %v5068_v38 = vmul.f32 -1.442695, %v4287_v44 }
 0x77c   :  { %v3825_v18 = vsub.f32 1.0, %v3824_v45  ;;  %v3686_v32 = vadd.f32 %v8699_v27, %v3685_v54  ;;  %v4506_v17 = vsel %vm4505_vm15, %v5604_v39, %v4502_v28  ;;  %vm4508_vm5 = vcmp.eq.f32.partialorder %v4507_v36, 8.507059e+37 }
 0x77d   :  { %v5608_v59 = vpop.eup %5607  ;;  %v4511_v4 = vsel %vm4508_vm5, %v4510_v40, %v4506_v17  ;;  %v3599_v22 = vsub.f32 %v8640_v31, %v3558_v57  ;;  %v3561_v51 = vrot.slane %v3560_v8, 2  ;;  %5611 = vpow2.f32 %v5068_v38 }
 0x77e   :  { %v8748_v50 = vadd.f32 %v3994_v60, %v8654_v2  ;;  %v4001_v0 = vrot.slane %v8702_v12, 1  ;;  %vm3818_vm6 = vcmp.eq.f32.partialorder %v3817_v62, 8.507059e+37  ;;  %v4628_v56 = vsub.f32 1.0, %v4511_v4 }
 0x77f   :  { %v8751_v52 = vpop.eup %5609  ;;  %v8754_v39 = vadd.f32 %v4006_v13, %v8690_v14  ;;  %v8757_v37 = vadd.f32 %v4011_v1, %v8696_v41  ;;  %v3821_v31 = vsel %vm3818_vm6, %v3820_v58, %v3816_v19  ;;  %v4514_v54 = vmul.f32 %v5608_v59, %v8713_v5 }
 0x780   :  { %v4017_v15 = vsel %vm75_vm0, %v3977_v30, 0.0  ;;  %v3826_v2 = vmul.f32 %v8715_v25, %v3825_v18  ;;  %v3687_v60 = vrot.slane %v3686_v32, 2  ;;  %v4644_v7 = vmul.f32 %v4628_v56, %v8208_v24 }
 0x781   :  { %v4612_v11 = vmul.f32 %v4511_v4, %v9339_v35  ;;  %v3625_v44 = vmul.f32 1.442695, %v3599_v22  ;;  %v4515_v45 = vsub.f32 1.0, %v4514_v54  ;;  %v3562_v14 = vmax.f32 %v3560_v8, %v3561_v51 }
 0x782   :  { %v3822_v13 = vmul.f32 %v8512_v21, %v3821_v31  ;;  %vm3828_vm14 = vweird.f32 %v8683_v20  ;;  %v3834_v41 = vand.u32 2147483648, %v8683_v20  ;;  %v3691_v1 = vrot.slane %v8751_v52, 4  ;;  %v4289_v21 = vpop.f32.mrf.mxu3 }
 0x783   :  { %v5612_v47 = vpop.eup %5611  ;;  %v4660_v36 = vadd.f32 %v4644_v7, %v4612_v11  ;;  %v4522_v62 = vand.u32 2147483647, %v8713_v5  ;;  %v4524_v57 = vand.u32 2147483648, %v8713_v5  ;;  %v8770_v30 = vmul.f32 0.17677669, %v3467_v61 }
 0x784   :  { %v4516_v35 = vmul.f32 %v5608_v59, %v4515_v45  ;;  %vm4519_vm2 = vweird.f32 %v5608_v59  ;;  %v3563_v3 = vrot.slane %v3562_v14, 1  ;;  %v8772_v28 = vadd.f32 1.0, %v5612_v47 }
 0x785   :  { %v3827_v8 = vadd.f32 %v8715_v25, %v3826_v2  ;;  %vm3829_vm3 = vweird.f32 %v8715_v25  ;;  %v3688_v19 = vadd.f32 %v3687_v60, %v3686_v32  ;;  %4676 = vst.msk [vmem:[#allocation2 + $0x48] sm:$0xff] %vm75_vm0, %v4660_v36  ;;  %5613 = vpow2.f32 %v3625_v44 }
 0x786   :  { %v4517_v58 = vadd.f32 %v5608_v59, %v4516_v35  ;;  %vm4518_vm4 = vweird.f32 %v8713_v5  ;;  %v3564_v40 = vmax.f32 %v3562_v14, %v3563_v3  ;;  %5615 = vrcp.f32 %v8772_v28  ;;  %vm8786_vm1 = vmor %vm3828_vm14, %vm3829_vm3 }
 0x787   :  { %v3832_v38 = vand.u32 2147483647, %v8683_v20  ;;  %v3692_v18 = vadd.f32 %v8751_v52, %v3691_v1  ;;  %vm4520_vm13 = vmor %vm4518_vm4, %vm4519_vm2  ;;  %v4525_v17 = vor.u32 1.1754944e-38, %v4524_v57  ;;  %v3565_v4 = vrot.slane %v8770_v30, 4 }
 0x788   :  { %v4013_v32 = vrot.slane %v8757_v37, 2  ;;  %v4521_v5 = vsel %vm4520_vm13, %v5608_v59, %v4517_v58  ;;  %vm4523_vm15 = vcmp.eq.f32.partialorder %v4522_v62, 8.507059e+37  ;;  %v3600_v51 = vsub.f32 %v8705_v29, %v3564_v40 }
 0x789   :  { %v4018_v56 = vrot.slane %v4017_v15, 4  ;;  %v3978_v31 = vmul.f32 %v3822_v13, %v8019_v33  ;;  %v3831_v54 = vsel %vm8786_vm1, %v8715_v25, %v3827_v8  ;;  %v4526_v2 = vsel %vm4523_vm15, %v4525_v17, %v4521_v5 }
 0x78a   :  { %v3835_v60 = vor.u32 1.1754944e-38, %v3834_v41  ;;  %v3689_v7 = vrot.slane %v3688_v19, 1  ;;  %v4629_v61 = vsub.f32 1.0, %v4526_v2  ;;  %v3627_v20 = vmul.f32 1.442695, %v3600_v51  ;;  %v4291_v35 = vpop.f32.mrf.mxu3 }
 0x78b   :  { %v8795_v11 = vpop.eup %5613  ;;  %v8798_v44 = vadd.f32 %v4001_v0, %v8702_v12  ;;  %vm3833_vm5 = vcmp.eq.f32.partialorder %v3832_v38, 8.507059e+37  ;;  %v3693_v59 = vrot.slane %v3692_v18, 2  ;;  %v3566_v29 = vmax.f32 %v8770_v30, %v3565_v4  ;;  %v3470_v0 = vpop.xlane.xlu0 %3469 }
 0x78c   :  { %v5616_v45 = vpop.eup %5615  ;;  %v4008_v33 = vrot.slane %v8754_v39, 1  ;;  %v3836_v14 = vsel %vm3833_vm5, %v3835_v60, %v3831_v54  ;;  %v4613_v25 = vmul.f32 %v4526_v2, %v9408_v6  ;;  %v4645_v13 = vmul.f32 %v4629_v61, %v8256_v23 }
 0x78d   :  { %v8805_v41 = vadd.f32 %v4013_v32, %v8757_v37  ;;  %v8807_v1 = vadd.f32 %v4018_v56, %v4017_v15  ;;  %5617 = vpow2.f32 %v3627_v20  ;;  %v4529_v12 = vmul.f32 %v5616_v45, %v8772_v28 }
 0x78e   :  { %v4024_v47 = vsel %vm75_vm0, %v3978_v31, 0.0  ;;  %v8811_v36 = vadd.f32 %v3689_v7, %v3688_v19  ;;  %v3697_v62 = vrot.slane %v8795_v11, 4  ;;  %v4661_v57 = vadd.f32 %v4645_v13, %v4613_v25 }
 0x78f   :  { %v3837_v6 = vmul.f32 %v8586_v9, %v3836_v14  ;;  %v3694_v3 = vadd.f32 %v3693_v59, %v3692_v18  ;;  %v4530_v8 = vsub.f32 1.0, %v4529_v12  ;;  %v3567_v37 = vrot.slane %v3566_v29, 2 }
 0x790   :  { %4677 = vst.msk [vmem:[#allocation2 + $0x50] sm:$0xff] %vm75_vm0, %v4661_v57  ;;  %v4537_v15 = vand.u32 2147483647, %v8772_v28  ;;  %v4539_v58 = vand.u32 2147483648, %v8772_v28  ;;  %v4290_v40 = vadd.f32 %v8661_v53, %v4289_v21  ;;  %v8819_v38 = vmul.f32 0.17677669, %v3470_v0 }
 0x791   :  { %v4531_v19 = vmul.f32 %v5616_v45, %v4530_v8  ;;  %vm4534_vm6 = vweird.f32 %v5616_v45  ;;  %v3568_v17 = vmax.f32 %v3566_v29, %v3567_v37  ;;  %v4292_v4 = vadd.f32 %v8661_v53, %v4291_v35 }
 0x792   :  { %v4025_v32 = vrot.slane %v4024_v47, 4  ;;  %5619 = vrcp.f32 %v8811_v36  ;;  %v3698_v9 = vadd.f32 %v8795_v11, %v3697_v62  ;;  %v5069_v18 = vmul.f32 -1.442695, %v4290_v40 }
 0x793   :  { %v8824_v22 = vpop.eup %5617  ;;  %v3695_v5 = vrot.slane %v3694_v3, 1  ;;  %v4532_v51 = vadd.f32 %v5616_v45, %v4531_v19  ;;  %vm4533_vm14 = vweird.f32 %v8772_v28  ;;  %v3569_v21 = vrot.slane %v3568_v17, 1  ;;  %v3452_v57 = vpop.xlane.xlu0 %3451 }
 0x794   :  { %v3979_v56 = vmul.f32 %v3837_v6, %v8074_v49  ;;  %vm4535_vm2 = vmor %vm4533_vm14, %vm4534_vm6  ;;  %v4540_v31 = vor.u32 1.1754944e-38, %v4539_v58  ;;  %5621 = vpow2.f32 %v5069_v18  ;;  %v3571_v54 = vrot.slane %v8819_v38, 4 }
 0x795   :  { %v4536_v2 = vsel %vm4535_vm2, %v5616_v45, %v4532_v51  ;;  %vm4538_vm3 = vcmp.eq.f32.partialorder %v4537_v15, 8.507059e+37  ;;  %v3570_v60 = vmax.f32 %v3568_v17, %v3569_v21  ;;  %v5070_v7 = vmul.f32 -1.442695, %v4292_v4 }
 0x796   :  { %v3699_v61 = vrot.slane %v3698_v9, 2  ;;  %v3703_v20 = vrot.slane %v8824_v22, 4  ;;  %v4541_v59 = vsel %vm4538_vm3, %v4540_v31, %v4536_v2  ;;  %v3572_v29 = vmax.f32 %v8819_v38, %v3571_v54 }
 0x797   :  { %v4009_v28 = vadd.f32 %v4008_v33, %v8754_v39  ;;  %v4015_v14 = vrot.slane %v8805_v41, 1  ;;  %v8833_v49 = vadd.f32 %v3695_v5, %v3694_v3  ;;  %v4630_v25 = vsub.f32 1.0, %v4541_v59 }
 0x798   :  { %v8835_v13 = vpop.eup %5619  ;;  %v4020_v45 = vrot.slane %v8807_v1, 2  ;;  %v4026_v12 = vadd.f32 %v4025_v32, %v4024_v47  ;;  %v3601_v0 = vsub.f32 %v8770_v30, %v3570_v60  ;;  %v3573_v62 = vrot.slane %v3572_v29, 2 }
 0x799   :  { %v4031_v35 = vsel %vm75_vm0, %v3979_v56, 0.0  ;;  %v4614_v6 = vmul.f32 %v4541_v59, %v9407_v16  ;;  %v4646_v39 = vmul.f32 %v4630_v25, %v8258_v42  ;;  %5623 = vpow2.f32 %v5070_v7 }
 0x79a   :  { %v5622_v33 = vpop.eup %5621  ;;  %v3700_v3 = vadd.f32 %v3699_v61, %v3698_v9  ;;  %v3704_v8 = vadd.f32 %v8824_v22, %v3703_v20  ;;  %v3629_v37 = vmul.f32 1.442695, %v3601_v0  ;;  %v3574_v15 = vmax.f32 %v3572_v29, %v3573_v62 }
 0x79b   :  { %5625 = vrcp.f32 %v8833_v49  ;;  %v4662_v47 = vadd.f32 %v4646_v39, %v4614_v6  ;;  %v8844_v58 = vadd.f32 1.0, %v5622_v33  ;;  %v8846_v30 = vmul.f32 0.17677669, %v3452_v57 }
 0x79c   :  { %v8849_v40 = vadd.f32 %v4020_v45, %v8807_v1  ;;  %v3854_v16 = vmul.f32 %v8835_v13, %v8811_v36  ;;  %5627 = vpow2.f32 %v3629_v37  ;;  %v3575_v19 = vrot.slane %v3574_v15, 1  ;;  %v3473_v1 = vpop.xlane.xlu2 %3472 }
 0x79d   :  { %v4027_v17 = vrot.slane %v4026_v12, 2  ;;  %v4032_v4 = vrot.slane %v4031_v35, 4  ;;  %4678 = vst.msk [vmem:[#allocation2 + $0x58] sm:$0xff] %vm75_vm0, %v4662_v47  ;;  %5629 = vrcp.f32 %v8844_v58  ;;  %v4699_v32 = vsel %vm2476_vm7, %v8798_v44, %v8748_v50 }
 0x79e   :  { %v3701_v9 = vrot.slane %v3700_v3, 1  ;;  %v3705_v18 = vrot.slane %v3704_v8, 2  ;;  %v3576_v5 = vmax.f32 %v3574_v15, %v3575_v19  ;;  %v8859_v21 = vsel %vm2479_vm8, %v4009_v28, %v4699_v32 }
 0x79f   :  { %v5624_v51 = vpop.eup %5623  ;;  %v3535_v56 = vrot.slane %v8846_v30, 4  ;;  %v8863_v31 = vadd.f32 %v4015_v14, %v8805_v41  ;;  %v4022_v54 = vrot.slane %v8849_v40, 1  ;;  %v3855_v2 = vsub.f32 1.0, %v3854_v16 }
 0x7a0   :  { %v3864_v60 = vand.u32 2147483648, %v8811_v36  ;;  %v8869_v50 = vadd.f32 %v4027_v17, %v4026_v12  ;;  %v4033_v44 = vadd.f32 %v4032_v4, %v4031_v35  ;;  %v3602_v61 = vsub.f32 %v8819_v38, %v3576_v5  ;;  %v4294_v4 = vpop.f32.mrf.mxu3 }
 0x7a1   :  { %v8867_v7 = vpop.eup %5625  ;;  %v8872_v20 = vmul.f32 0.17677669, %v3473_v1  ;;  %vm3858_vm4 = vweird.f32 %v8811_v36  ;;  %v8877_v41 = vadd.f32 %v3701_v9, %v3700_v3  ;;  %v3706_v29 = vadd.f32 %v3705_v18, %v3704_v8 }
 0x7a2   :  { %v8874_v59 = vpop.eup %5627  ;;  %v8879_v28 = vadd.f32 1.0, %v5624_v51  ;;  %v3862_v25 = vand.u32 2147483647, %v8811_v36  ;;  %v3631_v12 = vmul.f32 1.442695, %v3602_v61  ;;  %v3536_v0 = vmax.f32 %v8846_v30, %v3535_v56 }
 0x7a3   :  { %v5630_v14 = vpop.eup %5629  ;;  %v3709_v45 = vrot.slane %v8874_v59, 4  ;;  %v3856_v38 = vmul.f32 %v8835_v13, %v3855_v2  ;;  %v8885_v62 = vor.u32 1.1754944e-38, %v3864_v60  ;;  %v4034_v35 = vrot.slane %v4033_v44, 2 }
 0x7a4   :  { %v4544_v57 = vmul.f32 %v5630_v14, %v8844_v58  ;;  %5631 = vrcp.f32 %v8879_v28  ;;  %v3577_v39 = vrot.slane %v8872_v20, 4  ;;  %v3869_v33 = vmul.f32 %v8867_v7, %v8833_v49 }
 0x7a5   :  { %v3710_v6 = vadd.f32 %v8874_v59, %v3709_v45  ;;  %5633 = vpow2.f32 %v3631_v12  ;;  %v3707_v3 = vrot.slane %v3706_v29, 1  ;;  %vm3859_vm13 = vweird.f32 %v8835_v13 }
 0x7a6   :  { %5635 = vrcp.f32 %v8877_v41  ;;  %v4545_v8 = vsub.f32 1.0, %v4544_v57  ;;  %v4554_v15 = vand.u32 2147483648, %v8844_v58  ;;  %v3537_v47 = vrot.slane %v3536_v0, 2  ;;  %vm8905_vm15 = vmor %vm3858_vm4, %vm3859_vm13 }
 0x7a7   :  { %v3711_v37 = vrot.slane %v3710_v6, 2  ;;  %v8897_v16 = vadd.f32 %v8835_v13, %v3856_v38  ;;  %vm4549_vm1 = vweird.f32 %v5630_v14  ;;  %v4552_v17 = vand.u32 2147483647, %v8844_v58 }
 0x7a8   :  { %v4546_v19 = vmul.f32 %v5630_v14, %v4545_v8  ;;  %v8900_v32 = vadd.f32 %v4034_v35, %v4033_v44  ;;  %v3538_v18 = vmax.f32 %v3536_v0, %v3537_v47  ;;  %v3578_v5 = vmax.f32 %v8872_v20, %v3577_v39 }
 0x7a9   :  { %v3712_v9 = vadd.f32 %v3711_v37, %v3710_v6  ;;  %v3870_v56 = vsub.f32 1.0, %v3869_v33  ;;  %v8909_v2 = vadd.f32 %v3707_v3, %v3706_v29  ;;  %vm4548_vm5 = vweird.f32 %v8844_v58 }
 0x7aa   :  { %v5632_v1 = vpop.eup %5631  ;;  %v4547_v60 = vadd.f32 %v5630_v14, %v4546_v19  ;;  %vm4550_vm6 = vmor %vm4548_vm5, %vm4549_vm1  ;;  %v4555_v45 = vor.u32 1.1754944e-38, %v4554_v15  ;;  %v4295_v36 = vadd.f32 %v8661_v53, %v4294_v4  ;;  %v3861_v29 = vsel %vm8905_vm15, %v8835_v13, %v8897_v16 }
 0x7ab   :  { %v8912_v61 = vpop.eup %5633  ;;  %v3713_v44 = vrot.slane %v3712_v9, 1  ;;  %v4559_v12 = vmul.f32 %v5632_v1, %v8879_v28  ;;  %vm4553_vm14 = vcmp.eq.f32.partialorder %v4552_v17, 8.507059e+37  ;;  %v3539_v6 = vrot.slane %v3538_v18, 1 }
 0x7ac   :  { %v8917_v0 = vpop.eup %5635  ;;  %v4551_v38 = vsel %vm4550_vm6, %v5630_v14, %v4547_v60  ;;  %v3715_v58 = vrot.slane %v8912_v61, 4  ;;  %v3579_v39 = vrot.slane %v3578_v5, 2  ;;  %vm8924_vm2 = vcmp.eq.f32.partialorder %v3862_v25, 8.507059e+37 }
 0x7ad   :  { %v4556_v57 = vsel %vm4553_vm14, %v4555_v45, %v4551_v38  ;;  %v4560_v35 = vsub.f32 1.0, %v4559_v12  ;;  %v3871_v3 = vmul.f32 %v8867_v7, %v3870_v56  ;;  %v8929_v8 = vadd.f32 %v3713_v44, %v3712_v9 }
 0x7ae   :  { %v4631_v37 = vsub.f32 1.0, %v4556_v57  ;;  %v3716_v15 = vadd.f32 %v8912_v61, %v3715_v58  ;;  %v3884_v13 = vmul.f32 %v8917_v0, %v8877_v41  ;;  %5637 = vrcp.f32 %v8909_v2 }
 0x7af   :  { %v4567_v14 = vand.u32 2147483647, %v8879_v28  ;;  %v5071_v47 = vmul.f32 -1.442695, %v4295_v36  ;;  %v4615_v25 = vmul.f32 %v4556_v57, %v9410_v46  ;;  %v4569_v17 = vand.u32 2147483648, %v8879_v28  ;;  %v3476_v46 = vpop.xlane.xlu1 %3475 }
 0x7b0   :  { %v4647_v16 = vmul.f32 %v4631_v37, %v8272_v55  ;;  %v3717_v19 = vrot.slane %v3716_v15, 2  ;;  %v4561_v4 = vmul.f32 %v5632_v1, %v4560_v35  ;;  %vm4564_vm3 = vweird.f32 %v5632_v1 }
 0x7b1   :  { %v3540_v9 = vmax.f32 %v3538_v18, %v3539_v6  ;;  %v3580_v51 = vmax.f32 %v3578_v5, %v3579_v39  ;;  %5639 = vrcp.f32 %v8929_v8  ;;  %vm4563_vm4 = vweird.f32 %v8879_v28 }
 0x7b2   :  { %v4663_v56 = vadd.f32 %v4647_v16, %v4615_v25  ;;  %v3718_v60 = vadd.f32 %v3717_v19, %v3716_v15  ;;  %v4562_v44 = vadd.f32 %v5632_v1, %v4561_v4  ;;  %5641 = vpow2.f32 %v5071_v47  ;;  %vm4565_vm13 = vmor %vm4563_vm4, %vm4564_vm3  ;;  %v4296_v47 = vpop.f32.mrf.mxu3 }
 0x7b3   :  { %v3596_v45 = vsub.f32 %v8846_v30, %v3540_v9  ;;  %v3581_v12 = vrot.slane %v3580_v51, 1  ;;  %v3877_v36 = vand.u32 2147483647, %v8833_v49  ;;  %v3885_v38 = vsub.f32 1.0, %v3884_v13 }
 0x7b4   :  { %4679 = vst.msk [vmem:[#allocation2 + $0x60] sm:$0xff] %vm75_vm0, %v4663_v56  ;;  %v3719_v58 = vrot.slane %v3718_v60, 1  ;;  %v4570_v18 = vor.u32 1.1754944e-38, %v4569_v17  ;;  %v8945_v5 = vpop.eup %5637  ;;  %v4566_v57 = vsel %vm4565_vm13, %v5632_v1, %v4562_v44  ;;  %vm4568_vm1 = vcmp.eq.f32.partialorder %v4567_v14, 8.507059e+37 }
 0x7b5   :  { %v3619_v28 = vmul.f32 1.442695, %v3596_v45  ;;  %v3582_v35 = vmax.f32 %v3580_v51, %v3581_v12  ;;  %v3872_v30 = vadd.f32 %v8867_v7, %v3871_v3  ;;  %vm3874_vm15 = vweird.f32 %v8867_v7 }
 0x7b6   :  { %v4571_v6 = vsel %vm4568_vm1, %v4570_v18, %v4566_v57  ;;  %v8949_v39 = vmul.f32 0.17677669, %v3476_v46  ;;  %v3866_v37 = vsel %vm8924_vm2, %v8885_v62, %v3861_v29  ;;  %v8954_v15 = vadd.f32 %v3719_v58, %v3718_v60 }
 0x7b7   :  { %v4632_v13 = vsub.f32 1.0, %v4571_v6  ;;  %5643 = vpow2.f32 %v3619_v28  ;;  %v8956_v1 = vpop.eup %5639  ;;  %vm3873_vm5 = vweird.f32 %v8833_v49  ;;  %vm8959_vm6 = vcmp.eq.f32.partialorder %v3877_v36, 8.507059e+37 }
 0x7b8   :  { %v3879_v14 = vand.u32 2147483648, %v8833_v49  ;;  %v3886_v25 = vmul.f32 %v8917_v0, %v3885_v38  ;;  %v5642_v16 = vpop.eup %5641  ;;  %vm8965_vm14 = vmor %vm3873_vm5, %vm3874_vm15  ;;  %v3899_v29 = vmul.f32 %v8945_v5, %v8909_v2  ;;  %v4616_v33 = vmul.f32 %v4571_v6, %v9409_v10 }
 0x7b9   :  { %v4648_v19 = vmul.f32 %v4632_v13, %v8274_v26  ;;  %v3603_v17 = vsub.f32 %v8872_v20, %v3582_v35  ;;  %v3876_v49 = vsel %vm8965_vm14, %v8867_v7, %v3872_v30  ;;  %v8977_v4 = vadd.f32 1.0, %v5642_v16 }
 0x7ba   :  { %v3583_v9 = vrot.slane %v8949_v39, 4  ;;  %v4297_v51 = vadd.f32 %v8661_v53, %v4296_v47  ;;  %v3914_v56 = vmul.f32 %v8956_v1, %v8929_v8  ;;  %5645 = vrcp.f32 %v8954_v15 }
 0x7bb   :  { %v4664_v10 = vadd.f32 %v4648_v19, %v4616_v33  ;;  %v3633_v60 = vmul.f32 1.442695, %v3603_v17  ;;  %v3880_v44 = vor.u32 1.1754944e-38, %v3879_v14  ;;  %vm3889_vm2 = vweird.f32 %v8917_v0 }
 0x7bc   :  { %v3894_v20 = vand.u32 2147483648, %v8877_v41  ;;  %5647 = vrcp.f32 %v8977_v4  ;;  %v8990_v45 = vadd.f32 %v8917_v0, %v3886_v25  ;;  %v3900_v53 = vsub.f32 1.0, %v3899_v29 }
 0x7bd   :  { %v8987_v7 = vpop.eup %5643  ;;  %4680 = vst.msk [vmem:[#allocation2 + $0x68] sm:$0xff] %vm75_vm0, %v4664_v10  ;;  %5649 = vpow2.f32 %v3633_v60  ;;  %v3584_v12 = vmax.f32 %v8949_v39, %v3583_v9  ;;  %v8997_v46 = vadd.f32 %v4022_v54, %v8849_v40  ;;  %v3881_v36 = vsel %vm8959_vm6, %v3880_v44, %v3876_v49 }
 0x7be   :  { %v3679_v38 = vrot.slane %v8987_v7, 4  ;;  %v5072_v58 = vmul.f32 -1.442695, %v4297_v51  ;;  %v4029_v18 = vrot.slane %v8869_v50, 1  ;;  %v4036_v57 = vrot.slane %v8900_v32, 1 }
 0x7bf   :  { %vm3888_vm3 = vweird.f32 %v8877_v41  ;;  %v3915_v28 = vsub.f32 1.0, %v3914_v56  ;;  %v9006_v35 = vmul.f32 %v8699_v27, %v3866_v37  ;;  %v3892_v54 = vand.u32 2147483647, %v8877_v41 }
 0x7c0   :  { %vm9010_vm4 = vmor %vm3888_vm3, %vm3889_vm2  ;;  %v3680_v30 = vadd.f32 %v8987_v7, %v3679_v38  ;;  %v3585_v6 = vrot.slane %v3584_v12, 2  ;;  %v9016_v13 = vpop.eup %5645  ;;  %v9019_v47 = vmul.f32 %v8751_v52, %v3881_v36  ;;  %v3895_v37 = vor.u32 1.1754944e-38, %v3894_v20 }
 0x7c1   :  { %v3891_v27 = vsel %vm9010_vm4, %v8917_v0, %v8990_v45  ;;  %v3901_v3 = vmul.f32 %v8945_v5, %v3900_v53  ;;  %vm3903_vm13 = vweird.f32 %v8909_v2  ;;  %5651 = vpow2.f32 %v5072_v58 }
 0x7c2   :  { %v5648_v14 = vpop.eup %5647  ;;  %v3681_v41 = vrot.slane %v3680_v30, 2  ;;  %v3586_v25 = vmax.f32 %v3584_v12, %v3585_v6  ;;  %v3907_v62 = vand.u32 2147483647, %v8909_v2  ;;  %v3909_v52 = vand.u32 2147483648, %v8909_v2 }
 0x7c3   :  { %v9027_v16 = vpop.eup %5649  ;;  %v3916_v29 = vmul.f32 %v8956_v1, %v3915_v28  ;;  %v4574_v33 = vmul.f32 %v5648_v14, %v8977_v4  ;;  %vm9033_vm1 = vcmp.eq.f32.partialorder %v3892_v54, 8.507059e+37  ;;  %v3929_v19 = vmul.f32 %v9016_v13, %v8954_v15 }
 0x7c4   :  { %v3682_v17 = vadd.f32 %v3681_v41, %v3680_v30  ;;  %v3721_v49 = vrot.slane %v9027_v16, 4  ;;  %v3587_v9 = vrot.slane %v3586_v25, 1  ;;  %v3902_v51 = vadd.f32 %v8945_v5, %v3901_v3 }
 0x7c5   :  { %vm3904_vm15 = vweird.f32 %v8945_v5  ;;  %vm3919_vm5 = vweird.f32 %v8956_v1  ;;  %v4575_v56 = vsub.f32 1.0, %v4574_v33  ;;  %v4584_v44 = vand.u32 2147483648, %v8977_v4 }
 0x7c6   :  { %v3683_v10 = vrot.slane %v3682_v17, 1  ;;  %v3722_v60 = vadd.f32 %v9027_v16, %v3721_v49  ;;  %v3588_v20 = vmax.f32 %v3586_v25, %v3587_v9  ;;  %v3917_v45 = vadd.f32 %v8956_v1, %v3916_v29  ;;  %vm9049_vm14 = vmor %vm3903_vm13, %vm3904_vm15 }
 0x7c7   :  { %v4576_v53 = vmul.f32 %v5648_v14, %v4575_v56  ;;  %vm4579_vm6 = vweird.f32 %v5648_v14  ;;  %v4582_v12 = vand.u32 2147483647, %v8977_v4  ;;  %v5652_v36 = vpop.eup %5651  ;;  %v3930_v58 = vsub.f32 1.0, %v3929_v19 }
 0x7c8   :  { %v9053_v28 = vadd.f32 %v3683_v10, %v3682_v17  ;;  %v3723_v40 = vrot.slane %v3722_v60, 2  ;;  %v3604_v54 = vsub.f32 %v8949_v39, %v3588_v20  ;;  %v3906_v30 = vsel %vm9049_vm14, %v8945_v5, %v3902_v51 }
 0x7c9   :  { %v3924_v6 = vand.u32 2147483648, %v8929_v8  ;;  %v4577_v3 = vadd.f32 %v5648_v14, %v4576_v53  ;;  %vm4578_vm2 = vweird.f32 %v8977_v4  ;;  %vm3918_vm3 = vweird.f32 %v8929_v8 }
 0x7ca   :  { %v3922_v2 = vand.u32 2147483647, %v8929_v8  ;;  %5653 = vrcp.f32 %v9053_v28  ;;  %vm4580_vm4 = vmor %vm4578_vm2, %vm4579_vm6  ;;  %v4585_v41 = vor.u32 1.1754944e-38, %v4584_v44  ;;  %v3724_v5 = vadd.f32 %v3723_v40, %v3722_v60 }
 0x7cb   :  { %vm9067_vm13 = vmor %vm3918_vm3, %vm3919_vm5  ;;  %v4581_v25 = vsel %vm4580_vm4, %v5648_v14, %v4577_v3  ;;  %vm4583_vm15 = vcmp.eq.f32.partialorder %v4582_v12, 8.507059e+37  ;;  %v9071_v29 = vadd.f32 1.0, %v5652_v36  ;;  %v3931_v4 = vmul.f32 %v9016_v13, %v3930_v58 }
 0x7cc   :  { %v3921_v8 = vsel %vm9067_vm13, %v8956_v1, %v3917_v45  ;;  %v4586_v33 = vsel %vm4583_vm15, %v4585_v41, %v4581_v25  ;;  %v3635_v19 = vmul.f32 1.442695, %v3604_v54  ;;  %v3896_v17 = vsel %vm9033_vm1, %v3895_v37, %v3891_v27 }
 0x7cd   :  { %v3910_v49 = vor.u32 1.1754944e-38, %v3909_v52  ;;  %v3925_v9 = vor.u32 1.1754944e-38, %v3924_v6  ;;  %v3725_v51 = vrot.slane %v3724_v5, 1  ;;  %vm3908_vm5 = vcmp.eq.f32.partialorder %v3907_v62, 8.507059e+37 }
 0x7ce   :  { %vm3923_vm6 = vcmp.eq.f32.partialorder %v3922_v2, 8.507059e+37  ;;  %v4633_v14 = vsub.f32 1.0, %v4586_v33  ;;  %5655 = vpow2.f32 %v3635_v19  ;;  %v3897_v44 = vmul.f32 %v8795_v11, %v3896_v17 }
 0x7cf   :  { %v3911_v56 = vsel %vm3908_vm5, %v3910_v49, %v3906_v30  ;;  %v3926_v10 = vsel %vm3923_vm6, %v3925_v9, %v3921_v8  ;;  %v9079_v60 = vadd.f32 %v3725_v51, %v3724_v5  ;;  %5657 = vrcp.f32 %v9071_v29 }
 0x7d0   :  { %v5654_v1 = vpop.eup %5653  ;;  %v3932_v20 = vadd.f32 %v9016_v13, %v3931_v4  ;;  %vm3934_vm1 = vweird.f32 %v9016_v13  ;;  %v4649_v27 = vmul.f32 %v4633_v14, %v8288_v43  ;;  %v3939_v37 = vand.u32 2147483648, %v8954_v15 }
 0x7d1   :  { %v3839_v62 = vmul.f32 %v5654_v1, %v9053_v28  ;;  %5659 = vrcp.f32 %v9079_v60  ;;  %v4617_v52 = vmul.f32 %v4586_v33, %v9362_v63  ;;  %v3912_v0 = vmul.f32 %v8824_v22, %v3911_v56 }
 0x7d2   :  { %v3927_v45 = vmul.f32 %v8874_v59, %v3926_v10  ;;  %vm3933_vm14 = vweird.f32 %v8954_v15  ;;  %v3937_v11 = vand.u32 2147483647, %v8954_v15  ;;  %v9096_v53 = vmul.f32 %v9006_v35, %v8170_v48 }
 0x7d3   :  { %v9100_v12 = vmul.f32 %v9019_v47, %v8208_v24  ;;  %vm9102_vm2 = vmor %vm3933_vm14, %vm3934_vm1  ;;  %v3840_v63 = vsub.f32 1.0, %v3839_v62  ;;  %v4665_v22 = vadd.f32 %v4649_v27, %v4617_v52  ;;  %v9109_v59 = vmul.f32 %v3897_v44, %v8256_v23 }
 0x7d4   :  { %v9106_v38 = vpop.eup %5655  ;;  %v3936_v48 = vsel %vm9102_vm2, %v9016_v13, %v3932_v20  ;;  %v3847_v15 = vand.u32 2147483647, %v9053_v28  ;;  %v3849_v24 = vand.u32 2147483648, %v9053_v28  ;;  %v3940_v47 = vor.u32 1.1754944e-38, %v3939_v37 }
 0x7d5   :  { %v5658_v35 = vpop.eup %5657  ;;  %v3841_v58 = vmul.f32 %v5654_v1, %v3840_v63  ;;  %vm3844_vm3 = vweird.f32 %v5654_v1  ;;  %4681 = vst.msk [vmem:[#allocation2 + $0x70] sm:$0xff] %vm75_vm0, %v4665_v22  ;;  %v3727_v40 = vrot.slane %v9106_v38, 4  ;;  %v3984_v54 = vmul.f32 %v3912_v0, %v8258_v42  ;;  %v9449_v63 = vld [vmem:[#allocation14_spill] sm:$0xff] }
 0x7d6   :  { %v9120_v23 = vmul.f32 %v3927_v45, %v8272_v55  ;;  %vm3938_vm4 = vcmp.eq.f32.partialorder %v3937_v11, 8.507059e+37  ;;  %v4589_v13 = vmul.f32 %v5658_v35, %v9071_v29  ;;  %vm3843_vm13 = vweird.f32 %v9053_v28 }
 0x7d7   :  { %v5660_v30 = vpop.eup %5659  ;;  %v3941_v6 = vsel %vm3938_vm4, %v3940_v47, %v3936_v48  ;;  %v3842_v3 = vadd.f32 %v5654_v1, %v3841_v58  ;;  %v3728_v2 = vadd.f32 %v9106_v38, %v3727_v40  ;;  %vm3845_vm15 = vmor %vm3843_vm13, %vm3844_vm3  ;;  %vm3848_vm5 = vcmp.eq.f32.partialorder %v3847_v15, 8.507059e+37  ;;  %v9450_v48 = vld [vmem:[#allocation9_spill] sm:$0xff] }
 0x7d8   :  { %v3850_v41 = vor.u32 1.1754944e-38, %v3849_v24  ;;  %v3944_v39 = vmul.f32 %v5660_v30, %v9079_v60  ;;  %v4590_v5 = vsub.f32 1.0, %v4589_v13  ;;  %v4597_v55 = vand.u32 2147483647, %v9071_v29 }
 0x7d9   :  { %v3846_v42 = vsel %vm3845_vm15, %v5654_v1, %v3842_v3  ;;  %v3729_v25 = vrot.slane %v3728_v2, 2  ;;  %v4599_v8 = vand.u32 2147483648, %v9071_v29  ;;  %vm4594_vm6 = vweird.f32 %v5658_v35 }
 0x7da   :  { %v3851_v4 = vsel %vm3848_vm5, %v3850_v41, %v3846_v42  ;;  %v3945_v33 = vsub.f32 1.0, %v3944_v39  ;;  %v4591_v19 = vmul.f32 %v5658_v35, %v4590_v5  ;;  %v3954_v17 = vand.u32 2147483648, %v9079_v60 }
 0x7db   :  { %v3852_v28 = vmul.f32 %v8987_v7, %v3851_v4  ;;  %v3730_v49 = vadd.f32 %v3729_v25, %v3728_v2  ;;  %vm4593_vm1 = vweird.f32 %v9071_v29  ;;  %vm3949_vm14 = vweird.f32 %v5660_v30 }
 0x7dc   :  { %v3946_v9 = vmul.f32 %v5660_v30, %v3945_v33  ;;  %v3952_v51 = vand.u32 2147483647, %v9079_v60  ;;  %v4592_v14 = vadd.f32 %v5658_v35, %v4591_v19  ;;  %v3942_v56 = vmul.f32 %v8912_v61, %v3941_v6  ;;  %vm4595_vm2 = vmor %vm4593_vm1, %vm4594_vm6 }
 0x7dd   :  { %v3980_v10 = vmul.f32 %v3852_v28, %v8120_v34  ;;  %v3731_v1 = vrot.slane %v3730_v49, 1  ;;  %v4600_v44 = vor.u32 1.1754944e-38, %v4599_v8  ;;  %vm3948_vm3 = vweird.f32 %v9079_v60 }
 0x7de   :  { %v3947_v20 = vadd.f32 %v5660_v30, %v3946_v9  ;;  %v4596_v7 = vsel %vm4595_vm2, %v5658_v35, %v4592_v14  ;;  %vm4598_vm4 = vcmp.eq.f32.partialorder %v4597_v55, 8.507059e+37  ;;  %vm3950_vm13 = vmor %vm3948_vm3, %vm3949_vm14  ;;  %v3955_v29 = vor.u32 1.1754944e-38, %v3954_v17 }
 0x7df   :  { %v4038_v27 = vsel %vm75_vm0, %v3980_v10, 0.0  ;;  %v9136_v37 = vadd.f32 %v3731_v1, %v3730_v49  ;;  %v4601_v62 = vsel %vm4598_vm4, %v4600_v44, %v4596_v7  ;;  %vm3953_vm15 = vcmp.eq.f32.partialorder %v3952_v51, 8.507059e+37 }
 0x7e0   :  { %v4039_v52 = vrot.slane %v4038_v27, 4  ;;  %v3951_v0 = vsel %vm3950_vm13, %v5660_v30, %v3947_v20  ;;  %v4634_v61 = vsub.f32 1.0, %v4601_v62  ;;  %v4052_v34 = vsel %vm75_vm0, %v9100_v12, 0.0 }
 0x7e1   :  { %v3986_v60 = vmul.f32 %v3942_v56, %v8274_v26  ;;  %v3956_v45 = vsel %vm3953_vm15, %v3955_v29, %v3951_v0  ;;  %5661 = vrcp.f32 %v9136_v37  ;;  %v4618_v22 = vmul.f32 %v4601_v62, %v9449_v63 }
 0x7e2   :  { %v4040_v11 = vadd.f32 %v4039_v52, %v4038_v27  ;;  %v3957_v36 = vmul.f32 %v9027_v16, %v3956_v45  ;;  %v4650_v15 = vmul.f32 %v4634_v61, %v9450_v48  ;;  %v4030_v24 = vadd.f32 %v4029_v18, %v8869_v50 }
 0x7e3   :  { %v4045_v35 = vsel %vm75_vm0, %v9096_v53, 0.0  ;;  %v4059_v26 = vsel %vm75_vm0, %v9109_v59, 0.0  ;;  %v4066_v12 = vsel %vm75_vm0, %v3984_v54, 0.0  ;;  %v4073_v16 = vsel %vm75_vm0, %v9120_v23, 0.0 }
 0x7e4   :  { %v4041_v47 = vrot.slane %v4040_v11, 2  ;;  %v3987_v58 = vmul.f32 %v3957_v36, %v8288_v43  ;;  %v4666_v40 = vadd.f32 %v4650_v15, %v4618_v22  ;;  %v4701_v50 = vsel %vm2482_vm9, %v8863_v31, %v8859_v21 }
 0x7e5   :  { %v4037_v18 = vadd.f32 %v4036_v57, %v8900_v32  ;;  %v4053_v53 = vrot.slane %v4052_v34, 4  ;;  %v4702_v59 = vsel %vm2485_vm10, %v8997_v46, %v4701_v50  ;;  %v4060_v54 = vrot.slane %v4059_v26, 4 }
 0x7e6   :  { %v4080_v13 = vsel %vm75_vm0, %v3986_v60, 0.0  ;;  %v4042_v23 = vadd.f32 %v4041_v47, %v4040_v11  ;;  %4682 = vst.msk [vmem:[#allocation2 + $0x78] sm:$0xff] %vm75_vm0, %v4666_v40  ;;  %v4046_v30 = vrot.slane %v4045_v35, 4  ;;  %v4067_v6 = vrot.slane %v4066_v12, 4 }
 0x7e7   :  { %v5662_v43 = vpop.eup %5661  ;;  %v4074_v3 = vrot.slane %v4073_v16, 4  ;;  %v4087_v21 = vsel %vm75_vm0, %v3987_v58, 0.0  ;;  %4729 = dma.vmem_to_hbm [thread:$0]  %s4722_s23, 2048, %s4724_s26, [#allocation3], %s5699_s6, %s5699_s6, %s5700_s27   ;;  %v4703_v31 = vsel %vm2488_vm11, %v4030_v24, %v4702_v59  ;;  %v4054_v2 = vadd.f32 %v4053_v53, %v4052_v34 }
 0x7e8   :  { %v4043_v32 = vrot.slane %v4042_v23, 1  ;;  %v3959_v46 = vmul.f32 %v5662_v43, %v9136_v37  ;;  %v4704_v57 = vsel %vm2491_vm12, %v4037_v18, %v4703_v31  ;;  %v4081_v41 = vrot.slane %v4080_v13, 4 }
 0x7e9   :  { %v4061_v39 = vadd.f32 %v4060_v54, %v4059_v26  ;;  %v4088_v42 = vrot.slane %v4087_v21, 4  ;;  %v4047_v55 = vadd.f32 %v4046_v30, %v4045_v35  ;;  %v4068_v8 = vadd.f32 %v4067_v6, %v4066_v12 }
 0x7ea   :  { %v4044_v5 = vadd.f32 %v4043_v32, %v4042_v23  ;;  %v3960_v25 = vsub.f32 1.0, %v3959_v46  ;;  %v4075_v4 = vadd.f32 %v4074_v3, %v4073_v16  ;;  %v3969_v33 = vand.u32 2147483648, %v9136_v37 }
 0x7eb   :  { %vm9451_vm5 = vcmask 1047559   ;;  %vm3964_vm6 = vweird.f32 %v5662_v43  ;;  %v3967_v17 = vand.u32 2147483647, %v9136_v37  ;;  %v4055_v49 = vrot.slane %v4054_v2, 2 }
 0x7ec   :  { %v4705_v19 = vsel %vm9451_vm5, %v4044_v5, %v4704_v57  ;;  %v3961_v28 = vmul.f32 %v5662_v43, %v3960_v25  ;;  %v4082_v9 = vadd.f32 %v4081_v41, %v4080_v13  ;;  %v4062_v51 = vrot.slane %v4061_v39, 2  ;;  %vm9452_vm3 = vmmov %vm9451_vm5 }
 0x7ed   :  { %4715 = vst.msk [vmem:[%s9205_s7] sm:$0xff] %vm75_vm0, %v4705_v19  ;;  %v4089_v14 = vadd.f32 %v4088_v42, %v4087_v21  ;;  %vm3963_vm1 = vweird.f32 %v9136_v37  ;;  %v4048_v10 = vrot.slane %v4047_v55, 2  ;;  %v4069_v1 = vrot.slane %v4068_v8, 2 }
 0x7ee   :  { %v3962_v56 = vadd.f32 %v5662_v43, %v3961_v28  ;;  %vm3965_vm14 = vmor %vm3963_vm1, %vm3964_vm6  ;;  %v3970_v44 = vor.u32 1.1754944e-38, %v3969_v33  ;;  %v4076_v20 = vrot.slane %v4075_v4, 2  ;;  %vm3968_vm2 = vcmp.eq.f32.partialorder %v3967_v17, 8.507059e+37 }
 0x7ef   :  { %v4056_v27 = vadd.f32 %v4055_v49, %v4054_v2  ;;  %v4083_v29 = vrot.slane %v4082_v9, 2  ;;  %v4063_v52 = vadd.f32 %v4062_v51, %v4061_v39  ;;  %v4090_v0 = vrot.slane %v4089_v14, 2 }
 0x7f0   :  { %v3966_v7 = vsel %vm3965_vm14, %v5662_v43, %v3962_v56  ;;  %v4049_v34 = vadd.f32 %v4048_v10, %v4047_v55  ;;  %v4070_v60 = vadd.f32 %v4069_v1, %v4068_v8  ;;  %v4077_v45 = vadd.f32 %v4076_v20, %v4075_v4 }
 0x7f1   :  { %v3971_v62 = vsel %vm3968_vm2, %v3970_v44, %v3966_v7  ;;  %v4057_v37 = vrot.slane %v4056_v27, 1  ;;  %v4084_v36 = vadd.f32 %v4083_v29, %v4082_v9  ;;  %v4064_v63 = vrot.slane %v4063_v52, 1 }
 0x7f2   :  { %v3972_v61 = vmul.f32 %v9106_v38, %v3971_v62  ;;  %v4091_v22 = vadd.f32 %v4090_v0, %v4089_v14  ;;  %v4050_v24 = vrot.slane %v4049_v34, 1  ;;  %v4071_v35 = vrot.slane %v4070_v60, 1 }
 0x7f3   :  { %v4078_v12 = vrot.slane %v4077_v45, 1  ;;  %v4058_v16 = vadd.f32 %v4057_v37, %v4056_v27  ;;  %v4085_v47 = vrot.slane %v4084_v36, 1  ;;  %v4065_v40 = vadd.f32 %v4064_v63, %v4063_v52 }
 0x7f4   :  { %v3988_v11 = vmul.f32 %v3972_v61, %v9450_v48  ;;  %v4092_v38 = vrot.slane %v4091_v22, 1  ;;  %v4051_v50 = vadd.f32 %v4050_v24, %v4049_v34  ;;  %v4072_v18 = vadd.f32 %v4071_v35, %v4070_v60 }
 0x7f5   :  { %v4079_v59 = vadd.f32 %v4078_v12, %v4077_v45  ;;  %v4086_v54 = vadd.f32 %v4085_v47, %v4084_v36 }
 0x7f6   :  { %v4094_v15 = vsel %vm75_vm0, %v3988_v11, 0.0  ;;  %v4706_v48 = vsel %vm2476_vm7, %v4058_v16, %v4051_v50  ;;  %v4093_v43 = vadd.f32 %v4092_v38, %v4091_v22 }
 0x7f7   :  { %v4095_v26 = vrot.slane %v4094_v15, 4  ;;  %v4707_v23 = vsel %vm2479_vm8, %v4065_v40, %v4706_v48 }
 0x7f8   :  { %v4708_v30 = vsel %vm2482_vm9, %v4072_v18, %v4707_v23 }
 0x7f9   :  { %v4096_v58 = vadd.f32 %v4095_v26, %v4094_v15  ;;  %v4709_v3 = vsel %vm2485_vm10, %v4079_v59, %v4708_v30 }
 0x7fa   :  { %v4710_v21 = vsel %vm2488_vm11, %v4086_v54, %v4709_v3 }
 0x7fb   :  { %v4097_v53 = vrot.slane %v4096_v58, 2  ;;  %v4711_v32 = vsel %vm2491_vm12, %v4093_v43, %v4710_v21 }
 0x7fd   :  { %v4098_v13 = vadd.f32 %v4097_v53, %v4096_v58 }
 0x7ff   :  { %v4099_v6 = vrot.slane %v4098_v13, 1 }
 0x801   :  { %v4100_v31 = vadd.f32 %v4099_v6, %v4098_v13 }
 0x803   :  { %v4712_v46 = vsel %vm9452_vm3, %v4100_v31, %v4711_v32 }
 0x804   :  { %4716 = vst.msk [vmem:[%s9205_s7 + $0x8] sm:$0xff] %vm75_vm0, %v4712_v46 }
 0x805   :  { %5692 = dma.done.wait [#allocation3], 2048  }
 0x806   :  { %5693 = vsyncadd [#allocation3], 4294965248 }
 0x807   :  { %4738 = vsyncpa [#allocation3], 1 }

</bundles_post_ra>
